<compile_context>
chip_gen: v7x
topology: tpu7x:2x2x1
jax: 0.10.0
libtpu: 0.0.40
codegen_flags: <defaults>
</compile_context>

<pallas_src>
import numpy as np
import jax
import jax.numpy as jnp
from jax.experimental import pallas as pl
from jax.experimental.pallas import tpu as pltpu

# ----------------------- model config (small, per module) -----------------------
TRAJ_LEN = 8
IN_FEATURES = 2 * TRAJ_LEN + 1          # 17  (2 * trajectory_length + 1)
NUM_HIDDENS_ACTION = 32
NUM_OUTPUTS_ACTION = 27                 # action space size (cf. backward(): 27)
GAT_HIDDEN = 32                         # n_hidden in __init__
N_PAD = 8                               # padded node count per graph
D = 128                                 # padded feature width (lane dimension)
NUM_W = 8                               # 3 GAT W + 2 MLP W + 3 a-vector col mats
NEG_SLOPE_GAT = 0.2                     # GraphAttentionLayer LeakyReLU slope
NEG_SLOPE_MLP = 0.01                    # nn.LeakyReLU() default slope
NEG_BIG = -1e30                         # masked-softmax "minus infinity"

# synthetic map: n_info[node] = (x, y) grid coordinates (deterministic)
NUM_MAP_NODES = 28
MAP_N_INFO = np.stack([np.arange(NUM_MAP_NODES) % 7,
                       np.arange(NUM_MAP_NODES) // 7], axis=-1).astype(np.float64)


# --------------------------------- Pallas kernel ---------------------------------
def _leaky_relu(x, slope):
    return jnp.where(x >= 0, x, slope * x)


def _elu(x):
    return jnp.where(x > 0, x, jnp.exp(jnp.minimum(x, 0.0)) - 1.0)


def sampler_kernel(x_ref, adj_ref, w_ref, b_ref, out_ref):
    """Per grid step: one group of BG graphs (M = BG*8 rows).
       x_ref:(M,D) bf16, adj_ref:(1,M,M) bf16 block-diag mask,
       w_ref:(8,D,D) bf16 = [W1,W2,W3,Wm1,Wm2, Acols1,Acols2,Acols3]
         (Acols_k has a_src in lane 0, a_dst in lane 1, rest zero),
       b_ref:(2,D) f32 = [bm1, bm2],  out_ref:(BG,D) f32 (head row of each graph)."""
    m = x_ref.shape[0]
    bg = out_ref.shape[0]

    x = x_ref[...]                                       # (M, D) bf16
    adj = adj_ref[0].astype(jnp.float32)                 # (M, M) {0,1} f32
    mask = adj > 0.0

    def gat(h, k):
        # labml-style single-head GraphAttentionLayer on padded tiles.
        w = w_ref[k]                                     # (D, D) bf16
        a_cols = w_ref[5 + k]                            # (D, D) bf16
        g = jnp.dot(h.astype(jnp.bfloat16), w,
                    preferred_element_type=jnp.float32)  # (M, D) f32
        g_bf = g.astype(jnp.bfloat16)
        # src/dst attention scores via one MXU matmul (cols 0 and 1 of s).
        s = jnp.dot(g_bf, a_cols, preferred_element_type=jnp.float32)  # (M, D)
        s_src = s[:, 0:1]                                # (M, 1)
        s_dst = s[:, 1:2]                                # (M, 1)
        e = _leaky_relu(s_src + s_dst.T, NEG_SLOPE_GAT)  # e[i, j]  (M, M)
        # Masked softmax: take the row max over EDGE entries only so a large
        # non-edge score can never underflow the edge exponentials (matches
        # PyTorch masked_fill(-inf) + softmax).  All-zero (padded / cross-graph)
        # rows: exp(0) * adj(=0) = 0, denom clamp fires, attention stays 0.
        e = jnp.where(mask, e, NEG_BIG)
        e = e - jnp.max(e, axis=-1, keepdims=True)
        p = jnp.exp(e) * adj
        denom = jnp.maximum(jnp.sum(p, axis=-1, keepdims=True), 1e-20)
        attn = p * pl.reciprocal(denom, approx=True)     # EUP, not a VPU divide
        return jnp.dot(attn.astype(jnp.bfloat16), g_bf,
                       preferred_element_type=jnp.float32)              # (M, D)

    # dropout layers are identity (inference mode)
    h1 = _elu(gat(x, 0))
    h2 = _elu(gat(h1, 1))
    h3 = gat(h2, 2)

    # Extract each graph's head row (node 0 => rows 0, 8, 16, ...) with a small
    # selection matmul; the MLP then runs only on (BG, D) instead of (M, D).
    gid = jax.lax.broadcasted_iota(jnp.int32, (bg, m), 0)
    rid = jax.lax.broadcasted_iota(jnp.int32, (bg, m), 1)
    sel = jnp.where(rid == gid * N_PAD, 1.0, 0.0).astype(jnp.bfloat16)   # (BG, M)
    heads = jnp.dot(sel, h3.astype(jnp.bfloat16),
                    preferred_element_type=jnp.float32)                  # (BG, D)

    # mlp_forward: Linear -> LeakyReLU -> Linear on the head rows only.
    hm = jnp.dot(heads.astype(jnp.bfloat16), w_ref[3],
                 preferred_element_type=jnp.float32) + b_ref[0:1, :]
    hm = _leaky_relu(hm, NEG_SLOPE_MLP)
    out = jnp.dot(hm.astype(jnp.bfloat16), w_ref[4],
                  preferred_element_type=jnp.float32) + b_ref[1:2, :]
    out_ref[...] = out


def _pick_group_size():
    """Graphs per grid block.  M = 8*BG rows per MXU pass: 128 rows fills a
    v5e-class (4x128^2) MXU tile, 256 rows fills v6e/v7x (2x256^2)."""
    try:
        kind = jax.devices()[0].device_kind.lower()
    except Exception:
        return 16
    if "v3" in kind or "v4" in kind or "v5" in kind:
        return 16
    return 32


@jax.jit
def _run_kernel(x, adj, w_stack, bias):
    g = adj.shape[0]                 # number of graph groups (grid size)
    m_blk = adj.shape[1]             # rows per group = BG * 8
    bg = m_blk // N_PAD
    return pl.pallas_call(
        sampler_kernel,
        out_shape=jax.ShapeDtypeStruct((g * bg, D), jnp.float32),
        grid_spec=pltpu.PrefetchScalarGridSpec(
            num_scalar_prefetch=0,
            grid=(g,),
            in_specs=[
                pl.BlockSpec((m_blk, D), lambda i: (i, 0)),            # x slab
                pl.BlockSpec((1, m_blk, m_blk), lambda i: (i, 0, 0)),  # adjacency
                pl.BlockSpec((NUM_W, D, D), lambda i: (0, 0, 0)),      # weights (resident)
                pl.BlockSpec((2, D), lambda i: (0, 0)),                # biases (resident)
            ],
            out_specs=pl.BlockSpec((bg, D), lambda i: (i, 0)),
        ),
        compiler_params=pltpu.CompilerParams(
            dimension_semantics=("parallel",)),   # shards groups across v7x's 2 TCs
    )(x, adj, w_stack, bias)


# ------------------------------ parameter creation ------------------------------
def init_params(key):
    ks = jax.random.split(key, 10)
    s = 0.1
    w1 = jax.random.normal(ks[0], (IN_FEATURES, GAT_HIDDEN)) * s
    a1 = jax.random.normal(ks[1], (2 * GAT_HIDDEN,)) * s
    w2 = jax.random.normal(ks[2], (GAT_HIDDEN, GAT_HIDDEN)) * s
    a2 = jax.random.normal(ks[3], (2 * GAT_HIDDEN,)) * s
    w3 = jax.random.normal(ks[4], (GAT_HIDDEN, IN_FEATURES)) * s
    a3 = jax.random.normal(ks[5], (2 * IN_FEATURES,)) * s
    wm1 = jax.random.normal(ks[6], (IN_FEATURES, NUM_HIDDENS_ACTION)) * s
    bm1 = jax.random.normal(ks[7], (NUM_HIDDENS_ACTION,)) * s
    wm2 = jax.random.normal(ks[8], (NUM_HIDDENS_ACTION, NUM_OUTPUTS_ACTION)) * s
    bm2 = jax.random.normal(ks[9], (NUM_OUTPUTS_ACTION,)) * s

    def pad2(w, r, c):
        out = np.zeros((D, D), np.float32)
        out[:r, :c] = np.asarray(w, np.float32)
        return out

    def a_cols(src, dst, n):
        out = np.zeros((D, D), np.float32)
        out[:n, 0] = np.asarray(src, np.float32)
        out[:n, 1] = np.asarray(dst, np.float32)
        return out

    # Coalesced parameters: one (8,D,D) bf16 stack + one (2,D) f32 bias stack.
    w_stack = np.stack([
        pad2(w1, IN_FEATURES, GAT_HIDDEN),
        pad2(w2, GAT_HIDDEN, GAT_HIDDEN),
        pad2(w3, GAT_HIDDEN, IN_FEATURES),
        pad2(wm1, IN_FEATURES, NUM_HIDDENS_ACTION),
        pad2(wm2, NUM_HIDDENS_ACTION, NUM_OUTPUTS_ACTION),
        a_cols(a1[:GAT_HIDDEN], a1[GAT_HIDDEN:], GAT_HIDDEN),
        a_cols(a2[:GAT_HIDDEN], a2[GAT_HIDDEN:], GAT_HIDDEN),
        a_cols(a3[:IN_FEATURES], a3[IN_FEATURES:], IN_FEATURES),
    ])
    bias = np.zeros((2, D), np.float32)
    bias[0, :NUM_HIDDENS_ACTION] = np.asarray(bm1, np.float32)
    bias[1, :NUM_OUTPUTS_ACTION] = np.asarray(bm2, np.float32)
    # Weights bf16 (native MXU operand, half the HBM->VMEM traffic); f32 accum.
    return (jnp.asarray(w_stack, jnp.bfloat16),
            jnp.asarray(bias, jnp.float32))


# ----------------------------- graph-building glue -----------------------------
def _get_loc(bool_obs, n):
    # utils.get_loc: index of the set bit in the first n one-hot entries of obs
    return int(np.argmax(np.asarray(bool_obs[:n])))


def build_graph(obs, cur_blue, red_neighbors, prev_red, prev_blue, next_blue,
                step_counter, cur_gflow_state):
    T = TRAJ_LEN
    node_embeddings = []
    is_next_red = not (T - 1 == step_counter)

    prev_state = cur_gflow_state.copy()
    prev_state[(step_counter - 1) * 2] = 0.0
    prev_state[(step_counter - 1) * 2 + 1] = 0.0
    prev_state[-1] = float(prev_red == prev_blue)
    if prev_blue:
        node_embeddings.append(prev_state)

    bool_obs = (np.asarray(obs) != 0)[0]
    cur_node = _get_loc(bool_obs, 27) + 1

    embedding = cur_gflow_state.copy()
    embedding[step_counter * 2] = MAP_N_INFO[cur_node][0]
    embedding[step_counter * 2 + 1] = MAP_N_INFO[cur_node][1]
    embedding[-1] = float(cur_blue == cur_node)
    new_state = embedding.copy()
    node_embeddings.append(new_state)

    if is_next_red:
        for n in red_neighbors:
            nxt = np.concatenate([
                new_state[:step_counter * 2 + 2],
                np.array([MAP_N_INFO[n][0], MAP_N_INFO[n][1]], dtype=np.float64),
                np.zeros(2 * T - (2 * step_counter + 4), dtype=np.float64),
                np.array([1.0 if n == next_blue else 0.0], dtype=np.float64),
            ])
            node_embeddings.append(nxt)

    nodes = np.stack(node_embeddings)
    no_nodes = nodes.shape[0]
    adj = np.zeros((no_nodes, no_nodes), dtype=np.float32)
    if prev_blue:
        adj[0, 1] = 1.0
        adj[1, 0] = 1.0
        if is_next_red:
            for i in range(2, no_nodes):
                adj[1, i] = 1.0
                adj[i, 1] = 1.0
    else:
        for i in range(1, no_nodes):
            adj[0, i] = 1.0
            adj[i, 0] = 1.0
    return nodes, adj, new_state


def pack_graphs(graphs, group_graphs):
    """Pack B independent graphs into G = ceil(B/BG) groups.  Each group is one
    grid block: a BG*8-row node slab and a (BG*8, BG*8) block-diag adjacency."""
    b = len(graphs)
    g = max(1, -(-b // group_graphs))
    m_blk = group_graphs * N_PAD
    x = np.zeros((g * m_blk, D), np.float32)
    a = np.zeros((g, m_blk, m_blk), np.float32)
    for gi, (nodes, adj) in enumerate(graphs):
        n = nodes.shape[0]
        assert n <= N_PAD
        grp, slot = divmod(gi, group_graphs)
        r0 = slot * N_PAD
        x[grp * m_blk + r0: grp * m_blk + r0 + n, :IN_FEATURES] = \
            nodes.astype(np.float32)
        a[grp, r0:r0 + n, r0:r0 + n] = adj
    # node features / adjacency are small exact integers -> bf16 is lossless and
    # halves the H2D + HBM->VMEM traffic of the two largest operands.
    return jnp.asarray(x, jnp.bfloat16), jnp.asarray(a, jnp.bfloat16)


def sampler_forward(params, obs, cur_blue, red_neighbors, prev_red, prev_blue,
                    next_blue, step_counter, cur_gflow_state, group_graphs=None):
    """Single environment step (matches the PyTorch module's forward)."""
    if group_graphs is None:
        group_graphs = _pick_group_size()
    nodes, adj, new_state = build_graph(obs, cur_blue, red_neighbors, prev_red,
                                        prev_blue, next_blue, step_counter,
                                        cur_gflow_state)
    x, a = pack_graphs([(nodes, adj)], group_graphs)
    out = _run_kernel(x, a, *params)
    probs = out[0, :NUM_OUTPUTS_ACTION]     # mlp_forward(x[0])
    return probs, new_state


def sampler_forward_batched(params, step_args_list, group_graphs=None):
    """Throughput path: B independent graphs (e.g. parallel envs), one kernel
    launch, grid over graph groups (BG graphs = BG*8 MXU rows per block)."""
    if group_graphs is None:
        group_graphs = _pick_group_size()
    # TODO(synk): host-side numpy graph construction still runs per step; a
    # production loop would build graphs asynchronously / reuse device buffers.
    graphs, new_states = [], []
    for args in step_args_list:
        nodes, adj, new_state = build_graph(*args)
        graphs.append((nodes, adj))
        new_states.append(new_state)
    x, a = pack_graphs(graphs, group_graphs)
    out = _run_kernel(x, a, *params)
    probs = out[:len(graphs), :NUM_OUTPUTS_ACTION]   # head row of each graph
    return probs, new_states


# ------------------------------------ main ------------------------------------
if __name__ == "__main__":
    key = jax.random.PRNGKey(0)
    params = init_params(key)

    # deterministic synthetic single-step inputs (small shapes)
    obs = np.zeros((1, 40), dtype=np.float32)
    obs[0, 9] = 1.0                       # -> cur_node = 9 + 1 = 10
    cur_blue = 10
    red_neighbors = [7, 11, 14, 20]
    prev_red, prev_blue, next_blue = 5, 4, 11
    step_counter = 3
    cur_gflow_state = np.zeros(IN_FEATURES, dtype=np.float64)   # reset_state()

    # TODO(synk): torch.distributions.Categorical / stochastic sampling and the
    # stateful dropout masks are environment/training-time behaviour and are
    # not reproduced (inference semantics: dropout = identity); float64 PyTorch
    # params are approximated with bf16 weights + f32 accumulation.
    probs, new_state = sampler_forward(params, obs, cur_blue, red_neighbors,
                                       prev_red, prev_blue, next_blue,
                                       step_counter, cur_gflow_state)
    probs = jax.block_until_ready(probs)
    assert probs.shape == (NUM_OUTPUTS_ACTION,)
    assert bool(jnp.all(jnp.isfinite(probs)))

    # batched demo: 32 independent graphs.  BG=32 on v6e/v7x -> one 256-row
    # block; BG=16 on v5e -> two 128-row blocks.
    B = 32
    step_args = []
    for i in range(B):
        ob = np.zeros((1, 40), dtype=np.float32)
        cn = (i % 27)                     # -> cur_node = cn + 1
        ob[0, cn] = 1.0
        sc = 1 + (i % 6)                  # step_counter in [1, 6]
        pb = 4 if (i % 2 == 0) else 0     # alternate prev_blue truthiness
        step_args.append((ob, cn + 1, red_neighbors, 5, pb, 11, sc,
                          np.zeros(IN_FEATURES, dtype=np.float64)))
    # make graph 0 identical to the single-step case for a cross-check
    step_args[0] = (obs, cur_blue, red_neighbors, prev_red, prev_blue,
                    next_blue, step_counter, cur_gflow_state)

    probs_b, _ = sampler_forward_batched(params, step_args)
    probs_b = jax.block_until_ready(probs_b)
    assert probs_b.shape == (B, NUM_OUTPUTS_ACTION)
    assert bool(jnp.all(jnp.isfinite(probs_b)))
    # batched graph 0 must reproduce the single-graph result (cross-graph
    # attention entries are exactly zero, so only tiny bf16 rounding noise).
    assert bool(jnp.allclose(probs_b[0], probs, rtol=1e-3, atol=1e-3))

    print("KERNEL_OK")
</pallas_src>

<mosaic_0001>
module attributes {stable_mosaic.version = 11 : i64} {
  func.func @sampler_kernel(%arg0: i32, %arg1: memref<256x128xbf16, #tpu.memory_space<vmem>>, %arg2: memref<1x256x256xbf16, #tpu.memory_space<vmem>>, %arg3: memref<8x128x128xbf16, #tpu.memory_space<vmem>>, %arg4: memref<2x128xf32, #tpu.memory_space<vmem>>, %arg5: memref<32x128xf32, #tpu.memory_space<vmem>>) attributes {dimension_semantics = [#tpu.dimension_semantics<parallel>], iteration_bounds = array<i64: 1>, scalar_prefetch = 0 : i64, scratch_operands = 0 : i64, tpu.core_type = #tpu.core_type<tc>, window_params = [{transform_indices = @transform_0, window_bounds = array<i64: 256, 128>}, {transform_indices = @transform_1, window_bounds = array<i64: 1, 256, 256>}, {pipeline_mode = #tpu.pipeline_mode<synchronous>, transform_indices = @transform_2, window_bounds = array<i64: 8, 128, 128>}, {pipeline_mode = #tpu.pipeline_mode<synchronous>, transform_indices = @transform_3, window_bounds = array<i64: 2, 128>}, {transform_indices = @transform_4, window_bounds = array<i64: 32, 128>}]} {
    %c0 = arith.constant 0 : index
    %c0_0 = arith.constant 0 : index
    %0 = vector.load %arg1[%c0, %c0_0] : memref<256x128xbf16, #tpu.memory_space<vmem>>, vector<256x128xbf16>
    %c0_1 = arith.constant 0 : index
    %c0_2 = arith.constant 0 : index
    %c0_3 = arith.constant 0 : index
    %1 = vector.load %arg2[%c0_1, %c0_2, %c0_3] : memref<1x256x256xbf16, #tpu.memory_space<vmem>>, vector<1x256x256xbf16>
    %2 = vector.shape_cast %1 : vector<1x256x256xbf16> to vector<256x256xbf16>
    %3 = arith.extf %2 : vector<256x256xbf16> to vector<256x256xf32>
    %cst = arith.constant 0.000000e+00 : f32
    %4 = vector.broadcast %cst : f32 to vector<256x256xf32>
    %5 = arith.cmpf ogt, %3, %4 : vector<256x256xf32>
    %c0_4 = arith.constant 0 : index
    %c0_5 = arith.constant 0 : index
    %c0_6 = arith.constant 0 : index
    %6 = vector.load %arg3[%c0_4, %c0_5, %c0_6] : memref<8x128x128xbf16, #tpu.memory_space<vmem>>, vector<1x128x128xbf16>
    %7 = vector.shape_cast %6 : vector<1x128x128xbf16> to vector<128x128xbf16>
    %c5 = arith.constant 5 : index
    %c0_7 = arith.constant 0 : index
    %c0_8 = arith.constant 0 : index
    %8 = vector.load %arg3[%c5, %c0_7, %c0_8] : memref<8x128x128xbf16, #tpu.memory_space<vmem>>, vector<1x128x128xbf16>
    %9 = vector.shape_cast %8 : vector<1x128x128xbf16> to vector<128x128xbf16>
    %cst_9 = arith.constant dense<0.000000e+00> : vector<256x128xf32>
    %10 = tpu.matmul %0, %7, %cst_9 {dimension_numbers = #tpu.dot_dimension_numbers<[1], [0], [0], [1], [0, 0, 1, 1], [], []>} : vector<256x128xbf16>, vector<128x128xbf16>, vector<256x128xf32> -> vector<256x128xf32>
    %11 = arith.truncf %10 : vector<256x128xf32> to vector<256x128xbf16>
    %cst_10 = arith.constant dense<0.000000e+00> : vector<256x128xf32>
    %12 = tpu.matmul %11, %9, %cst_10 {dimension_numbers = #tpu.dot_dimension_numbers<[1], [0], [0], [1], [0, 0, 1, 1], [], []>} : vector<256x128xbf16>, vector<128x128xbf16>, vector<256x128xf32> -> vector<256x128xf32>
    %13 = vector.extract_strided_slice %12 {offsets = [0, 0], sizes = [256, 1], strides = [1, 1]} : vector<256x128xf32> to vector<256x1xf32>
    %14 = vector.extract_strided_slice %12 {offsets = [0, 1], sizes = [256, 1], strides = [1, 1]} : vector<256x128xf32> to vector<256x1xf32>
    %15 = tpu.transpose %14, [1, 0] : vector<256x1xf32> -> vector<1x256xf32>
    %16 = vector.broadcast %13 : vector<256x1xf32> to vector<256x256xf32>
    %17 = vector.broadcast %15 : vector<1x256xf32> to vector<256x256xf32>
    %18 = arith.addf %16, %17 : vector<256x256xf32>
    %cst_11 = arith.constant 0.000000e+00 : f32
    %19 = vector.broadcast %cst_11 : f32 to vector<256x256xf32>
    %20 = arith.cmpf oge, %18, %19 : vector<256x256xf32>
    %cst_12 = arith.constant 2.000000e-01 : f32
    %21 = vector.broadcast %cst_12 : f32 to vector<256x256xf32>
    %22 = arith.mulf %21, %18 : vector<256x256xf32>
    %23 = arith.select %20, %18, %22 : vector<256x256xi1>, vector<256x256xf32>
    %cst_13 = arith.constant -1.000000e+30 : f32
    %24 = vector.broadcast %cst_13 : f32 to vector<256x256xf32>
    %25 = arith.select %5, %23, %24 : vector<256x256xi1>, vector<256x256xf32>
    %cst_14 = arith.constant dense<0xFF800000> : vector<256xf32>
    %26 = vector.multi_reduction <maximumf>, %25, %cst_14 [1] : vector<256x256xf32> to vector<256xf32>
    %27 = vector.shape_cast %26 : vector<256xf32> to vector<256x1xf32>
    %28 = vector.broadcast %27 : vector<256x1xf32> to vector<256x256xf32>
    %29 = arith.subf %25, %28 : vector<256x256xf32>
    %30 = math.exp %29 : vector<256x256xf32>
    %31 = arith.mulf %30, %3 : vector<256x256xf32>
    %cst_15 = arith.constant dense<0.000000e+00> : vector<256xf32>
    %32 = vector.multi_reduction <add>, %31, %cst_15 [1] : vector<256x256xf32> to vector<256xf32>
    %33 = vector.shape_cast %32 : vector<256xf32> to vector<256x1xf32>
    %cst_16 = arith.constant 9.99999968E-21 : f32
    %34 = vector.broadcast %cst_16 : f32 to vector<256x1xf32>
    %35 = arith.maximumf %33, %34 : vector<256x1xf32>
    %36 = tpu.reciprocal %35 {approx = true} : vector<256x1xf32> -> vector<256x1xf32>
    %37 = vector.broadcast %36 : vector<256x1xf32> to vector<256x256xf32>
    %38 = arith.mulf %31, %37 : vector<256x256xf32>
    %39 = arith.truncf %38 : vector<256x256xf32> to vector<256x256xbf16>
    %cst_17 = arith.constant dense<0.000000e+00> : vector<256x128xf32>
    %40 = tpu.matmul %39, %11, %cst_17 {dimension_numbers = #tpu.dot_dimension_numbers<[1], [0], [0], [1], [0, 0, 1, 1], [], []>} : vector<256x256xbf16>, vector<256x128xbf16>, vector<256x128xf32> -> vector<256x128xf32>
    %cst_18 = arith.constant 0.000000e+00 : f32
    %41 = vector.broadcast %cst_18 : f32 to vector<256x128xf32>
    %42 = arith.cmpf ogt, %40, %41 : vector<256x128xf32>
    %cst_19 = arith.constant 0.000000e+00 : f32
    %43 = vector.broadcast %cst_19 : f32 to vector<256x128xf32>
    %44 = arith.minimumf %40, %43 : vector<256x128xf32>
    %45 = math.exp %44 : vector<256x128xf32>
    %cst_20 = arith.constant 1.000000e+00 : f32
    %46 = vector.broadcast %cst_20 : f32 to vector<256x128xf32>
    %47 = arith.subf %45, %46 : vector<256x128xf32>
    %48 = arith.select %42, %40, %47 : vector<256x128xi1>, vector<256x128xf32>
    %c1 = arith.constant 1 : index
    %c0_21 = arith.constant 0 : index
    %c0_22 = arith.constant 0 : index
    %49 = vector.load %arg3[%c1, %c0_21, %c0_22] : memref<8x128x128xbf16, #tpu.memory_space<vmem>>, vector<1x128x128xbf16>
    %50 = vector.shape_cast %49 : vector<1x128x128xbf16> to vector<128x128xbf16>
    %c6 = arith.constant 6 : index
    %c0_23 = arith.constant 0 : index
    %c0_24 = arith.constant 0 : index
    %51 = vector.load %arg3[%c6, %c0_23, %c0_24] : memref<8x128x128xbf16, #tpu.memory_space<vmem>>, vector<1x128x128xbf16>
    %52 = vector.shape_cast %51 : vector<1x128x128xbf16> to vector<128x128xbf16>
    %53 = arith.truncf %48 : vector<256x128xf32> to vector<256x128xbf16>
    %cst_25 = arith.constant dense<0.000000e+00> : vector<256x128xf32>
    %54 = tpu.matmul %53, %50, %cst_25 {dimension_numbers = #tpu.dot_dimension_numbers<[1], [0], [0], [1], [0, 0, 1, 1], [], []>} : vector<256x128xbf16>, vector<128x128xbf16>, vector<256x128xf32> -> vector<256x128xf32>
    %55 = arith.truncf %54 : vector<256x128xf32> to vector<256x128xbf16>
    %cst_26 = arith.constant dense<0.000000e+00> : vector<256x128xf32>
    %56 = tpu.matmul %55, %52, %cst_26 {dimension_numbers = #tpu.dot_dimension_numbers<[1], [0], [0], [1], [0, 0, 1, 1], [], []>} : vector<256x128xbf16>, vector<128x128xbf16>, vector<256x128xf32> -> vector<256x128xf32>
    %57 = vector.extract_strided_slice %56 {offsets = [0, 0], sizes = [256, 1], strides = [1, 1]} : vector<256x128xf32> to vector<256x1xf32>
    %58 = vector.extract_strided_slice %56 {offsets = [0, 1], sizes = [256, 1], strides = [1, 1]} : vector<256x128xf32> to vector<256x1xf32>
    %59 = tpu.transpose %58, [1, 0] : vector<256x1xf32> -> vector<1x256xf32>
    %60 = vector.broadcast %57 : vector<256x1xf32> to vector<256x256xf32>
    %61 = vector.broadcast %59 : vector<1x256xf32> to vector<256x256xf32>
    %62 = arith.addf %60, %61 : vector<256x256xf32>
    %cst_27 = arith.constant 0.000000e+00 : f32
    %63 = vector.broadcast %cst_27 : f32 to vector<256x256xf32>
    %64 = arith.cmpf oge, %62, %63 : vector<256x256xf32>
    %cst_28 = arith.constant 2.000000e-01 : f32
    %65 = vector.broadcast %cst_28 : f32 to vector<256x256xf32>
    %66 = arith.mulf %65, %62 : vector<256x256xf32>
    %67 = arith.select %64, %62, %66 : vector<256x256xi1>, vector<256x256xf32>
    %cst_29 = arith.constant -1.000000e+30 : f32
    %68 = vector.broadcast %cst_29 : f32 to vector<256x256xf32>
    %69 = arith.select %5, %67, %68 : vector<256x256xi1>, vector<256x256xf32>
    %cst_30 = arith.constant dense<0xFF800000> : vector<256xf32>
    %70 = vector.multi_reduction <maximumf>, %69, %cst_30 [1] : vector<256x256xf32> to vector<256xf32>
    %71 = vector.shape_cast %70 : vector<256xf32> to vector<256x1xf32>
    %72 = vector.broadcast %71 : vector<256x1xf32> to vector<256x256xf32>
    %73 = arith.subf %69, %72 : vector<256x256xf32>
    %74 = math.exp %73 : vector<256x256xf32>
    %75 = arith.mulf %74, %3 : vector<256x256xf32>
    %cst_31 = arith.constant dense<0.000000e+00> : vector<256xf32>
    %76 = vector.multi_reduction <add>, %75, %cst_31 [1] : vector<256x256xf32> to vector<256xf32>
    %77 = vector.shape_cast %76 : vector<256xf32> to vector<256x1xf32>
    %cst_32 = arith.constant 9.99999968E-21 : f32
    %78 = vector.broadcast %cst_32 : f32 to vector<256x1xf32>
    %79 = arith.maximumf %77, %78 : vector<256x1xf32>
    %80 = tpu.reciprocal %79 {approx = true} : vector<256x1xf32> -> vector<256x1xf32>
    %81 = vector.broadcast %80 : vector<256x1xf32> to vector<256x256xf32>
    %82 = arith.mulf %75, %81 : vector<256x256xf32>
    %83 = arith.truncf %82 : vector<256x256xf32> to vector<256x256xbf16>
    %cst_33 = arith.constant dense<0.000000e+00> : vector<256x128xf32>
    %84 = tpu.matmul %83, %55, %cst_33 {dimension_numbers = #tpu.dot_dimension_numbers<[1], [0], [0], [1], [0, 0, 1, 1], [], []>} : vector<256x256xbf16>, vector<256x128xbf16>, vector<256x128xf32> -> vector<256x128xf32>
    %cst_34 = arith.constant 0.000000e+00 : f32
    %85 = vector.broadcast %cst_34 : f32 to vector<256x128xf32>
    %86 = arith.cmpf ogt, %84, %85 : vector<256x128xf32>
    %cst_35 = arith.constant 0.000000e+00 : f32
    %87 = vector.broadcast %cst_35 : f32 to vector<256x128xf32>
    %88 = arith.minimumf %84, %87 : vector<256x128xf32>
    %89 = math.exp %88 : vector<256x128xf32>
    %cst_36 = arith.constant 1.000000e+00 : f32
    %90 = vector.broadcast %cst_36 : f32 to vector<256x128xf32>
    %91 = arith.subf %89, %90 : vector<256x128xf32>
    %92 = arith.select %86, %84, %91 : vector<256x128xi1>, vector<256x128xf32>
    %c2 = arith.constant 2 : index
    %c0_37 = arith.constant 0 : index
    %c0_38 = arith.constant 0 : index
    %93 = vector.load %arg3[%c2, %c0_37, %c0_38] : memref<8x128x128xbf16, #tpu.memory_space<vmem>>, vector<1x128x128xbf16>
    %94 = vector.shape_cast %93 : vector<1x128x128xbf16> to vector<128x128xbf16>
    %c7 = arith.constant 7 : index
    %c0_39 = arith.constant 0 : index
    %c0_40 = arith.constant 0 : index
    %95 = vector.load %arg3[%c7, %c0_39, %c0_40] : memref<8x128x128xbf16, #tpu.memory_space<vmem>>, vector<1x128x128xbf16>
    %96 = vector.shape_cast %95 : vector<1x128x128xbf16> to vector<128x128xbf16>
    %97 = arith.truncf %92 : vector<256x128xf32> to vector<256x128xbf16>
    %cst_41 = arith.constant dense<0.000000e+00> : vector<256x128xf32>
    %98 = tpu.matmul %97, %94, %cst_41 {dimension_numbers = #tpu.dot_dimension_numbers<[1], [0], [0], [1], [0, 0, 1, 1], [], []>} : vector<256x128xbf16>, vector<128x128xbf16>, vector<256x128xf32> -> vector<256x128xf32>
    %99 = arith.truncf %98 : vector<256x128xf32> to vector<256x128xbf16>
    %cst_42 = arith.constant dense<0.000000e+00> : vector<256x128xf32>
    %100 = tpu.matmul %99, %96, %cst_42 {dimension_numbers = #tpu.dot_dimension_numbers<[1], [0], [0], [1], [0, 0, 1, 1], [], []>} : vector<256x128xbf16>, vector<128x128xbf16>, vector<256x128xf32> -> vector<256x128xf32>
    %101 = vector.extract_strided_slice %100 {offsets = [0, 0], sizes = [256, 1], strides = [1, 1]} : vector<256x128xf32> to vector<256x1xf32>
    %102 = vector.extract_strided_slice %100 {offsets = [0, 1], sizes = [256, 1], strides = [1, 1]} : vector<256x128xf32> to vector<256x1xf32>
    %103 = tpu.transpose %102, [1, 0] : vector<256x1xf32> -> vector<1x256xf32>
    %104 = vector.broadcast %101 : vector<256x1xf32> to vector<256x256xf32>
    %105 = vector.broadcast %103 : vector<1x256xf32> to vector<256x256xf32>
    %106 = arith.addf %104, %105 : vector<256x256xf32>
    %cst_43 = arith.constant 0.000000e+00 : f32
    %107 = vector.broadcast %cst_43 : f32 to vector<256x256xf32>
    %108 = arith.cmpf oge, %106, %107 : vector<256x256xf32>
    %cst_44 = arith.constant 2.000000e-01 : f32
    %109 = vector.broadcast %cst_44 : f32 to vector<256x256xf32>
    %110 = arith.mulf %109, %106 : vector<256x256xf32>
    %111 = arith.select %108, %106, %110 : vector<256x256xi1>, vector<256x256xf32>
    %cst_45 = arith.constant -1.000000e+30 : f32
    %112 = vector.broadcast %cst_45 : f32 to vector<256x256xf32>
    %113 = arith.select %5, %111, %112 : vector<256x256xi1>, vector<256x256xf32>
    %cst_46 = arith.constant dense<0xFF800000> : vector<256xf32>
    %114 = vector.multi_reduction <maximumf>, %113, %cst_46 [1] : vector<256x256xf32> to vector<256xf32>
    %115 = vector.shape_cast %114 : vector<256xf32> to vector<256x1xf32>
    %116 = vector.broadcast %115 : vector<256x1xf32> to vector<256x256xf32>
    %117 = arith.subf %113, %116 : vector<256x256xf32>
    %118 = math.exp %117 : vector<256x256xf32>
    %119 = arith.mulf %118, %3 : vector<256x256xf32>
    %cst_47 = arith.constant dense<0.000000e+00> : vector<256xf32>
    %120 = vector.multi_reduction <add>, %119, %cst_47 [1] : vector<256x256xf32> to vector<256xf32>
    %121 = vector.shape_cast %120 : vector<256xf32> to vector<256x1xf32>
    %cst_48 = arith.constant 9.99999968E-21 : f32
    %122 = vector.broadcast %cst_48 : f32 to vector<256x1xf32>
    %123 = arith.maximumf %121, %122 : vector<256x1xf32>
    %124 = tpu.reciprocal %123 {approx = true} : vector<256x1xf32> -> vector<256x1xf32>
    %125 = vector.broadcast %124 : vector<256x1xf32> to vector<256x256xf32>
    %126 = arith.mulf %119, %125 : vector<256x256xf32>
    %127 = arith.truncf %126 : vector<256x256xf32> to vector<256x256xbf16>
    %cst_49 = arith.constant dense<0.000000e+00> : vector<256x128xf32>
    %128 = tpu.matmul %127, %99, %cst_49 {dimension_numbers = #tpu.dot_dimension_numbers<[1], [0], [0], [1], [0, 0, 1, 1], [], []>} : vector<256x256xbf16>, vector<256x128xbf16>, vector<256x128xf32> -> vector<256x128xf32>
    %129 = tpu.iota {dimensions = array<i32: 0>} : vector<32x256xi32>
    %130 = tpu.iota {dimensions = array<i32: 1>} : vector<32x256xi32>
    %c8_i32 = arith.constant 8 : i32
    %131 = vector.broadcast %c8_i32 : i32 to vector<32x256xi32>
    %132 = arith.muli %129, %131 : vector<32x256xi32>
    %133 = arith.cmpi eq, %130, %132 : vector<32x256xi32>
    %cst_50 = arith.constant 1.000000e+00 : f32
    %cst_51 = arith.constant 0.000000e+00 : f32
    %134 = vector.broadcast %cst_50 : f32 to vector<32x256xf32>
    %135 = vector.broadcast %cst_51 : f32 to vector<32x256xf32>
    %136 = arith.select %133, %134, %135 : vector<32x256xi1>, vector<32x256xf32>
    %137 = arith.truncf %136 : vector<32x256xf32> to vector<32x256xbf16>
    %138 = arith.truncf %128 : vector<256x128xf32> to vector<256x128xbf16>
    %cst_52 = arith.constant dense<0.000000e+00> : vector<32x128xf32>
    %139 = tpu.matmul %137, %138, %cst_52 {dimension_numbers = #tpu.dot_dimension_numbers<[1], [0], [0], [1], [0, 0, 1, 1], [], []>} : vector<32x256xbf16>, vector<256x128xbf16>, vector<32x128xf32> -> vector<32x128xf32>
    %140 = arith.truncf %139 : vector<32x128xf32> to vector<32x128xbf16>
    %c3 = arith.constant 3 : index
    %c0_53 = arith.constant 0 : index
    %c0_54 = arith.constant 0 : index
    %141 = vector.load %arg3[%c3, %c0_53, %c0_54] : memref<8x128x128xbf16, #tpu.memory_space<vmem>>, vector<1x128x128xbf16>
    %142 = vector.shape_cast %141 : vector<1x128x128xbf16> to vector<128x128xbf16>
    %cst_55 = arith.constant dense<0.000000e+00> : vector<32x128xf32>
    %143 = tpu.matmul %140, %142, %cst_55 {dimension_numbers = #tpu.dot_dimension_numbers<[1], [0], [0], [1], [0, 0, 1, 1], [], []>} : vector<32x128xbf16>, vector<128x128xbf16>, vector<32x128xf32> -> vector<32x128xf32>
    %c0_56 = arith.constant 0 : index
    %c0_57 = arith.constant 0 : index
    %144 = vector.load %arg4[%c0_56, %c0_57] : memref<2x128xf32, #tpu.memory_space<vmem>>, vector<1x128xf32>
    %145 = vector.broadcast %144 : vector<1x128xf32> to vector<32x128xf32>
    %146 = arith.addf %143, %145 : vector<32x128xf32>
    %cst_58 = arith.constant 0.000000e+00 : f32
    %147 = vector.broadcast %cst_58 : f32 to vector<32x128xf32>
    %148 = arith.cmpf oge, %146, %147 : vector<32x128xf32>
    %cst_59 = arith.constant 0.00999999977 : f32
    %149 = vector.broadcast %cst_59 : f32 to vector<32x128xf32>
    %150 = arith.mulf %149, %146 : vector<32x128xf32>
    %151 = arith.select %148, %146, %150 : vector<32x128xi1>, vector<32x128xf32>
    %152 = arith.truncf %151 : vector<32x128xf32> to vector<32x128xbf16>
    %c4 = arith.constant 4 : index
    %c0_60 = arith.constant 0 : index
    %c0_61 = arith.constant 0 : index
    %153 = vector.load %arg3[%c4, %c0_60, %c0_61] : memref<8x128x128xbf16, #tpu.memory_space<vmem>>, vector<1x128x128xbf16>
    %154 = vector.shape_cast %153 : vector<1x128x128xbf16> to vector<128x128xbf16>
    %cst_62 = arith.constant dense<0.000000e+00> : vector<32x128xf32>
    %155 = tpu.matmul %152, %154, %cst_62 {dimension_numbers = #tpu.dot_dimension_numbers<[1], [0], [0], [1], [0, 0, 1, 1], [], []>} : vector<32x128xbf16>, vector<128x128xbf16>, vector<32x128xf32> -> vector<32x128xf32>
    %c1_63 = arith.constant 1 : index
    %c0_64 = arith.constant 0 : index
    %156 = vector.load %arg4[%c1_63, %c0_64] : memref<2x128xf32, #tpu.memory_space<vmem>>, vector<1x128xf32>
    %157 = vector.broadcast %156 : vector<1x128xf32> to vector<32x128xf32>
    %158 = arith.addf %155, %157 : vector<32x128xf32>
    %c0_65 = arith.constant 0 : index
    %c0_66 = arith.constant 0 : index
    %159 = vector.load %arg5[%c0_65, %c0_66] : memref<32x128xf32, #tpu.memory_space<vmem>>, vector<32x128xf32>
    tpu.vector_store %arg5[%c0_65, %c0_66], %158 {strides = array<i32>} : memref<32x128xf32, #tpu.memory_space<vmem>>, vector<32x128xf32>,
    return
  }
  func.func @transform_0(%arg0: i32) -> (i32, i32) {
    %c0_i32 = arith.constant 0 : i32
    %c0_i32_0 = arith.constant 0 : i32
    return %arg0, %c0_i32 : i32, i32
  }
  func.func @transform_1(%arg0: i32) -> (i32, i32, i32) {
    %c0_i32 = arith.constant 0 : i32
    %c0_i32_0 = arith.constant 0 : i32
    %c0_i32_1 = arith.constant 0 : i32
    return %arg0, %c0_i32, %c0_i32_0 : i32, i32, i32
  }
  func.func @transform_2(%arg0: i32) -> (i32, i32, i32) {
    %c0_i32 = arith.constant 0 : i32
    %c0_i32_0 = arith.constant 0 : i32
    %c0_i32_1 = arith.constant 0 : i32
    %c0_i32_2 = arith.constant 0 : i32
    return %c0_i32, %c0_i32_0, %c0_i32_1 : i32, i32, i32
  }
  func.func @transform_3(%arg0: i32) -> (i32, i32) {
    %c0_i32 = arith.constant 0 : i32
    %c0_i32_0 = arith.constant 0 : i32
    %c0_i32_1 = arith.constant 0 : i32
    return %c0_i32, %c0_i32_0 : i32, i32
  }
  func.func @transform_4(%arg0: i32) -> (i32, i32) {
    %c0_i32 = arith.constant 0 : i32
    %c0_i32_0 = arith.constant 0 : i32
    return %arg0, %c0_i32 : i32, i32
  }
}

</mosaic_0001>

<bundles_post_ra>
// kernel: _run_kernel.1
= control target key start
LH: loop header
LB: loop body
LE: loop exit
PB: predicated region body
PF: predicated region fallthrough
CT: control target
= control target key end

     0   :  { %9 = vsyncpa [#allocation3], 0  ;;  %s12451_s0 = inlined_call_operand.hbm [shape: bf16[256,128], index: 0, kind: input, shape index: {}]   ;;  %s12452_s1 = inlined_call_operand.hbm [shape: bf16[1,256,256], index: 1, kind: input, shape index: {}]   ;;  %s12453_s2 = inlined_call_operand.hbm [shape: bf16[8,128,128], index: 2, kind: input, shape index: {}]   ;;  %s12454_s3 = inlined_call_operand.vmem [shape: f32[2,128], index: 3, kind: input, shape index: {}]   ;;  %s12455_s4 = inlined_call_operand.hbm [shape: f32[32,128], index: 4, kind: output, shape index: {}]  }
   0x1   :  { %10 = vsyncpa [#allocation6], 0 }
   0x2   :  { %11 = vsyncpa [#allocation4], 0  ;;  %s8708_s15 = smov [#allocation5]   ;;  %s8614_s19 = scalar_lea.hbm %s12452_s1, 4096 }
   0x3   :  { %s29_s16 = sshll.u32 %s8708_s15, 4  ;;  %p8615_p0 = scmp.ne.s32.totalorder %s12452_s1, %s8614_s19  ;;  %s30_s16 = int_to_ptr.vmem [resolvable:$true] %s29_s16 }
   0x4   :  { %p8618_p1 = scmp.lt.u32.totalorder %s8614_s19, %s12452_s1 }
   0x6   :  { %p8620_p2 = pnand %p8618_p1, %p8615_p0 }
   0x8   :  { %8623 = shalt.err (!%p8620_p2)
}
   0x9   :  { %s8624_s24 = scalar_lea.vmem %s30_s16, 4096  ;;  %p8629_p4 = scmp.lt.s32.totalorder %s30_s16, %s30_s16 }
   0xa   :  { %p8625_p3 = scmp.ne.s32.totalorder %s30_s16, %s8624_s24  ;;  %p8630_p5 = scmp.lt.s32.totalorder %s8624_s24, %s8624_s24 }
   0xc   :  { %p8631_p6 = por %p8630_p5, %p8629_p4 }
   0xe   :  { %p8632_p7 = pnand %p8631_p6, %p8625_p3 }
  0x10   :  { %8635 = shalt.err (!%p8632_p7)
}
  0x11   :  { %s8709_s25 = smov 128   ;;  %s8710_s26 = smov 8  }
  0x12   :  { %35 = dma.hbm_to_vmem [thread:$0]  %s12452_s1, 4096, %s30_s16, [#allocation6], %s8709_s25, %s8709_s25, %s8710_s26  }
  0x13   :  { %s8711_s29 = smov [#allocation2]   ;;  %s8636_s7 = scalar_lea.hbm %s12451_s0, 2048 }
  0x14   :  { %s17_s30 = sshll.u32 %s8711_s29, 4  ;;  %p8637_p8 = scmp.ne.s32.totalorder %s12451_s0, %s8636_s7  ;;  %s18_s30 = int_to_ptr.vmem [resolvable:$true] %s17_s30 }
  0x15   :  { %p8640_p9 = scmp.lt.u32.totalorder %s8636_s7, %s12451_s0 }
  0x17   :  { %p8642_p10 = pnand %p8640_p9, %p8637_p8 }
  0x19   :  { %8645 = shalt.err (!%p8642_p10)
}
  0x1a   :  { %s8646_s12 = scalar_lea.vmem %s18_s30, 2048  ;;  %p8651_p12 = scmp.lt.s32.totalorder %s18_s30, %s18_s30 }
  0x1b   :  { %p8647_p11 = scmp.ne.s32.totalorder %s18_s30, %s8646_s12  ;;  %p8652_p13 = scmp.lt.s32.totalorder %s8646_s12, %s8646_s12 }
  0x1d   :  { %p8653_p0 = por %p8652_p13, %p8651_p12 }
  0x1f   :  { %p8654_p1 = pnand %p8653_p0, %p8647_p11 }
  0x21   :  { %8657 = shalt.err (!%p8654_p1)
}
  0x22   :  { %s8712_s1 = smov 64   ;;  %s8713_s13 = smov 4  }
  0x23   :  { %23 = dma.hbm_to_vmem [thread:$0]  %s12451_s0, 2048, %s18_s30, [#allocation3], %s8712_s1, %s8712_s1, %s8713_s13  }
  0x24   :  { %s8714_s16 = smov [#allocation7]   ;;  %s8658_s20 = scalar_lea.hbm %s12453_s2, 8192 }
  0x25   :  { %s41_s17 = sshll.u32 %s8714_s16, 4  ;;  %p8659_p2 = scmp.ne.s32.totalorder %s12453_s2, %s8658_s20  ;;  %s42_s17 = int_to_ptr.vmem [resolvable:$true] %s41_s17 }
  0x26   :  { %p8662_p3 = scmp.lt.u32.totalorder %s8658_s20, %s12453_s2 }
  0x28   :  { %p8664_p4 = pnand %p8662_p3, %p8659_p2 }
  0x2a   :  { %8667 = shalt.err (!%p8664_p4)
}
  0x2b   :  { %s8668_s27 = scalar_lea.vmem %s42_s17, 8192  ;;  %p8673_p6 = scmp.lt.s32.totalorder %s42_s17, %s42_s17 }
  0x2c   :  { %p8669_p5 = scmp.ne.s32.totalorder %s42_s17, %s8668_s27  ;;  %p8674_p7 = scmp.lt.s32.totalorder %s8668_s27, %s8668_s27 }
  0x2e   :  { %p8675_p8 = por %p8674_p7, %p8673_p6 }
  0x30   :  { %p8676_p9 = pnand %p8675_p8, %p8669_p5 }
  0x32   :  { %8679 = shalt.err (!%p8676_p9)
}
  0x33   :  { %47 = dma.hbm_to_vmem [thread:$0]  %s12453_s2, 8192, %s42_s17, [#allocation6], %s8712_s1, %s8712_s1, %s8713_s13  }
  0x34   :  { %8702 = dma.done.wait [#allocation3], 2048  }
  0x35   :  { %8703 = vsyncadd [#allocation3], 4294965248 }
  0x36   :  { %8704 = dma.done.wait [#allocation6], 12288  }
  0x37   :  { %8705 = vsyncadd [#allocation6], 4294955008  ;;  %v7830_v0 = vld [vmem:[#allocation7] sm:$0xff]   ;;  %v7831_v1 = vld [vmem:[#allocation7 + $0x8] sm:$0xff]   ;;  %v8715_v32 = vmov 0   ;;  %s8716_s2 = smov 127  }
  0x38   :  { %7473 = vmatprep.subr.bf16.mxu0 %v7830_v0  ;;  %7801 = vmatprep.subr.bf16.mxu1 %v7830_v0  ;;  %v7832_v2 = vld [vmem:[#allocation7 + $0x10] sm:$0xff]   ;;  %v7833_v3 = vld [vmem:[#allocation7 + $0x18] sm:$0xff]   ;;  %v7838_v4 = vld [vmem:[#allocation2] sm:$0xff]   ;;  %s8718_s7 = smov [#allocation8]  }
  0x39   :  { %7474 = vmatpush3.bf16.msra.mxu0 %v7830_v0  ;;  %7809 = vmatpush3.bf16.msra.mxu1 %v7830_v0  ;;  %v7839_v5 = vld [vmem:[#allocation2 + $0x40] sm:$0xff]   ;;  %v7835_v7 = vld [vmem:[#allocation7 + $0x28] sm:$0xff]   ;;  %v7836_v8 = vld [vmem:[#allocation7 + $0x30] sm:$0xff]   ;;  %s6778_s8 = sshll.u32 %s8718_s7, 4  ;;  %s6779_s8 = int_to_ptr.vmem [resolvable:$true] %s6778_s8 }
  0x3a   :  { %7475 = vmatprep.subr.bf16.mxu0 %v7831_v1  ;;  %7802 = vmatprep.subr.bf16.mxu1 %v7831_v1  ;;  %v7834_v6 = vld [vmem:[#allocation7 + $0x20] sm:$0xff]   ;;  %v7837_v9 = vld [vmem:[#allocation7 + $0x38] sm:$0xff]   ;;  %v7840_v10 = vld [vmem:[#allocation2 + $0x8] sm:$0xff]   ;;  %s8680_s9 = scalar_lea.vmem %s6779_s8, 512  ;;  %p8685_p11 = scmp.lt.s32.totalorder %s6779_s8, %s6779_s8 }
  0x3b   :  { %7489 = vmatprep.mubr.bf16.mxu0 %v7838_v4  ;;  %7505 = vmatprep.mubr.bf16.mxu1 %v7839_v5  ;;  %v7841_v11 = vld [vmem:[#allocation2 + $0x48] sm:$0xff]   ;;  %v7854_v12 = vld [vmem:[#allocation7 + $0x140] sm:$0xff]   ;;  %v7842_v13 = vld [vmem:[#allocation2 + $0x10] sm:$0xff]   ;;  %p8681_p10 = scmp.ne.s32.totalorder %s6779_s8, %s8680_s9  ;;  %p8686_p12 = scmp.lt.s32.totalorder %s8680_s9, %s8680_s9 }
  0x3c   :  { %v7843_v14 = vld [vmem:[#allocation2 + $0x50] sm:$0xff]   ;;  %v7855_v15 = vld [vmem:[#allocation7 + $0x148] sm:$0xff]   ;;  %v7844_v17 = vld [vmem:[#allocation2 + $0x18] sm:$0xff]   ;;  %7828 = vset.pattern.permute.xlu1 %v8715_v32  ;;  %7829 = vset.pattern.permute.xlu0 %v8715_v32 }
  0x3d   :  { %7476 = vmatpush3.bf16.msra.mxu0 %v7831_v1  ;;  %7810 = vmatpush3.bf16.msra.mxu1 %v7831_v1  ;;  %v7856_v16 = vld [vmem:[#allocation7 + $0x150] sm:$0xff]   ;;  %v7845_v18 = vld [vmem:[#allocation2 + $0x58] sm:$0xff]   ;;  %v7846_v19 = vld [vmem:[#allocation2 + $0x20] sm:$0xff]   ;;  %p8687_p13 = por %p8686_p12, %p8685_p11 }
  0x3e   :  { %7477 = vmatprep.subr.bf16.mxu0 %v7832_v2  ;;  %7803 = vmatprep.subr.bf16.mxu1 %v7832_v2  ;;  %v7850_v20 = vld [vmem:[#allocation2 + $0x60] sm:$0xff]   ;;  %v7857_v21 = vld [vmem:[#allocation7 + $0x158] sm:$0xff]   ;;  %v7847_v23 = vld [vmem:[#allocation2 + $0x28] sm:$0xff]  }
  0x3f   :  { %v7858_v22 = vld [vmem:[#allocation7 + $0x160] sm:$0xff]   ;;  %v7851_v24 = vld [vmem:[#allocation2 + $0x68] sm:$0xff]   ;;  %v7848_v25 = vld [vmem:[#allocation2 + $0x30] sm:$0xff]   ;;  %p8688_p0 = pnand %p8687_p13, %p8681_p10 }
  0x40   :  { %v7852_v26 = vld [vmem:[#allocation2 + $0x70] sm:$0xff]   ;;  %v7859_v27 = vld [vmem:[#allocation7 + $0x168] sm:$0xff]   ;;  %v7849_v29 = vld [vmem:[#allocation2 + $0x38] sm:$0xff]  }
  0x41   :  { %7478 = vmatpush3.bf16.msra.mxu0 %v7832_v2  ;;  %7811 = vmatpush3.bf16.msra.mxu1 %v7832_v2  ;;  %v7860_v28 = vld [vmem:[#allocation7 + $0x170] sm:$0xff]   ;;  %v7853_v30 = vld [vmem:[#allocation2 + $0x78] sm:$0xff]  }
  0x42   :  { %7479 = vmatprep.subr.bf16.mxu0 %v7833_v3  ;;  %7804 = vmatprep.subr.bf16.mxu1 %v7833_v3  ;;  %v7861_v31 = vld [vmem:[#allocation7 + $0x178] sm:$0xff]  }
  0x45   :  { %7480 = vmatpush3.bf16.msra.mxu0 %v7833_v3  ;;  %7812 = vmatpush3.bf16.msra.mxu1 %v7833_v3 }
  0x46   :  { %7481 = vmatprep.subr.bf16.mxu0 %v7834_v6  ;;  %7805 = vmatprep.subr.bf16.mxu1 %v7834_v6 }
  0x49   :  { %7482 = vmatpush3.bf16.msra.mxu0 %v7834_v6  ;;  %7813 = vmatpush3.bf16.msra.mxu1 %v7834_v6 }
  0x4a   :  { %7483 = vmatprep.subr.bf16.mxu0 %v7835_v7  ;;  %7806 = vmatprep.subr.bf16.mxu1 %v7835_v7 }
  0x4d   :  { %7484 = vmatpush3.bf16.msra.mxu0 %v7835_v7  ;;  %7814 = vmatpush3.bf16.msra.mxu1 %v7835_v7 }
  0x4e   :  { %7485 = vmatprep.subr.bf16.mxu0 %v7836_v8  ;;  %7807 = vmatprep.subr.bf16.mxu1 %v7836_v8 }
  0x51   :  { %7486 = vmatpush3.bf16.msra.mxu0 %v7836_v8  ;;  %7815 = vmatpush3.bf16.msra.mxu1 %v7836_v8 }
  0x52   :  { %7487 = vmatprep.subr.bf16.mxu0 %v7837_v9  ;;  %7808 = vmatprep.subr.bf16.mxu1 %v7837_v9 }
  0x55   :  { %7488 = vmatpush3.bf16.msra.mxu0 %v7837_v9  ;;  %7816 = vmatpush3.bf16.msra.mxu1 %v7837_v9 }
  0x56   :  { %7521 = vmatprep.subr.bf16.mxu1 %v7854_v12 }
  0x58   :  { %7490 = vmatmul.mubr.bf16.vlgmr.msra.gmra.mrb[0].mxu0 %v7840_v10  ;;  %7506 = vmatmul.mubr.bf16.vlgmr.msra.gmra.mrb[0].mxu1 %v7841_v11 }
  0x59   :  { %7493 = vmatprep.mubr.bf16.mxu0 %v7842_v13  ;;  %7509 = vmatprep.mubr.bf16.mxu1 %v7843_v14 }
  0x5a   :  { %7522 = vmatpush3.bf16.msra.mxu1 %v7854_v12 }
  0x5b   :  { %7523 = vmatprep.subr.bf16.mxu1 %v7855_v15 }
  0x5e   :  { %7524 = vmatpush3.bf16.msra.mxu1 %v7855_v15 }
  0x5f   :  { %7525 = vmatprep.subr.bf16.mxu1 %v7856_v16 }
  0x60   :  { %7494 = vmatmul.mubr.bf16.gmra.mrb[4].mxu0 %v7844_v17  ;;  %7510 = vmatmul.mubr.bf16.gmra.mrb[4].mxu1 %v7845_v18 }
  0x61   :  { %7497 = vmatprep.mubr.bf16.mxu0 %v7846_v19  ;;  %7513 = vmatprep.mubr.bf16.mxu1 %v7850_v20 }
  0x62   :  { %7526 = vmatpush3.bf16.msra.mxu1 %v7856_v16 }
  0x63   :  { %7527 = vmatprep.subr.bf16.mxu1 %v7857_v21 }
  0x66   :  { %7528 = vmatpush3.bf16.msra.mxu1 %v7857_v21 }
  0x67   :  { %7529 = vmatprep.subr.bf16.mxu1 %v7858_v22 }
  0x68   :  { %7498 = vmatmul.mubr.bf16.gmra.mrb[8].mxu0 %v7847_v23  ;;  %7514 = vmatmul.mubr.bf16.gmra.mrb[8].mxu1 %v7851_v24 }
  0x69   :  { %7501 = vmatprep.mubr.bf16.mxu0 %v7848_v25  ;;  %7517 = vmatprep.mubr.bf16.mxu1 %v7852_v26 }
  0x6a   :  { %7530 = vmatpush3.bf16.msra.mxu1 %v7858_v22 }
  0x6b   :  { %7531 = vmatprep.subr.bf16.mxu1 %v7859_v27 }
  0x6e   :  { %7532 = vmatpush3.bf16.msra.mxu1 %v7859_v27 }
  0x6f   :  { %7533 = vmatprep.subr.bf16.mxu1 %v7860_v28 }
  0x70   :  { %7502 = vmatmul.mubr.bf16.gmra.mrb[12].mxu0 %v7849_v29  ;;  %7518 = vmatmul.mubr.bf16.gmra.mrb[12].mxu1 %v7853_v30 }
  0x72   :  { %7534 = vmatpush3.bf16.msra.mxu1 %v7860_v28 }
  0x73   :  { %7535 = vmatprep.subr.bf16.mxu1 %v7861_v31 }
  0x76   :  { %7536 = vmatpush3.bf16.msra.mxu1 %v7861_v31 }
 0x12b   :  { %v7491_v33 = vpop.f32.mrb[0].mxu0  ;;  %v7507_v34 = vpop.f32.mrb[0].mxu1 }
 0x12c   :  { %v463_v35 = vpop.f32.mrb[1].mxu0  ;;  %v527_v36 = vpop.f32.mrb[1].mxu1 }
 0x12d   :  { %v7492_v37 = vpop.f32.mrb[2].mxu0  ;;  %v7508_v38 = vpop.f32.mrb[2].mxu1 }
 0x12e   :  { %v591_v39 = vpack.c.bf16 %v7492_v37, %v7491_v33  ;;  %v8783_v40 = vpack.c.bf16 %v7508_v38, %v7507_v34  ;;  %v466_v41 = vpop.f32.mrb[3].mxu0  ;;  %v530_v42 = vpop.f32.mrb[3].mxu1 }
 0x12f   :  { %v590_v43 = vpack.c.bf16 %v466_v41, %v463_v35  ;;  %v598_v44 = vpack.c.bf16 %v530_v42, %v527_v36 }
 0x131   :  { %7537 = vmatprep.mubr.bf16.mxu1 %v590_v43  ;;  %6993 = vmatprep.subr.bf16.mxu0 %v598_v44 }
 0x132   :  { %7538 = vmatmul.mubr.bf16.vlgmr.msra.gmra.mrb[16].mxu1 %v591_v39  ;;  %6994 = vmatpush3.bf16.msra.mxu0 %v590_v43 }
 0x133   :  { %6995 = vmatprep.subr.bf16.mxu0 %v8783_v40  ;;  %v7495_v45 = vpop.f32.mrb[4].mxu0  ;;  %v7511_v46 = vpop.f32.mrb[4].mxu1 }
 0x134   :  { %v479_v47 = vpop.f32.mrb[5].mxu0  ;;  %v543_v48 = vpop.f32.mrb[5].mxu1 }
 0x135   :  { %v7496_v49 = vpop.f32.mrb[6].mxu0  ;;  %v7512_v50 = vpop.f32.mrb[6].mxu1 }
 0x136   :  { %6996 = vmatpush3.bf16.msra.mxu0 %v591_v39  ;;  %v593_v51 = vpack.c.bf16 %v7496_v49, %v7495_v45  ;;  %v601_v52 = vpack.c.bf16 %v7512_v50, %v7511_v46  ;;  %v482_v53 = vpop.f32.mrb[7].mxu0  ;;  %v546_v54 = vpop.f32.mrb[7].mxu1 }
 0x137   :  { %v592_v55 = vpack.c.bf16 %v482_v53, %v479_v47  ;;  %v600_v56 = vpack.c.bf16 %v546_v54, %v543_v48 }
 0x139   :  { %7541 = vmatprep.mubr.bf16.mxu1 %v592_v55  ;;  %6997 = vmatprep.subr.bf16.mxu0 %v600_v56 }
 0x13a   :  { %7542 = vmatmul.mubr.bf16.gmra.mrb[20].mxu1 %v593_v51  ;;  %6998 = vmatpush3.bf16.msra.mxu0 %v592_v55 }
 0x13b   :  { %v7499_v57 = vpop.f32.mrb[8].mxu0  ;;  %6999 = vmatprep.subr.bf16.mxu0 %v601_v52  ;;  %v7515_v58 = vpop.f32.mrb[8].mxu1 }
 0x13c   :  { %v495_v59 = vpop.f32.mrb[9].mxu0  ;;  %v559_v60 = vpop.f32.mrb[9].mxu1 }
 0x13d   :  { %v7500_v61 = vpop.f32.mrb[10].mxu0  ;;  %v7516_v62 = vpop.f32.mrb[10].mxu1 }
 0x13e   :  { %v595_v63 = vpack.c.bf16 %v7500_v61, %v7499_v57  ;;  %v498_v0 = vpop.f32.mrb[11].mxu0  ;;  %7000 = vmatpush3.bf16.msra.mxu0 %v593_v51  ;;  %v603_v1 = vpack.c.bf16 %v7516_v62, %v7515_v58  ;;  %v562_v2 = vpop.f32.mrb[11].mxu1 }
 0x13f   :  { %v594_v3 = vpack.c.bf16 %v498_v0, %v495_v59  ;;  %v602_v4 = vpack.c.bf16 %v562_v2, %v559_v60 }
 0x141   :  { %7545 = vmatprep.mubr.bf16.mxu1 %v594_v3  ;;  %7001 = vmatprep.subr.bf16.mxu0 %v602_v4 }
 0x142   :  { %7546 = vmatmul.mubr.bf16.gmra.mrb[24].mxu1 %v595_v63  ;;  %7002 = vmatpush3.bf16.msra.mxu0 %v594_v3 }
 0x143   :  { %v7503_v5 = vpop.f32.mrb[12].mxu0  ;;  %7003 = vmatprep.subr.bf16.mxu0 %v603_v1  ;;  %v7519_v6 = vpop.f32.mrb[12].mxu1 }
 0x144   :  { %v511_v7 = vpop.f32.mrb[13].mxu0  ;;  %v575_v8 = vpop.f32.mrb[13].mxu1 }
 0x145   :  { %v7504_v9 = vpop.f32.mrb[14].mxu0  ;;  %v7520_v10 = vpop.f32.mrb[14].mxu1 }
 0x146   :  { %v597_v11 = vpack.c.bf16 %v7504_v9, %v7503_v5  ;;  %v514_v12 = vpop.f32.mrb[15].mxu0  ;;  %7004 = vmatpush3.bf16.msra.mxu0 %v595_v63  ;;  %v605_v13 = vpack.c.bf16 %v7520_v10, %v7519_v6  ;;  %v578_v14 = vpop.f32.mrb[15].mxu1 }
 0x147   :  { %v596_v15 = vpack.c.bf16 %v514_v12, %v511_v7  ;;  %v604_v16 = vpack.c.bf16 %v578_v14, %v575_v8 }
 0x149   :  { %7549 = vmatprep.mubr.bf16.mxu1 %v596_v15  ;;  %7005 = vmatprep.subr.bf16.mxu0 %v604_v16 }
 0x14a   :  { %7550 = vmatmul.mubr.bf16.gmra.mrb[28].mxu1 %v597_v11  ;;  %7006 = vmatpush3.bf16.msra.mxu0 %v596_v15 }
 0x14b   :  { %7553 = vmatprep.mubr.bf16.mxu1 %v598_v44  ;;  %7007 = vmatprep.subr.bf16.mxu0 %v605_v13 }
 0x14e   :  { %7008 = vmatpush3.bf16.msra.mxu0 %v597_v11 }
 0x152   :  { %7554 = vmatmul.mubr.bf16.gmra.mrb[32].mxu1 %v8783_v40 }
 0x153   :  { %7557 = vmatprep.mubr.bf16.mxu1 %v600_v56 }
 0x15a   :  { %7558 = vmatmul.mubr.bf16.gmra.mrb[36].mxu1 %v601_v52 }
 0x15b   :  { %7561 = vmatprep.mubr.bf16.mxu1 %v602_v4 }
 0x162   :  { %7562 = vmatmul.mubr.bf16.gmra.mrb[40].mxu1 %v603_v1 }
 0x163   :  { %7565 = vmatprep.mubr.bf16.mxu1 %v604_v16 }
 0x16a   :  { %7566 = vmatmul.mubr.bf16.gmra.mrb[44].mxu1 %v605_v13 }
 0x205   :  { %v7539_v17 = vpop.f32.mrb[16].mxu1 }
 0x206   :  { %1016 = vperm.xlu1 %7828, %v7539_v17   ;;  %851 = vrot.lane.b32.xlu0 %v7539_v17, %s8716_s2  ;;  %v688_v18 = vpop.f32.mrb[17].mxu1 }
 0x207   :  { %v7540_v19 = vpop.f32.mrb[18].mxu1 }
 0x208   :  { %v691_v20 = vpop.f32.mrb[19].mxu1 }
 0x20a   :  { %847 = vrot.lane.b32.xlu0 %v688_v18, %s8716_s2  ;;  %849 = vrot.lane.b32.xlu1 %v691_v20, %s8716_s2 }
 0x20d   :  { %v7543_v21 = vpop.f32.mrb[20].mxu1 }
 0x20e   :  { %1008 = vperm.xlu0 %7829, %v688_v18   ;;  %1012 = vperm.xlu1 %7828, %v691_v20   ;;  %v704_v22 = vpop.f32.mrb[21].mxu1 }
 0x20f   :  { %v7544_v23 = vpop.f32.mrb[22].mxu1 }
 0x210   :  { %v707_v24 = vpop.f32.mrb[23].mxu1 }
 0x212   :  { %853 = vrot.lane.b32.xlu0 %v7540_v19, %s8716_s2  ;;  %1032 = vperm.xlu1 %7828, %v7543_v21  }
 0x215   :  { %v7547_v25 = vpop.f32.mrb[24].mxu1 }
 0x216   :  { %1020 = vperm.xlu0 %7829, %v7540_v19   ;;  %1024 = vperm.xlu1 %7828, %v704_v22   ;;  %v720_v26 = vpop.f32.mrb[25].mxu1 }
 0x217   :  { %v7548_v27 = vpop.f32.mrb[26].mxu1 }
 0x218   :  { %v723_v28 = vpop.f32.mrb[27].mxu1 }
 0x21a   :  { %859 = vrot.lane.b32.xlu0 %v7543_v21, %s8716_s2  ;;  %1048 = vperm.xlu1 %7828, %v7547_v25  }
 0x21d   :  { %v7551_v29 = vpop.f32.mrb[28].mxu1 }
 0x21e   :  { %855 = vrot.lane.b32.xlu0 %v704_v22, %s8716_s2  ;;  %1044 = vperm.xlu1 %7828, %v723_v28   ;;  %v736_v30 = vpop.f32.mrb[29].mxu1 }
 0x21f   :  { %v7552_v31 = vpop.f32.mrb[30].mxu1 }
 0x220   :  { %v739_v32 = vpop.f32.mrb[31].mxu1 }
 0x222   :  { %861 = vrot.lane.b32.xlu0 %v7544_v23, %s8716_s2  ;;  %1064 = vperm.xlu1 %7828, %v7551_v29  }
 0x225   :  { %v7555_v33 = vpop.f32.mrb[32].mxu1 }
 0x226   :  { %1036 = vperm.xlu0 %7829, %v7544_v23   ;;  %1056 = vperm.xlu1 %7828, %v736_v30   ;;  %v752_v34 = vpop.f32.mrb[33].mxu1 }
 0x227   :  { %v7556_v35 = vpop.f32.mrb[34].mxu1 }
 0x228   :  { %v755_v36 = vpop.f32.mrb[35].mxu1 }
 0x22a   :  { %857 = vrot.lane.b32.xlu0 %v707_v24, %s8716_s2  ;;  %883 = vrot.lane.b32.xlu1 %v7555_v33, %s8716_s2 }
 0x22d   :  { %v7559_v37 = vpop.f32.mrb[36].mxu1 }
 0x22e   :  { %1028 = vperm.xlu0 %7829, %v707_v24   ;;  %1080 = vperm.xlu1 %7828, %v7555_v33   ;;  %v768_v38 = vpop.f32.mrb[37].mxu1 }
 0x22f   :  { %v7560_v39 = vpop.f32.mrb[38].mxu1 }
 0x230   :  { %v771_v40 = vpop.f32.mrb[39].mxu1 }
 0x232   :  { %867 = vrot.lane.b32.xlu0 %v7547_v25, %s8716_s2  ;;  %1072 = vperm.xlu1 %7828, %v752_v34  }
 0x235   :  { %v7563_v41 = vpop.f32.mrb[40].mxu1 }
 0x236   :  { %863 = vrot.lane.b32.xlu0 %v720_v26, %s8716_s2  ;;  %885 = vrot.lane.b32.xlu1 %v7556_v35, %s8716_s2  ;;  %v784_v42 = vpop.f32.mrb[41].mxu1 }
 0x237   :  { %v7564_v43 = vpop.f32.mrb[42].mxu1 }
 0x238   :  { %v787_v44 = vpop.f32.mrb[43].mxu1 }
 0x23a   :  { %1040 = vperm.xlu0 %7829, %v720_v26   ;;  %881 = vrot.lane.b32.xlu1 %v755_v36, %s8716_s2 }
 0x23d   :  { %v8800_v45 = vpop.f32.mrb[44].mxu1 }
 0x23e   :  { %12805 = vst [vmem:[#allocation12_spill] sm:$0xff] %v8800_v45  ;;  %869 = vrot.lane.b32.xlu0 %v7548_v27, %s8716_s2  ;;  %891 = vrot.lane.b32.xlu1 %v7559_v37, %s8716_s2  ;;  %v800_v46 = vpop.f32.mrb[45].mxu1 }
 0x23f   :  { %v8804_v47 = vpop.f32.mrb[46].mxu1 }
 0x240   :  { %v803_v48 = vpop.f32.mrb[47].mxu1 }
 0x242   :  { %1052 = vperm.xlu0 %7829, %v7548_v27   ;;  %887 = vrot.lane.b32.xlu1 %v768_v38, %s8716_s2 }
 0x246   :  { %865 = vrot.lane.b32.xlu0 %v723_v28, %s8716_s2  ;;  %893 = vrot.lane.b32.xlu1 %v7560_v39, %s8716_s2 }
 0x24a   :  { %875 = vrot.lane.b32.xlu0 %v7551_v29, %s8716_s2  ;;  %1100 = vperm.xlu1 %7828, %v7560_v39  }
 0x24e   :  { %871 = vrot.lane.b32.xlu0 %v736_v30, %s8716_s2  ;;  %889 = vrot.lane.b32.xlu1 %v771_v40, %s8716_s2 }
 0x252   :  { %877 = vrot.lane.b32.xlu0 %v7552_v31, %s8716_s2  ;;  %1092 = vperm.xlu1 %7828, %v771_v40  }
 0x256   :  { %1068 = vperm.xlu0 %7829, %v7552_v31   ;;  %899 = vrot.lane.b32.xlu1 %v7563_v41, %s8716_s2 }
 0x25a   :  { %873 = vrot.lane.b32.xlu0 %v739_v32, %s8716_s2  ;;  %895 = vrot.lane.b32.xlu1 %v784_v42, %s8716_s2 }
 0x25e   :  { %1060 = vperm.xlu0 %7829, %v739_v32   ;;  %901 = vrot.lane.b32.xlu1 %v7564_v43, %s8716_s2 }
 0x262   :  { %879 = vrot.lane.b32.xlu0 %v752_v34, %s8716_s2  ;;  %1116 = vperm.xlu1 %7828, %v7564_v43   ;;  %v12456_v43 = vlaneseq }
 0x266   :  { %1084 = vperm.xlu0 %7829, %v7556_v35   ;;  %897 = vrot.lane.b32.xlu1 %v787_v44, %s8716_s2 }
 0x26a   :  { %1076 = vperm.xlu0 %7829, %v755_v36   ;;  %1108 = vperm.xlu1 %7828, %v787_v44  }
 0x26e   :  { %1096 = vperm.xlu0 %7829, %v7559_v37   ;;  %907 = vrot.lane.b32.xlu1 %v8800_v45, %s8716_s2 }
 0x272   :  { %1088 = vperm.xlu0 %7829, %v768_v38   ;;  %903 = vrot.lane.b32.xlu1 %v800_v46, %s8716_s2 }
 0x276   :  { %1112 = vperm.xlu0 %7829, %v7563_v41   ;;  %909 = vrot.lane.b32.xlu1 %v8804_v47, %s8716_s2 }
 0x278   :  { %v852_v49 = vpop.permute.xlu0 %851 }
 0x27a   :  { %1104 = vperm.xlu0 %7829, %v784_v42   ;;  %905 = vrot.lane.b32.xlu1 %v803_v48, %s8716_s2 }
 0x27c   :  { %v848_v51 = vpop.permute.xlu0 %847 }
 0x27e   :  { %1120 = vperm.xlu0 %7829, %v800_v46   ;;  %1124 = vperm.xlu1 %7828, %v803_v48   ;;  %v8880_v46 = vshrl.u32 %v12456_v43, 7 }
 0x280   :  { %12821 = vst [vmem:[#allocation28_spill] sm:$0xff] %v8880_v46 }
 0x285   :  { %v8825_v50 = vpop.permute.xlu1 %1016 }
 0x289   :  { %v850_v52 = vpop.permute.xlu1 %849 }
 0x28d   :  { %v8827_v53 = vpop.permute.xlu0 %1008  ;;  %v8829_v54 = vpop.permute.xlu1 %1012 }
 0x291   :  { %v854_v55 = vpop.permute.xlu0 %853  ;;  %v8831_v56 = vpop.permute.xlu1 %1032 }
 0x295   :  { %v8833_v57 = vpop.permute.xlu0 %1020  ;;  %v8835_v58 = vpop.permute.xlu1 %1024 }
 0x299   :  { %v860_v59 = vpop.permute.xlu0 %859  ;;  %v8837_v60 = vpop.permute.xlu1 %1048 }
 0x29d   :  { %v856_v61 = vpop.permute.xlu0 %855  ;;  %v8839_v62 = vpop.permute.xlu1 %1044 }
 0x2a1   :  { %v862_v63 = vpop.permute.xlu0 %861  ;;  %v8841_v0 = vpop.permute.xlu1 %1064 }
 0x2a2   :  { %12806 = vst [vmem:[#allocation13_spill] sm:$0xff] %v8841_v0 }
 0x2a5   :  { %v8843_v1 = vpop.permute.xlu0 %1036  ;;  %v8845_v2 = vpop.permute.xlu1 %1056 }
 0x2a6   :  { %12807 = vst [vmem:[#allocation14_spill] sm:$0xff] %v8845_v2 }
 0x2a7   :  { %943 = vxpose.xlu1.b32.start [1/16] (narrow) %v848_v51, 8 }
 0x2a9   :  { %v858_v3 = vpop.permute.xlu0 %857  ;;  %v884_v4 = vpop.permute.xlu1 %883 }
 0x2ab   :  { %944 = vxpose.xlu1.b32.cont [2/16] (narrow) %v850_v52, 8  ;;  %v93_v52 = vld [vmem:[#allocation5 + $0x8] sm:$0xff] }
 0x2ad   :  { %v8847_v5 = vpop.permute.xlu0 %1028  ;;  %v8849_v6 = vpop.permute.xlu1 %1080 }
 0x2ae   :  { %12808 = vst [vmem:[#allocation15_spill] sm:$0xff] %v8849_v6 }
 0x2af   :  { %945 = vxpose.xlu1.b32.cont [3/16] (narrow) %v852_v49, 8  ;;  %v8885_v49 = vsub.s32 0, %v8880_v46 }
 0x2b1   :  { %v868_v7 = vpop.permute.xlu0 %867  ;;  %v8851_v8 = vpop.permute.xlu1 %1072  ;;  %12823 = vst [vmem:[#allocation30_spill] sm:$0xff] %v8885_v49 }
 0x2b2   :  { %12809 = vst [vmem:[#allocation16_spill] sm:$0xff] %v8851_v8 }
 0x2b3   :  { %946 = vxpose.xlu1.b32.cont [4/16] (narrow) %v854_v55, 8  ;;  %v92_v55 = vld [vmem:[#allocation5] sm:$0xff] }
 0x2b4   :  { %v8927_v43 = vunpack.c.h.bf16 %v92_v55 }
 0x2b5   :  { %v864_v9 = vpop.permute.xlu0 %863  ;;  %v886_v10 = vpop.permute.xlu1 %885 }
 0x2b6   :  { %12840 = vst [vmem:[#allocation47_spill] sm:$0xff] %v8927_v43  ;;  %vm12484_vm9 = vcmp.gt.f32.partialorder %v8927_v43, 0.0 }
 0x2b7   :  { %947 = vxpose.xlu1.b32.cont [5/16] (narrow) %v856_v61, 8  ;;  %v95_v61 = vld [vmem:[#allocation5 + $0x18] sm:$0xff] }
 0x2b8   :  { %v8930_v46 = vunpack.c.h.bf16 %v95_v61 }
 0x2b9   :  { %v8853_v11 = vpop.permute.xlu0 %1040  ;;  %v882_v12 = vpop.permute.xlu1 %881 }
 0x2ba   :  { %12841 = vst [vmem:[#allocation48_spill] sm:$0xff] %v8930_v46  ;;  %vm12485_vm10 = vcmp.gt.f32.partialorder %v8930_v46, 0.0 }
 0x2bb   :  { %948 = vxpose.xlu1.b32.cont [6/16] (narrow) %v858_v3, 8  ;;  %v97_v3 = vld [vmem:[#allocation5 + $0x28] sm:$0xff] }
 0x2bd   :  { %v870_v13 = vpop.permute.xlu0 %869  ;;  %v892_v14 = vpop.permute.xlu1 %891 }
 0x2bf   :  { %949 = vxpose.xlu1.b32.cont [7/16] (narrow) %v860_v59, 8 }
 0x2c1   :  { %v8855_v15 = vpop.permute.xlu0 %1052  ;;  %v888_v16 = vpop.permute.xlu1 %887 }
 0x2c3   :  { %950 = vxpose.xlu1.b32.cont [8/16] (narrow) %v862_v63, 8  ;;  %v94_v63 = vld [vmem:[#allocation5 + $0x10] sm:$0xff] }
 0x2c5   :  { %v866_v17 = vpop.permute.xlu0 %865  ;;  %v894_v18 = vpop.permute.xlu1 %893 }
 0x2c7   :  { %951 = vxpose.xlu1.b32.cont [9/16] (narrow) %v864_v9, 8  ;;  %v98_v9 = vld [vmem:[#allocation5 + $0x30] sm:$0xff] }
 0x2c9   :  { %v876_v19 = vpop.permute.xlu0 %875  ;;  %v8857_v20 = vpop.permute.xlu1 %1100 }
 0x2ca   :  { %12810 = vst [vmem:[#allocation17_spill] sm:$0xff] %v8857_v20 }
 0x2cb   :  { %952 = vxpose.xlu1.b32.cont [10/16] (narrow) %v866_v17, 8  ;;  %v8894_v17 = vunpack.c.l.bf16 %v92_v55 }
 0x2cd   :  { %v872_v21 = vpop.permute.xlu0 %871  ;;  %v890_v23 = vpop.permute.xlu1 %889  ;;  %12827 = vst [vmem:[#allocation34_spill] sm:$0xff] %v8894_v17  ;;  %vm12483_vm1 = vcmp.gt.f32.partialorder %v8894_v17, 0.0 }
 0x2cf   :  { %953 = vxpose.xlu1.b32.cont [11/16] (narrow) %v868_v7, 8  ;;  %v99_v7 = vld [vmem:[#allocation5 + $0x38] sm:$0xff] }
 0x2d1   :  { %v878_v22 = vpop.permute.xlu0 %877  ;;  %v8861_v25 = vpop.permute.xlu1 %1092 }
 0x2d2   :  { %12812 = vst [vmem:[#allocation19_spill] sm:$0xff] %v8861_v25 }
 0x2d3   :  { %954 = vxpose.xlu1.b32.cont [12/16] (narrow) %v870_v13, 8  ;;  %v101_v13 = vld [vmem:[#allocation5 + $0x48] sm:$0xff] }
 0x2d5   :  { %v8859_v24 = vpop.permute.xlu0 %1068  ;;  %v900_v28 = vpop.permute.xlu1 %899 }
 0x2d6   :  { %12811 = vst [vmem:[#allocation18_spill] sm:$0xff] %v8859_v24 }
 0x2d7   :  { %955 = vxpose.xlu1.b32.cont [13/16] (narrow) %v872_v21, 8  ;;  %v8898_v21 = vunpack.c.l.bf16 %v94_v63 }
 0x2d9   :  { %v874_v26 = vpop.permute.xlu0 %873  ;;  %v896_v30 = vpop.permute.xlu1 %895  ;;  %12829 = vst [vmem:[#allocation36_spill] sm:$0xff] %v8898_v21  ;;  %vm12480_vm3 = vcmp.gt.f32.partialorder %v8898_v21, 0.0  ;;  %v12906_v21 = vld [vmem:[#allocation16_spill] sm:$0xff] }
 0x2db   :  { %956 = vxpose.xlu1.b32.cont [14/16] (narrow) %v874_v26, 8  ;;  %v8904_v26 = vunpack.c.l.bf16 %v99_v7 }
 0x2dd   :  { %v8863_v27 = vpop.permute.xlu0 %1060  ;;  %v902_v31 = vpop.permute.xlu1 %901  ;;  %12832 = vst [vmem:[#allocation39_spill] sm:$0xff] %v8904_v26 }
 0x2de   :  { %12813 = vst [vmem:[#allocation20_spill] sm:$0xff] %v8863_v27 }
 0x2df   :  { %957 = vxpose.xlu1.b32.cont [15/16] (narrow) %v876_v19, 8  ;;  %v102_v19 = vld [vmem:[#allocation5 + $0x50] sm:$0xff] }
 0x2e1   :  { %v880_v29 = vpop.permute.xlu0 %879  ;;  %v8865_v32 = vpop.permute.xlu1 %1116 }
 0x2e2   :  { %975 = vxpose.xlu0.b32.start [1/16] (narrow) %v880_v29, 8  ;;  %12814 = vst [vmem:[#allocation21_spill] sm:$0xff] %v8865_v32  ;;  %v8908_v29 = vunpack.c.l.bf16 %v101_v13 }
 0x2e3   :  { %958 = vxpose.xlu1.b32.end [16/16] (narrow) %v878_v22, 8  ;;  %v8900_v22 = vunpack.c.l.bf16 %v97_v3 }
 0x2e4   :  { %12834 = vst [vmem:[#allocation41_spill] sm:$0xff] %v8908_v29 }
 0x2e5   :  { %v898_v33 = vpop.permute.xlu1 %897  ;;  %v8869_v39 = vpop.permute.xlu0 %1084  ;;  %12830 = vst [vmem:[#allocation37_spill] sm:$0xff] %v8900_v22  ;;  %vm12482_vm4 = vcmp.gt.f32.partialorder %v8900_v22, 0.0 }
 0x2e6   :  { %976 = vxpose.xlu0.b32.cont [2/16] (narrow) %v882_v12, 8  ;;  %12816 = vst [vmem:[#allocation23_spill] sm:$0xff] %v8869_v39  ;;  %v8892_v12 = vunpack.c.l.bf16 %v93_v52 }
 0x2e8   :  { %12826 = vst [vmem:[#allocation33_spill] sm:$0xff] %v8892_v12  ;;  %vm12487_vm0 = vcmp.gt.f32.partialorder %v8892_v12, 0.0  ;;  %v12913_v12 = vld [vmem:[#allocation17_spill] sm:$0xff] }
 0x2e9   :  { %v8867_v34 = vpop.permute.xlu1 %1108  ;;  %v8871_v40 = vpop.permute.xlu0 %1076 }
 0x2ea   :  { %977 = vxpose.xlu0.b32.cont [3/16] (narrow) %v884_v4, 8  ;;  %12815 = vst [vmem:[#allocation22_spill] sm:$0xff] %v8867_v34  ;;  %12817 = vst [vmem:[#allocation24_spill] sm:$0xff] %v8871_v40  ;;  %v96_v4 = vld [vmem:[#allocation5 + $0x20] sm:$0xff] }
 0x2eb   :  { %v8943_v55 = vunpack.c.h.bf16 %v96_v4 }
 0x2ed   :  { %v908_v35 = vpop.permute.xlu1 %907  ;;  %v8873_v41 = vpop.permute.xlu0 %1096  ;;  %12844 = vst [vmem:[#allocation51_spill] sm:$0xff] %v8943_v55  ;;  %v12909_v46 = vld [vmem:[#allocation23_spill] sm:$0xff] }
 0x2ee   :  { %978 = vxpose.xlu0.b32.cont [4/16] (narrow) %v886_v10, 8  ;;  %12818 = vst [vmem:[#allocation25_spill] sm:$0xff] %v8873_v41 }
 0x2f1   :  { %v904_v36 = vpop.permute.xlu1 %903  ;;  %v8875_v42 = vpop.permute.xlu0 %1088 }
 0x2f2   :  { %979 = vxpose.xlu0.b32.cont [5/16] (narrow) %v888_v16, 8  ;;  %12819 = vst [vmem:[#allocation26_spill] sm:$0xff] %v8875_v42  ;;  %v103_v16 = vld [vmem:[#allocation5 + $0x58] sm:$0xff] }
 0x2f5   :  { %v910_v37 = vpop.permute.xlu1 %909  ;;  %v8877_v44 = vpop.permute.xlu0 %1112 }
 0x2f6   :  { %980 = vxpose.xlu0.b32.cont [6/16] (narrow) %v890_v23, 8  ;;  %12820 = vst [vmem:[#allocation27_spill] sm:$0xff] %v8877_v44  ;;  %v8902_v23 = vunpack.c.l.bf16 %v96_v4  ;;  %v8933_v44 = vunpack.c.h.bf16 %v94_v63  ;;  %v8949_v63 = vunpack.c.h.bf16 %v101_v13 }
 0x2f8   :  { %12831 = vst [vmem:[#allocation38_spill] sm:$0xff] %v8902_v23  ;;  %12842 = vst [vmem:[#allocation49_spill] sm:$0xff] %v8933_v44  ;;  %vm12570_vm15 = vcmp.gt.f32.partialorder %v8933_v44, 0.0 }
 0x2f9   :  { %v906_v38 = vpop.permute.xlu1 %905  ;;  %v8887_v59 = vpop.permute.xlu0 %1104  ;;  %12847 = vst [vmem:[#allocation54_spill] sm:$0xff] %v8949_v63 }
 0x2fa   :  { %981 = vxpose.xlu0.b32.cont [7/16] (narrow) %v892_v14, 8  ;;  %12824 = vst [vmem:[#allocation31_spill] sm:$0xff] %v8887_v59  ;;  %v100_v14 = vld [vmem:[#allocation5 + $0x40] sm:$0xff]  ;;  %v8940_v59 = vunpack.c.h.bf16 %v97_v3  ;;  %v8955_v3 = vunpack.c.h.bf16 %v103_v16 }
 0x2fc   :  { %12843 = vst [vmem:[#allocation50_spill] sm:$0xff] %v8940_v59  ;;  %12849 = vst [vmem:[#allocation56_spill] sm:$0xff] %v8955_v3 }
 0x2fd   :  { %v8882_v48 = vpop.permute.xlu1 %1124 }
 0x2fe   :  { %982 = vxpose.xlu0.b32.cont [8/16] (narrow) %v894_v18, 8  ;;  %12822 = vst [vmem:[#allocation29_spill] sm:$0xff] %v8882_v48  ;;  %v8896_v18 = vunpack.c.l.bf16 %v95_v61  ;;  %v8945_v61 = vunpack.c.h.bf16 %v99_v7  ;;  %v8947_v48 = vunpack.c.h.bf16 %v98_v9 }
 0x300   :  { %12828 = vst [vmem:[#allocation35_spill] sm:$0xff] %v8896_v18  ;;  %vm12481_vm2 = vcmp.gt.f32.partialorder %v8896_v18, 0.0  ;;  %12845 = vst [vmem:[#allocation52_spill] sm:$0xff] %v8945_v61 }
 0x301   :  { %12846 = vst [vmem:[#allocation53_spill] sm:$0xff] %v8947_v48 }
 0x302   :  { %983 = vxpose.xlu0.b32.cont [9/16] (narrow) %v896_v30, 8  ;;  %v8910_v30 = vunpack.c.l.bf16 %v100_v14 }
 0x304   :  { %12835 = vst [vmem:[#allocation42_spill] sm:$0xff] %v8910_v30 }
 0x306   :  { %984 = vxpose.xlu0.b32.cont [10/16] (narrow) %v898_v33, 8  ;;  %v8914_v33 = vpop.permute.xlu0 %1120 }
 0x307   :  { %12837 = vst [vmem:[#allocation44_spill] sm:$0xff] %v8914_v33  ;;  %v8951_v33 = vunpack.c.h.bf16 %v100_v14 }
 0x309   :  { %12848 = vst [vmem:[#allocation55_spill] sm:$0xff] %v8951_v33 }
 0x30a   :  { %985 = vxpose.xlu0.b32.cont [11/16] (narrow) %v900_v28, 8  ;;  %v8906_v28 = vunpack.c.l.bf16 %v98_v9 }
 0x30c   :  { %12833 = vst [vmem:[#allocation40_spill] sm:$0xff] %v8906_v28 }
 0x30e   :  { %986 = vxpose.xlu0.b32.cont [12/16] (narrow) %v902_v31, 8  ;;  %v8912_v31 = vunpack.c.l.bf16 %v103_v16  ;;  %v8969_v16 = vunpack.c.h.bf16 %v102_v19 }
 0x310   :  { %12836 = vst [vmem:[#allocation43_spill] sm:$0xff] %v8912_v31  ;;  %12850 = vst [vmem:[#allocation57_spill] sm:$0xff] %v8969_v16 }
 0x312   :  { %987 = vxpose.xlu0.b32.cont [13/16] (narrow) %v904_v36, 8 }
 0x316   :  { %988 = vxpose.xlu0.b32.cont [14/16] (narrow) %v906_v38, 8  ;;  %v8923_v38 = vunpack.c.l.bf16 %v102_v19 }
 0x318   :  { %12839 = vst [vmem:[#allocation46_spill] sm:$0xff] %v8923_v38 }
 0x31a   :  { %989 = vxpose.xlu0.b32.cont [15/16] (narrow) %v908_v35, 8 }
 0x31e   :  { %990 = vxpose.xlu0.b32.end [16/16] (narrow) %v910_v37, 8  ;;  %v8920_v37 = vunpack.c.h.bf16 %v93_v52 }
 0x320   :  { %12838 = vst [vmem:[#allocation45_spill] sm:$0xff] %v8920_v37  ;;  %vm12486_vm7 = vcmp.gt.f32.partialorder %v8920_v37, 0.0 }
 0x327   :  { %v959_v51 = vpop.trf.xlu1 }
 0x328   :  { %v8890_v10 = vrot.slane %v959_v51, %v8885_v49 }
 0x32a   :  { %12825 = vst [vmem:[#allocation32_spill] sm:$0xff] %v8890_v10  ;;  %v1143_v35 = vadd.f32 %v8890_v10, %v8827_v53  ;;  %v1145_v36 = vadd.f32 %v8890_v10, %v8829_v54  ;;  %v1149_v51 = vadd.f32 %v8890_v10, %v8833_v57  ;;  %v1147_v52 = vadd.f32 %v8890_v10, %v8825_v50 }
 0x32b   :  { %v1153_v32 = vadd.f32 %v8890_v10, %v8847_v5  ;;  %v1151_v34 = vadd.f32 %v8890_v10, %v8835_v58  ;;  %v1157_v4 = vadd.f32 %v8890_v10, %v8843_v1  ;;  %v8965_v42 = vadd.f32 %v8890_v10, %v8831_v56 }
 0x32c   :  { %v1273_v41 = vmul.f32 0.2, %v1145_v36  ;;  %v1271_v25 = vmul.f32 0.2, %v1143_v35  ;;  %vm1209_vm5 = vcmp.ge.f32.partialorder %v1145_v36, 0.0  ;;  %vm1207_vm6 = vcmp.ge.f32.partialorder %v1143_v35, 0.0 }
 0x32d   :  { %v1277_v7 = vmul.f32 0.2, %v1149_v51  ;;  %vm1213_vm8 = vcmp.ge.f32.partialorder %v1149_v51, 0.0  ;;  %v1275_v13 = vmul.f32 0.2, %v1147_v52  ;;  %vm1211_vm11 = vcmp.ge.f32.partialorder %v1147_v52, 0.0 }
 0x32e   :  { %v1281_v14 = vmul.f32 0.2, %v1153_v32  ;;  %vm1217_vm12 = vcmp.ge.f32.partialorder %v1153_v32, 0.0  ;;  %v1337_v39 = vsel %vm1209_vm5, %v1145_v36, %v1273_v41  ;;  %v1335_v6 = vsel %vm1207_vm6, %v1143_v35, %v1271_v25 }
 0x32f   :  { %v1341_v40 = vsel %vm1213_vm8, %v1149_v51, %v1277_v7  ;;  %vm1215_vm13 = vcmp.ge.f32.partialorder %v1151_v34, 0.0  ;;  %v1279_v8 = vmul.f32 0.2, %v1151_v34  ;;  %v1285_v24 = vmul.f32 0.2, %v1157_v4 }
 0x330   :  { %v1339_v0 = vsel %vm1211_vm11, %v1147_v52, %v1275_v13  ;;  %v1345_v2 = vsel %vm1217_vm12, %v1153_v32, %v1281_v14  ;;  %vm1221_vm14 = vcmp.ge.f32.partialorder %v1157_v4, 0.0  ;;  %v8985_v27 = vadd.f32 %v8890_v10, %v8837_v60 }
 0x331   :  { %v8993_v41 = vsel %vm12487_vm0, %v1337_v39, -1e+30  ;;  %v9002_v32 = vsel %vm12483_vm1, %v1335_v6, -1e+30  ;;  %vm12568_vm5 = vcmp.gt.f32.partialorder %v8940_v59, 0.0  ;;  %vm12563_vm6 = vcmp.gt.f32.partialorder %v8902_v23, 0.0 }
 0x332   :  { %12851 = vst [vmem:[#allocation58_spill] sm:$0xff] %v8993_v41  ;;  %12852 = vst [vmem:[#allocation59_spill] sm:$0xff] %v9002_v32  ;;  %vm12488_vm8 = vcmp.gt.f32.partialorder %v8904_v26, 0.0  ;;  %v9014_v39 = vsel %vm12480_vm3, %v1339_v0, -1e+30  ;;  %vm12567_vm11 = vcmp.gt.f32.partialorder %v8943_v55, 0.0  ;;  %v1349_v35 = vsel %vm1221_vm14, %v1157_v4, %v1285_v24 }
 0x333   :  { %12854 = vst [vmem:[#allocation61_spill] sm:$0xff] %v9014_v39  ;;  %v9018_v6 = vsel %vm12482_vm4, %v1345_v2, -1e+30  ;;  %vm1219_vm12 = vcmp.ge.f32.partialorder %v8965_v42, 0.0  ;;  %vm12489_vm14 = vcmp.gt.f32.partialorder %v8906_v28, 0.0  ;;  %vm12557_vm0 = vcmp.gt.f32.partialorder %v8951_v33, 0.0 }
 0x334   :  { %12855 = vst [vmem:[#allocation62_spill] sm:$0xff] %v9018_v6  ;;  %vm12560_vm1 = vcmp.gt.f32.partialorder %v8908_v29, 0.0  ;;  %v9248_v18 = vadd.f32 %v8890_v10, %v12909_v46 }
 0x362   :  { %v991_v20 = vpop.trf.xlu0 }
 0x363   :  { %v8960_v9 = vrot.slane %v991_v20, %v8885_v49  ;;  %v8973_v20 = vadd.f32 %v8890_v10, %v8853_v11  ;;  %v8977_v49 = vadd.f32 %v8890_v10, %v8839_v62 }
 0x365   :  { %v1146_v19 = vadd.f32 %v8960_v9, %v8829_v54  ;;  %v1144_v45 = vadd.f32 %v8960_v9, %v8827_v53  ;;  %v1150_v25 = vadd.f32 %v8960_v9, %v8833_v57  ;;  %v8998_v54 = vadd.f32 %v8890_v10, %v8855_v15 }
 0x366   :  { %v9006_v53 = vsel %vm12481_vm2, %v1341_v40, -1e+30  ;;  %v1283_v57 = vmul.f32 0.2, %v8965_v42  ;;  %v1343_v40 = vsel %vm1215_vm13, %v1151_v34, %v1279_v8  ;;  %v1148_v36 = vadd.f32 %v8960_v9, %v8825_v50 }
 0x367   :  { %12853 = vst [vmem:[#allocation60_spill] sm:$0xff] %v9006_v53  ;;  %v1154_v51 = vadd.f32 %v8960_v9, %v8847_v5  ;;  %vm1210_vm3 = vcmp.ge.f32.partialorder %v1146_v19, 0.0  ;;  %v1274_v0 = vmul.f32 0.2, %v1146_v19  ;;  %vm1208_vm2 = vcmp.ge.f32.partialorder %v1144_v45, 0.0 }
 0x368   :  { %v1272_v52 = vmul.f32 0.2, %v1144_v45  ;;  %vm1214_vm4 = vcmp.ge.f32.partialorder %v1150_v25, 0.0  ;;  %v1278_v2 = vmul.f32 0.2, %v1150_v25  ;;  %v1152_v7 = vadd.f32 %v8960_v9, %v8835_v58 }
 0x369   :  { %v1156_v8 = vadd.f32 %v8960_v9, %v8831_v56  ;;  %v1158_v24 = vadd.f32 %v8960_v9, %v8843_v1  ;;  %v1338_v34 = vsel %vm1210_vm3, %v1146_v19, %v1274_v0  ;;  %vm12565_vm13 = vcmp.gt.f32.partialorder %v8945_v61, 0.0 }
 0x36a   :  { %v1160_v50 = vadd.f32 %v8960_v9, %v8853_v11  ;;  %v9040_v5 = vsel %vm12486_vm7, %v1338_v34, -1e+30  ;;  %v1336_v4 = vsel %vm1208_vm2, %v1144_v45, %v1272_v52  ;;  %v1342_v58 = vsel %vm1214_vm4, %v1150_v25, %v1278_v2 }
 0x36b   :  { %12856 = vst [vmem:[#allocation63_spill] sm:$0xff] %v9040_v5  ;;  %v1466_v56 = vmax.f32 %v8993_v41, %v9040_v5  ;;  %v9047_v1 = vsel %vm12484_vm9, %v1336_v4, -1e+30  ;;  %v9051_v13 = vsel %vm12485_vm10, %v1342_v58, -1e+30  ;;  %vm1212_vm3 = vcmp.ge.f32.partialorder %v1148_v36, 0.0 }
 0x36c   :  { %12857 = vst [vmem:[#allocation64_spill] sm:$0xff] %v9047_v1  ;;  %12858 = vst [vmem:[#allocation65_spill] sm:$0xff] %v9051_v13  ;;  %v1162_v11 = vadd.f32 %v8960_v9, %v8839_v62  ;;  %v1463_v45 = vmax.f32 %v9002_v32, %v9047_v1  ;;  %v1276_v14 = vmul.f32 0.2, %v1148_v36  ;;  %vm1218_vm2 = vcmp.ge.f32.partialorder %v1154_v51, 0.0 }
 0x36d   :  { %1467 = vmax.xlane.f32.xlu0 %v1466_v56  ;;  %v1472_v19 = vmax.f32 %v9006_v53, %v9051_v13  ;;  %v1282_v25 = vmul.f32 0.2, %v1154_v51  ;;  %vm1216_vm9 = vcmp.ge.f32.partialorder %v1152_v7, 0.0  ;;  %v1280_v0 = vmul.f32 0.2, %v1152_v7 }
 0x36e   :  { %vm12561_vm10 = vcmp.gt.f32.partialorder %v8949_v63, 0.0  ;;  %1464 = vmax.xlane.f32.xlu1 %v1463_v45  ;;  %v1340_v52 = vsel %vm1212_vm3, %v1148_v36, %v1276_v14  ;;  %vm1222_vm7 = vcmp.ge.f32.partialorder %v1158_v24, 0.0  ;;  %v1286_v62 = vmul.f32 0.2, %v1158_v24  ;;  %v12886_v63 = vld [vmem:[#allocation20_spill] sm:$0xff] }
 0x36f   :  { %v1284_v2 = vmul.f32 0.2, %v1156_v8  ;;  %v9064_v34 = vsel %vm12570_vm15, %v1340_v52, -1e+30  ;;  %v1346_v4 = vsel %vm1218_vm2, %v1154_v51, %v1282_v25  ;;  %v1344_v58 = vsel %vm1216_vm9, %v1152_v7, %v1280_v0 }
 0x370   :  { %12859 = vst [vmem:[#allocation66_spill] sm:$0xff] %v9064_v34  ;;  %vm1220_vm4 = vcmp.ge.f32.partialorder %v1156_v8, 0.0  ;;  %v1469_v56 = vmax.f32 %v9014_v39, %v9064_v34  ;;  %v9071_v36 = vsel %vm12568_vm5, %v1346_v4, -1e+30  ;;  %v9075_v45 = vsel %vm12563_vm6, %v1343_v40, -1e+30 }
 0x371   :  { %12860 = vst [vmem:[#allocation67_spill] sm:$0xff] %v9071_v36  ;;  %12861 = vst [vmem:[#allocation68_spill] sm:$0xff] %v9075_v45  ;;  %v9079_v14 = vsel %vm12488_vm8, %v1349_v35, -1e+30  ;;  %vm12542_vm9 = vcmp.gt.f32.partialorder %v8910_v30, 0.0  ;;  %v1166_v51 = vadd.f32 %v8960_v9, %v8855_v15  ;;  %1473 = vmax.xlane.f32.xlu0 %v1472_v19  ;;  %v1350_v25 = vsel %vm1222_vm7, %v1158_v24, %v1286_v62 }
 0x372   :  { %12862 = vst [vmem:[#allocation69_spill] sm:$0xff] %v9079_v14  ;;  %v9086_v7 = vsel %vm12567_vm11, %v1344_v58, -1e+30  ;;  %v1347_v40 = vsel %vm1219_vm12, %v8965_v42, %v1283_v57  ;;  %v1164_v35 = vadd.f32 %v8960_v9, %v8837_v60  ;;  %1470 = vmax.xlane.f32.xlu1 %v1469_v56  ;;  %v1348_v0 = vsel %vm1220_vm4, %v1156_v8, %v1284_v2 }
 0x373   :  { %12863 = vst [vmem:[#allocation70_spill] sm:$0xff] %v9086_v7  ;;  %vm1226_vm3 = vcmp.ge.f32.partialorder %v1162_v11, 0.0  ;;  %v1290_v52 = vmul.f32 0.2, %v1162_v11  ;;  %v1478_v15 = vmax.f32 %v9018_v6, %v9071_v36  ;;  %v1289_v19 = vmul.f32 0.2, %v8977_v49 }
 0x374   :  { %vm1224_vm2 = vcmp.ge.f32.partialorder %v1160_v50, 0.0  ;;  %v1288_v4 = vmul.f32 0.2, %v1160_v50  ;;  %v1475_v24 = vmax.f32 %v9075_v45, %v9086_v7  ;;  %v9101_v42 = vsel %vm12565_vm13, %v1350_v25, -1e+30 }
 0x375   :  { %12864 = vst [vmem:[#allocation71_spill] sm:$0xff] %v9101_v42  ;;  %v9105_v60 = vsel %vm12489_vm14, %v1347_v40, -1e+30  ;;  %v1287_v57 = vmul.f32 0.2, %v8973_v20  ;;  %1479 = vmax.xlane.f32.xlu0 %v1478_v15  ;;  %vm12866_vm7 = vcmp.gt.f32.partialorder %v8947_v48, 0.0  ;;  %v1354_v62 = vsel %vm1226_vm3, %v1162_v11, %v1290_v52 }
 0x376   :  { %12865 = vst [vmem:[#allocation72_spill] sm:$0xff] %v9105_v60  ;;  %v9110_v8 = vsel %vm12866_vm7, %v1348_v0, -1e+30  ;;  %vm1223_vm12 = vcmp.ge.f32.partialorder %v8973_v20, 0.0  ;;  %v1294_v2 = vmul.f32 0.2, %v1166_v51  ;;  %1476 = vmax.xlane.f32.xlu1 %v1475_v24  ;;  %v1352_v58 = vsel %vm1224_vm2, %v1160_v50, %v1288_v4 }
 0x377   :  { %12867 = vst [vmem:[#allocation73_spill] sm:$0xff] %v9110_v8  ;;  %vm1229_vm4 = vcmp.ge.f32.partialorder %v8998_v54, 0.0  ;;  %vm1230_vm8 = vcmp.ge.f32.partialorder %v1166_v51, 0.0  ;;  %v1292_v56 = vmul.f32 0.2, %v1164_v35  ;;  %v1484_v25 = vmax.f32 %v9079_v14, %v9101_v42  ;;  %v12912_v42 = vld [vmem:[#allocation25_spill] sm:$0xff] }
 0x378   :  { %vm12868_vm14 = vcmp.ge.f32.partialorder %v8977_v49, 0.0  ;;  %v1293_v0 = vmul.f32 0.2, %v8998_v54  ;;  %vm1228_vm7 = vcmp.ge.f32.partialorder %v1164_v35, 0.0  ;;  %v1481_v11 = vmax.f32 %v9105_v60, %v9110_v8  ;;  %v12911_v60 = vld [vmem:[#allocation19_spill] sm:$0xff] }
 0x379   :  { %v1353_v40 = vsel %vm12868_vm14, %v8977_v49, %v1289_v19  ;;  %v9124_v50 = vsel %vm12561_vm10, %v1354_v62, -1e+30  ;;  %v1351_v52 = vsel %vm1223_vm12, %v8973_v20, %v1287_v57  ;;  %v1291_v15 = vmul.f32 0.2, %v8985_v27  ;;  %1485 = vmax.xlane.f32.xlu0 %v1484_v25 }
 0x37a   :  { %12869 = vst [vmem:[#allocation74_spill] sm:$0xff] %v9124_v50  ;;  %v9130_v4 = vsel %vm12557_vm0, %v1352_v58, -1e+30  ;;  %vm12555_vm14 = vcmp.gt.f32.partialorder %v8955_v3, 0.0  ;;  %v1358_v49 = vsel %vm1230_vm8, %v1166_v51, %v1294_v2  ;;  %vm1227_vm3 = vcmp.ge.f32.partialorder %v8985_v27, 0.0  ;;  %1482 = vmax.xlane.f32.xlu1 %v1481_v11  ;;  %v104_v11 = vld [vmem:[#allocation5 + $0x60] sm:$0xff] }
 0x37b   :  { %12870 = vst [vmem:[#allocation75_spill] sm:$0xff] %v9130_v4  ;;  %v9136_v19 = vsel %vm12560_vm1, %v1353_v40, -1e+30  ;;  %vm12533_vm2 = vcmp.gt.f32.partialorder %v8969_v16, 0.0  ;;  %v1356_v20 = vsel %vm1228_vm7, %v1164_v35, %v1292_v56  ;;  %v9143_v57 = vsel %vm12542_vm9, %v1351_v52, -1e+30 }
 0x37c   :  { %12871 = vst [vmem:[#allocation76_spill] sm:$0xff] %v9136_v19  ;;  %v1490_v24 = vmax.f32 %v9136_v19, %v9124_v50  ;;  %12872 = vst [vmem:[#allocation77_spill] sm:$0xff] %v9143_v57  ;;  %vm12534_vm12 = vcmp.gt.f32.partialorder %v8912_v31, 0.0  ;;  %v1357_v51 = vsel %vm1229_vm4, %v8998_v54, %v1293_v0  ;;  %v1487_v62 = vmax.f32 %v9143_v57, %v9130_v4  ;;  %v12877_v40 = vld [vmem:[#allocation12_spill] sm:$0xff]  ;;  %v105_v0 = vld [vmem:[#allocation5 + $0x68] sm:$0xff] }
 0x37d   :  { %v9153_v2 = vsel %vm12555_vm14, %v1358_v49, -1e+30  ;;  %vm12532_vm8 = vcmp.gt.f32.partialorder %v8923_v38, 0.0  ;;  %v1355_v35 = vsel %vm1227_vm3, %v8985_v27, %v1291_v15  ;;  %v9159_v58 = vsel %vm12533_vm2, %v1356_v20, -1e+30  ;;  %v106_v52 = vld [vmem:[#allocation5 + $0x70] sm:$0xff] }
 0x37e   :  { %12873 = vst [vmem:[#allocation78_spill] sm:$0xff] %v9153_v2  ;;  %1491 = vmax.xlane.f32.xlu0 %v1490_v24  ;;  %12874 = vst [vmem:[#allocation79_spill] sm:$0xff] %v9159_v58  ;;  %1488 = vmax.xlane.f32.xlu1 %v1487_v62  ;;  %v9163_v54 = vsel %vm12534_vm12, %v1357_v51, -1e+30  ;;  %v9169_v25 = vsel %vm12532_vm8, %v1355_v35, -1e+30  ;;  %v9175_v20 = vunpack.c.l.bf16 %v105_v0  ;;  %v9177_v3 = vunpack.c.l.bf16 %v104_v11 }
 0x37f   :  { %12875 = vst [vmem:[#allocation80_spill] sm:$0xff] %v9163_v54  ;;  %v1496_v56 = vmax.f32 %v9163_v54, %v9153_v2  ;;  %12876 = vst [vmem:[#allocation81_spill] sm:$0xff] %v9169_v25  ;;  %v1493_v27 = vmax.f32 %v9169_v25, %v9159_v58  ;;  %v107_v15 = vld [vmem:[#allocation5 + $0x78] sm:$0xff]  ;;  %v108_v49 = vld [vmem:[#allocation5 + $0x80] sm:$0xff]  ;;  %v1169_v29 = vadd.f32 %v8890_v10, %v12886_v63  ;;  %v9200_v26 = vunpack.c.h.bf16 %v105_v0 }
 0x380   :  { %12878 = vst [vmem:[#allocation12_spill] sm:$0xff] %v9175_v20  ;;  %v109_v24 = vld [vmem:[#allocation5 + $0x88] sm:$0xff]  ;;  %v110_v51 = vld [vmem:[#allocation5 + $0x90] sm:$0xff]  ;;  %v111_v62 = vld [vmem:[#allocation5 + $0x98] sm:$0xff]  ;;  %vm12577_vm4 = vcmp.gt.f32.partialorder %v9175_v20, 0.0  ;;  %v9202_v55 = vunpack.c.h.bf16 %v104_v11  ;;  %v9204_v23 = vunpack.c.h.bf16 %v106_v52  ;;  %v9208_v25 = vunpack.c.h.bf16 %v107_v15 }
 0x381   :  { %v112_v35 = vld [vmem:[#allocation5 + $0xa0] sm:$0xff]  ;;  %v113_v16 = vld [vmem:[#allocation5 + $0xa8] sm:$0xff]  ;;  %v114_v38 = vld [vmem:[#allocation5 + $0xb0] sm:$0xff]  ;;  %12879 = vst [vmem:[#allocation82_spill] sm:$0xff] %v9177_v3  ;;  %v9185_v31 = vunpack.c.l.bf16 %v109_v24  ;;  %v9187_v33 = vunpack.c.l.bf16 %v110_v51  ;;  %v9189_v30 = vunpack.c.l.bf16 %v111_v62  ;;  %v9210_v59 = vunpack.c.h.bf16 %v108_v49 }
 0x382   :  { %1497 = vmax.xlane.f32.xlu0 %v1496_v56  ;;  %1494 = vmax.xlane.f32.xlu1 %v1493_v27  ;;  %v9179_v56 = vunpack.c.l.bf16 %v106_v52  ;;  %v115_v27 = vld [vmem:[#allocation5 + $0xb8] sm:$0xff]  ;;  %v9194_v48 = vunpack.c.l.bf16 %v112_v35  ;;  %v9196_v28 = vunpack.c.l.bf16 %v113_v16  ;;  %v9198_v61 = vunpack.c.l.bf16 %v114_v38  ;;  %12890 = vst [vmem:[#allocation91_spill] sm:$0xff] %v9200_v26  ;;  %12891 = vst [vmem:[#allocation92_spill] sm:$0xff] %v9202_v55  ;;  %v12898_v54 = vld [vmem:[#allocation14_spill] sm:$0xff] }
 0x383   :  { %12883 = vst [vmem:[#allocation86_spill] sm:$0xff] %v9185_v31  ;;  %12884 = vst [vmem:[#allocation87_spill] sm:$0xff] %v9187_v33  ;;  %v9206_v58 = vunpack.c.l.bf16 %v115_v27  ;;  %v9212_v22 = vunpack.c.h.bf16 %v109_v24  ;;  %v9214_v2 = vunpack.c.h.bf16 %v110_v51  ;;  %v1167_v4 = vadd.f32 %v8890_v10, %v12898_v54  ;;  %v12902_v52 = vld [vmem:[#allocation13_spill] sm:$0xff]  ;;  %v12905_v51 = vld [vmem:[#allocation18_spill] sm:$0xff] }
 0x384   :  { %12880 = vst [vmem:[#allocation83_spill] sm:$0xff] %v9179_v56  ;;  %12885 = vst [vmem:[#allocation88_spill] sm:$0xff] %v9189_v30  ;;  %v9218_v57 = vunpack.c.h.bf16 %v111_v62  ;;  %v9220_v0 = vunpack.c.h.bf16 %v112_v35  ;;  %v9222_v11 = vunpack.c.h.bf16 %v113_v16  ;;  %v1171_v44 = vadd.f32 %v8890_v10, %v12902_v52  ;;  %v12907_v50 = vld [vmem:[#allocation24_spill] sm:$0xff]  ;;  %v12908_v19 = vld [vmem:[#allocation15_spill] sm:$0xff] }
 0x385   :  { %12887 = vst [vmem:[#allocation20_spill] sm:$0xff] %v9194_v48  ;;  %12888 = vst [vmem:[#allocation89_spill] sm:$0xff] %v9196_v28  ;;  %vm12585_vm7 = vcmp.gt.f32.partialorder %v9177_v3, 0.0  ;;  %vm12581_vm3 = vcmp.gt.f32.partialorder %v9179_v56, 0.0  ;;  %v9230_v24 = vunpack.c.h.bf16 %v115_v27  ;;  %v1173_v62 = vadd.f32 %v8890_v10, %v12905_v51 }
 0x386   :  { %12889 = vst [vmem:[#allocation90_spill] sm:$0xff] %v9198_v61  ;;  %12892 = vst [vmem:[#allocation93_spill] sm:$0xff] %v9204_v23  ;;  %v1175_v35 = vadd.f32 %v8890_v10, %v12906_v21  ;;  %v1170_v16 = vadd.f32 %v8960_v9, %v12886_v63  ;;  %vm12587_vm8 = vcmp.gt.f32.partialorder %v9200_v26, 0.0  ;;  %vm1233_vm2 = vcmp.ge.f32.partialorder %v1169_v29, 0.0  ;;  %v12910_v63 = vld [vmem:[#allocation26_spill] sm:$0xff]  ;;  %v12949_v26 = vld [vmem:[#allocation61_spill] sm:$0xff] }
 0x387   :  { %12893 = vst [vmem:[#allocation94_spill] sm:$0xff] %v9206_v58  ;;  %12894 = vst [vmem:[#allocation95_spill] sm:$0xff] %v9208_v25  ;;  %v9244_v27 = vadd.f32 %v8890_v10, %v12908_v19  ;;  %v1168_v8 = vadd.f32 %v8960_v9, %v12898_v54  ;;  %vm12584_vm9 = vcmp.gt.f32.partialorder %v9202_v55, 0.0  ;;  %v9255_v43 = vadd.f32 %v8890_v10, %v12910_v63 }
 0x388   :  { %12895 = vst [vmem:[#allocation96_spill] sm:$0xff] %v9210_v59  ;;  %12896 = vst [vmem:[#allocation97_spill] sm:$0xff] %v9212_v22  ;;  %v9259_v17 = vadd.f32 %v8890_v10, %v12911_v60  ;;  %v9263_v37 = vadd.f32 %v8890_v10, %v12912_v42  ;;  %v1295_v14 = vmul.f32 0.2, %v1167_v4  ;;  %v9267_v7 = vadd.f32 %v8890_v10, %v12913_v12 }
 0x389   :  { %12897 = vst [vmem:[#allocation98_spill] sm:$0xff] %v9214_v2  ;;  %12899 = vst [vmem:[#allocation14_spill] sm:$0xff] %v9218_v57  ;;  %vm1231_vm14 = vcmp.ge.f32.partialorder %v1167_v4, 0.0  ;;  %v1299_v45 = vmul.f32 0.2, %v1171_v44  ;;  %v1172_v36 = vadd.f32 %v8960_v9, %v12902_v52  ;;  %vm1235_vm10 = vcmp.ge.f32.partialorder %v1171_v44, 0.0 }
 0x38a   :  { %12900 = vst [vmem:[#allocation99_spill] sm:$0xff] %v9220_v0  ;;  %12901 = vst [vmem:[#allocation100_spill] sm:$0xff] %v9222_v11  ;;  %v1298_v6 = vmul.f32 0.2, %v1170_v16  ;;  %v1301_v34 = vmul.f32 0.2, %v1173_v62  ;;  %v1174_v39 = vadd.f32 %v8960_v9, %v12905_v51  ;;  %v1359_v52 = vsel %vm1231_vm14, %v1167_v4, %v1295_v14 }
 0x38b   :  { %12904 = vst [vmem:[#allocation101_spill] sm:$0xff] %v9230_v24  ;;  %vm12583_vm6 = vcmp.gt.f32.partialorder %v9185_v31, 0.0  ;;  %vm1234_vm13 = vcmp.ge.f32.partialorder %v1170_v16, 0.0  ;;  %v1296_v13 = vmul.f32 0.2, %v1168_v8  ;;  %vm1237_vm11 = vcmp.ge.f32.partialorder %v1173_v62, 0.0 }
 0x38c   :  { %vm1232_vm5 = vcmp.ge.f32.partialorder %v1168_v8, 0.0  ;;  %v1363_v53 = vsel %vm1235_vm10, %v1171_v44, %v1299_v45  ;;  %vm1239_vm15 = vcmp.ge.f32.partialorder %v1175_v35, 0.0  ;;  %v1176_v51 = vadd.f32 %v8960_v9, %v12906_v21 }
 0x38d   :  { %v1362_v32 = vsel %vm1234_vm13, %v1170_v16, %v1298_v6  ;;  %v1300_v5 = vmul.f32 0.2, %v1172_v36  ;;  %v1365_v41 = vsel %vm1237_vm11, %v1173_v62, %v1301_v34  ;;  %v1360_v20 = vsel %vm1232_vm5, %v1168_v8, %v1296_v13 }
 0x38e   :  { %vm223_vm14 = vcmp.gt.f32.partialorder %v9212_v22, 0.0  ;;  %v9290_v44 = vsel %vm12585_vm7, %v1359_v52, -1e+30  ;;  %v9294_v21 = vsel %vm12581_vm3, %v1363_v53, -1e+30  ;;  %vm1238_vm10 = vcmp.ge.f32.partialorder %v1174_v39, 0.0 }
 0x38f   :  { %v9299_v34 = vsel %vm12587_vm8, %v1362_v32, -1e+30  ;;  %vm1243_vm5 = vcmp.ge.f32.partialorder %v9244_v27, 0.0  ;;  %v1180_v14 = vadd.f32 %v8960_v9, %v12908_v19  ;;  %v9311_v53 = vsel %vm12584_vm9, %v1360_v20, -1e+30 }
 0x390   :  { %vm225_vm11 = vcmp.gt.f32.partialorder %v9214_v2, 0.0  ;;  %vm227_vm13 = vcmp.gt.f32.partialorder %v9218_v57, 0.0  ;;  %vm1245_vm3 = vcmp.ge.f32.partialorder %v9248_v18, 0.0  ;;  %v1186_v16 = vadd.f32 %v8960_v9, %v12911_v60 }
 0x391   :  { %vm12643_vm9 = vcmp.gt.f32.partialorder %v9222_v11, 0.0 }
 0x392   :  { %vm1250_vm8 = vcmp.ge.f32.partialorder %v1186_v16, 0.0 }
 0x393   :  { %1132 = vperm.xlu1 %7828, %v8804_v47   ;;  %v9181_v47 = vunpack.c.l.bf16 %v107_v15  ;;  %v1297_v15 = vmul.f32 0.2, %v1169_v29 }
 0x395   :  { %12881 = vst [vmem:[#allocation84_spill] sm:$0xff] %v9181_v47  ;;  %vm12580_vm12 = vcmp.gt.f32.partialorder %v9181_v47, 0.0  ;;  %v1361_v54 = vsel %vm1233_vm2, %v1169_v29, %v1297_v15  ;;  %v1303_v15 = vmul.f32 0.2, %v1175_v35  ;;  %vm12586_vm2 = vcmp.gt.f32.partialorder %v9210_v59, 0.0 }
 0x396   :  { %v9279_v29 = vsel %vm12577_vm4, %v1361_v54, -1e+30  ;;  %v1178_v54 = vadd.f32 %v8960_v9, %v12907_v50  ;;  %vm1236_vm4 = vcmp.ge.f32.partialorder %v1172_v36, 0.0  ;;  %v9303_v13 = vsel %vm12580_vm12, %v1365_v41, -1e+30 }
 0x397   :  { %v1367_v6 = vsel %vm1239_vm15, %v1175_v35, %v1303_v15  ;;  %v1364_v8 = vsel %vm1236_vm4, %v1172_v36, %v1300_v5  ;;  %vm224_vm15 = vcmp.gt.f32.partialorder %v9187_v33, 0.0  ;;  %v1182_v41 = vadd.f32 %v8960_v9, %v12909_v46  ;;  %v12939_v33 = vld [vmem:[#allocation27_spill] sm:$0xff] }
 0x398   :  { %1128 = vperm.xlu0 %7829, %v12877_v40   ;;  %v9183_v40 = vunpack.c.l.bf16 %v108_v49  ;;  %v9228_v49 = vunpack.c.h.bf16 %v114_v38  ;;  %v1177_v38 = vadd.f32 %v8890_v10, %v12907_v50  ;;  %v1302_v10 = vmul.f32 0.2, %v1174_v39 }
 0x399   :  { %v1304_v50 = vmul.f32 0.2, %v1176_v51  ;;  %v1502_v4 = vmax.f32 %v9279_v29, %v9299_v34  ;;  %vm1242_vm4 = vcmp.ge.f32.partialorder %v1178_v54, 0.0  ;;  %v1307_v5 = vmul.f32 0.2, %v9244_v27 }
 0x39a   :  { %12882 = vst [vmem:[#allocation85_spill] sm:$0xff] %v9183_v40  ;;  %12903 = vst [vmem:[#allocation13_spill] sm:$0xff] %v9228_v49  ;;  %vm12582_vm0 = vcmp.gt.f32.partialorder %v9183_v40, 0.0  ;;  %vm1241_vm1 = vcmp.ge.f32.partialorder %v1177_v38, 0.0  ;;  %v1305_v1 = vmul.f32 0.2, %v1177_v38  ;;  %v1366_v32 = vsel %vm1238_vm10, %v1174_v39, %v1302_v10 }
 0x39b   :  { %v9322_v19 = vsel %vm12582_vm0, %v1367_v6, -1e+30  ;;  %v1499_v36 = vmax.f32 %v9290_v44, %v9311_v53  ;;  %vm12914_vm12 = vcmp.gt.f32.partialorder %v9204_v23, 0.0  ;;  %vm12645_vm10 = vcmp.gt.f32.partialorder %v9189_v30, 0.0  ;;  %v12944_v23 = vld [vmem:[#allocation63_spill] sm:$0xff] }
 0x39c   :  { %v1369_v45 = vsel %vm1241_vm1, %v1177_v38, %v1305_v1  ;;  %vm1240_vm1 = vcmp.ge.f32.partialorder %v1176_v51, 0.0  ;;  %v1306_v1 = vmul.f32 0.2, %v1178_v54  ;;  %v9329_v46 = vsel %vm12914_vm12, %v1364_v8, -1e+30 }
 0x39d   :  { %v9333_v10 = vsel %vm12583_vm6, %v1369_v45, -1e+30  ;;  %v1184_v39 = vadd.f32 %v8960_v9, %v12910_v63  ;;  %vm12915_vm0 = vcmp.gt.f32.partialorder %v9208_v25, 0.0  ;;  %v1368_v62 = vsel %vm1240_vm1, %v1176_v51, %v1304_v50  ;;  %v12943_v25 = vld [vmem:[#allocation58_spill] sm:$0xff] }
 0x39e   :  { %v9341_v20 = vsel %vm12915_vm0, %v1366_v32, -1e+30  ;;  %v1308_v35 = vmul.f32 0.2, %v1180_v14  ;;  %vm12717_vm12 = vcmp.gt.f32.partialorder %v9220_v0, 0.0  ;;  %v1370_v38 = vsel %vm1242_vm4, %v1178_v54, %v1306_v1  ;;  %v12936_v0 = vld [vmem:[#allocation21_spill] sm:$0xff] }
 0x39f   :  { %vm1244_vm6 = vcmp.ge.f32.partialorder %v1180_v14, 0.0  ;;  %v1310_v52 = vmul.f32 0.2, %v1182_v41  ;;  %v1505_v63 = vmax.f32 %v9294_v21, %v9329_v46  ;;  %vm1246_vm7 = vcmp.ge.f32.partialorder %v1182_v41, 0.0 }
 0x3a0   :  { %v1309_v15 = vmul.f32 0.2, %v9248_v18  ;;  %vm12644_vm0 = vcmp.gt.f32.partialorder %v9194_v48, 0.0  ;;  %vm1247_vm1 = vcmp.ge.f32.partialorder %v9255_v43, 0.0  ;;  %v1508_v51 = vmax.f32 %v9303_v13, %v9341_v20 }
 0x3a1   :  { %v9356_v60 = vsel %vm12586_vm2, %v1368_v62, -1e+30  ;;  %v1371_v54 = vsel %vm1243_vm5, %v9244_v27, %v1307_v5  ;;  %v1311_v6 = vmul.f32 0.2, %v9255_v43  ;;  %vm12641_vm4 = vcmp.gt.f32.partialorder %v9196_v28, 0.0 }
 0x3a2   :  { %v1188_v45 = vadd.f32 %v8960_v9, %v12912_v42  ;;  %v9367_v8 = vsel %vm223_vm14, %v1370_v38, -1e+30  ;;  %v1372_v50 = vsel %vm1244_vm6, %v1180_v14, %v1308_v35  ;;  %v1312_v32 = vmul.f32 0.2, %v1184_v39 }
 0x3a3   :  { %v1190_v1 = vadd.f32 %v8960_v9, %v12913_v12  ;;  %v1374_v27 = vsel %vm1246_vm7, %v1182_v41, %v1310_v52  ;;  %vm1248_vm5 = vcmp.ge.f32.partialorder %v1184_v39, 0.0  ;;  %v1511_v5 = vmax.f32 %v9322_v19, %v9356_v60 }
 0x3a4   :  { %vm1249_vm2 = vcmp.ge.f32.partialorder %v9259_v17, 0.0  ;;  %v1313_v42 = vmul.f32 0.2, %v9259_v17  ;;  %v1514_v14 = vmax.f32 %v9333_v10, %v9367_v8  ;;  %v9385_v12 = vsel %vm225_vm11, %v1372_v50, -1e+30 }
 0x3a5   :  { %v1373_v41 = vsel %vm1245_vm3, %v9248_v18, %v1309_v15  ;;  %v9392_v62 = vsel %vm227_vm13, %v1374_v27, -1e+30  ;;  %v1376_v35 = vsel %vm1248_vm5, %v1184_v39, %v1312_v32  ;;  %vm1251_vm6 = vcmp.ge.f32.partialorder %v9263_v37, 0.0 }
 0x3a6   :  { %v1316_v38 = vmul.f32 0.2, %v1188_v45  ;;  %vm1252_vm7 = vcmp.ge.f32.partialorder %v1188_v45, 0.0  ;;  %v9400_v18 = vsel %vm12645_vm10, %v1373_v41, -1e+30  ;;  %v1375_v39 = vsel %vm1247_vm1, %v9255_v43, %v1311_v6 }
 0x3a7   :  { %vm1254_vm3 = vcmp.ge.f32.partialorder %v1190_v1, 0.0  ;;  %v1520_v15 = vmax.f32 %v9400_v18, %v9392_v62  ;;  %v1377_v50 = vsel %vm1249_vm2, %v9259_v17, %v1313_v42  ;;  %v1317_v32 = vmul.f32 0.2, %v9267_v7 }
 0x3a8   :  { %v1380_v43 = vsel %vm1252_vm7, %v1188_v45, %v1316_v38  ;;  %vm1253_vm1 = vcmp.ge.f32.partialorder %v9267_v7, 0.0  ;;  %v9423_v6 = vsel %vm12644_vm0, %v1375_v39, -1e+30  ;;  %vm12617_vm5 = vcmp.gt.f32.partialorder %v9230_v24, 0.0  ;;  %v119_v39 = vld [vmem:[#allocation5 + $0xd8] sm:$0xff] }
 0x3a9   :  { %12918 = vst [vmem:[#allocation24_spill] sm:$0xff] %v9423_v6  ;;  %vm12630_vm2 = vcmp.gt.f32.partialorder %v9198_v61, 0.0  ;;  %vm12614_vm7 = vcmp.gt.f32.partialorder %v9206_v58, 0.0  ;;  %v9475_v24 = vunpack.c.l.bf16 %v119_v39  ;;  %v12932_v58 = vld [vmem:[#allocation31_spill] sm:$0xff]  ;;  %v9489_v2 = vunpack.c.h.bf16 %v119_v39 }
 0x3ab   :  { %12938 = vst [vmem:[#allocation103_spill] sm:$0xff] %v9489_v2 }
 0x3b7   :  { %1503 = vmax.xlane.f32.xlu0 %v1502_v4  ;;  %1500 = vmax.xlane.f32.xlu1 %v1499_v36  ;;  %v1314_v4 = vmul.f32 0.2, %v1186_v16  ;;  %v9381_v36 = vsel %vm224_vm15, %v1371_v54, -1e+30 }
 0x3b8   :  { %v1517_v54 = vmax.f32 %v9381_v36, %v9385_v12 }
 0x3b9   :  { %v1378_v52 = vsel %vm1250_vm8, %v1186_v16, %v1314_v4  ;;  %v9409_v16 = vsel %vm12717_vm12, %v1376_v35, -1e+30  ;;  %vm12642_vm8 = vcmp.gt.f32.partialorder %v9228_v49, 0.0 }
 0x3ba   :  { %12916 = vst [vmem:[#allocation18_spill] sm:$0xff] %v9409_v16  ;;  %v9417_v27 = vsel %vm12643_vm9, %v1378_v52, -1e+30  ;;  %v1523_v4 = vmax.f32 %v9423_v6, %v9409_v16  ;;  %v117_v52 = vld [vmem:[#allocation5 + $0xc8] sm:$0xff]  ;;  %v12950_v6 = vld [vmem:[#allocation66_spill] sm:$0xff] }
 0x3bb   :  { %1506 = vmax.xlane.f32.xlu0 %v1505_v63  ;;  %1509 = vmax.xlane.f32.xlu1 %v1508_v51  ;;  %v1315_v63 = vmul.f32 0.2, %v9263_v37  ;;  %v1318_v51 = vmul.f32 0.2, %v1190_v1  ;;  %12917 = vst [vmem:[#allocation16_spill] sm:$0xff] %v9417_v27  ;;  %v9479_v61 = vunpack.c.h.bf16 %v117_v52 }
 0x3bd   :  { %v1382_v17 = vsel %vm1254_vm3, %v1190_v1, %v1318_v51  ;;  %v1379_v45 = vsel %vm1251_vm6, %v9263_v37, %v1315_v63  ;;  %v1381_v1 = vsel %vm1253_vm1, %v9267_v7, %v1317_v32  ;;  %v121_v63 = vld [vmem:[#allocation5 + $0xe8] sm:$0xff]  ;;  %v9460_v51 = vunpack.c.l.bf16 %v117_v52 }
 0x3be   :  { %v9446_v41 = vsel %vm12617_vm5, %v1382_v17, -1e+30  ;;  %v9450_v37 = vsel %vm12630_vm2, %v1379_v45, -1e+30  ;;  %v9456_v38 = vsel %vm12614_vm7, %v1381_v1, -1e+30  ;;  %v9464_v17 = vunpack.c.l.bf16 %v121_v63 }
 0x3bf   :  { %1512 = vmax.xlane.f32.xlu0 %v1511_v5  ;;  %1515 = vmax.xlane.f32.xlu1 %v1514_v14  ;;  %v9430_v5 = vsel %vm12641_vm4, %v1377_v50, -1e+30  ;;  %v9440_v14 = vsel %vm12642_vm8, %v1380_v43, -1e+30  ;;  %12921 = vst [vmem:[#allocation26_spill] sm:$0xff] %v9446_v41  ;;  %12922 = vst [vmem:[#allocation19_spill] sm:$0xff] %v9450_v37  ;;  %v1532_v7 = vmax.f32 %v9456_v38, %v9446_v41  ;;  %v9497_v31 = vunpack.c.h.bf16 %v121_v63 }
 0x3c0   :  { %12919 = vst [vmem:[#allocation15_spill] sm:$0xff] %v9430_v5  ;;  %v1526_v42 = vmax.f32 %v9430_v5, %v9417_v27  ;;  %12920 = vst [vmem:[#allocation23_spill] sm:$0xff] %v9440_v14  ;;  %v1529_v35 = vmax.f32 %v9450_v37, %v9440_v14  ;;  %v12926_v50 = vld [vmem:[#allocation32_spill] sm:$0xff]  ;;  %v118_v43 = vld [vmem:[#allocation5 + $0xd0] sm:$0xff]  ;;  %vm12652_vm6 = vcmp.gt.f32.partialorder %v9460_v51, 0.0  ;;  %vm12650_vm3 = vcmp.gt.f32.partialorder %v9464_v17, 0.0 }
 0x3c1   :  { %12923 = vst [vmem:[#allocation25_spill] sm:$0xff] %v9456_v38  ;;  %12924 = vst [vmem:[#allocation17_spill] sm:$0xff] %v9460_v51  ;;  %v1191_v49 = vadd.f32 %v12926_v50, %v12932_v58  ;;  %v9481_v11 = vunpack.c.l.bf16 %v118_v43  ;;  %v1197_v48 = vadd.f32 %v12926_v50, %v12936_v0  ;;  %v1195_v22 = vadd.f32 %v12926_v50, %v12939_v33  ;;  %v12945_v14 = vld [vmem:[#allocation59_spill] sm:$0xff]  ;;  %v12946_v37 = vld [vmem:[#allocation64_spill] sm:$0xff] }
 0x3c2   :  { %v9495_v52 = vunpack.c.h.bf16 %v118_v43  ;;  %12941 = vst [vmem:[#allocation104_spill] sm:$0xff] %v9497_v31  ;;  %vm12653_vm4 = vcmp.gt.f32.partialorder %v9475_v24, 0.0 }
 0x3c3   :  { %1518 = vmax.xlane.f32.xlu0 %v1517_v54  ;;  %1521 = vmax.xlane.f32.xlu1 %v1520_v15  ;;  %v116_v54 = vld [vmem:[#allocation5 + $0xc0] sm:$0xff]  ;;  %v12925_v15 = vld [vmem:[#allocation22_spill] sm:$0xff]  ;;  %12934 = vst [vmem:[#allocation31_spill] sm:$0xff] %v9481_v11  ;;  %vm1255_vm2 = vcmp.ge.f32.partialorder %v1191_v49, 0.0  ;;  %v1319_v56 = vmul.f32 0.2, %v1191_v49 }
 0x3c4   :  { %v1193_v32 = vadd.f32 %v12926_v50, %v12925_v15  ;;  %12927 = vst [vmem:[#allocation22_spill] sm:$0xff] %v9464_v17  ;;  %v9466_v45 = vunpack.c.l.bf16 %v116_v54  ;;  %v9487_v30 = vunpack.c.h.bf16 %v116_v54  ;;  %12940 = vst [vmem:[#allocation27_spill] sm:$0xff] %v9495_v52  ;;  %v1325_v3 = vmul.f32 0.2, %v1197_v48 }
 0x3c5   :  { %vm1261_vm8 = vcmp.ge.f32.partialorder %v1197_v48, 0.0  ;;  %vm12654_vm9 = vcmp.gt.f32.partialorder %v9481_v11, 0.0  ;;  %vm1259_vm0 = vcmp.ge.f32.partialorder %v1195_v22, 0.0 }
 0x3c6   :  { %12928 = vst [vmem:[#allocation32_spill] sm:$0xff] %v9466_v45  ;;  %v1321_v57 = vmul.f32 0.2, %v1193_v32  ;;  %12937 = vst [vmem:[#allocation21_spill] sm:$0xff] %v9487_v30  ;;  %vm1257_vm1 = vcmp.ge.f32.partialorder %v1193_v32, 0.0  ;;  %vm12651_vm7 = vcmp.gt.f32.partialorder %v9466_v45, 0.0 }
 0x3c7   :  { %1524 = vmax.xlane.f32.xlu0 %v1523_v4  ;;  %1527 = vmax.xlane.f32.xlu1 %v1526_v42  ;;  %v120_v4 = vld [vmem:[#allocation5 + $0xe0] sm:$0xff] }
 0x3c8   :  { %v12929_v42 = vld [vmem:[#allocation44_spill] sm:$0xff]  ;;  %v9483_v28 = vunpack.c.l.bf16 %v120_v4  ;;  %v9502_v39 = vunpack.c.h.bf16 %v120_v4  ;;  %v1385_v55 = vsel %vm1257_vm1, %v1193_v32, %v1321_v57  ;;  %v1323_v4 = vmul.f32 0.2, %v1195_v22 }
 0x3c9   :  { %v9470_v1 = vadd.f32 %v12926_v50, %v12929_v42  ;;  %12931 = vst [vmem:[#allocation44_spill] sm:$0xff] %v9475_v24  ;;  %v9517_v32 = vsel %vm12652_vm6, %v1385_v55, -1e+30  ;;  %vm12712_vm1 = vcmp.gt.f32.partialorder %v9489_v2, 0.0 }
 0x3ca   :  { %12935 = vst [vmem:[#allocation102_spill] sm:$0xff] %v9483_v28  ;;  %12942 = vst [vmem:[#allocation105_spill] sm:$0xff] %v9502_v39 }
 0x3cb   :  { %1530 = vmax.xlane.f32.xlu0 %v1529_v35  ;;  %1533 = vmax.xlane.f32.xlu1 %v1532_v7  ;;  %v12930_v35 = vld [vmem:[#allocation29_spill] sm:$0xff]  ;;  %v9500_v59 = vmul.f32 0.2, %v9470_v1  ;;  %vm1263_vm10 = vcmp.ge.f32.partialorder %v9470_v1, 0.0 }
 0x3cc   :  { %v1201_v7 = vadd.f32 %v12926_v50, %v12930_v35  ;;  %12933 = vst [vmem:[#allocation29_spill] sm:$0xff] %v9479_v61 }
 0x3ce   :  { %vm1265_vm5 = vcmp.ge.f32.partialorder %v1201_v7, 0.0  ;;  %v1329_v54 = vmul.f32 0.2, %v1201_v7 }
 0x3fa   :  { %v1468_v40 = vpop.xlane.xlu0 %1467 }
 0x3fb   :  { %v1561_v47 = vsub.f32 %v12943_v25, %v1468_v40  ;;  %v1562_v41 = vsub.f32 %v12944_v23, %v1468_v40  ;;  %v1465_v38 = vpop.xlane.xlu1 %1464 }
 0x3fc   :  { %v1559_v43 = vsub.f32 %v12945_v14, %v1465_v38  ;;  %v1560_v63 = vsub.f32 %v12946_v37, %v1465_v38  ;;  %v1393_v14 = vsel %vm1265_vm5, %v1201_v7, %v1329_v54  ;;  %v12947_v37 = vld [vmem:[#allocation60_spill] sm:$0xff]  ;;  %v12948_v38 = vld [vmem:[#allocation65_spill] sm:$0xff]  ;;  %v1194_v7 = vadd.f32 %v8960_v9, %v12925_v15 }
 0x3fd   :  { %v1627_v27 = vmul.f32 1.442695, %v1561_v47  ;;  %v1629_v5 = vmul.f32 1.442695, %v1562_v41  ;;  %vm12714_vm5 = vcmp.gt.f32.partialorder %v9479_v61, 0.0 }
 0x3fe   :  { %v1623_v23 = vmul.f32 1.442695, %v1559_v43  ;;  %v1625_v25 = vmul.f32 1.442695, %v1560_v63  ;;  %v1474_v40 = vpop.xlane.xlu0 %1473  ;;  %v1383_v63 = vsel %vm1255_vm2, %v1191_v49, %v1319_v56  ;;  %vm12713_vm2 = vcmp.gt.f32.partialorder %v9487_v30, 0.0 }
 0x3ff   :  { %7910 = vpow2.f32 %v1627_v27  ;;  %v1565_v57 = vsub.f32 %v12947_v37, %v1474_v40  ;;  %v1566_v47 = vsub.f32 %v12948_v38, %v1474_v40  ;;  %v1471_v41 = vpop.xlane.xlu1 %1470  ;;  %v1192_v40 = vadd.f32 %v8960_v9, %v12932_v58  ;;  %v12953_v58 = vld [vmem:[#allocation67_spill] sm:$0xff] }
 0x400   :  { %7912 = vpow2.f32 %v1629_v5  ;;  %v1563_v16 = vsub.f32 %v12949_v26, %v1471_v41  ;;  %v1564_v43 = vsub.f32 %v12950_v6, %v1471_v41  ;;  %v1389_v26 = vsel %vm1261_vm8, %v1197_v48, %v1325_v3  ;;  %v12951_v5 = vld [vmem:[#allocation62_spill] sm:$0xff] }
 0x401   :  { %7914 = vpow2.f32 %v1623_v23  ;;  %v1635_v27 = vmul.f32 1.442695, %v1565_v57  ;;  %v1637_v54 = vmul.f32 1.442695, %v1566_v47  ;;  %v9532_v15 = vsel %vm12650_vm3, %v1393_v14, -1e+30 }
 0x402   :  { %7916 = vpow2.f32 %v1625_v25  ;;  %v1631_v37 = vmul.f32 1.442695, %v1563_v16  ;;  %v1480_v55 = vpop.xlane.xlu0 %1479  ;;  %v1633_v6 = vmul.f32 1.442695, %v1564_v43  ;;  %12952 = vst [vmem:[#allocation58_spill] sm:$0xff] %v9532_v15  ;;  %v1387_v48 = vsel %vm1259_vm0, %v1195_v22, %v1323_v4  ;;  %v12954_v57 = vld [vmem:[#allocation68_spill] sm:$0xff] }
 0x403   :  { %7918 = vpow2.f32 %v1635_v27  ;;  %v1569_v56 = vsub.f32 %v12951_v5, %v1480_v55  ;;  %v1477_v49 = vpop.xlane.xlu1 %1476  ;;  %v1570_v23 = vsub.f32 %v12953_v58, %v1480_v55  ;;  %v9537_v16 = vsel %vm12651_vm7, %v1383_v63, -1e+30  ;;  %v12955_v22 = vld [vmem:[#allocation70_spill] sm:$0xff] }
 0x404   :  { %7920 = vpow2.f32 %v1637_v54  ;;  %v1198_v3 = vadd.f32 %v8960_v9, %v12936_v0  ;;  %v9544_v25 = vadd.f32 %v8960_v9, %v12929_v42  ;;  %v9548_v14 = vadd.f32 %v8960_v9, %v12930_v35 }
 0x405   :  { %vm1258_vm8 = vcmp.ge.f32.partialorder %v1194_v7, 0.0  ;;  %7922 = vpow2.f32 %v1631_v37  ;;  %v1567_v38 = vsub.f32 %v12954_v57, %v1477_v49  ;;  %v1322_v47 = vmul.f32 0.2, %v1194_v7 }
 0x406   :  { %v1320_v41 = vmul.f32 0.2, %v1192_v40  ;;  %7924 = vpow2.f32 %v1633_v6  ;;  %v1643_v43 = vmul.f32 1.442695, %v1569_v56  ;;  %v1568_v4 = vsub.f32 %v12955_v22, %v1477_v49  ;;  %v1486_v35 = vpop.xlane.xlu0 %1485  ;;  %v12956_v56 = vld [vmem:[#allocation33_spill] sm:$0xff] }
 0x407   :  { %v9552_v63 = vpop.xlane.xlu1 %1482  ;;  %vm1256_vm0 = vcmp.ge.f32.partialorder %v1192_v40, 0.0  ;;  %v1196_v0 = vadd.f32 %v8960_v9, %v12939_v33  ;;  %v1645_v42 = vmul.f32 1.442695, %v1570_v23  ;;  %v9559_v27 = vsel %vm12653_vm4, %v1389_v26, -1e+30  ;;  %v12957_v22 = vld [vmem:[#allocation69_spill] sm:$0xff] }
 0x408   :  { %vm12711_vm3 = vcmp.gt.f32.partialorder %v9495_v52, 0.0  ;;  %v9564_v54 = vsel %vm12654_vm9, %v1387_v48, -1e+30  ;;  %vm12685_vm7 = vcmp.gt.f32.partialorder %v9497_v31, 0.0  ;;  %v1330_v55 = vmul.f32 0.2, %v9548_v14 }
 0x409   :  { %v7911_v37 = vpop.eup %7910  ;;  %vm1262_vm6 = vcmp.ge.f32.partialorder %v1198_v3, 0.0  ;;  %v1326_v6 = vmul.f32 0.2, %v1198_v3  ;;  %v9572_v33 = vsel %vm1263_vm10, %v9470_v1, %v9500_v59  ;;  %vm1264_vm4 = vcmp.ge.f32.partialorder %v9544_v25, 0.0  ;;  %v12958_v59 = vld [vmem:[#allocation45_spill] sm:$0xff] }
 0x40a   :  { %v7913_v26 = vpop.eup %7912  ;;  %v1639_v5 = vmul.f32 1.442695, %v1567_v38  ;;  %v9576_v49 = vmul.f32 %v7911_v37, %v12956_v56  ;;  %v1386_v58 = vsel %vm1258_vm8, %v1194_v7, %v1322_v47  ;;  %v1384_v23 = vsel %vm1256_vm0, %v1192_v40, %v1320_v41  ;;  %v12959_v38 = vld [vmem:[#allocation71_spill] sm:$0xff]  ;;  %v12960_v56 = vld [vmem:[#allocation34_spill] sm:$0xff] }
 0x40b   :  { %vm12683_vm9 = vcmp.gt.f32.partialorder %v9483_v28, 0.0  ;;  %v7915_v48 = vpop.eup %7914  ;;  %7926 = vpow2.f32 %v1643_v43  ;;  %v1641_v57 = vmul.f32 1.442695, %v1568_v4  ;;  %v1573_v17 = vsub.f32 %v12957_v22, %v1486_v35  ;;  %v9586_v37 = vpop.xlane.xlu1 %1488 }
 0x40c   :  { %v9583_v1 = vmul.f32 %v7913_v26, %v12958_v59  ;;  %v7917_v11 = vpop.eup %7916  ;;  %7928 = vpow2.f32 %v1645_v42  ;;  %v1574_v24 = vsub.f32 %v12959_v38, %v1486_v35  ;;  %v9589_v7 = vmul.f32 %v7915_v48, %v12960_v56  ;;  %v12961_v42 = vld [vmem:[#allocation72_spill] sm:$0xff]  ;;  %v1492_v26 = vpop.xlane.xlu0 %1491  ;;  %v12962_v48 = vld [vmem:[#allocation47_spill] sm:$0xff] }
 0x40d   :  { %v1324_v40 = vmul.f32 0.2, %v1196_v0  ;;  %v7919_v47 = vpop.eup %7918  ;;  %vm1266_vm10 = vcmp.ge.f32.partialorder %v9548_v14, 0.0  ;;  %v9596_v43 = vsel %vm12714_vm5, %v1386_v58, -1e+30  ;;  %vm1260_vm8 = vcmp.ge.f32.partialorder %v1196_v0, 0.0 }
 0x40e   :  { %v1818_v41 = vadd.f32 %v9583_v1, %v9576_v49  ;;  %vm12684_vm0 = vcmp.gt.f32.partialorder %v9502_v39, 0.0  ;;  %v7921_v4 = vpop.eup %7920  ;;  %7930 = vpow2.f32 %v1639_v5  ;;  %v1571_v35 = vsub.f32 %v12961_v42, %v9552_v63  ;;  %v12963_v58 = vld [vmem:[#allocation73_spill] sm:$0xff] }
 0x40f   :  { %v9602_v22 = vmul.f32 %v7917_v11, %v12962_v48  ;;  %v9606_v38 = vsel %vm12713_vm2, %v1384_v23, -1e+30  ;;  %7932 = vpow2.f32 %v1641_v57  ;;  %v1651_v56 = vmul.f32 1.442695, %v1573_v17  ;;  %v7923_v5 = vpop.eup %7922  ;;  %v12964_v57 = vld [vmem:[#allocation35_spill] sm:$0xff] }
 0x410   :  { %v1572_v59 = vsub.f32 %v12963_v58, %v9552_v63  ;;  %1819 = vadd.xlane.f32.xlu1 %v1818_v41  ;;  %v1390_v45 = vsel %vm1262_vm6, %v1198_v3, %v1326_v6  ;;  %v1653_v61 = vmul.f32 1.442695, %v1574_v24  ;;  %v1388_v11 = vsel %vm1260_vm8, %v1196_v0, %v1324_v40  ;;  %v7925_v48 = vpop.eup %7924  ;;  %v12966_v3 = vld [vmem:[#allocation48_spill] sm:$0xff]  ;;  %v9627_v0 = vpop.xlane.xlu1 %1494 }
 0x411   :  { %v1815_v42 = vadd.f32 %v9602_v22, %v9589_v7  ;;  %v1394_v23 = vsel %vm1266_vm10, %v9548_v14, %v1330_v55  ;;  %v1328_v17 = vmul.f32 0.2, %v9544_v25  ;;  %v1538_v63 = vmax.f32 %v9517_v32, %v9596_v43  ;;  %v12968_v58 = vld [vmem:[#allocation76_spill] sm:$0xff] }
 0x412   :  { %v9621_v41 = vmul.f32 %v7919_v47, %v12964_v57  ;;  %v9624_v24 = vmul.f32 %v7921_v4, %v12966_v3  ;;  %v1647_v6 = vmul.f32 1.442695, %v1571_v35  ;;  %v1577_v30 = vsub.f32 %v12968_v58, %v1492_v26  ;;  %v12970_v35 = vld [vmem:[#allocation74_spill] sm:$0xff]  ;;  %v1498_v58 = vpop.xlane.xlu0 %1497  ;;  %v12971_v3 = vld [vmem:[#allocation36_spill] sm:$0xff] }
 0x413   :  { %1816 = vadd.xlane.f32.xlu0 %v1815_v42  ;;  %v1535_v14 = vmax.f32 %v9537_v16, %v9606_v38  ;;  %v9633_v55 = vsel %vm12712_vm1, %v1390_v45, -1e+30  ;;  %7934 = vpow2.f32 %v1651_v56  ;;  %v1649_v40 = vmul.f32 1.442695, %v1572_v59  ;;  %v12973_v45 = vld [vmem:[#allocation49_spill] sm:$0xff] }
 0x414   :  { %12965 = vst [vmem:[#allocation63_spill] sm:$0xff] %v9621_v41  ;;  %12967 = vst [vmem:[#allocation59_spill] sm:$0xff] %v9624_v24  ;;  %1539 = vmax.xlane.f32.xlu1 %v1538_v63  ;;  %v9637_v47 = vsel %vm12711_vm3, %v1388_v11, -1e+30  ;;  %v9641_v4 = vsel %vm12685_vm7, %v1394_v23, -1e+30  ;;  %7936 = vpow2.f32 %v1653_v61  ;;  %v1578_v42 = vsub.f32 %v12970_v35, %v1492_v26 }
 0x415   :  { %12969 = vst [vmem:[#allocation64_spill] sm:$0xff] %v9641_v4  ;;  %v9645_v57 = vmul.f32 %v7923_v5, %v12971_v3  ;;  %v9648_v2 = vmul.f32 %v7925_v48, %v12973_v45  ;;  %v7927_v56 = vpop.eup %7926  ;;  %v12975_v59 = vld [vmem:[#allocation77_spill] sm:$0xff]  ;;  %v1824_v11 = vadd.f32 %v9624_v24, %v9621_v41  ;;  %v1392_v61 = vsel %vm1264_vm4, %v9544_v25, %v1328_v17  ;;  %v12976_v23 = vld [vmem:[#allocation75_spill] sm:$0xff]  ;;  %v122_v45 = vld [vmem:[#allocation5 + $0xf0] sm:$0xff] }
 0x416   :  { %v1575_v63 = vsub.f32 %v12975_v59, %v9586_v37  ;;  %v9660_v26 = vsel %vm12683_vm9, %v9572_v33, -1e+30  ;;  %v7929_v5 = vpop.eup %7928  ;;  %7938 = vpow2.f32 %v1647_v6  ;;  %v1659_v48 = vmul.f32 1.442695, %v1577_v30  ;;  %v12977_v3 = vld [vmem:[#allocation80_spill] sm:$0xff]  ;;  %v12978_v6 = vld [vmem:[#allocation78_spill] sm:$0xff] }
 0x417   :  { %12972 = vst [vmem:[#allocation60_spill] sm:$0xff] %v9645_v57  ;;  %12974 = vst [vmem:[#allocation65_spill] sm:$0xff] %v9648_v2  ;;  %v1576_v35 = vsub.f32 %v12976_v23, %v9586_v37  ;;  %1536 = vmax.xlane.f32.xlu0 %v1535_v14  ;;  %v1544_v59 = vmax.f32 %v9559_v27, %v9633_v55  ;;  %7940 = vpow2.f32 %v1649_v40  ;;  %v1661_v30 = vmul.f32 1.442695, %v1578_v42  ;;  %v1133_v37 = vpop.permute.xlu1 %1132  ;;  %v12979_v23 = vld [vmem:[#allocation37_spill] sm:$0xff]  ;;  %v12980_v41 = vld [vmem:[#allocation50_spill] sm:$0xff] }
 0x418   :  { %v1581_v31 = vsub.f32 %v12977_v3, %v1498_v58  ;;  %1825 = vadd.xlane.f32.xlu1 %v1824_v11  ;;  %v1541_v25 = vmax.f32 %v9564_v54, %v9637_v47  ;;  %v1550_v33 = vmax.f32 %v9532_v15, %v9641_v4  ;;  %v7931_v17 = vpop.eup %7930  ;;  %v1582_v28 = vsub.f32 %v12978_v6, %v1498_v58  ;;  %v12982_v58 = vld [vmem:[#allocation81_spill] sm:$0xff] }
 0x419   :  { %v1821_v14 = vadd.f32 %v9648_v2, %v9645_v57  ;;  %v9676_v40 = vsel %vm12684_vm0, %v1392_v61, -1e+30  ;;  %v7933_v3 = vpop.eup %7932  ;;  %v1655_v11 = vmul.f32 1.442695, %v1575_v63  ;;  %v9679_v52 = vmul.f32 %v7927_v56, %v12979_v23  ;;  %v1129_v57 = vpop.permute.xlu0 %1128  ;;  %v123_v61 = vld [vmem:[#allocation5 + $0xf8] sm:$0xff] }
 0x41a   :  { %v9682_v24 = vmul.f32 %v7929_v5, %v12980_v41  ;;  %v9684_v4 = vunpack.c.l.bf16 %v122_v45  ;;  %7942 = vpow2.f32 %v1659_v48  ;;  %v1657_v42 = vmul.f32 1.442695, %v1576_v35  ;;  %v12984_v63 = vld [vmem:[#allocation79_spill] sm:$0xff]  ;;  %v12985_v35 = vld [vmem:[#allocation38_spill] sm:$0xff] }
 0x41b   :  { %v1579_v6 = vsub.f32 %v12982_v58, %v9627_v0  ;;  %1822 = vadd.xlane.f32.xlu0 %v1821_v14  ;;  %v9688_v39 = vunpack.c.h.bf16 %v122_v45  ;;  %v1667_v2 = vmul.f32 1.442695, %v1581_v31  ;;  %v1580_v56 = vsub.f32 %v12984_v63, %v9627_v0  ;;  %v12986_v58 = vld [vmem:[#allocation51_spill] sm:$0xff] }
 0x41c   :  { %12981 = vst [vmem:[#allocation61_spill] sm:$0xff] %v9684_v4  ;;  %v1205_v23 = vadd.f32 %v12926_v50, %v1133_v37  ;;  %v1206_v5 = vadd.f32 %v8960_v9, %v1133_v37  ;;  %1545 = vmax.xlane.f32.xlu1 %v1544_v59  ;;  %7944 = vpow2.f32 %v1661_v30  ;;  %v1669_v48 = vmul.f32 1.442695, %v1582_v28 }
 0x41d   :  { %12983 = vst [vmem:[#allocation66_spill] sm:$0xff] %v9688_v39  ;;  %v9695_v41 = vmul.f32 %v7931_v17, %v12985_v35  ;;  %v9698_v15 = vmul.f32 %v7933_v3, %v12986_v58  ;;  %v7935_v45 = vpop.eup %7934  ;;  %7946 = vpow2.f32 %v1655_v11  ;;  %v1203_v31 = vadd.f32 %v12926_v50, %v1129_v57 }
 0x41e   :  { %v1830_v0 = vadd.f32 %v9682_v24, %v9679_v52  ;;  %v9703_v14 = vunpack.c.l.bf16 %v123_v61  ;;  %v7937_v63 = vpop.eup %7936  ;;  %7948 = vpow2.f32 %v1657_v42  ;;  %v1663_v59 = vmul.f32 1.442695, %v1579_v6  ;;  %v12989_v6 = vld [vmem:[#allocation39_spill] sm:$0xff] }
 0x41f   :  { %v1204_v28 = vadd.f32 %v8960_v9, %v1129_v57  ;;  %1542 = vmax.xlane.f32.xlu0 %v1541_v25  ;;  %v9706_v17 = vunpack.c.h.bf16 %v123_v61  ;;  %7950 = vpow2.f32 %v1667_v2  ;;  %v1665_v30 = vmul.f32 1.442695, %v1580_v56  ;;  %v12990_v9 = vld [vmem:[#allocation52_spill] sm:$0xff] }
 0x420   :  { %12987 = vst [vmem:[#allocation62_spill] sm:$0xff] %v9703_v14  ;;  %v1333_v37 = vmul.f32 0.2, %v1205_v23  ;;  %v1334_v3 = vmul.f32 0.2, %v1206_v5  ;;  %1831 = vadd.xlane.f32.xlu1 %v1830_v0  ;;  %v7939_v11 = vpop.eup %7938  ;;  %7952 = vpow2.f32 %v1669_v48  ;;  %vm1269_vm4 = vcmp.ge.f32.partialorder %v1205_v23, 0.0 }
 0x421   :  { %12988 = vst [vmem:[#allocation67_spill] sm:$0xff] %v9706_v17  ;;  %vm1270_vm6 = vcmp.ge.f32.partialorder %v1206_v5, 0.0  ;;  %v1827_v50 = vadd.f32 %v9698_v15, %v9695_v41  ;;  %v7941_v35 = vpop.eup %7940  ;;  %v1331_v42 = vmul.f32 0.2, %v1203_v31  ;;  %v9711_v58 = vmul.f32 %v7935_v45, %v12989_v6  ;;  %v12991_v45 = vld [vmem:[#allocation40_spill] sm:$0xff]  ;;  %v12996_v6 = vld [vmem:[#allocation42_spill] sm:$0xff] }
 0x422   :  { %v9714_v57 = vmul.f32 %v7937_v63, %v12990_v9  ;;  %vm12710_vm10 = vcmp.gt.f32.partialorder %v9703_v14, 0.0  ;;  %7954 = vpow2.f32 %v1663_v59  ;;  %vm1267_vm8 = vcmp.ge.f32.partialorder %v1203_v31, 0.0  ;;  %v12992_v63 = vld [vmem:[#allocation53_spill] sm:$0xff] }
 0x423   :  { %v1332_v2 = vmul.f32 0.2, %v1204_v28  ;;  %1828 = vadd.xlane.f32.xlu0 %v1827_v50  ;;  %vm12709_vm9 = vcmp.gt.f32.partialorder %v9706_v17, 0.0  ;;  %7956 = vpow2.f32 %v1665_v30  ;;  %vm1268_vm0 = vcmp.ge.f32.partialorder %v1204_v28, 0.0 }
 0x424   :  { %1551 = vmax.xlane.f32.xlu1 %v1550_v33  ;;  %v1397_v25 = vsel %vm1269_vm4, %v1205_v23, %v1333_v37  ;;  %v1398_v61 = vsel %vm1270_vm6, %v1206_v5, %v1334_v3  ;;  %v7943_v56 = vpop.eup %7942  ;;  %v1547_v48 = vmax.f32 %v9660_v26, %v9676_v40  ;;  %v9723_v0 = vmul.f32 %v7939_v11, %v12991_v45 }
 0x425   :  { %v9726_v59 = vmul.f32 %v7941_v35, %v12992_v63  ;;  %v1836_v50 = vadd.f32 %v9714_v57, %v9711_v58  ;;  %vm12708_vm7 = vcmp.gt.f32.partialorder %v9684_v4, 0.0  ;;  %v1395_v33 = vsel %vm1267_vm8, %v1203_v31, %v1331_v42 }
 0x426   :  { %v7945_v30 = vpop.eup %7944  ;;  %vm12706_vm4 = vcmp.gt.f32.partialorder %v9688_v39, 0.0  ;;  %v1396_v23 = vsel %vm1268_vm0, %v1204_v28, %v1332_v2  ;;  %v9734_v5 = vsel %vm12710_vm10, %v1397_v25, -1e+30  ;;  %v9738_v37 = vsel %vm12709_vm9, %v1398_v61, -1e+30  ;;  %v12993_v25 = vld [vmem:[#allocation41_spill] sm:$0xff] }
 0x427   :  { %1548 = vmax.xlane.f32.xlu0 %v1547_v48  ;;  %v7947_v35 = vpop.eup %7946  ;;  %v1833_v11 = vadd.f32 %v9726_v59, %v9723_v0  ;;  %v9744_v31 = vsel %vm12708_vm7, %v1395_v33, -1e+30  ;;  %v9748_v28 = vsel %vm12706_vm4, %v1396_v23, -1e+30  ;;  %v1556_v2 = vmax.f32 %v9734_v5, %v9738_v37  ;;  %v12995_v48 = vld [vmem:[#allocation54_spill] sm:$0xff]  ;;  %v12997_v23 = vld [vmem:[#allocation55_spill] sm:$0xff] }
 0x428   :  { %1837 = vadd.xlane.f32.xlu1 %v1836_v50  ;;  %v7949_v3 = vpop.eup %7948  ;;  %v9753_v61 = vmul.f32 %v7943_v56, %v12993_v25  ;;  %v9756_v50 = vmul.f32 %v7945_v30, %v12995_v48  ;;  %v1553_v33 = vmax.f32 %v9744_v31, %v9748_v28  ;;  %v9761_v9 = vmul.f32 %v7947_v35, %v12996_v6  ;;  %v12998_v25 = vld [vmem:[#allocation43_spill] sm:$0xff]  ;;  %v13000_v48 = vld [vmem:[#allocation56_spill] sm:$0xff]  ;;  %v13001_v35 = vld [vmem:[#allocation46_spill] sm:$0xff] }
 0x429   :  { %v7951_v42 = vpop.eup %7950  ;;  %v9764_v39 = vmul.f32 %v7949_v3, %v12997_v23  ;;  %v13003_v3 = vld [vmem:[#allocation57_spill] sm:$0xff] }
 0x42a   :  { %12994 = vst [vmem:[#allocation68_spill] sm:$0xff] %v9753_v61  ;;  %v7953_v45 = vpop.eup %7952  ;;  %v1842_v56 = vadd.f32 %v9756_v50, %v9753_v61  ;;  %v9769_v30 = vmul.f32 %v7951_v42, %v12998_v25 }
 0x42b   :  { %1834 = vadd.xlane.f32.xlu0 %v1833_v11  ;;  %v9772_v11 = vmul.f32 %v7953_v45, %v13000_v48 }
 0x42c   :  { %1557 = vmax.xlane.f32.xlu1 %v1556_v2  ;;  %v7955_v63 = vpop.eup %7954  ;;  %12999 = vst [vmem:[#allocation70_spill] sm:$0xff] %v9769_v30  ;;  %v1839_v2 = vadd.f32 %v9764_v39, %v9761_v9 }
 0x42d   :  { %v7957_v4 = vpop.eup %7956  ;;  %v9777_v6 = vmul.f32 %v7955_v63, %v13001_v35  ;;  %v1848_v61 = vadd.f32 %v9772_v11, %v9769_v30 }
 0x42e   :  { %v9780_v23 = vmul.f32 %v7957_v4, %v13003_v3 }
 0x42f   :  { %1554 = vmax.xlane.f32.xlu0 %v1553_v33  ;;  %13002 = vst [vmem:[#allocation69_spill] sm:$0xff] %v9777_v6 }
 0x430   :  { %1843 = vadd.xlane.f32.xlu1 %v1842_v56  ;;  %v1845_v45 = vadd.f32 %v9780_v23, %v9777_v6 }
 0x433   :  { %1840 = vadd.xlane.f32.xlu0 %v1839_v2 }
 0x434   :  { %1849 = vadd.xlane.f32.xlu1 %v1848_v61 }
 0x437   :  { %1846 = vadd.xlane.f32.xlu0 %v1845_v45 }
 0x444   :  { %v1504_v42 = vpop.xlane.xlu0 %1503  ;;  %v1501_v25 = vpop.xlane.xlu1 %1500 }
 0x445   :  { %v1585_v33 = vsub.f32 %v9279_v29, %v1504_v42  ;;  %v1586_v56 = vsub.f32 %v9299_v34, %v1504_v42  ;;  %v1583_v63 = vsub.f32 %v9290_v44, %v1501_v25  ;;  %v1584_v4 = vsub.f32 %v9311_v53, %v1501_v25 }
 0x447   :  { %v1675_v35 = vmul.f32 1.442695, %v1585_v33  ;;  %v1677_v3 = vmul.f32 1.442695, %v1586_v56  ;;  %v1671_v48 = vmul.f32 1.442695, %v1583_v63 }
 0x448   :  { %v1673_v30 = vmul.f32 1.442695, %v1584_v4  ;;  %v1507_v2 = vpop.xlane.xlu0 %1506  ;;  %v1510_v6 = vpop.xlane.xlu1 %1509 }
 0x449   :  { %7958 = vpow2.f32 %v1675_v35  ;;  %v1587_v61 = vsub.f32 %v9294_v21, %v1507_v2  ;;  %v1588_v45 = vsub.f32 %v9329_v46, %v1507_v2  ;;  %v1589_v29 = vsub.f32 %v9303_v13, %v1510_v6 }
 0x44a   :  { %7960 = vpow2.f32 %v1677_v3  ;;  %v1590_v34 = vsub.f32 %v9341_v20, %v1510_v6 }
 0x44b   :  { %7962 = vpow2.f32 %v1671_v48  ;;  %v1679_v44 = vmul.f32 1.442695, %v1587_v61  ;;  %v1681_v42 = vmul.f32 1.442695, %v1588_v45  ;;  %v1683_v53 = vmul.f32 1.442695, %v1589_v29 }
 0x44c   :  { %7964 = vpow2.f32 %v1673_v30  ;;  %v1685_v25 = vmul.f32 1.442695, %v1590_v34  ;;  %v1513_v33 = vpop.xlane.xlu0 %1512  ;;  %v1516_v56 = vpop.xlane.xlu1 %1515 }
 0x44d   :  { %7966 = vpow2.f32 %v1679_v44  ;;  %v1591_v35 = vsub.f32 %v9322_v19, %v1513_v33  ;;  %v1592_v21 = vsub.f32 %v9356_v60, %v1513_v33  ;;  %v1593_v46 = vsub.f32 %v9333_v10, %v1516_v56  ;;  %v13006_v33 = vld [vmem:[#allocation18_spill] sm:$0xff] }
 0x44e   :  { %7968 = vpow2.f32 %v1681_v42  ;;  %v1594_v13 = vsub.f32 %v9367_v8, %v1516_v56  ;;  %v13004_v42 = vld [vmem:[#allocation12_spill] sm:$0xff] }
 0x44f   :  { %7970 = vpow2.f32 %v1683_v53  ;;  %v1687_v20 = vmul.f32 1.442695, %v1591_v35  ;;  %v1689_v6 = vmul.f32 1.442695, %v1592_v21  ;;  %v1691_v48 = vmul.f32 1.442695, %v1593_v46 }
 0x450   :  { %7972 = vpow2.f32 %v1685_v25  ;;  %v1693_v30 = vmul.f32 1.442695, %v1594_v13  ;;  %v1519_v3 = vpop.xlane.xlu0 %1518  ;;  %v1522_v4 = vpop.xlane.xlu1 %1521  ;;  %v13008_v46 = vld [vmem:[#allocation15_spill] sm:$0xff] }
 0x451   :  { %7974 = vpow2.f32 %v1687_v20  ;;  %v1595_v63 = vsub.f32 %v9381_v36, %v1519_v3  ;;  %v1596_v19 = vsub.f32 %v9385_v12, %v1519_v3  ;;  %v1597_v60 = vsub.f32 %v9400_v18, %v1522_v4  ;;  %v13005_v12 = vld [vmem:[#allocation24_spill] sm:$0xff] }
 0x452   :  { %7976 = vpow2.f32 %v1689_v6  ;;  %v1598_v10 = vsub.f32 %v9392_v62, %v1522_v4  ;;  %v13007_v62 = vld [vmem:[#allocation91_spill] sm:$0xff]  ;;  %v13009_v20 = vld [vmem:[#allocation16_spill] sm:$0xff] }
 0x453   :  { %v7959_v2 = vpop.eup %7958  ;;  %7978 = vpow2.f32 %v1691_v48  ;;  %v1695_v8 = vmul.f32 1.442695, %v1595_v63  ;;  %v1697_v61 = vmul.f32 1.442695, %v1596_v19  ;;  %v1699_v29 = vmul.f32 1.442695, %v1597_v60 }
 0x454   :  { %v7961_v45 = vpop.eup %7960  ;;  %7980 = vpow2.f32 %v1693_v30  ;;  %v1701_v34 = vmul.f32 1.442695, %v1598_v10  ;;  %v1525_v44 = vpop.xlane.xlu0 %1524  ;;  %v9803_v53 = vmul.f32 %v7959_v2, %v13004_v42  ;;  %v13010_v48 = vld [vmem:[#allocation82_spill] sm:$0xff] }
 0x455   :  { %v7963_v36 = vpop.eup %7962  ;;  %7982 = vpow2.f32 %v1695_v8  ;;  %v1599_v25 = vsub.f32 %v13005_v12, %v1525_v44  ;;  %v1600_v18 = vsub.f32 %v13006_v33, %v1525_v44  ;;  %v1528_v35 = vpop.xlane.xlu1 %1527  ;;  %v9808_v21 = vmul.f32 %v7961_v45, %v13007_v62  ;;  %v13012_v12 = vld [vmem:[#allocation19_spill] sm:$0xff] }
 0x456   :  { %v7965_v56 = vpop.eup %7964  ;;  %7984 = vpow2.f32 %v1697_v61  ;;  %v1601_v13 = vsub.f32 %v13008_v46, %v1528_v35  ;;  %v1602_v6 = vsub.f32 %v13009_v20, %v1528_v35  ;;  %v9813_v30 = vmul.f32 %v7963_v36, %v13010_v48  ;;  %v13011_v61 = vld [vmem:[#allocation92_spill] sm:$0xff]  ;;  %v13013_v33 = vld [vmem:[#allocation23_spill] sm:$0xff]  ;;  %v13017_v48 = vld [vmem:[#allocation93_spill] sm:$0xff] }
 0x457   :  { %v7967_v3 = vpop.eup %7966  ;;  %7986 = vpow2.f32 %v1699_v29  ;;  %v1703_v63 = vmul.f32 1.442695, %v1599_v25  ;;  %v1705_v19 = vmul.f32 1.442695, %v1600_v18  ;;  %v1854_v4 = vadd.f32 %v9808_v21, %v9803_v53  ;;  %v13014_v25 = vld [vmem:[#allocation83_spill] sm:$0xff] }
 0x458   :  { %v7969_v60 = vpop.eup %7968  ;;  %7988 = vpow2.f32 %v1701_v34  ;;  %v1707_v10 = vmul.f32 1.442695, %v1601_v13  ;;  %v1709_v2 = vmul.f32 1.442695, %v1602_v6  ;;  %v1531_v8 = vpop.xlane.xlu0 %1530  ;;  %v9818_v45 = vmul.f32 %v7965_v56, %v13011_v61  ;;  %v13015_v13 = vld [vmem:[#allocation25_spill] sm:$0xff]  ;;  %v13016_v56 = vld [vmem:[#allocation26_spill] sm:$0xff] }
 0x459   :  { %v7971_v44 = vpop.eup %7970  ;;  %7990 = vpow2.f32 %v1703_v63  ;;  %v1603_v36 = vsub.f32 %v13012_v12, %v1531_v8  ;;  %v1604_v35 = vsub.f32 %v13013_v33, %v1531_v8  ;;  %1855 = vadd.xlane.f32.xlu1 %v1854_v4  ;;  %v1534_v29 = vpop.xlane.xlu1 %1533  ;;  %v9823_v18 = vmul.f32 %v7967_v3, %v13014_v25 }
 0x45a   :  { %v7973_v46 = vpop.eup %7972  ;;  %7992 = vpow2.f32 %v1705_v19  ;;  %v1851_v34 = vadd.f32 %v9818_v45, %v9813_v30  ;;  %v1605_v20 = vsub.f32 %v13015_v13, %v1534_v29  ;;  %v1606_v6 = vsub.f32 %v13016_v56, %v1534_v29  ;;  %v13018_v19 = vld [vmem:[#allocation84_spill] sm:$0xff]  ;;  %v13019_v13 = vld [vmem:[#allocation95_spill] sm:$0xff] }
 0x45b   :  { %v7975_v61 = vpop.eup %7974  ;;  %7994 = vpow2.f32 %v1707_v10  ;;  %v1711_v63 = vmul.f32 1.442695, %v1603_v36  ;;  %v1713_v12 = vmul.f32 1.442695, %v1604_v35  ;;  %v9830_v8 = vmul.f32 %v7969_v60, %v13017_v48  ;;  %v13020_v36 = vld [vmem:[#allocation85_spill] sm:$0xff] }
 0x45c   :  { %v7977_v4 = vpop.eup %7976  ;;  %7996 = vpow2.f32 %v1709_v2  ;;  %1852 = vadd.xlane.f32.xlu0 %v1851_v34  ;;  %v1715_v3 = vmul.f32 1.442695, %v1605_v20  ;;  %v1717_v33 = vmul.f32 1.442695, %v1606_v6  ;;  %v9833_v25 = vmul.f32 %v7971_v44, %v13018_v19  ;;  %v13022_v2 = vld [vmem:[#allocation96_spill] sm:$0xff]  ;;  %v13023_v20 = vld [vmem:[#allocation86_spill] sm:$0xff] }
 0x45d   :  { %v7979_v42 = vpop.eup %7978  ;;  %7998 = vpow2.f32 %v1711_v63  ;;  %v1857_v29 = vadd.f32 %v9830_v8, %v9823_v18  ;;  %v9838_v10 = vmul.f32 %v7973_v46, %v13019_v13  ;;  %v9841_v35 = vmul.f32 %v7975_v61, %v13020_v36  ;;  %v13025_v63 = vld [vmem:[#allocation97_spill] sm:$0xff] }
 0x45e   :  { %v7981_v60 = vpop.eup %7980  ;;  %8000 = vpow2.f32 %v1713_v12  ;;  %v9844_v34 = vmul.f32 %v7977_v4, %v13022_v2  ;;  %v9847_v56 = vmul.f32 %v7979_v42, %v13023_v20  ;;  %v13026_v12 = vld [vmem:[#allocation87_spill] sm:$0xff] }
 0x45f   :  { %13021 = vst [vmem:[#allocation71_spill] sm:$0xff] %v9841_v35  ;;  %v7983_v44 = vpop.eup %7982  ;;  %8002 = vpow2.f32 %v1715_v3  ;;  %v1860_v6 = vadd.f32 %v9838_v10, %v9833_v25  ;;  %v9852_v19 = vmul.f32 %v7981_v60, %v13025_v63  ;;  %v13028_v3 = vld [vmem:[#allocation98_spill] sm:$0xff]  ;;  %v13029_v60 = vld [vmem:[#allocation88_spill] sm:$0xff] }
 0x460   :  { %13024 = vst [vmem:[#allocation72_spill] sm:$0xff] %v9847_v56  ;;  %v7985_v46 = vpop.eup %7984  ;;  %8004 = vpow2.f32 %v1717_v33  ;;  %1858 = vadd.xlane.f32.xlu0 %v1857_v29  ;;  %v1863_v61 = vadd.f32 %v9844_v34, %v9841_v35  ;;  %v9857_v4 = vmul.f32 %v7983_v44, %v13026_v12  ;;  %v13031_v29 = vld [vmem:[#allocation14_spill] sm:$0xff] }
 0x461   :  { %v7987_v36 = vpop.eup %7986  ;;  %1861 = vadd.xlane.f32.xlu1 %v1860_v6  ;;  %v1866_v42 = vadd.f32 %v9852_v19, %v9847_v56  ;;  %v9862_v20 = vmul.f32 %v7985_v46, %v13028_v3  ;;  %v13033_v6 = vld [vmem:[#allocation20_spill] sm:$0xff]  ;;  %v13034_v3 = vld [vmem:[#allocation99_spill] sm:$0xff]  ;;  %v13035_v56 = vld [vmem:[#allocation89_spill] sm:$0xff] }
 0x462   :  { %13027 = vst [vmem:[#allocation73_spill] sm:$0xff] %v9857_v4  ;;  %v7989_v2 = vpop.eup %7988  ;;  %v9865_v63 = vmul.f32 %v7987_v36, %v13029_v60 }
 0x463   :  { %v7991_v33 = vpop.eup %7990  ;;  %v9868_v13 = vmul.f32 %v7989_v2, %v13031_v29  ;;  %v1869_v44 = vadd.f32 %v9862_v20, %v9857_v4 }
 0x464   :  { %13030 = vst [vmem:[#allocation76_spill] sm:$0xff] %v9865_v63  ;;  %v7993_v48 = vpop.eup %7992  ;;  %1864 = vadd.xlane.f32.xlu0 %v1863_v61  ;;  %v9873_v12 = vmul.f32 %v7991_v33, %v13033_v6  ;;  %v13037_v61 = vld [vmem:[#allocation100_spill] sm:$0xff] }
 0x465   :  { %13032 = vst [vmem:[#allocation74_spill] sm:$0xff] %v9868_v13  ;;  %v7995_v62 = vpop.eup %7994  ;;  %1867 = vadd.xlane.f32.xlu1 %v1866_v42  ;;  %v1872_v46 = vadd.f32 %v9868_v13, %v9865_v63  ;;  %v9878_v36 = vmul.f32 %v7993_v48, %v13034_v3  ;;  %v13038_v42 = vld [vmem:[#allocation90_spill] sm:$0xff]  ;;  %v13040_v3 = vld [vmem:[#allocation13_spill] sm:$0xff] }
 0x466   :  { %v7997_v60 = vpop.eup %7996  ;;  %v9881_v2 = vmul.f32 %v7995_v62, %v13035_v56  ;;  %v13041_v13 = vld [vmem:[#allocation94_spill] sm:$0xff] }
 0x467   :  { %v7999_v29 = vpop.eup %7998  ;;  %v9884_v35 = vmul.f32 %v7997_v60, %v13037_v61  ;;  %v1875_v33 = vadd.f32 %v9878_v36, %v9873_v12  ;;  %v13043_v61 = vld [vmem:[#allocation101_spill] sm:$0xff] }
 0x468   :  { %13036 = vst [vmem:[#allocation77_spill] sm:$0xff] %v9881_v2  ;;  %v8001_v4 = vpop.eup %8000  ;;  %1870 = vadd.xlane.f32.xlu0 %v1869_v44  ;;  %v9889_v6 = vmul.f32 %v7999_v29, %v13038_v42 }
 0x469   :  { %v8003_v63 = vpop.eup %8002  ;;  %1873 = vadd.xlane.f32.xlu1 %v1872_v46  ;;  %v1878_v48 = vadd.f32 %v9884_v35, %v9881_v2  ;;  %v9894_v62 = vmul.f32 %v8001_v4, %v13040_v3 }
 0x46a   :  { %13039 = vst [vmem:[#allocation75_spill] sm:$0xff] %v9889_v6  ;;  %v8005_v56 = vpop.eup %8004  ;;  %v9897_v60 = vmul.f32 %v8003_v63, %v13041_v13 }
 0x46b   :  { %v9900_v44 = vmul.f32 %v8005_v56, %v13043_v61  ;;  %v1881_v29 = vadd.f32 %v9894_v62, %v9889_v6 }
 0x46c   :  { %13042 = vst [vmem:[#allocation80_spill] sm:$0xff] %v9897_v60  ;;  %1876 = vadd.xlane.f32.xlu0 %v1875_v33 }
 0x46d   :  { %13044 = vst [vmem:[#allocation78_spill] sm:$0xff] %v9900_v44  ;;  %1879 = vadd.xlane.f32.xlu1 %v1878_v48  ;;  %v1884_v46 = vadd.f32 %v9900_v44, %v9897_v60 }
 0x470   :  { %1882 = vadd.xlane.f32.xlu0 %v1881_v29 }
 0x471   :  { %1885 = vadd.xlane.f32.xlu1 %v1884_v46 }
 0x49d   :  { %v1820_v42 = vpop.xlane.xlu1 %1819 }
 0x49e   :  { %v1912_v4 = vmax.f32 %v1820_v42, 1e-20 }
 0x4a0   :  { %v1817_v3 = vpop.xlane.xlu0 %1816  ;;  %8006 = vrcp.f32 %v1912_v4 }
 0x4a1   :  { %v1911_v2 = vmax.f32 %v1817_v3, 1e-20  ;;  %v1540_v63 = vpop.xlane.xlu1 %1539 }
 0x4a2   :  { %v1609_v13 = vsub.f32 %v9517_v32, %v1540_v63  ;;  %v1610_v56 = vsub.f32 %v9596_v43, %v1540_v63 }
 0x4a3   :  { %8008 = vrcp.f32 %v1911_v2 }
 0x4a4   :  { %v1537_v33 = vpop.xlane.xlu0 %1536  ;;  %v1723_v61 = vmul.f32 1.442695, %v1609_v13  ;;  %v1725_v6 = vmul.f32 1.442695, %v1610_v56 }
 0x4a5   :  { %v1607_v48 = vsub.f32 %v9537_v16, %v1537_v33  ;;  %v1608_v60 = vsub.f32 %v9606_v38, %v1537_v33  ;;  %v1826_v29 = vpop.xlane.xlu1 %1825 }
 0x4a6   :  { %8010 = vpow2.f32 %v1723_v61  ;;  %v1914_v46 = vmax.f32 %v1826_v29, 1e-20 }
 0x4a7   :  { %v1719_v42 = vmul.f32 1.442695, %v1607_v48  ;;  %v1721_v44 = vmul.f32 1.442695, %v1608_v60  ;;  %8012 = vpow2.f32 %v1725_v6 }
 0x4a8   :  { %v1823_v3 = vpop.xlane.xlu0 %1822  ;;  %8014 = vrcp.f32 %v1914_v46 }
 0x4a9   :  { %8016 = vpow2.f32 %v1719_v42  ;;  %v1913_v32 = vmax.f32 %v1823_v3, 1e-20  ;;  %v1546_v4 = vpop.xlane.xlu1 %1545 }
 0x4aa   :  { %v8007_v43 = vpop.eup %8006  ;;  %8018 = vpow2.f32 %v1721_v44  ;;  %v1613_v13 = vsub.f32 %v9559_v27, %v1546_v4  ;;  %v1614_v2 = vsub.f32 %v9633_v55, %v1546_v4 }
 0x4ab   :  { %8020 = vrcp.f32 %v1913_v32  ;;  %v1977_v16 = vmul.f32 %v8007_v43, %v9576_v49  ;;  %v1978_v60 = vmul.f32 %v8007_v43, %v9583_v1  ;;  %v13045_v43 = vld [vmem:[#allocation58_spill] sm:$0xff] }
 0x4ac   :  { %v1543_v38 = vpop.xlane.xlu0 %1542  ;;  %v1731_v61 = vmul.f32 1.442695, %v1613_v13  ;;  %v1733_v63 = vmul.f32 1.442695, %v1614_v2  ;;  %v13046_v13 = vld [vmem:[#allocation64_spill] sm:$0xff] }
 0x4ad   :  { %v8009_v6 = vpop.eup %8008  ;;  %v1611_v56 = vsub.f32 %v9564_v54, %v1543_v38  ;;  %v1612_v33 = vsub.f32 %v9637_v47, %v1543_v38  ;;  %v1832_v48 = vpop.xlane.xlu1 %1831  ;;  %v13047_v38 = vld [vmem:[#allocation29_spill] sm:$0xff] }
 0x4ae   :  { %v1975_v44 = vmul.f32 %v8009_v6, %v9589_v7  ;;  %8022 = vpow2.f32 %v1731_v61  ;;  %v1916_v27 = vmax.f32 %v1832_v48, 1e-20  ;;  %v1976_v55 = vmul.f32 %v8009_v6, %v9602_v22  ;;  %v13049_v6 = vld [vmem:[#allocation63_spill] sm:$0xff] }
 0x4af   :  { %v1727_v29 = vmul.f32 1.442695, %v1611_v56  ;;  %v1729_v46 = vmul.f32 1.442695, %v1612_v33  ;;  %8024 = vpow2.f32 %v1733_v63 }
 0x4b0   :  { %v8011_v49 = vpop.eup %8010  ;;  %v1829_v42 = vpop.xlane.xlu0 %1828  ;;  %8026 = vrcp.f32 %v1916_v27  ;;  %v2040_v3 = vpack.c.bf16 %v1978_v60, %v1976_v55  ;;  %v2039_v1 = vpack.c.bf16 %v1977_v16, %v1975_v44  ;;  %v13048_v16 = vld [vmem:[#allocation59_spill] sm:$0xff]  ;;  %v13050_v55 = vld [vmem:[#allocation32_spill] sm:$0xff] }
 0x4b1   :  { %v8013_v32 = vpop.eup %8012  ;;  %8028 = vpow2.f32 %v1727_v29  ;;  %v1915_v54 = vmax.f32 %v1829_v42, 1e-20  ;;  %v1552_v4 = vpop.xlane.xlu1 %1551  ;;  %v9919_v47 = vmul.f32 %v8011_v49, %v9460_v51  ;;  %v13083_v51 = vld [vmem:[#allocation34_spill] sm:$0xff] }
 0x4b2   :  { %v8015_v7 = vpop.eup %8014  ;;  %8030 = vpow2.f32 %v1729_v46  ;;  %2103 = vmatprep.mubr.bf16.mxu0 %v2040_v3  ;;  %v1617_v22 = vsub.f32 %v13045_v43, %v1552_v4  ;;  %v1618_v2 = vsub.f32 %v13046_v13, %v1552_v4  ;;  %v9924_v61 = vmul.f32 %v8013_v32, %v13047_v38 }
 0x4b3   :  { %v8017_v63 = vpop.eup %8016  ;;  %8032 = vrcp.f32 %v1915_v54  ;;  %2104 = vmatmul.mubr.bf16.vlgmr.msra.gmra.mrb[16].mxu0 %v2039_v1  ;;  %v1982_v60 = vmul.f32 %v8015_v7, %v13048_v16  ;;  %v1981_v56 = vmul.f32 %v8015_v7, %v13049_v6  ;;  %v13051_v1 = vld [vmem:[#allocation21_spill] sm:$0xff]  ;;  %vm13084_vm12 = vcmp.gt.f32.partialorder %v13083_v51, 0.0  ;;  %v13085_v51 = vld [vmem:[#allocation47_spill] sm:$0xff] }
 0x4b4   :  { %v8019_v33 = vpop.eup %8018  ;;  %v1549_v48 = vpop.xlane.xlu0 %1548  ;;  %v1739_v44 = vmul.f32 1.442695, %v1617_v22  ;;  %v1741_v27 = vmul.f32 1.442695, %v1618_v2  ;;  %v9929_v29 = vmul.f32 %v8017_v63, %v13050_v55  ;;  %v1890_v46 = vadd.f32 %v9924_v61, %v9919_v47  ;;  %v13052_v7 = vld [vmem:[#allocation65_spill] sm:$0xff]  ;;  %v13053_v22 = vld [vmem:[#allocation60_spill] sm:$0xff] }
 0x4b5   :  { %v8021_v49 = vpop.eup %8020  ;;  %v1615_v42 = vsub.f32 %v9660_v26, %v1549_v48  ;;  %v1616_v3 = vsub.f32 %v9676_v40, %v1549_v48  ;;  %v9936_v32 = vmul.f32 %v8019_v33, %v13051_v1  ;;  %v1838_v54 = vpop.xlane.xlu1 %1837 }
 0x4b6   :  { %8034 = vpow2.f32 %v1739_v44  ;;  %1891 = vadd.xlane.f32.xlu1 %v1890_v46  ;;  %v1918_v4 = vmax.f32 %v1838_v54, 1e-20  ;;  %v1980_v43 = vmul.f32 %v8021_v49, %v13052_v7  ;;  %v1979_v13 = vmul.f32 %v8021_v49, %v13053_v22  ;;  %v13054_v54 = vld [vmem:[#allocation44_spill] sm:$0xff] }
 0x4b7   :  { %v1735_v2 = vmul.f32 1.442695, %v1615_v42  ;;  %v1737_v63 = vmul.f32 1.442695, %v1616_v3  ;;  %8036 = vpow2.f32 %v1741_v27  ;;  %v1887_v16 = vadd.f32 %v9936_v32, %v9929_v29  ;;  %v13055_v3 = vld [vmem:[#allocation103_spill] sm:$0xff] }
 0x4b8   :  { %v8023_v26 = vpop.eup %8022  ;;  %v1835_v6 = vpop.xlane.xlu0 %1834  ;;  %8038 = vrcp.f32 %v1918_v4  ;;  %v2042_v40 = vpack.c.bf16 %v1982_v60, %v1980_v43  ;;  %v2041_v33 = vpack.c.bf16 %v1981_v56, %v1979_v13 }
 0x4b9   :  { %v8025_v48 = vpop.eup %8024  ;;  %8040 = vpow2.f32 %v1735_v2  ;;  %v1917_v44 = vmax.f32 %v1835_v6, 1e-20  ;;  %1888 = vadd.xlane.f32.xlu0 %v1887_v16  ;;  %v1558_v46 = vpop.xlane.xlu1 %1557  ;;  %v9943_v7 = vmul.f32 %v8023_v26, %v13054_v54 }
 0x4ba   :  { %v8027_v49 = vpop.eup %8026  ;;  %8042 = vpow2.f32 %v1737_v63  ;;  %2111 = vmatprep.mubr.bf16.mxu0 %v2042_v40  ;;  %v1621_v27 = vsub.f32 %v9734_v5, %v1558_v46  ;;  %v1622_v42 = vsub.f32 %v9738_v37, %v1558_v46  ;;  %v9948_v22 = vmul.f32 %v8025_v48, %v13055_v3  ;;  %v13056_v63 = vld [vmem:[#allocation31_spill] sm:$0xff] }
 0x4bb   :  { %v8029_v60 = vpop.eup %8028  ;;  %8044 = vrcp.f32 %v1917_v44  ;;  %2112 = vmatmul.mubr.bf16.gmra.mrb[20].mxu0 %v2041_v33  ;;  %v1986_v56 = vmul.f32 %v8027_v49, %v9682_v24  ;;  %v1985_v4 = vmul.f32 %v8027_v49, %v9679_v52  ;;  %v13057_v33 = vld [vmem:[#allocation27_spill] sm:$0xff] }
 0x4bc   :  { %v8031_v43 = vpop.eup %8030  ;;  %v1555_v13 = vpop.xlane.xlu0 %1554  ;;  %v1747_v2 = vmul.f32 1.442695, %v1621_v27  ;;  %v1749_v16 = vmul.f32 1.442695, %v1622_v42  ;;  %v9953_v26 = vmul.f32 %v8029_v60, %v13056_v63  ;;  %v1896_v5 = vadd.f32 %v9948_v22, %v9943_v7 }
 0x4bd   :  { %v8033_v37 = vpop.eup %8032  ;;  %v1619_v6 = vsub.f32 %v9744_v31, %v1555_v13  ;;  %v1620_v40 = vsub.f32 %v9748_v28, %v1555_v13  ;;  %v9960_v48 = vmul.f32 %v8031_v43, %v13057_v33  ;;  %v1844_v24 = vpop.xlane.xlu1 %1843 }
 0x4be   :  { %8046 = vpow2.f32 %v1747_v2  ;;  %1897 = vadd.xlane.f32.xlu1 %v1896_v5  ;;  %v1920_v52 = vmax.f32 %v1844_v24, 1e-20  ;;  %v1984_v44 = vmul.f32 %v8033_v37, %v9698_v15  ;;  %v1983_v46 = vmul.f32 %v8033_v37, %v9695_v41  ;;  %v13058_v24 = vld [vmem:[#allocation22_spill] sm:$0xff]  ;;  %v13059_v37 = vld [vmem:[#allocation104_spill] sm:$0xff] }
 0x4bf   :  { %v1743_v49 = vmul.f32 1.442695, %v1619_v6  ;;  %v1745_v27 = vmul.f32 1.442695, %v1620_v40  ;;  %8048 = vpow2.f32 %v1749_v16  ;;  %v1893_v42 = vadd.f32 %v9960_v48, %v9953_v26 }
 0x4c0   :  { %v8035_v31 = vpop.eup %8034  ;;  %v1841_v60 = vpop.xlane.xlu0 %1840  ;;  %8050 = vrcp.f32 %v1920_v52  ;;  %v2044_v28 = vpack.c.bf16 %v1986_v56, %v1984_v44  ;;  %v2043_v43 = vpack.c.bf16 %v1985_v4, %v1983_v46  ;;  %v13060_v44 = vld [vmem:[#allocation102_spill] sm:$0xff] }
 0x4c1   :  { %v8037_v13 = vpop.eup %8036  ;;  %8052 = vpow2.f32 %v1743_v49  ;;  %v1919_v2 = vmax.f32 %v1841_v60, 1e-20  ;;  %1894 = vadd.xlane.f32.xlu0 %v1893_v42  ;;  %v1850_v5 = vpop.xlane.xlu1 %1849  ;;  %v9967_v15 = vmul.f32 %v8035_v31, %v13058_v24  ;;  %v13061_v60 = vld [vmem:[#allocation105_spill] sm:$0xff] }
 0x4c2   :  { %v8039_v41 = vpop.eup %8038  ;;  %8054 = vpow2.f32 %v1745_v27  ;;  %2119 = vmatprep.mubr.bf16.mxu0 %v2044_v28  ;;  %v1922_v16 = vmax.f32 %v1850_v5, 1e-20  ;;  %v9970_v6 = vmul.f32 %v8037_v13, %v13059_v37 }
 0x4c3   :  { %v8041_v40 = vpop.eup %8040  ;;  %8056 = vrcp.f32 %v1919_v2  ;;  %2120 = vmatmul.mubr.bf16.gmra.mrb[24].mxu0 %v2043_v43  ;;  %v1990_v56 = vmul.f32 %v8039_v41, %v9714_v57  ;;  %v1989_v27 = vmul.f32 %v8039_v41, %v9711_v58 }
 0x4c4   :  { %v8043_v4 = vpop.eup %8042  ;;  %v1847_v52 = vpop.xlane.xlu0 %1846  ;;  %8058 = vrcp.f32 %v1922_v16  ;;  %v9974_v46 = vmul.f32 %v8041_v40, %v13060_v44  ;;  %v1902_v49 = vadd.f32 %v9970_v6, %v9967_v15 }
 0x4c5   :  { %v8045_v42 = vpop.eup %8044  ;;  %v1921_v31 = vmax.f32 %v1847_v52, 1e-20  ;;  %v9980_v28 = vmul.f32 %v8043_v4, %v13061_v60  ;;  %v13062_v52 = vld [vmem:[#allocation61_spill] sm:$0xff] }
 0x4c6   :  { %1903 = vadd.xlane.f32.xlu1 %v1902_v49  ;;  %v1988_v43 = vmul.f32 %v8045_v42, %v9726_v59  ;;  %v1987_v57 = vmul.f32 %v8045_v42, %v9723_v0  ;;  %v13063_v42 = vld [vmem:[#allocation68_spill] sm:$0xff] }
 0x4c7   :  { %8060 = vrcp.f32 %v1921_v31  ;;  %v1899_v13 = vadd.f32 %v9980_v28, %v9974_v46 }
 0x4c8   :  { %v8047_v2 = vpop.eup %8046  ;;  %v2046_v5 = vpack.c.bf16 %v1990_v56, %v1988_v43  ;;  %v2045_v16 = vpack.c.bf16 %v1989_v27, %v1987_v57  ;;  %v13064_v57 = vld [vmem:[#allocation66_spill] sm:$0xff] }
 0x4c9   :  { %v8049_v40 = vpop.eup %8048  ;;  %1900 = vadd.xlane.f32.xlu0 %v1899_v13  ;;  %v9987_v58 = vmul.f32 %v8047_v2, %v9703_v14 }
 0x4ca   :  { %v8051_v41 = vpop.eup %8050  ;;  %2127 = vmatprep.mubr.bf16.mxu0 %v2046_v5  ;;  %v9990_v4 = vmul.f32 %v8049_v40, %v9706_v17 }
 0x4cb   :  { %v8053_v59 = vpop.eup %8052  ;;  %2128 = vmatmul.mubr.bf16.gmra.mrb[28].mxu0 %v2045_v16  ;;  %v1994_v27 = vmul.f32 %v8051_v41, %v9756_v50  ;;  %v1993_v31 = vmul.f32 %v8051_v41, %v13063_v42  ;;  %v13065_v42 = vld [vmem:[#allocation69_spill] sm:$0xff] }
 0x4cc   :  { %v8055_v0 = vpop.eup %8054  ;;  %v9993_v49 = vmul.f32 %v8053_v59, %v13062_v52  ;;  %v1908_v56 = vadd.f32 %v9990_v4, %v9987_v58 }
 0x4cd   :  { %v8057_v43 = vpop.eup %8056  ;;  %v10000_v13 = vmul.f32 %v8055_v0, %v13064_v57  ;;  %v13066_v57 = vld [vmem:[#allocation70_spill] sm:$0xff] }
 0x4ce   :  { %v8059_v2 = vpop.eup %8058  ;;  %1909 = vadd.xlane.f32.xlu1 %v1908_v56  ;;  %v1992_v5 = vmul.f32 %v8057_v43, %v9764_v39  ;;  %v1991_v16 = vmul.f32 %v8057_v43, %v9761_v9 }
 0x4cf   :  { %v1905_v40 = vadd.f32 %v10000_v13, %v9993_v49  ;;  %v1998_v17 = vmul.f32 %v8059_v2, %v9772_v11  ;;  %v1997_v39 = vmul.f32 %v8059_v2, %v13066_v57 }
 0x4d0   :  { %v2048_v59 = vpack.c.bf16 %v1994_v27, %v1992_v5  ;;  %v2047_v52 = vpack.c.bf16 %v1993_v31, %v1991_v16 }
 0x4d1   :  { %v8061_v50 = vpop.eup %8060  ;;  %1906 = vadd.xlane.f32.xlu0 %v1905_v40 }
 0x4d2   :  { %2135 = vmatprep.mubr.bf16.mxu0 %v2048_v59  ;;  %v1996_v41 = vmul.f32 %v8061_v50, %v9780_v23  ;;  %v1995_v56 = vmul.f32 %v8061_v50, %v13065_v42 }
 0x4d3   :  { %2136 = vmatmul.mubr.bf16.gmra.mrb[32].mxu0 %v2047_v52 }
 0x4d4   :  { %v2050_v0 = vpack.c.bf16 %v1998_v17, %v1996_v41  ;;  %v2049_v9 = vpack.c.bf16 %v1997_v39, %v1995_v56 }
 0x4d6   :  { %2143 = vmatprep.mubr.bf16.mxu0 %v2050_v0 }
 0x4db   :  { %2144 = vmatmul.mubr.bf16.gmra.mrb[36].mxu0 %v2049_v9 }
 0x4e6   :  { %v1856_v43 = vpop.xlane.xlu1 %1855 }
 0x4e7   :  { %v1924_v14 = vmax.f32 %v1856_v43, 1e-20 }
 0x4e9   :  { %v1853_v27 = vpop.xlane.xlu0 %1852  ;;  %8062 = vrcp.f32 %v1924_v14 }
 0x4ea   :  { %v1923_v31 = vmax.f32 %v1853_v27, 1e-20 }
 0x4ec   :  { %8064 = vrcp.f32 %v1923_v31 }
 0x4ed   :  { %v1859_v11 = vpop.xlane.xlu0 %1858 }
 0x4ee   :  { %v1925_v5 = vmax.f32 %v1859_v11, 1e-20  ;;  %v1862_v16 = vpop.xlane.xlu1 %1861 }
 0x4ef   :  { %v1926_v40 = vmax.f32 %v1862_v16, 1e-20 }
 0x4f0   :  { %8066 = vrcp.f32 %v1925_v5 }
 0x4f1   :  { %8068 = vrcp.f32 %v1926_v40  ;;  %v1865_v17 = vpop.xlane.xlu0 %1864 }
 0x4f2   :  { %v1927_v23 = vmax.f32 %v1865_v17, 1e-20  ;;  %v1868_v52 = vpop.xlane.xlu1 %1867 }
 0x4f3   :  { %v8063_v59 = vpop.eup %8062  ;;  %v1928_v57 = vmax.f32 %v1868_v52, 1e-20 }
 0x4f4   :  { %8070 = vrcp.f32 %v1927_v23  ;;  %v2002_v50 = vmul.f32 %v8063_v59, %v9808_v21  ;;  %v2001_v14 = vmul.f32 %v8063_v59, %v9803_v53 }
 0x4f5   :  { %8072 = vrcp.f32 %v1928_v57  ;;  %v1871_v2 = vpop.xlane.xlu0 %1870 }
 0x4f6   :  { %v8065_v41 = vpop.eup %8064  ;;  %v1929_v0 = vmax.f32 %v1871_v2, 1e-20  ;;  %v1874_v42 = vpop.xlane.xlu1 %1873 }
 0x4f7   :  { %v1930_v56 = vmax.f32 %v1874_v42, 1e-20  ;;  %v2000_v39 = vmul.f32 %v8065_v41, %v9818_v45  ;;  %v1999_v9 = vmul.f32 %v8065_v41, %v9813_v30 }
 0x4f8   :  { %8074 = vrcp.f32 %v1929_v0 }
 0x4f9   :  { %v2052_v43 = vpack.c.bf16 %v2002_v50, %v2000_v39  ;;  %v2051_v27 = vpack.c.bf16 %v2001_v14, %v1999_v9  ;;  %8076 = vrcp.f32 %v1930_v56  ;;  %v1877_v11 = vpop.xlane.xlu0 %1876  ;;  %v13067_v56 = vld [vmem:[#allocation71_spill] sm:$0xff]  ;;  %v13068_v39 = vld [vmem:[#allocation72_spill] sm:$0xff] }
 0x4fa   :  { %v8067_v31 = vpop.eup %8066  ;;  %v1880_v16 = vpop.xlane.xlu1 %1879  ;;  %v1931_v40 = vmax.f32 %v1877_v11, 1e-20 }
 0x4fb   :  { %v8069_v5 = vpop.eup %8068  ;;  %2151 = vmatprep.mubr.bf16.mxu0 %v2052_v43  ;;  %v2004_v21 = vmul.f32 %v8067_v31, %v9830_v8  ;;  %v1932_v23 = vmax.f32 %v1880_v16, 1e-20  ;;  %v2003_v30 = vmul.f32 %v8067_v31, %v9823_v18  ;;  %v13069_v43 = vld [vmem:[#allocation74_spill] sm:$0xff]  ;;  %v13070_v16 = vld [vmem:[#allocation73_spill] sm:$0xff] }
 0x4fc   :  { %2152 = vmatmul.mubr.bf16.gmra.mrb[40].mxu0 %v2051_v27  ;;  %v2006_v53 = vmul.f32 %v8069_v5, %v9838_v10  ;;  %v2005_v52 = vmul.f32 %v8069_v5, %v9833_v25  ;;  %8078 = vrcp.f32 %v1931_v40 }
 0x4fd   :  { %8080 = vrcp.f32 %v1932_v23  ;;  %v1883_v8 = vpop.xlane.xlu0 %1882 }
 0x4fe   :  { %v8071_v17 = vpop.eup %8070  ;;  %v2054_v45 = vpack.c.bf16 %v2006_v53, %v2004_v21  ;;  %v2053_v50 = vpack.c.bf16 %v2005_v52, %v2003_v30  ;;  %v1886_v10 = vpop.xlane.xlu1 %1885  ;;  %v1933_v42 = vmax.f32 %v1883_v8, 1e-20  ;;  %v13071_v53 = vld [vmem:[#allocation76_spill] sm:$0xff] }
 0x4ff   :  { %v8073_v59 = vpop.eup %8072  ;;  %v2008_v57 = vmul.f32 %v8071_v17, %v9844_v34  ;;  %v1934_v18 = vmax.f32 %v1886_v10, 1e-20  ;;  %v2007_v25 = vmul.f32 %v8071_v17, %v13067_v56  ;;  %v7862_v10 = vld [vmem:[#allocation7 + $0x40] sm:$0xff]  }
 0x500   :  { %2159 = vmatprep.mubr.bf16.mxu0 %v2054_v45  ;;  %v2010_v2 = vmul.f32 %v8073_v59, %v9852_v19  ;;  %v2009_v9 = vmul.f32 %v8073_v59, %v13068_v39  ;;  %8082 = vrcp.f32 %v1933_v42  ;;  %7569 = vmatprep.subr.bf16.mxu1 %v7862_v10  ;;  %v7866_v39 = vld [vmem:[#allocation7 + $0x60] sm:$0xff]  }
 0x501   :  { %8084 = vrcp.f32 %v1934_v18  ;;  %7570 = vmatpush3.bf16.msra.mxu1 %v7862_v10  ;;  %v13075_v18 = vld [vmem:[#allocation80_spill] sm:$0xff] }
 0x502   :  { %v8075_v14 = vpop.eup %8074  ;;  %v2056_v41 = vpack.c.bf16 %v2010_v2, %v2008_v57  ;;  %v2055_v27 = vpack.c.bf16 %v2009_v9, %v2007_v25  ;;  %v13072_v57 = vld [vmem:[#allocation77_spill] sm:$0xff]  ;;  %v7864_v25 = vld [vmem:[#allocation7 + $0x50] sm:$0xff]  }
 0x503   :  { %v8077_v0 = vpop.eup %8076  ;;  %v2012_v34 = vmul.f32 %v8075_v14, %v9862_v20  ;;  %v2011_v21 = vmul.f32 %v8075_v14, %v13070_v16  ;;  %v7867_v9 = vld [vmem:[#allocation7 + $0x68] sm:$0xff]  }
 0x504   :  { %2160 = vmatmul.mubr.bf16.gmra.mrb[44].mxu0 %v2053_v50  ;;  %v2014_v19 = vmul.f32 %v8077_v0, %v13069_v43  ;;  %v2013_v40 = vmul.f32 %v8077_v0, %v13071_v53  ;;  %v13073_v50 = vld [vmem:[#allocation78_spill] sm:$0xff]  ;;  %v7869_v43 = vld [vmem:[#allocation7 + $0x78] sm:$0xff]  }
 0x505   :  { %2167 = vmatprep.mubr.bf16.mxu0 %v2056_v41 }
 0x506   :  { %v8079_v31 = vpop.eup %8078  ;;  %v2058_v11 = vpack.c.bf16 %v2014_v19, %v2012_v34  ;;  %v2057_v45 = vpack.c.bf16 %v2013_v40, %v2011_v21  ;;  %v7868_v34 = vld [vmem:[#allocation7 + $0x70] sm:$0xff]  }
 0x507   :  { %v8081_v5 = vpop.eup %8080  ;;  %v2016_v17 = vmul.f32 %v8079_v31, %v9878_v36  ;;  %v2015_v59 = vmul.f32 %v8079_v31, %v9873_v12  ;;  %v7863_v36 = vld [vmem:[#allocation7 + $0x48] sm:$0xff]  }
 0x508   :  { %v2018_v23 = vmul.f32 %v8081_v5, %v9884_v35  ;;  %v2017_v2 = vmul.f32 %v8081_v5, %v13072_v57  ;;  %7571 = vmatprep.subr.bf16.mxu1 %v7863_v36  ;;  %v13074_v35 = vld [vmem:[#allocation75_spill] sm:$0xff] }
 0x509   :  { %7572 = vmatpush3.bf16.msra.mxu1 %v7863_v36 }
 0x50a   :  { %v8083_v20 = vpop.eup %8082  ;;  %v2060_v30 = vpack.c.bf16 %v2018_v23, %v2016_v17  ;;  %v2059_v41 = vpack.c.bf16 %v2017_v2, %v2015_v59  ;;  %7573 = vmatprep.subr.bf16.mxu1 %v7864_v25 }
 0x50b   :  { %v8085_v52 = vpop.eup %8084  ;;  %v2020_v8 = vmul.f32 %v8083_v20, %v9894_v62  ;;  %v2019_v42 = vmul.f32 %v8083_v20, %v13074_v35  ;;  %v7865_v62 = vld [vmem:[#allocation7 + $0x58] sm:$0xff]  }
 0x50c   :  { %2168 = vmatmul.mubr.bf16.gmra.mrb[48].mxu0 %v2055_v27  ;;  %v2022_v14 = vmul.f32 %v8085_v52, %v13073_v50  ;;  %v2021_v56 = vmul.f32 %v8085_v52, %v13075_v18 }
 0x50d   :  { %2175 = vmatprep.mubr.bf16.mxu0 %v2058_v11  ;;  %7574 = vmatpush3.bf16.msra.mxu1 %v7864_v25 }
 0x50e   :  { %v2062_v0 = vpack.c.bf16 %v2022_v14, %v2020_v8  ;;  %v2061_v12 = vpack.c.bf16 %v2021_v56, %v2019_v42  ;;  %7575 = vmatprep.subr.bf16.mxu1 %v7865_v62 }
 0x511   :  { %7576 = vmatpush3.bf16.msra.mxu1 %v7865_v62 }
 0x512   :  { %7577 = vmatprep.subr.bf16.mxu1 %v7866_v39 }
 0x514   :  { %2176 = vmatmul.mubr.bf16.gmra.mrb[52].mxu0 %v2057_v45 }
 0x515   :  { %2183 = vmatprep.mubr.bf16.mxu0 %v2060_v30  ;;  %7578 = vmatpush3.bf16.msra.mxu1 %v7866_v39 }
 0x516   :  { %7579 = vmatprep.subr.bf16.mxu1 %v7867_v9 }
 0x519   :  { %7580 = vmatpush3.bf16.msra.mxu1 %v7867_v9 }
 0x51a   :  { %7581 = vmatprep.subr.bf16.mxu1 %v7868_v34 }
 0x51c   :  { %2184 = vmatmul.mubr.bf16.gmra.mrb[56].mxu0 %v2059_v41 }
 0x51d   :  { %2191 = vmatprep.mubr.bf16.mxu0 %v2062_v0  ;;  %7582 = vmatpush3.bf16.msra.mxu1 %v7868_v34 }
 0x51e   :  { %7583 = vmatprep.subr.bf16.mxu1 %v7869_v43 }
 0x521   :  { %7584 = vmatpush3.bf16.msra.mxu1 %v7869_v43 }
 0x524   :  { %2192 = vmatmul.mubr.bf16.gmra.mrb[60].mxu0 %v2061_v12 }
 0x543   :  { %v1892_v19 = vpop.xlane.xlu1 %1891 }
 0x544   :  { %v1936_v27 = vmax.f32 %v1892_v19, 1e-20 }
 0x546   :  { %v1889_v31 = vpop.xlane.xlu0 %1888  ;;  %8086 = vrcp.f32 %v1936_v27 }
 0x547   :  { %v1935_v11 = vmax.f32 %v1889_v31, 1e-20 }
 0x549   :  { %8088 = vrcp.f32 %v1935_v11 }
 0x54b   :  { %v1898_v5 = vpop.xlane.xlu1 %1897 }
 0x54c   :  { %v1938_v16 = vmax.f32 %v1898_v5, 1e-20 }
 0x54e   :  { %v1895_v21 = vpop.xlane.xlu0 %1894  ;;  %8090 = vrcp.f32 %v1938_v16 }
 0x54f   :  { %v1937_v53 = vmax.f32 %v1895_v21, 1e-20 }
 0x550   :  { %v8087_v40 = vpop.eup %8086 }
 0x551   :  { %8092 = vrcp.f32 %v1937_v53  ;;  %v2026_v17 = vmul.f32 %v8087_v40, %v9924_v61  ;;  %v2025_v23 = vmul.f32 %v8087_v40, %v9919_v47 }
 0x553   :  { %v8089_v45 = vpop.eup %8088  ;;  %v1904_v20 = vpop.xlane.xlu1 %1903 }
 0x554   :  { %v1940_v30 = vmax.f32 %v1904_v20, 1e-20  ;;  %v2024_v52 = vmul.f32 %v8089_v45, %v9936_v32  ;;  %v2023_v59 = vmul.f32 %v8089_v45, %v9929_v29 }
 0x556   :  { %v1901_v57 = vpop.xlane.xlu0 %1900  ;;  %8094 = vrcp.f32 %v1940_v30  ;;  %v2064_v2 = vpack.c.bf16 %v2026_v17, %v2024_v52  ;;  %v2063_v8 = vpack.c.bf16 %v2025_v23, %v2023_v59 }
 0x557   :  { %v1939_v50 = vmax.f32 %v1901_v57, 1e-20 }
 0x558   :  { %v8091_v14 = vpop.eup %8090  ;;  %2199 = vmatprep.mubr.bf16.mxu0 %v2064_v2 }
 0x559   :  { %8096 = vrcp.f32 %v1939_v50  ;;  %2200 = vmatmul.mubr.bf16.gmra.mrb[64].mxu0 %v2063_v8  ;;  %v2030_v61 = vmul.f32 %v8091_v14, %v9948_v22  ;;  %v2029_v47 = vmul.f32 %v8091_v14, %v9943_v7 }
 0x55b   :  { %v8093_v10 = vpop.eup %8092  ;;  %v1910_v41 = vpop.xlane.xlu1 %1909 }
 0x55c   :  { %v1942_v0 = vmax.f32 %v1910_v41, 1e-20  ;;  %v2028_v32 = vmul.f32 %v8093_v10, %v9960_v48  ;;  %v2027_v29 = vmul.f32 %v8093_v10, %v9953_v26 }
 0x55e   :  { %v1907_v36 = vpop.xlane.xlu0 %1906  ;;  %8098 = vrcp.f32 %v1942_v0  ;;  %v2066_v35 = vpack.c.bf16 %v2030_v61, %v2028_v32  ;;  %v2065_v42 = vpack.c.bf16 %v2029_v47, %v2027_v29 }
 0x55f   :  { %v1941_v18 = vmax.f32 %v1907_v36, 1e-20 }
 0x560   :  { %v8095_v56 = vpop.eup %8094  ;;  %2207 = vmatprep.mubr.bf16.mxu0 %v2066_v35 }
 0x561   :  { %8100 = vrcp.f32 %v1941_v18  ;;  %2208 = vmatmul.mubr.bf16.gmra.mrb[68].mxu0 %v2065_v42  ;;  %v2034_v22 = vmul.f32 %v8095_v56, %v9970_v6  ;;  %v2033_v7 = vmul.f32 %v8095_v56, %v9967_v15 }
 0x563   :  { %v8097_v12 = vpop.eup %8096 }
 0x564   :  { %v2032_v25 = vmul.f32 %v8097_v12, %v9980_v28  ;;  %v2031_v48 = vmul.f32 %v8097_v12, %v9974_v46 }
 0x566   :  { %v2068_v62 = vpack.c.bf16 %v2034_v22, %v2032_v25  ;;  %v2067_v26 = vpack.c.bf16 %v2033_v7, %v2031_v48 }
 0x568   :  { %v8099_v39 = vpop.eup %8098  ;;  %2215 = vmatprep.mubr.bf16.mxu0 %v2068_v62 }
 0x569   :  { %2216 = vmatmul.mubr.bf16.gmra.mrb[72].mxu0 %v2067_v26  ;;  %v2038_v9 = vmul.f32 %v8099_v39, %v9990_v4  ;;  %v2037_v34 = vmul.f32 %v8099_v39, %v9987_v58 }
 0x56b   :  { %v8101_v43 = vpop.eup %8100 }
 0x56c   :  { %v2036_v19 = vmul.f32 %v8101_v43, %v10000_v13  ;;  %v2035_v6 = vmul.f32 %v8101_v43, %v9993_v49 }
 0x56e   :  { %v2070_v15 = vpack.c.bf16 %v2038_v9, %v2036_v19  ;;  %v2069_v27 = vpack.c.bf16 %v2037_v34, %v2035_v6 }
 0x570   :  { %2223 = vmatprep.mubr.bf16.mxu0 %v2070_v15 }
 0x571   :  { %2224 = vmatmul.mubr.bf16.gmra.mrb[76].mxu0 %v2069_v27 }
 0x586   :  { %v7009_v28 = vpop.f32.mrb[16].mxu0 }
 0x587   :  { %v7010_v46 = vpop.f32.mrb[17].mxu0 }
 0x588   :  { %v7011_v31 = vadd.f32 %v7010_v46, %v7009_v28  ;;  %v7012_v11 = vpop.f32.mrb[18].mxu0 }
 0x589   :  { %v7013_v5 = vpop.f32.mrb[19].mxu0 }
 0x58a   :  { %v2264_v16 = vmin.f32 %v7011_v31, 0.0  ;;  %v7014_v21 = vadd.f32 %v7013_v5, %v7012_v11  ;;  %vm2232_vm0 = vcmp.gt.f32.partialorder %v7011_v31, 0.0 }
 0x58c   :  { %v2296_v53 = vmul.f32 1.442695, %v2264_v16  ;;  %v2265_v4 = vmin.f32 %v7014_v21, 0.0  ;;  %vm2233_vm6 = vcmp.gt.f32.partialorder %v7014_v21, 0.0 }
 0x58e   :  { %8102 = vpow2.f32 %v2296_v53  ;;  %v2298_v58 = vmul.f32 1.442695, %v2265_v4  ;;  %v7015_v40 = vpop.f32.mrb[20].mxu0 }
 0x58f   :  { %v7016_v17 = vpop.f32.mrb[21].mxu0 }
 0x590   :  { %8104 = vpow2.f32 %v2298_v58  ;;  %v7017_v13 = vadd.f32 %v7016_v17, %v7015_v40  ;;  %v7018_v49 = vpop.f32.mrb[22].mxu0 }
 0x591   :  { %v7019_v23 = vpop.f32.mrb[23].mxu0 }
 0x592   :  { %v2266_v45 = vmin.f32 %v7017_v13, 0.0  ;;  %v7020_v20 = vadd.f32 %v7019_v23, %v7018_v49  ;;  %vm2234_vm8 = vcmp.gt.f32.partialorder %v7017_v13, 0.0 }
 0x594   :  { %v2300_v30 = vmul.f32 1.442695, %v2266_v45  ;;  %v2267_v52 = vmin.f32 %v7020_v20, 0.0  ;;  %vm2235_vm4 = vcmp.gt.f32.partialorder %v7020_v20, 0.0 }
 0x596   :  { %8106 = vpow2.f32 %v2300_v30  ;;  %v2302_v59 = vmul.f32 1.442695, %v2267_v52  ;;  %v7021_v57 = vpop.f32.mrb[24].mxu0 }
 0x597   :  { %v7022_v2 = vpop.f32.mrb[25].mxu0 }
 0x598   :  { %v8103_v8 = vpop.eup %8102  ;;  %8108 = vpow2.f32 %v2302_v59  ;;  %v7023_v50 = vadd.f32 %v7022_v2, %v7021_v57  ;;  %v7024_v14 = vpop.f32.mrb[26].mxu0 }
 0x599   :  { %v6823_v61 = vadd.f32 -1.0, %v8103_v8  ;;  %v7025_v47 = vpop.f32.mrb[27].mxu0 }
 0x59a   :  { %v8105_v10 = vpop.eup %8104  ;;  %v2268_v41 = vmin.f32 %v7023_v50, 0.0  ;;  %v7026_v0 = vadd.f32 %v7025_v47, %v7024_v14 }
 0x59b   :  { %v6824_v32 = vadd.f32 -1.0, %v8105_v10  ;;  %v2392_v35 = vsel %vm2232_vm0, %v7011_v31, %v6823_v61  ;;  %vm2236_vm0 = vcmp.gt.f32.partialorder %v7023_v50, 0.0 }
 0x59c   :  { %v2304_v29 = vmul.f32 1.442695, %v2268_v41  ;;  %v2269_v36 = vmin.f32 %v7026_v0, 0.0 }
 0x59d   :  { %v2393_v42 = vsel %vm2233_vm6, %v7014_v21, %v6824_v32  ;;  %vm2237_vm6 = vcmp.gt.f32.partialorder %v7026_v0, 0.0 }
 0x59e   :  { %8110 = vpow2.f32 %v2304_v29  ;;  %v2306_v18 = vmul.f32 1.442695, %v2269_v36  ;;  %v7027_v56 = vpop.f32.mrb[28].mxu0  ;;  %v2458_v22 = vpack.c.bf16 %v2393_v42, %v2392_v35 }
 0x59f   :  { %v7028_v7 = vpop.f32.mrb[29].mxu0 }
 0x5a0   :  { %v8107_v12 = vpop.eup %8106  ;;  %8112 = vpow2.f32 %v2306_v18  ;;  %v7029_v25 = vadd.f32 %v7028_v7, %v7027_v56  ;;  %v7030_v48 = vpop.f32.mrb[30].mxu0  ;;  %7585 = vmatprep.mubr.bf16.mxu1 %v2458_v22 }
 0x5a1   :  { %v6825_v62 = vadd.f32 -1.0, %v8107_v12  ;;  %v7031_v26 = vpop.f32.mrb[31].mxu0 }
 0x5a2   :  { %v8109_v39 = vpop.eup %8108  ;;  %v2270_v9 = vmin.f32 %v7029_v25, 0.0  ;;  %v7032_v34 = vadd.f32 %v7031_v26, %v7030_v48 }
 0x5a3   :  { %v6826_v43 = vadd.f32 -1.0, %v8109_v39  ;;  %v2394_v15 = vsel %vm2234_vm8, %v7017_v13, %v6825_v62 }
 0x5a4   :  { %v2308_v19 = vmul.f32 1.442695, %v2270_v9  ;;  %v2271_v6 = vmin.f32 %v7032_v34, 0.0  ;;  %vm2239_vm8 = vcmp.gt.f32.partialorder %v7032_v34, 0.0 }
 0x5a5   :  { %v2395_v27 = vsel %vm2235_vm4, %v7020_v20, %v6826_v43  ;;  %vm2238_vm4 = vcmp.gt.f32.partialorder %v7029_v25, 0.0 }
 0x5a6   :  { %v2459_v28 = vpack.c.bf16 %v2395_v27, %v2394_v15  ;;  %8114 = vpow2.f32 %v2308_v19  ;;  %v2310_v46 = vmul.f32 1.442695, %v2271_v6  ;;  %v7033_v31 = vpop.f32.mrb[32].mxu0 }
 0x5a7   :  { %v7034_v11 = vpop.f32.mrb[33].mxu0 }
 0x5a8   :  { %v8111_v5 = vpop.eup %8110  ;;  %8116 = vpow2.f32 %v2310_v46  ;;  %v7035_v16 = vadd.f32 %v7034_v11, %v7033_v31  ;;  %v7036_v21 = vpop.f32.mrb[34].mxu0  ;;  %7586 = vmatmul.mubr.bf16.vlgmr.msra.gmra.mrb[48].mxu1 %v2459_v28 }
 0x5a9   :  { %v6827_v53 = vadd.f32 -1.0, %v8111_v5  ;;  %v7037_v4 = vpop.f32.mrb[35].mxu0 }
 0x5aa   :  { %v8113_v58 = vpop.eup %8112  ;;  %v2272_v40 = vmin.f32 %v7035_v16, 0.0  ;;  %v7038_v17 = vadd.f32 %v7037_v4, %v7036_v21 }
 0x5ab   :  { %v6828_v49 = vadd.f32 -1.0, %v8113_v58  ;;  %v2396_v45 = vsel %vm2236_vm0, %v7023_v50, %v6827_v53  ;;  %vm2240_vm0 = vcmp.gt.f32.partialorder %v7035_v16, 0.0 }
 0x5ac   :  { %v2312_v13 = vmul.f32 1.442695, %v2272_v40  ;;  %v2273_v23 = vmin.f32 %v7038_v17, 0.0 }
 0x5ad   :  { %v2397_v20 = vsel %vm2237_vm6, %v7026_v0, %v6828_v49  ;;  %vm2241_vm6 = vcmp.gt.f32.partialorder %v7038_v17, 0.0 }
 0x5ae   :  { %8118 = vpow2.f32 %v2312_v13  ;;  %v2314_v30 = vmul.f32 1.442695, %v2273_v23  ;;  %v7039_v52 = vpop.f32.mrb[36].mxu0  ;;  %v2460_v59 = vpack.c.bf16 %v2397_v20, %v2396_v45 }
 0x5af   :  { %v7040_v57 = vpop.f32.mrb[37].mxu0 }
 0x5b0   :  { %v8115_v2 = vpop.eup %8114  ;;  %8120 = vpow2.f32 %v2314_v30  ;;  %v7041_v8 = vadd.f32 %v7040_v57, %v7039_v52  ;;  %v7042_v14 = vpop.f32.mrb[38].mxu0  ;;  %7589 = vmatprep.mubr.bf16.mxu1 %v2460_v59  ;;  %v7870_v30 = vld [vmem:[#allocation7 + $0x180] sm:$0xff]   ;;  %v7871_v52 = vld [vmem:[#allocation7 + $0x188] sm:$0xff]  }
 0x5b1   :  { %v6829_v61 = vadd.f32 -1.0, %v8115_v2  ;;  %v7043_v47 = vpop.f32.mrb[39].mxu0  ;;  %7617 = vmatprep.subr.bf16.mxu1 %v7870_v30 }
 0x5b2   :  { %v8117_v10 = vpop.eup %8116  ;;  %v2274_v41 = vmin.f32 %v7041_v8, 0.0  ;;  %v7044_v32 = vadd.f32 %v7043_v47, %v7042_v14  ;;  %7618 = vmatpush3.bf16.msra.mxu1 %v7870_v30 }
 0x5b3   :  { %v6830_v29 = vadd.f32 -1.0, %v8117_v10  ;;  %v2398_v36 = vsel %vm2238_vm4, %v7029_v25, %v6829_v61  ;;  %vm2242_vm4 = vcmp.gt.f32.partialorder %v7041_v8, 0.0  ;;  %7619 = vmatprep.subr.bf16.mxu1 %v7871_v52 }
 0x5b4   :  { %v2316_v50 = vmul.f32 1.442695, %v2274_v41  ;;  %v2275_v0 = vmin.f32 %v7044_v32, 0.0  ;;  %v7872_v41 = vld [vmem:[#allocation7 + $0x190] sm:$0xff]  }
 0x5b5   :  { %v2399_v35 = vsel %vm2239_vm8, %v7032_v34, %v6830_v29  ;;  %vm2243_vm8 = vcmp.gt.f32.partialorder %v7044_v32, 0.0 }
 0x5b6   :  { %8122 = vpow2.f32 %v2316_v50  ;;  %v2318_v42 = vmul.f32 1.442695, %v2275_v0  ;;  %v2461_v18 = vpack.c.bf16 %v2399_v35, %v2398_v36  ;;  %7620 = vmatpush3.bf16.msra.mxu1 %v7871_v52 }
 0x5b7   :  { %7621 = vmatprep.subr.bf16.mxu1 %v7872_v41 }
 0x5b8   :  { %v8119_v56 = vpop.eup %8118  ;;  %8124 = vpow2.f32 %v2318_v42  ;;  %7590 = vmatmul.mubr.bf16.gmra.mrb[52].mxu1 %v2461_v18 }
 0x5b9   :  { %v6831_v22 = vadd.f32 -1.0, %v8119_v56  ;;  %v7873_v56 = vld [vmem:[#allocation7 + $0x198] sm:$0xff]  }
 0x5ba   :  { %v8121_v7 = vpop.eup %8120  ;;  %7622 = vmatpush3.bf16.msra.mxu1 %v7872_v41 }
 0x5bb   :  { %v6832_v12 = vadd.f32 -1.0, %v8121_v7  ;;  %v2400_v48 = vsel %vm2240_vm0, %v7035_v16, %v6831_v22  ;;  %7623 = vmatprep.subr.bf16.mxu1 %v7873_v56 }
 0x5bd   :  { %v2401_v62 = vsel %vm2241_vm6, %v7038_v17, %v6832_v12 }
 0x5be   :  { %v2462_v26 = vpack.c.bf16 %v2401_v62, %v2400_v48  ;;  %7624 = vmatpush3.bf16.msra.mxu1 %v7873_v56 }
 0x5c0   :  { %v8123_v39 = vpop.eup %8122  ;;  %7593 = vmatprep.mubr.bf16.mxu1 %v2462_v26 }
 0x5c1   :  { %v6833_v9 = vadd.f32 -1.0, %v8123_v39 }
 0x5c2   :  { %v8125_v43 = vpop.eup %8124 }
 0x5c3   :  { %v6834_v25 = vadd.f32 -1.0, %v8125_v43  ;;  %v2402_v34 = vsel %vm2242_vm4, %v7041_v8, %v6833_v9 }
 0x5c5   :  { %v2403_v19 = vsel %vm2243_vm8, %v7044_v32, %v6834_v25  ;;  %v7874_v25 = vld [vmem:[#allocation7 + $0x1a0] sm:$0xff]  }
 0x5c6   :  { %v2463_v6 = vpack.c.bf16 %v2403_v19, %v2402_v34  ;;  %7625 = vmatprep.subr.bf16.mxu1 %v7874_v25 }
 0x5c7   :  { %7626 = vmatpush3.bf16.msra.mxu1 %v7874_v25 }
 0x5c8   :  { %7594 = vmatmul.mubr.bf16.gmra.mrb[56].mxu1 %v2463_v6 }
 0x5cf   :  { %v7045_v15 = vpop.f32.mrb[40].mxu0 }
 0x5d0   :  { %v7046_v27 = vpop.f32.mrb[41].mxu0 }
 0x5d1   :  { %v7047_v28 = vadd.f32 %v7046_v27, %v7045_v15  ;;  %v7048_v46 = vpop.f32.mrb[42].mxu0 }
 0x5d2   :  { %v7049_v31 = vpop.f32.mrb[43].mxu0 }
 0x5d3   :  { %v2276_v11 = vmin.f32 %v7047_v28, 0.0  ;;  %v7050_v5 = vadd.f32 %v7049_v31, %v7048_v46  ;;  %vm2244_vm0 = vcmp.gt.f32.partialorder %v7047_v28, 0.0 }
 0x5d5   :  { %v2320_v16 = vmul.f32 1.442695, %v2276_v11  ;;  %v2277_v21 = vmin.f32 %v7050_v5, 0.0  ;;  %vm2245_vm6 = vcmp.gt.f32.partialorder %v7050_v5, 0.0 }
 0x5d7   :  { %8126 = vpow2.f32 %v2320_v16  ;;  %v2322_v53 = vmul.f32 1.442695, %v2277_v21  ;;  %v7051_v4 = vpop.f32.mrb[44].mxu0  ;;  %v7875_v21 = vld [vmem:[#allocation7 + $0x1a8] sm:$0xff]  }
 0x5d8   :  { %v7052_v58 = vpop.f32.mrb[45].mxu0  ;;  %7627 = vmatprep.subr.bf16.mxu1 %v7875_v21 }
 0x5d9   :  { %8128 = vpow2.f32 %v2322_v53  ;;  %v7053_v40 = vadd.f32 %v7052_v58, %v7051_v4  ;;  %v7054_v17 = vpop.f32.mrb[46].mxu0  ;;  %7628 = vmatpush3.bf16.msra.mxu1 %v7875_v21 }
 0x5da   :  { %v7055_v49 = vpop.f32.mrb[47].mxu0 }
 0x5db   :  { %v2278_v13 = vmin.f32 %v7053_v40, 0.0  ;;  %v7056_v23 = vadd.f32 %v7055_v49, %v7054_v17  ;;  %vm2246_vm4 = vcmp.gt.f32.partialorder %v7053_v40, 0.0 }
 0x5dd   :  { %v2324_v45 = vmul.f32 1.442695, %v2278_v13  ;;  %v2279_v20 = vmin.f32 %v7056_v23, 0.0  ;;  %vm2247_vm8 = vcmp.gt.f32.partialorder %v7056_v23, 0.0 }
 0x5df   :  { %8130 = vpow2.f32 %v2324_v45  ;;  %v2326_v59 = vmul.f32 1.442695, %v2279_v20  ;;  %v7057_v57 = vpop.f32.mrb[48].mxu0 }
 0x5e0   :  { %v7058_v2 = vpop.f32.mrb[49].mxu0 }
 0x5e1   :  { %v8127_v8 = vpop.eup %8126  ;;  %8132 = vpow2.f32 %v2326_v59  ;;  %v10050_v14 = vadd.f32 %v7058_v2, %v7057_v57  ;;  %v7060_v61 = vpop.f32.mrb[50].mxu0 }
 0x5e2   :  { %v6835_v47 = vadd.f32 -1.0, %v8127_v8  ;;  %v7061_v10 = vpop.f32.mrb[51].mxu0 }
 0x5e3   :  { %v8129_v32 = vpop.eup %8128  ;;  %v2280_v29 = vmin.f32 %v10050_v14, 0.0  ;;  %v10053_v50 = vadd.f32 %v7061_v10, %v7060_v61 }
 0x5e4   :  { %v6836_v0 = vadd.f32 -1.0, %v8129_v32  ;;  %v2404_v42 = vsel %vm2244_vm0, %v7047_v28, %v6835_v47  ;;  %vm2248_vm0 = vcmp.gt.f32.partialorder %v10050_v14, 0.0 }
 0x5e5   :  { %v2328_v36 = vmul.f32 1.442695, %v2280_v29  ;;  %v2281_v35 = vmin.f32 %v10053_v50, 0.0 }
 0x5e6   :  { %v2405_v18 = vsel %vm2245_vm6, %v7050_v5, %v6836_v0  ;;  %vm2249_vm6 = vcmp.gt.f32.partialorder %v10053_v50, 0.0 }
 0x5e7   :  { %8134 = vpow2.f32 %v2328_v36  ;;  %v2330_v22 = vmul.f32 1.442695, %v2281_v35  ;;  %v7063_v7 = vpop.f32.mrb[52].mxu0  ;;  %v2464_v12 = vpack.c.bf16 %v2405_v18, %v2404_v42 }
 0x5e8   :  { %v7064_v48 = vpop.f32.mrb[53].mxu0 }
 0x5e9   :  { %v8131_v62 = vpop.eup %8130  ;;  %8136 = vpow2.f32 %v2330_v22  ;;  %v10056_v26 = vadd.f32 %v7064_v48, %v7063_v7  ;;  %v7066_v39 = vpop.f32.mrb[54].mxu0  ;;  %7597 = vmatprep.mubr.bf16.mxu1 %v2464_v12 }
 0x5ea   :  { %v6837_v9 = vadd.f32 -1.0, %v8131_v62  ;;  %v7067_v43 = vpop.f32.mrb[55].mxu0  ;;  %v7877_v62 = vld [vmem:[#allocation7 + $0x1b8] sm:$0xff]  }
 0x5eb   :  { %v8133_v34 = vpop.eup %8132  ;;  %v2282_v19 = vmin.f32 %v10056_v26, 0.0  ;;  %v7068_v6 = vadd.f32 %v7067_v43, %v7066_v39 }
 0x5ec   :  { %v6838_v15 = vadd.f32 -1.0, %v8133_v34  ;;  %v2406_v46 = vsel %vm2246_vm4, %v7053_v40, %v6837_v9  ;;  %v7876_v40 = vld [vmem:[#allocation7 + $0x1b0] sm:$0xff]   ;;  %vm2250_vm4 = vcmp.gt.f32.partialorder %v10056_v26, 0.0 }
 0x5ed   :  { %v2332_v27 = vmul.f32 1.442695, %v2282_v19  ;;  %v2283_v28 = vmin.f32 %v7068_v6, 0.0  ;;  %7629 = vmatprep.subr.bf16.mxu1 %v7876_v40 }
 0x5ee   :  { %v2407_v31 = vsel %vm2247_vm8, %v7056_v23, %v6838_v15  ;;  %7630 = vmatpush3.bf16.msra.mxu1 %v7876_v40  ;;  %vm2251_vm8 = vcmp.gt.f32.partialorder %v7068_v6, 0.0 }
 0x5ef   :  { %8138 = vpow2.f32 %v2332_v27  ;;  %v2334_v11 = vmul.f32 1.442695, %v2283_v28  ;;  %v7069_v5 = vpop.f32.mrb[56].mxu0  ;;  %v2465_v16 = vpack.c.bf16 %v2407_v31, %v2406_v46  ;;  %7631 = vmatprep.subr.bf16.mxu1 %v7877_v62 }
 0x5f0   :  { %v7070_v53 = vpop.f32.mrb[57].mxu0 }
 0x5f1   :  { %v8135_v4 = vpop.eup %8134  ;;  %8140 = vpow2.f32 %v2334_v11  ;;  %v7071_v58 = vadd.f32 %v7070_v53, %v7069_v5  ;;  %v7072_v17 = vpop.f32.mrb[58].mxu0  ;;  %7598 = vmatmul.mubr.bf16.gmra.mrb[60].mxu1 %v2465_v16 }
 0x5f2   :  { %v6839_v49 = vadd.f32 -1.0, %v8135_v4  ;;  %v7073_v13 = vpop.f32.mrb[59].mxu0  ;;  %7632 = vmatpush3.bf16.msra.mxu1 %v7877_v62 }
 0x5f3   :  { %v8137_v45 = vpop.eup %8136  ;;  %v2284_v20 = vmin.f32 %v7071_v58, 0.0  ;;  %v7074_v30 = vadd.f32 %v7073_v13, %v7072_v17 }
 0x5f4   :  { %v6840_v23 = vadd.f32 -1.0, %v8137_v45  ;;  %v2408_v57 = vsel %vm2248_vm0, %v10050_v14, %v6839_v49  ;;  %vm2252_vm0 = vcmp.gt.f32.partialorder %v7071_v58, 0.0 }
 0x5f5   :  { %v2336_v52 = vmul.f32 1.442695, %v2284_v20  ;;  %v2285_v59 = vmin.f32 %v7074_v30, 0.0 }
 0x5f6   :  { %v2409_v2 = vsel %vm2249_vm6, %v10053_v50, %v6840_v23  ;;  %vm2253_vm6 = vcmp.gt.f32.partialorder %v7074_v30, 0.0 }
 0x5f7   :  { %8142 = vpow2.f32 %v2336_v52  ;;  %v2338_v8 = vmul.f32 1.442695, %v2285_v59  ;;  %v7075_v61 = vpop.f32.mrb[60].mxu0  ;;  %v2466_v47 = vpack.c.bf16 %v2409_v2, %v2408_v57 }
 0x5f8   :  { %v7076_v10 = vpop.f32.mrb[61].mxu0 }
 0x5f9   :  { %v8139_v41 = vpop.eup %8138  ;;  %8144 = vpow2.f32 %v2338_v8  ;;  %v7077_v32 = vadd.f32 %v7076_v10, %v7075_v61  ;;  %v7078_v29 = vpop.f32.mrb[62].mxu0  ;;  %7601 = vmatprep.mubr.bf16.mxu1 %v2466_v47 }
 0x5fa   :  { %v6841_v0 = vadd.f32 -1.0, %v8139_v41  ;;  %v7079_v36 = vpop.f32.mrb[63].mxu0 }
 0x5fb   :  { %v8141_v35 = vpop.eup %8140  ;;  %v2286_v42 = vmin.f32 %v7077_v32, 0.0  ;;  %v7080_v14 = vadd.f32 %v7079_v36, %v7078_v29 }
 0x5fc   :  { %v6842_v18 = vadd.f32 -1.0, %v8141_v35  ;;  %v2410_v22 = vsel %vm2250_vm4, %v10056_v26, %v6841_v0  ;;  %vm2254_vm4 = vcmp.gt.f32.partialorder %v7077_v32, 0.0 }
 0x5fd   :  { %v2340_v50 = vmul.f32 1.442695, %v2286_v42  ;;  %v2287_v56 = vmin.f32 %v7080_v14, 0.0 }
 0x5fe   :  { %v2411_v7 = vsel %vm2251_vm8, %v7068_v6, %v6842_v18  ;;  %vm2255_vm8 = vcmp.gt.f32.partialorder %v7080_v14, 0.0 }
 0x5ff   :  { %8146 = vpow2.f32 %v2340_v50  ;;  %v2342_v12 = vmul.f32 1.442695, %v2287_v56  ;;  %v2467_v48 = vpack.c.bf16 %v2411_v7, %v2410_v22 }
 0x601   :  { %v8143_v39 = vpop.eup %8142  ;;  %8148 = vpow2.f32 %v2342_v12  ;;  %7602 = vmatmul.mubr.bf16.gmra.mrb[64].mxu1 %v2467_v48 }
 0x602   :  { %v6843_v9 = vadd.f32 -1.0, %v8143_v39 }
 0x603   :  { %v8145_v43 = vpop.eup %8144 }
 0x604   :  { %v6844_v25 = vadd.f32 -1.0, %v8145_v43  ;;  %v2412_v34 = vsel %vm2252_vm0, %v7071_v58, %v6843_v9 }
 0x606   :  { %v2413_v19 = vsel %vm2253_vm6, %v7074_v30, %v6844_v25 }
 0x607   :  { %v2468_v15 = vpack.c.bf16 %v2413_v19, %v2412_v34 }
 0x609   :  { %v8147_v27 = vpop.eup %8146  ;;  %7605 = vmatprep.mubr.bf16.mxu1 %v2468_v15 }
 0x60a   :  { %v6845_v26 = vadd.f32 -1.0, %v8147_v27 }
 0x60b   :  { %v8149_v6 = vpop.eup %8148 }
 0x60c   :  { %v6846_v28 = vadd.f32 -1.0, %v8149_v6  ;;  %v2414_v46 = vsel %vm2254_vm4, %v7077_v32, %v6845_v26 }
 0x60e   :  { %v2415_v31 = vsel %vm2255_vm8, %v7080_v14, %v6846_v28 }
 0x60f   :  { %v2469_v11 = vpack.c.bf16 %v2415_v31, %v2414_v46 }
 0x611   :  { %7606 = vmatmul.mubr.bf16.gmra.mrb[68].mxu1 %v2469_v11 }
 0x62c   :  { %v7081_v5 = vpop.f32.mrb[64].mxu0 }
 0x62d   :  { %v7082_v16 = vpop.f32.mrb[65].mxu0 }
 0x62e   :  { %v7083_v21 = vadd.f32 %v7082_v16, %v7081_v5  ;;  %v7084_v53 = vpop.f32.mrb[66].mxu0 }
 0x62f   :  { %v7085_v4 = vpop.f32.mrb[67].mxu0 }
 0x630   :  { %v2288_v17 = vmin.f32 %v7083_v21, 0.0  ;;  %v7086_v58 = vadd.f32 %v7085_v4, %v7084_v53  ;;  %vm2256_vm0 = vcmp.gt.f32.partialorder %v7083_v21, 0.0 }
 0x632   :  { %v2344_v49 = vmul.f32 1.442695, %v2288_v17  ;;  %v2289_v13 = vmin.f32 %v7086_v58, 0.0  ;;  %vm2257_vm6 = vcmp.gt.f32.partialorder %v7086_v58, 0.0 }
 0x634   :  { %8150 = vpow2.f32 %v2344_v49  ;;  %v2346_v45 = vmul.f32 1.442695, %v2289_v13  ;;  %v7087_v20 = vpop.f32.mrb[68].mxu0 }
 0x635   :  { %v7088_v30 = vpop.f32.mrb[69].mxu0 }
 0x636   :  { %8152 = vpow2.f32 %v2346_v45  ;;  %v7089_v40 = vadd.f32 %v7088_v30, %v7087_v20  ;;  %v7090_v23 = vpop.f32.mrb[70].mxu0 }
 0x637   :  { %v7091_v52 = vpop.f32.mrb[71].mxu0 }
 0x638   :  { %v2290_v59 = vmin.f32 %v7089_v40, 0.0  ;;  %v7092_v57 = vadd.f32 %v7091_v52, %v7090_v23  ;;  %vm2258_vm4 = vcmp.gt.f32.partialorder %v7089_v40, 0.0 }
 0x63a   :  { %v2348_v2 = vmul.f32 1.442695, %v2290_v59  ;;  %v2291_v8 = vmin.f32 %v7092_v57, 0.0  ;;  %vm2259_vm8 = vcmp.gt.f32.partialorder %v7092_v57, 0.0 }
 0x63c   :  { %8154 = vpow2.f32 %v2348_v2  ;;  %v2350_v61 = vmul.f32 1.442695, %v2291_v8  ;;  %v7093_v47 = vpop.f32.mrb[72].mxu0 }
 0x63d   :  { %v7094_v10 = vpop.f32.mrb[73].mxu0 }
 0x63e   :  { %v8151_v41 = vpop.eup %8150  ;;  %8156 = vpow2.f32 %v2350_v61  ;;  %v7095_v32 = vadd.f32 %v7094_v10, %v7093_v47  ;;  %v7096_v29 = vpop.f32.mrb[74].mxu0 }
 0x63f   :  { %v6847_v0 = vadd.f32 -1.0, %v8151_v41  ;;  %v7097_v36 = vpop.f32.mrb[75].mxu0 }
 0x640   :  { %v8153_v35 = vpop.eup %8152  ;;  %v2292_v42 = vmin.f32 %v7095_v32, 0.0  ;;  %v7098_v14 = vadd.f32 %v7097_v36, %v7096_v29 }
 0x641   :  { %v6848_v18 = vadd.f32 -1.0, %v8153_v35  ;;  %v2416_v22 = vsel %vm2256_vm0, %v7083_v21, %v6847_v0  ;;  %vm2260_vm0 = vcmp.gt.f32.partialorder %v7095_v32, 0.0 }
 0x642   :  { %v2352_v50 = vmul.f32 1.442695, %v2292_v42  ;;  %v2293_v56 = vmin.f32 %v7098_v14, 0.0 }
 0x643   :  { %v2417_v7 = vsel %vm2257_vm6, %v7086_v58, %v6848_v18  ;;  %vm2261_vm6 = vcmp.gt.f32.partialorder %v7098_v14, 0.0 }
 0x644   :  { %8158 = vpow2.f32 %v2352_v50  ;;  %v2354_v12 = vmul.f32 1.442695, %v2293_v56  ;;  %v7099_v48 = vpop.f32.mrb[76].mxu0  ;;  %v2470_v62 = vpack.c.bf16 %v2417_v7, %v2416_v22 }
 0x645   :  { %v7100_v39 = vpop.f32.mrb[77].mxu0 }
 0x646   :  { %v8155_v9 = vpop.eup %8154  ;;  %8160 = vpow2.f32 %v2354_v12  ;;  %v7101_v43 = vadd.f32 %v7100_v39, %v7099_v48  ;;  %v7102_v25 = vpop.f32.mrb[78].mxu0  ;;  %7609 = vmatprep.mubr.bf16.mxu1 %v2470_v62 }
 0x647   :  { %v6849_v34 = vadd.f32 -1.0, %v8155_v9  ;;  %v7103_v19 = vpop.f32.mrb[79].mxu0 }
 0x648   :  { %v8157_v15 = vpop.eup %8156  ;;  %v2294_v27 = vmin.f32 %v7101_v43, 0.0  ;;  %v7104_v26 = vadd.f32 %v7103_v19, %v7102_v25 }
 0x649   :  { %v6850_v6 = vadd.f32 -1.0, %v8157_v15  ;;  %v2418_v31 = vsel %vm2258_vm4, %v7089_v40, %v6849_v34  ;;  %vm2262_vm4 = vcmp.gt.f32.partialorder %v7101_v43, 0.0 }
 0x64a   :  { %v2356_v28 = vmul.f32 1.442695, %v2294_v27  ;;  %v2295_v46 = vmin.f32 %v7104_v26, 0.0 }
 0x64b   :  { %v2419_v11 = vsel %vm2259_vm8, %v7092_v57, %v6850_v6  ;;  %vm2263_vm8 = vcmp.gt.f32.partialorder %v7104_v26, 0.0 }
 0x64c   :  { %8162 = vpow2.f32 %v2356_v28  ;;  %v2358_v5 = vmul.f32 1.442695, %v2295_v46  ;;  %v2471_v16 = vpack.c.bf16 %v2419_v11, %v2418_v31 }
 0x64e   :  { %v8159_v21 = vpop.eup %8158  ;;  %8164 = vpow2.f32 %v2358_v5  ;;  %7610 = vmatmul.mubr.bf16.gmra.mrb[72].mxu1 %v2471_v16 }
 0x64f   :  { %v6851_v53 = vadd.f32 -1.0, %v8159_v21 }
 0x650   :  { %v8161_v4 = vpop.eup %8160 }
 0x651   :  { %v6852_v17 = vadd.f32 -1.0, %v8161_v4  ;;  %v2420_v58 = vsel %vm2260_vm0, %v7095_v32, %v6851_v53 }
 0x653   :  { %v2421_v49 = vsel %vm2261_vm6, %v7098_v14, %v6852_v17 }
 0x654   :  { %v2472_v13 = vpack.c.bf16 %v2421_v49, %v2420_v58 }
 0x656   :  { %v8163_v45 = vpop.eup %8162  ;;  %7613 = vmatprep.mubr.bf16.mxu1 %v2472_v13 }
 0x657   :  { %v6853_v20 = vadd.f32 -1.0, %v8163_v45 }
 0x658   :  { %v8165_v30 = vpop.eup %8164 }
 0x659   :  { %v6854_v40 = vadd.f32 -1.0, %v8165_v30  ;;  %v2422_v23 = vsel %vm2262_vm4, %v7101_v43, %v6853_v20 }
 0x65b   :  { %v2423_v52 = vsel %vm2263_vm8, %v7104_v26, %v6854_v40 }
 0x65c   :  { %v2473_v59 = vpack.c.bf16 %v2423_v52, %v2422_v23 }
 0x65e   :  { %7614 = vmatmul.mubr.bf16.gmra.mrb[76].mxu1 %v2473_v59 }
 0x67b   :  { %v7587_v57 = vpop.f32.mrb[48].mxu1 }
 0x67c   :  { %v2556_v2 = vpop.f32.mrb[49].mxu1 }
 0x67d   :  { %v7588_v8 = vpop.f32.mrb[50].mxu1 }
 0x67e   :  { %v2684_v61 = vpack.c.bf16 %v7588_v8, %v7587_v57  ;;  %v2559_v47 = vpop.f32.mrb[51].mxu1 }
 0x67f   :  { %v2683_v10 = vpack.c.bf16 %v2559_v47, %v2556_v2 }
 0x681   :  { %7633 = vmatprep.mubr.bf16.mxu1 %v2683_v10 }
 0x682   :  { %7634 = vmatmul.mubr.bf16.vlgmr.msra.gmra.mrb[80].mxu1 %v2684_v61 }
 0x68b   :  { %v7591_v41 = vpop.f32.mrb[52].mxu1 }
 0x68c   :  { %v2572_v32 = vpop.f32.mrb[53].mxu1 }
 0x68d   :  { %v7592_v29 = vpop.f32.mrb[54].mxu1 }
 0x68e   :  { %v2686_v0 = vpack.c.bf16 %v7592_v29, %v7591_v41  ;;  %v2575_v36 = vpop.f32.mrb[55].mxu1 }
 0x68f   :  { %v2685_v35 = vpack.c.bf16 %v2575_v36, %v2572_v32 }
 0x691   :  { %7637 = vmatprep.mubr.bf16.mxu1 %v2685_v35 }
 0x692   :  { %7638 = vmatmul.mubr.bf16.gmra.mrb[84].mxu1 %v2686_v0 }
 0x69b   :  { %v7595_v42 = vpop.f32.mrb[56].mxu1 }
 0x69c   :  { %v2588_v14 = vpop.f32.mrb[57].mxu1 }
 0x69d   :  { %v7596_v18 = vpop.f32.mrb[58].mxu1 }
 0x69e   :  { %v2688_v50 = vpack.c.bf16 %v7596_v18, %v7595_v42  ;;  %v2591_v56 = vpop.f32.mrb[59].mxu1 }
 0x69f   :  { %v2687_v22 = vpack.c.bf16 %v2591_v56, %v2588_v14 }
 0x6a1   :  { %7641 = vmatprep.mubr.bf16.mxu1 %v2687_v22 }
 0x6a2   :  { %7642 = vmatmul.mubr.bf16.gmra.mrb[88].mxu1 %v2688_v50 }
 0x6c4   :  { %v7599_v7 = vpop.f32.mrb[60].mxu1 }
 0x6c5   :  { %v2604_v12 = vpop.f32.mrb[61].mxu1 }
 0x6c6   :  { %v7600_v48 = vpop.f32.mrb[62].mxu1 }
 0x6c7   :  { %v2690_v62 = vpack.c.bf16 %v7600_v48, %v7599_v7  ;;  %v2607_v39 = vpop.f32.mrb[63].mxu1 }
 0x6c8   :  { %v2689_v9 = vpack.c.bf16 %v2607_v39, %v2604_v12 }
 0x6ca   :  { %7645 = vmatprep.mubr.bf16.mxu1 %v2689_v9 }
 0x6cb   :  { %7646 = vmatmul.mubr.bf16.gmra.mrb[92].mxu1 %v2690_v62 }
 0x6d4   :  { %v7603_v43 = vpop.f32.mrb[64].mxu1 }
 0x6d5   :  { %v2620_v25 = vpop.f32.mrb[65].mxu1 }
 0x6d6   :  { %v7604_v34 = vpop.f32.mrb[66].mxu1 }
 0x6d7   :  { %v2692_v19 = vpack.c.bf16 %v7604_v34, %v7603_v43  ;;  %v2623_v15 = vpop.f32.mrb[67].mxu1 }
 0x6d8   :  { %v2691_v27 = vpack.c.bf16 %v2623_v15, %v2620_v25 }
 0x6da   :  { %7649 = vmatprep.mubr.bf16.mxu1 %v2691_v27  ;;  %7153 = vmatprep.subr.bf16.mxu0 %v2691_v27 }
 0x6db   :  { %7650 = vmatmul.mubr.bf16.gmra.mrb[96].mxu1 %v2692_v19  ;;  %7154 = vmatpush3.bf16.msra.mxu0 %v2683_v10 }
 0x6dc   :  { %7155 = vmatprep.subr.bf16.mxu0 %v2692_v19 }
 0x6df   :  { %7156 = vmatpush3.bf16.msra.mxu0 %v2684_v61 }
 0x6e4   :  { %v7607_v26 = vpop.f32.mrb[68].mxu1 }
 0x6e5   :  { %v2636_v6 = vpop.f32.mrb[69].mxu1 }
 0x6e6   :  { %v7608_v28 = vpop.f32.mrb[70].mxu1 }
 0x6e7   :  { %v2694_v46 = vpack.c.bf16 %v7608_v28, %v7607_v26  ;;  %v2639_v31 = vpop.f32.mrb[71].mxu1 }
 0x6e8   :  { %v2693_v11 = vpack.c.bf16 %v2639_v31, %v2636_v6 }
 0x6ea   :  { %7653 = vmatprep.mubr.bf16.mxu1 %v2693_v11  ;;  %7157 = vmatprep.subr.bf16.mxu0 %v2693_v11 }
 0x6eb   :  { %7654 = vmatmul.mubr.bf16.gmra.mrb[100].mxu1 %v2694_v46  ;;  %7158 = vmatpush3.bf16.msra.mxu0 %v2685_v35 }
 0x6ec   :  { %7159 = vmatprep.subr.bf16.mxu0 %v2694_v46 }
 0x6ef   :  { %7160 = vmatpush3.bf16.msra.mxu0 %v2686_v0 }
 0x721   :  { %v7611_v5 = vpop.f32.mrb[72].mxu1 }
 0x722   :  { %v2652_v16 = vpop.f32.mrb[73].mxu1 }
 0x723   :  { %v7612_v21 = vpop.f32.mrb[74].mxu1 }
 0x724   :  { %v2696_v53 = vpack.c.bf16 %v7612_v21, %v7611_v5  ;;  %v2655_v4 = vpop.f32.mrb[75].mxu1 }
 0x725   :  { %v2695_v17 = vpack.c.bf16 %v2655_v4, %v2652_v16 }
 0x727   :  { %7657 = vmatprep.mubr.bf16.mxu1 %v2695_v17  ;;  %7161 = vmatprep.subr.bf16.mxu0 %v2695_v17 }
 0x728   :  { %7658 = vmatmul.mubr.bf16.gmra.mrb[104].mxu1 %v2696_v53  ;;  %7162 = vmatpush3.bf16.msra.mxu0 %v2687_v22 }
 0x729   :  { %7163 = vmatprep.subr.bf16.mxu0 %v2696_v53 }
 0x72c   :  { %7164 = vmatpush3.bf16.msra.mxu0 %v2688_v50 }
 0x731   :  { %v7615_v58 = vpop.f32.mrb[76].mxu1 }
 0x732   :  { %v2668_v49 = vpop.f32.mrb[77].mxu1 }
 0x733   :  { %v7616_v13 = vpop.f32.mrb[78].mxu1 }
 0x734   :  { %v2698_v45 = vpack.c.bf16 %v7616_v13, %v7615_v58  ;;  %v2671_v20 = vpop.f32.mrb[79].mxu1 }
 0x735   :  { %v2697_v30 = vpack.c.bf16 %v2671_v20, %v2668_v49 }
 0x737   :  { %7661 = vmatprep.mubr.bf16.mxu1 %v2697_v30  ;;  %7165 = vmatprep.subr.bf16.mxu0 %v2697_v30 }
 0x738   :  { %7662 = vmatmul.mubr.bf16.gmra.mrb[108].mxu1 %v2698_v45  ;;  %7166 = vmatpush3.bf16.msra.mxu0 %v2689_v9 }
 0x739   :  { %7167 = vmatprep.subr.bf16.mxu0 %v2698_v45 }
 0x73c   :  { %7168 = vmatpush3.bf16.msra.mxu0 %v2690_v62 }
 0x755   :  { %v7635_v40 = vpop.f32.mrb[80].mxu1 }
 0x756   :  { %2944 = vrot.lane.b32.xlu1 %v7635_v40, %s8716_s2  ;;  %v2781_v23 = vpop.f32.mrb[81].mxu1 }
 0x757   :  { %2940 = vrot.lane.b32.xlu0 %v2781_v23, %s8716_s2  ;;  %v7636_v52 = vpop.f32.mrb[82].mxu1 }
 0x758   :  { %v2784_v59 = vpop.f32.mrb[83].mxu1 }
 0x75a   :  { %3109 = vperm.xlu1 %7828, %v7635_v40  }
 0x75b   :  { %3113 = vperm.xlu0 %7829, %v7636_v52  }
 0x75e   :  { %3101 = vperm.xlu1 %7828, %v2781_v23  }
 0x75f   :  { %3105 = vperm.xlu0 %7829, %v2784_v59  }
 0x762   :  { %2946 = vrot.lane.b32.xlu1 %v7636_v52, %s8716_s2 }
 0x765   :  { %v7639_v57 = vpop.f32.mrb[84].mxu1 }
 0x766   :  { %2942 = vrot.lane.b32.xlu1 %v2784_v59, %s8716_s2  ;;  %v2797_v2 = vpop.f32.mrb[85].mxu1 }
 0x767   :  { %v7640_v8 = vpop.f32.mrb[86].mxu1 }
 0x768   :  { %3129 = vperm.xlu0 %7829, %v7640_v8   ;;  %v2800_v61 = vpop.f32.mrb[87].mxu1 }
 0x76a   :  { %2952 = vrot.lane.b32.xlu1 %v7639_v57, %s8716_s2 }
 0x76c   :  { %3121 = vperm.xlu0 %7829, %v2800_v61  }
 0x76e   :  { %3125 = vperm.xlu1 %7828, %v7639_v57  }
 0x772   :  { %2948 = vrot.lane.b32.xlu1 %v2797_v2, %s8716_s2 }
 0x775   :  { %v7643_v47 = vpop.f32.mrb[88].mxu1 }
 0x776   :  { %3117 = vperm.xlu1 %7828, %v2797_v2   ;;  %v2813_v10 = vpop.f32.mrb[89].mxu1 }
 0x777   :  { %3133 = vperm.xlu0 %7829, %v2813_v10   ;;  %v7644_v41 = vpop.f32.mrb[90].mxu1 }
 0x778   :  { %v2816_v32 = vpop.f32.mrb[91].mxu1 }
 0x77a   :  { %2954 = vrot.lane.b32.xlu1 %v7640_v8, %s8716_s2 }
 0x77b   :  { %3145 = vperm.xlu0 %7829, %v7644_v41  }
 0x77e   :  { %2950 = vrot.lane.b32.xlu1 %v2800_v61, %s8716_s2 }
 0x782   :  { %2960 = vrot.lane.b32.xlu1 %v7643_v47, %s8716_s2 }
 0x786   :  { %3141 = vperm.xlu1 %7828, %v7643_v47  }
 0x78a   :  { %2956 = vrot.lane.b32.xlu1 %v2813_v10, %s8716_s2 }
 0x78e   :  { %2962 = vrot.lane.b32.xlu1 %v7644_v41, %s8716_s2 }
 0x792   :  { %2958 = vrot.lane.b32.xlu1 %v2816_v32, %s8716_s2 }
 0x796   :  { %3137 = vperm.xlu1 %7828, %v2816_v32  }
 0x79e   :  { %v7647_v29 = vpop.f32.mrb[92].mxu1 }
 0x79f   :  { %2968 = vrot.lane.b32.xlu1 %v7647_v29, %s8716_s2  ;;  %v2829_v0 = vpop.f32.mrb[93].mxu1 }
 0x7a0   :  { %v7648_v36 = vpop.f32.mrb[94].mxu1 }
 0x7a1   :  { %3161 = vperm.xlu0 %7829, %v7648_v36   ;;  %v2832_v35 = vpop.f32.mrb[95].mxu1 }
 0x7a3   :  { %3157 = vperm.xlu1 %7828, %v7647_v29  }
 0x7a5   :  { %3153 = vperm.xlu0 %7829, %v2832_v35  }
 0x7a7   :  { %2964 = vrot.lane.b32.xlu1 %v2829_v0, %s8716_s2 }
 0x7ab   :  { %3149 = vperm.xlu1 %7828, %v2829_v0  }
 0x7ae   :  { %v7651_v42 = vpop.f32.mrb[96].mxu1 }
 0x7af   :  { %2970 = vrot.lane.b32.xlu1 %v7648_v36, %s8716_s2  ;;  %2976 = vrot.lane.b32.xlu0 %v7651_v42, %s8716_s2  ;;  %v2845_v14 = vpop.f32.mrb[97].mxu1 }
 0x7b0   :  { %v7652_v18 = vpop.f32.mrb[98].mxu1 }
 0x7b1   :  { %v2848_v50 = vpop.f32.mrb[99].mxu1 }
 0x7b3   :  { %2966 = vrot.lane.b32.xlu1 %v2832_v35, %s8716_s2  ;;  %2978 = vrot.lane.b32.xlu0 %v7652_v18, %s8716_s2 }
 0x7b7   :  { %3173 = vperm.xlu1 %7828, %v7651_v42   ;;  %3177 = vperm.xlu0 %7829, %v7652_v18  }
 0x7bb   :  { %2972 = vrot.lane.b32.xlu1 %v2845_v14, %s8716_s2  ;;  %2974 = vrot.lane.b32.xlu0 %v2848_v50, %s8716_s2 }
 0x7be   :  { %v7655_v56 = vpop.f32.mrb[100].mxu1 }
 0x7bf   :  { %3165 = vperm.xlu1 %7828, %v2845_v14   ;;  %3169 = vperm.xlu0 %7829, %v2848_v50   ;;  %v2861_v22 = vpop.f32.mrb[101].mxu1 }
 0x7c0   :  { %v7656_v7 = vpop.f32.mrb[102].mxu1 }
 0x7c1   :  { %v2864_v12 = vpop.f32.mrb[103].mxu1 }
 0x7c3   :  { %2984 = vrot.lane.b32.xlu0 %v7655_v56, %s8716_s2  ;;  %3193 = vperm.xlu1 %7828, %v7656_v7  }
 0x7c7   :  { %3189 = vperm.xlu0 %7829, %v7655_v56   ;;  %3185 = vperm.xlu1 %7828, %v2864_v12  }
 0x7c8   :  { %v2945_v48 = vpop.permute.xlu1 %2944 }
 0x7c9   :  { %v2941_v31 = vpop.permute.xlu0 %2940 }
 0x7cb   :  { %2980 = vrot.lane.b32.xlu0 %v2861_v22, %s8716_s2 }
 0x7cf   :  { %3181 = vperm.xlu0 %7829, %v2861_v22  }
 0x7d3   :  { %2986 = vrot.lane.b32.xlu0 %v7656_v7, %s8716_s2 }
 0x7d7   :  { %2982 = vrot.lane.b32.xlu0 %v2864_v12, %s8716_s2 }
 0x7d9   :  { %v10089_v62 = vpop.permute.xlu1 %3109 }
 0x7da   :  { %v10104_v16 = vpop.permute.xlu0 %3113 }
 0x7dd   :  { %v10091_v39 = vpop.permute.xlu1 %3101 }
 0x7de   :  { %v10109_v53 = vpop.permute.xlu0 %3105 }
 0x7e1   :  { %v2947_v9 = vpop.permute.xlu1 %2946 }
 0x7e5   :  { %v2943_v43 = vpop.permute.xlu1 %2942 }
 0x7e7   :  { %v10113_v58 = vpop.permute.xlu0 %3129 }
 0x7e9   :  { %v10093_v25 = vpop.permute.xlu1 %2952 }
 0x7eb   :  { %v10119_v30 = vpop.permute.xlu0 %3121 }
 0x7ed   :  { %v10095_v34 = vpop.permute.xlu1 %3125 }
 0x7f1   :  { %v2949_v19 = vpop.permute.xlu1 %2948 }
 0x7f5   :  { %v10097_v15 = vpop.permute.xlu1 %3117 }
 0x7f6   :  { %v10123_v23 = vpop.permute.xlu0 %3133 }
 0x7f9   :  { %v10099_v27 = vpop.permute.xlu1 %2954 }
 0x7fa   :  { %v10128_v59 = vpop.permute.xlu0 %3145 }
 0x7fb   :  { %v7659_v26 = vpop.f32.mrb[104].mxu1 }
 0x7fc   :  { %2992 = vrot.lane.b32.xlu0 %v7659_v26, %s8716_s2  ;;  %v2877_v6 = vpop.f32.mrb[105].mxu1 }
 0x7fd   :  { %v7660_v28 = vpop.f32.mrb[106].mxu1  ;;  %v2951_v46 = vpop.permute.xlu1 %2950 }
 0x7fe   :  { %3209 = vperm.xlu1 %7828, %v7660_v28   ;;  %v2880_v11 = vpop.f32.mrb[107].mxu1 }
 0x800   :  { %3205 = vperm.xlu0 %7829, %v7659_v26  }
 0x801   :  { %v10102_v5 = vpop.permute.xlu1 %2960 }
 0x802   :  { %3201 = vperm.xlu1 %7828, %v2880_v11  }
 0x804   :  { %2988 = vrot.lane.b32.xlu0 %v2877_v6, %s8716_s2 }
 0x805   :  { %v10107_v21 = vpop.permute.xlu1 %3141 }
 0x808   :  { %3197 = vperm.xlu0 %7829, %v2877_v6  }
 0x809   :  { %v2957_v4 = vpop.permute.xlu1 %2956 }
 0x80b   :  { %v10111_v17 = vpop.f32.mrb[108].mxu1 }
 0x80c   :  { %2994 = vrot.lane.b32.xlu0 %v7660_v28, %s8716_s2  ;;  %v2893_v49 = vpop.f32.mrb[109].mxu1 }
 0x80d   :  { %v10116_v13 = vpop.f32.mrb[110].mxu1  ;;  %v2963_v45 = vpop.permute.xlu1 %2962 }
 0x80e   :  { %v2896_v20 = vpop.f32.mrb[111].mxu1 }
 0x80f   :  { %3217 = vperm.xlu1 %7828, %v2896_v20  }
 0x810   :  { %2990 = vrot.lane.b32.xlu0 %v2880_v11, %s8716_s2 }
 0x811   :  { %v2959_v40 = vpop.permute.xlu1 %2958 }
 0x814   :  { %3000 = vrot.lane.b32.xlu0 %v10111_v17, %s8716_s2 }
 0x815   :  { %v10125_v52 = vpop.permute.xlu1 %3137 }
 0x818   :  { %2996 = vrot.lane.b32.xlu0 %v2893_v49, %s8716_s2 }
 0x819   :  { %v2969_v57 = vpop.permute.xlu1 %2968 }
 0x81c   :  { %3213 = vperm.xlu0 %7829, %v2893_v49  }
 0x820   :  { %3002 = vrot.lane.b32.xlu0 %v10116_v13, %s8716_s2  ;;  %v10132_v2 = vpop.permute.xlu0 %3161 }
 0x822   :  { %v10134_v8 = vpop.permute.xlu1 %3157 }
 0x824   :  { %2998 = vrot.lane.b32.xlu0 %v2896_v20, %s8716_s2  ;;  %v10137_v61 = vpop.permute.xlu0 %3153 }
 0x826   :  { %v2965_v47 = vpop.permute.xlu1 %2964 }
 0x828   :  { %v2977_v41 = vpop.permute.xlu0 %2976 }
 0x82a   :  { %v10139_v10 = vpop.permute.xlu1 %3149 }
 0x82c   :  { %v2979_v29 = vpop.permute.xlu0 %2978 }
 0x82e   :  { %v2971_v32 = vpop.permute.xlu1 %2970 }
 0x832   :  { %v2967_v0 = vpop.permute.xlu1 %2966 }
 0x836   :  { %v10141_v36 = vpop.permute.xlu0 %3177  ;;  %v10143_v42 = vpop.permute.xlu1 %3173 }
 0x838   :  { %3036 = vxpose.xlu1.b32.start [1/16] (narrow) %v2941_v31, 8 }
 0x83a   :  { %v2975_v35 = vpop.permute.xlu0 %2974  ;;  %v2973_v18 = vpop.permute.xlu1 %2972 }
 0x83c   :  { %3037 = vxpose.xlu1.b32.cont [2/16] (narrow) %v2943_v43, 8 }
 0x83e   :  { %v10145_v14 = vpop.permute.xlu0 %3169 }
 0x840   :  { %3038 = vxpose.xlu1.b32.cont [3/16] (narrow) %v2945_v48, 8 }
 0x842   :  { %3068 = vxpose.xlu0.b32.start [1/16] (narrow) %v2973_v18, 8  ;;  %v2985_v50 = vpop.permute.xlu0 %2984 }
 0x844   :  { %3039 = vxpose.xlu1.b32.cont [4/16] (narrow) %v2947_v9, 8 }
 0x846   :  { %3069 = vxpose.xlu0.b32.cont [2/16] (narrow) %v2975_v35, 8  ;;  %v10147_v56 = vpop.permute.xlu0 %3189 }
 0x848   :  { %3040 = vxpose.xlu1.b32.cont [5/16] (narrow) %v2949_v19, 8 }
 0x84a   :  { %3070 = vxpose.xlu0.b32.cont [3/16] (narrow) %v2977_v41, 8  ;;  %v2981_v22 = vpop.permute.xlu0 %2980 }
 0x84c   :  { %3041 = vxpose.xlu1.b32.cont [6/16] (narrow) %v2951_v46, 8 }
 0x84e   :  { %3071 = vxpose.xlu0.b32.cont [4/16] (narrow) %v2979_v29, 8  ;;  %v10149_v7 = vpop.permute.xlu0 %3181 }
 0x850   :  { %3042 = vxpose.xlu1.b32.cont [7/16] (narrow) %v10093_v25, 8 }
 0x852   :  { %3072 = vxpose.xlu0.b32.cont [5/16] (narrow) %v2981_v22, 8  ;;  %v2987_v12 = vpop.permute.xlu0 %2986 }
 0x854   :  { %3043 = vxpose.xlu1.b32.cont [8/16] (narrow) %v10099_v27, 8 }
 0x856   :  { %v2983_v48 = vpop.permute.xlu0 %2982 }
 0x857   :  { %3073 = vxpose.xlu0.b32.cont [6/16] (narrow) %v2983_v48, 8  ;;  %v13079_v48 = vld [vmem:[#allocation33_spill] sm:$0xff] }
 0x858   :  { %3044 = vxpose.xlu1.b32.cont [9/16] (narrow) %v2957_v4, 8  ;;  %vm13080_vm4 = vcmp.gt.f32.partialorder %v13079_v48, 0.0 }
 0x85b   :  { %3074 = vxpose.xlu0.b32.cont [7/16] (narrow) %v2985_v50, 8 }
 0x85c   :  { %3045 = vxpose.xlu1.b32.cont [10/16] (narrow) %v2959_v40, 8 }
 0x85f   :  { %3075 = vxpose.xlu0.b32.cont [8/16] (narrow) %v2987_v12, 8 }
 0x860   :  { %3046 = vxpose.xlu1.b32.cont [11/16] (narrow) %v10102_v5, 8  ;;  %v10160_v5 = vpop.permute.xlu1 %3165 }
 0x864   :  { %3047 = vxpose.xlu1.b32.cont [12/16] (narrow) %v2963_v45, 8  ;;  %v10162_v4 = vpop.permute.xlu1 %3193 }
 0x868   :  { %3048 = vxpose.xlu1.b32.cont [13/16] (narrow) %v2965_v47, 8  ;;  %v10164_v49 = vpop.permute.xlu1 %3185  ;;  %v13078_v47 = vld [vmem:[#allocation30_spill] sm:$0xff] }
 0x86c   :  { %3049 = vxpose.xlu1.b32.cont [14/16] (narrow) %v2967_v0, 8 }
 0x86e   :  { %v2993_v9 = vpop.permute.xlu0 %2992 }
 0x870   :  { %3050 = vxpose.xlu1.b32.cont [15/16] (narrow) %v2969_v57, 8 }
 0x874   :  { %3051 = vxpose.xlu1.b32.end [16/16] (narrow) %v2971_v32, 8 }
 0x87d   :  { %v10166_v45 = vpop.permute.xlu1 %3209 }
 0x87f   :  { %v10154_v43 = vpop.permute.xlu0 %3205 }
 0x881   :  { %v10168_v20 = vpop.permute.xlu1 %3201 }
 0x883   :  { %v2989_v25 = vpop.permute.xlu0 %2988 }
 0x884   :  { %3076 = vxpose.xlu0.b32.cont [9/16] (narrow) %v2989_v25, 8  ;;  %v13081_v25 = vld [vmem:[#allocation45_spill] sm:$0xff] }
 0x885   :  { %vm13082_vm8 = vcmp.gt.f32.partialorder %v13081_v25, 0.0 }
 0x887   :  { %v10156_v19 = vpop.permute.xlu0 %3197 }
 0x88b   :  { %v2995_v27 = vpop.permute.xlu0 %2994 }
 0x88e   :  { %v10170_v40 = vpop.permute.xlu1 %3217 }
 0x88f   :  { %v2991_v26 = vpop.permute.xlu0 %2990  ;;  %13077 = vst [vmem:[#allocation79_spill] sm:$0xff] %v10170_v40 }
 0x890   :  { %3077 = vxpose.xlu0.b32.cont [10/16] (narrow) %v2991_v26, 8 }
 0x893   :  { %v3001_v6 = vpop.permute.xlu0 %3000 }
 0x894   :  { %3078 = vxpose.xlu0.b32.cont [11/16] (narrow) %v2993_v9, 8 }
 0x897   :  { %v2997_v28 = vpop.permute.xlu0 %2996 }
 0x898   :  { %3079 = vxpose.xlu0.b32.cont [12/16] (narrow) %v2995_v27, 8 }
 0x89b   :  { %v10158_v46 = vpop.permute.xlu0 %3213 }
 0x89c   :  { %13076 = vst [vmem:[#allocation81_spill] sm:$0xff] %v10158_v46  ;;  %3080 = vxpose.xlu0.b32.cont [13/16] (narrow) %v2997_v28, 8 }
 0x89f   :  { %v3003_v31 = vpop.permute.xlu0 %3002 }
 0x8a3   :  { %v2999_v11 = vpop.permute.xlu0 %2998 }
 0x8a4   :  { %3081 = vxpose.xlu0.b32.cont [14/16] (narrow) %v2999_v11, 8 }
 0x8a8   :  { %3082 = vxpose.xlu0.b32.cont [15/16] (narrow) %v3001_v6, 8 }
 0x8ac   :  { %3083 = vxpose.xlu0.b32.end [16/16] (narrow) %v3003_v31, 8 }
 0x8b8   :  { %v3052_v57 = vpop.trf.xlu1 }
 0x8b9   :  { %v10173_v41 = vrot.slane %v3052_v57, %v13078_v47 }
 0x8bb   :  { %v3238_v29 = vadd.f32 %v10173_v41, %v10109_v53  ;;  %v3240_v6 = vadd.f32 %v10173_v41, %v10089_v62  ;;  %v3242_v28 = vadd.f32 %v10173_v41, %v10104_v16  ;;  %v10200_v31 = vadd.f32 %v10173_v41, %v10097_v15 }
 0x8bc   :  { %v3246_v11 = vadd.f32 %v10173_v41, %v10119_v30  ;;  %v10206_v57 = vadd.f32 %v10173_v41, %v10095_v34  ;;  %v10234_v44 = vadd.f32 %v10173_v41, %v10128_v59 }
 0x8bd   :  { %v3366_v18 = vmul.f32 0.2, %v3238_v29  ;;  %vm3302_vm0 = vcmp.ge.f32.partialorder %v3238_v29, 0.0  ;;  %v3372_v60 = vmul.f32 0.2, %v10200_v31 }
 0x8be   :  { %vm3310_vm7 = vcmp.ge.f32.partialorder %v3246_v11, 0.0  ;;  %v3376_v63 = vmul.f32 0.2, %v10206_v57  ;;  %vm3312_vm5 = vcmp.ge.f32.partialorder %v10206_v57, 0.0 }
 0x8bf   :  { %v3430_v22 = vsel %vm3302_vm0, %v3238_v29, %v3366_v18  ;;  %v10212_v29 = vadd.f32 %v10173_v41, %v10113_v58  ;;  %v10220_v18 = vadd.f32 %v10173_v41, %v10125_v52 }
 0x8c0   :  { %v10184_v9 = vsel %vm13080_vm4, %v3430_v22, -1e+30  ;;  %v10226_v22 = vadd.f32 %v10173_v41, %v10107_v21  ;;  %vm3306_vm4 = vcmp.ge.f32.partialorder %v3242_v28, 0.0 }
 0x8c1   :  { %vm3314_vm10 = vcmp.ge.f32.partialorder %v10212_v29, 0.0  ;;  %v3378_v55 = vmul.f32 0.2, %v10212_v29 }
 0x8f0   :  { %v3084_v32 = vpop.trf.xlu0 }
 0x8f1   :  { %v10178_v0 = vrot.slane %v3084_v32, %v13078_v47  ;;  %v3368_v47 = vmul.f32 0.2, %v3240_v6 }
 0x8f3   :  { %v3239_v35 = vadd.f32 %v10178_v0, %v10109_v53  ;;  %v3236_v53 = vadd.f32 %v10173_v41, %v10091_v39  ;;  %v3237_v32 = vadd.f32 %v10178_v0, %v10091_v39  ;;  %v3241_v39 = vadd.f32 %v10178_v0, %v10089_v62 }
 0x8f4   :  { %v3374_v62 = vmul.f32 0.2, %v3246_v11  ;;  %v3251_v24 = vadd.f32 %v10178_v0, %v10113_v58  ;;  %v3249_v48 = vadd.f32 %v10178_v0, %v10095_v34  ;;  %v3255_v40 = vadd.f32 %v10178_v0, %v10125_v52  ;;  %v13089_v52 = vld [vmem:[#allocation48_spill] sm:$0xff] }
 0x8f5   :  { %vm3303_vm6 = vcmp.ge.f32.partialorder %v3239_v35, 0.0  ;;  %v3367_v50 = vmul.f32 0.2, %v3239_v35  ;;  %vm3300_vm0 = vcmp.ge.f32.partialorder %v3236_v53, 0.0  ;;  %v3365_v37 = vmul.f32 0.2, %v3237_v32 }
 0x8f6   :  { %vm3301_vm9 = vcmp.ge.f32.partialorder %v3237_v32, 0.0  ;;  %v3369_v3 = vmul.f32 0.2, %v3241_v39  ;;  %vm3305_vm1 = vcmp.ge.f32.partialorder %v3241_v39, 0.0  ;;  %v3379_v46 = vmul.f32 0.2, %v3251_v24 }
 0x8f7   :  { %v3431_v12 = vsel %vm3303_vm6, %v3239_v35, %v3367_v50  ;;  %v10216_v35 = vadd.f32 %v10173_v41, %v10123_v23  ;;  %v3243_v50 = vadd.f32 %v10178_v0, %v10104_v16  ;;  %vm3304_vm6 = vcmp.ge.f32.partialorder %v3240_v6, 0.0 }
 0x8f8   :  { %v10188_v27 = vsel %vm13082_vm8, %v3431_v12, -1e+30  ;;  %v3364_v12 = vmul.f32 0.2, %v3236_v53  ;;  %v3370_v16 = vmul.f32 0.2, %v3242_v28 }
 0x8f9   :  { %v3559_v26 = vmax.f32 %v10184_v9, %v10188_v27  ;;  %vm3308_vm8 = vcmp.ge.f32.partialorder %v10200_v31, 0.0  ;;  %v3371_v33 = vmul.f32 0.2, %v3243_v50  ;;  %vm3307_vm3 = vcmp.ge.f32.partialorder %v3243_v50, 0.0 }
 0x8fa   :  { %v3428_v1 = vsel %vm3300_vm0, %v3236_v53, %v3364_v12  ;;  %v10247_v38 = vmul.f32 0.2, %v10216_v35  ;;  %v3434_v53 = vsel %vm3306_vm4, %v3242_v28, %v3370_v16  ;;  %v3432_v12 = vsel %vm3304_vm6, %v3240_v6, %v3368_v47  ;;  %v13087_v47 = vld [vmem:[#allocation35_spill] sm:$0xff] }
 0x8fb   :  { %3560 = vmax.xlane.f32.xlu0 %v3559_v26  ;;  %v3247_v26 = vadd.f32 %v10178_v0, %v10119_v30  ;;  %v3245_v30 = vadd.f32 %v10178_v0, %v10097_v15  ;;  %v3429_v15 = vsel %vm3301_vm9, %v3237_v32, %v3365_v37  ;;  %v10252_v25 = vsel %vm13084_vm12, %v3428_v1, -1e+30 }
 0x8fc   :  { %v3435_v58 = vsel %vm3307_vm3, %v3243_v50, %v3371_v33  ;;  %vm3318_vm0 = vcmp.ge.f32.partialorder %v10220_v18, 0.0  ;;  %v3433_v32 = vsel %vm3305_vm1, %v3241_v39, %v3369_v3  ;;  %vm13086_vm12 = vcmp.gt.f32.partialorder %v13085_v51, 0.0  ;;  %v13091_v50 = vld [vmem:[#allocation36_spill] sm:$0xff]  ;;  %v13093_v39 = vld [vmem:[#allocation49_spill] sm:$0xff] }
 0x8fd   :  { %v3375_v54 = vmul.f32 0.2, %v3247_v26  ;;  %vm3311_vm2 = vcmp.ge.f32.partialorder %v3247_v26, 0.0  ;;  %v3373_v37 = vmul.f32 0.2, %v3245_v30  ;;  %vm3309_vm9 = vcmp.ge.f32.partialorder %v3245_v30, 0.0 }
 0x8fe   :  { %v10263_v1 = vsel %vm13086_vm12, %v3429_v15, -1e+30  ;;  %vm3315_vm3 = vcmp.ge.f32.partialorder %v3251_v24, 0.0  ;;  %vm13088_vm6 = vcmp.gt.f32.partialorder %v13087_v47, 0.0  ;;  %vm13090_vm4 = vcmp.gt.f32.partialorder %v13089_v52, 0.0 }
 0x8ff   :  { %v3439_v28 = vsel %vm3311_vm2, %v3247_v26, %v3375_v54  ;;  %v3556_v33 = vmax.f32 %v10252_v25, %v10263_v1  ;;  %v10269_v34 = vsel %vm13088_vm6, %v3434_v53, -1e+30  ;;  %v10273_v6 = vsel %vm13090_vm4, %v3435_v58, -1e+30  ;;  %v13095_v58 = vld [vmem:[#allocation50_spill] sm:$0xff] }
 0x900   :  { %vm3316_vm1 = vcmp.ge.f32.partialorder %v10216_v35, 0.0  ;;  %v3565_v3 = vmax.f32 %v10269_v34, %v10273_v6  ;;  %vm13092_vm12 = vcmp.gt.f32.partialorder %v13091_v50, 0.0  ;;  %vm13094_vm2 = vcmp.gt.f32.partialorder %v13093_v39, 0.0 }
 0x901   :  { %v10280_v54 = vsel %vm13092_vm12, %v3432_v12, -1e+30  ;;  %v10284_v26 = vsel %vm13094_vm2, %v3433_v32, -1e+30  ;;  %v3438_v16 = vsel %vm3310_vm7, %v3246_v11, %v3374_v62  ;;  %v3253_v15 = vadd.f32 %v10178_v0, %v10123_v23  ;;  %3557 = vmax.xlane.f32.xlu1 %v3556_v33  ;;  %v13097_v11 = vld [vmem:[#allocation37_spill] sm:$0xff] }
 0x902   :  { %v3377_v53 = vmul.f32 0.2, %v3249_v48  ;;  %vm13096_vm6 = vcmp.gt.f32.partialorder %v13095_v58, 0.0  ;;  %v3437_v47 = vsel %vm3309_vm9, %v3245_v30, %v3373_v37  ;;  %v3259_v12 = vadd.f32 %v10178_v0, %v10128_v59  ;;  %3566 = vmax.xlane.f32.xlu0 %v3565_v3 }
 0x903   :  { %v10291_v52 = vsel %vm13096_vm6, %v3439_v28, -1e+30  ;;  %vm3313_vm4 = vcmp.ge.f32.partialorder %v3249_v48, 0.0  ;;  %v3383_v39 = vmul.f32 0.2, %v3255_v40  ;;  %v3443_v32 = vsel %vm3315_vm3, %v3251_v24, %v3379_v46  ;;  %v13099_v28 = vld [vmem:[#allocation51_spill] sm:$0xff] }
 0x904   :  { %vm3319_vm7 = vcmp.ge.f32.partialorder %v3255_v40, 0.0  ;;  %v3562_v23 = vmax.f32 %v10280_v54, %v10284_v26  ;;  %vm13098_vm12 = vcmp.gt.f32.partialorder %v13097_v11, 0.0  ;;  %v3436_v30 = vsel %vm3308_vm8, %v10200_v31, %v3372_v60 }
 0x905   :  { %v10301_v62 = vsel %vm13098_vm12, %v3438_v16, -1e+30  ;;  %v3382_v37 = vmul.f32 0.2, %v10220_v18  ;;  %vm13100_vm9 = vcmp.gt.f32.partialorder %v13099_v28, 0.0  ;;  %v3442_v46 = vsel %vm3314_vm10, %v10212_v29, %v3378_v55  ;;  %v13101_v16 = vld [vmem:[#allocation52_spill] sm:$0xff] }
 0x906   :  { %v3571_v59 = vmax.f32 %v10301_v62, %v10291_v52  ;;  %v10311_v24 = vsel %vm13100_vm9, %v3437_v47, -1e+30  ;;  %v3257_v33 = vadd.f32 %v10178_v0, %v10107_v21  ;;  %v3381_v3 = vmul.f32 0.2, %v3253_v15  ;;  %3563 = vmax.xlane.f32.xlu1 %v3562_v23  ;;  %v13103_v47 = vld [vmem:[#allocation38_spill] sm:$0xff]  ;;  %v13105_v29 = vld [vmem:[#allocation39_spill] sm:$0xff] }
 0x907   :  { %vm13102_vm8 = vcmp.gt.f32.partialorder %v13101_v16, 0.0  ;;  %v3441_v31 = vsel %vm3313_vm4, %v3249_v48, %v3377_v53  ;;  %vm3317_vm3 = vcmp.ge.f32.partialorder %v3253_v15, 0.0  ;;  %v3387_v58 = vmul.f32 0.2, %v3259_v12  ;;  %v13113_v16 = vld [vmem:[#allocation40_spill] sm:$0xff] }
 0x908   :  { %v10320_v60 = vsel %vm13102_vm8, %v3443_v32, -1e+30  ;;  %3572 = vmax.xlane.f32.xlu0 %v3571_v59  ;;  %vm13104_vm2 = vcmp.gt.f32.partialorder %v13103_v47, 0.0  ;;  %v3447_v55 = vsel %vm3319_vm7, %v3255_v40, %v3383_v39  ;;  %vm3323_vm10 = vcmp.ge.f32.partialorder %v3259_v12, 0.0 }
 0x909   :  { %v10325_v28 = vsel %vm13104_vm2, %v3436_v30, -1e+30  ;;  %vm13106_vm6 = vcmp.gt.f32.partialorder %v13105_v29, 0.0  ;;  %v3440_v48 = vsel %vm3312_vm5, %v10206_v57, %v3376_v63  ;;  %v3386_v53 = vmul.f32 0.2, %v10234_v44  ;;  %v13107_v30 = vld [vmem:[#allocation53_spill] sm:$0xff] }
 0x90a   :  { %v3568_v21 = vmax.f32 %v10325_v28, %v10311_v24  ;;  %v10332_v23 = vsel %vm13106_vm6, %v3442_v46, -1e+30  ;;  %vm13108_vm4 = vcmp.gt.f32.partialorder %v13107_v30, 0.0  ;;  %v3446_v39 = vsel %vm3318_vm0, %v10220_v18, %v3382_v37  ;;  %v13110_v46 = vld [vmem:[#allocation54_spill] sm:$0xff] }
 0x90b   :  { %v3577_v32 = vmax.f32 %v10332_v23, %v10320_v60  ;;  %v10342_v40 = vsel %vm13108_vm4, %v3441_v31, -1e+30  ;;  %vm3322_vm7 = vcmp.ge.f32.partialorder %v10234_v44, 0.0  ;;  %v3385_v59 = vmul.f32 0.2, %v3257_v33 }
 0x90c   :  { %13109 = vst [vmem:[#allocation24_spill] sm:$0xff] %v10342_v40  ;;  %3569 = vmax.xlane.f32.xlu1 %v3568_v21  ;;  %vm13111_vm12 = vcmp.gt.f32.partialorder %v13110_v46, 0.0  ;;  %v3445_v57 = vsel %vm3317_vm3, %v3253_v15, %v3381_v3  ;;  %vm3321_vm5 = vcmp.ge.f32.partialorder %v3257_v33, 0.0  ;;  %vm13114_vm9 = vcmp.gt.f32.partialorder %v13113_v16, 0.0  ;;  %v13115_v21 = vld [vmem:[#allocation41_spill] sm:$0xff] }
 0x90d   :  { %v10350_v63 = vsel %vm13111_vm12, %v3447_v55, -1e+30  ;;  %3578 = vmax.xlane.f32.xlu0 %v3577_v32  ;;  %v10355_v31 = vsel %vm13114_vm9, %v3440_v48, -1e+30  ;;  %v3451_v30 = vsel %vm3323_vm10, %v3259_v12, %v3387_v58  ;;  %v3384_v18 = vmul.f32 0.2, %v10226_v22 }
 0x90e   :  { %13112 = vst [vmem:[#allocation18_spill] sm:$0xff] %v10350_v63  ;;  %v3574_v37 = vmax.f32 %v10355_v31, %v10342_v40  ;;  %vm13116_vm0 = vcmp.gt.f32.partialorder %v13115_v21, 0.0  ;;  %v3444_v15 = vsel %vm3316_vm1, %v10216_v35, %v10247_v38  ;;  %vm3320_vm8 = vcmp.ge.f32.partialorder %v10226_v22, 0.0  ;;  %v13118_v58 = vld [vmem:[#allocation55_spill] sm:$0xff]  ;;  %v13121_v48 = vld [vmem:[#allocation56_spill] sm:$0xff]  ;;  %v13124_v38 = vld [vmem:[#allocation42_spill] sm:$0xff] }
 0x90f   :  { %v10363_v46 = vsel %vm13116_vm0, %v3446_v39, -1e+30  ;;  %vm13119_vm3 = vcmp.gt.f32.partialorder %v13118_v58, 0.0  ;;  %v3450_v55 = vsel %vm3322_vm7, %v10234_v44, %v3386_v53  ;;  %vm13122_vm2 = vcmp.gt.f32.partialorder %v13121_v48, 0.0 }
 0x910   :  { %13117 = vst [vmem:[#allocation15_spill] sm:$0xff] %v10363_v46  ;;  %v3583_v3 = vmax.f32 %v10363_v46, %v10350_v63  ;;  %v10374_v12 = vsel %vm13119_vm3, %v3445_v57, -1e+30  ;;  %3575 = vmax.xlane.f32.xlu1 %v3574_v37  ;;  %v10381_v32 = vsel %vm13122_vm2, %v3451_v30, -1e+30  ;;  %v3449_v39 = vsel %vm3321_vm5, %v3257_v33, %v3385_v59  ;;  %v13127_v57 = vld [vmem:[#allocation43_spill] sm:$0xff] }
 0x911   :  { %13120 = vst [vmem:[#allocation16_spill] sm:$0xff] %v10374_v12  ;;  %13123 = vst [vmem:[#allocation19_spill] sm:$0xff] %v10381_v32  ;;  %vm13125_vm1 = vcmp.gt.f32.partialorder %v13124_v38, 0.0  ;;  %vm13128_vm10 = vcmp.gt.f32.partialorder %v13127_v57, 0.0  ;;  %v3448_v44 = vsel %vm3320_vm8, %v10226_v22, %v3384_v18  ;;  %v13130_v30 = vld [vmem:[#allocation57_spill] sm:$0xff]  ;;  %v13133_v59 = vld [vmem:[#allocation46_spill] sm:$0xff]  ;;  %v3263_v22 = vadd.f32 %v10178_v0, %v10137_v61 }
 0x912   :  { %3584 = vmax.xlane.f32.xlu0 %v3583_v3  ;;  %v10385_v35 = vsel %vm13125_vm1, %v3444_v15, -1e+30  ;;  %v10391_v21 = vsel %vm13128_vm10, %v3450_v55, -1e+30  ;;  %vm13131_vm6 = vcmp.gt.f32.partialorder %v13130_v30, 0.0  ;;  %vm13134_vm4 = vcmp.gt.f32.partialorder %v13133_v59, 0.0 }
 0x913   :  { %13126 = vst [vmem:[#allocation23_spill] sm:$0xff] %v10385_v35  ;;  %v3580_v58 = vmax.f32 %v10385_v35, %v10374_v12  ;;  %13129 = vst [vmem:[#allocation25_spill] sm:$0xff] %v10391_v21  ;;  %v3589_v53 = vmax.f32 %v10391_v21, %v10381_v32  ;;  %v10398_v33 = vsel %vm13131_vm6, %v3449_v39, -1e+30  ;;  %v10402_v37 = vsel %vm13134_vm4, %v3448_v44, -1e+30 }
 0x914   :  { %13132 = vst [vmem:[#allocation26_spill] sm:$0xff] %v10398_v33  ;;  %13135 = vst [vmem:[#allocation58_spill] sm:$0xff] %v10402_v37  ;;  %v3586_v15 = vmax.f32 %v10402_v37, %v10398_v33  ;;  %v3260_v18 = vadd.f32 %v10173_v41, %v10139_v10  ;;  %v3262_v3 = vadd.f32 %v10173_v41, %v10137_v61  ;;  %v3391_v59 = vmul.f32 0.2, %v3263_v22 }
 0x915   :  { %3581 = vmax.xlane.f32.xlu1 %v3580_v58  ;;  %v3264_v58 = vadd.f32 %v10173_v41, %v10134_v8  ;;  %v3266_v55 = vadd.f32 %v10173_v41, %v10132_v2  ;;  %v10428_v39 = vadd.f32 %v10173_v41, %v10143_v42  ;;  %v10432_v61 = vadd.f32 %v10173_v41, %v10141_v36 }
 0x916   :  { %3590 = vmax.xlane.f32.xlu0 %v3589_v53  ;;  %v3261_v44 = vadd.f32 %v10178_v0, %v10139_v10  ;;  %v10438_v53 = vadd.f32 %v10173_v41, %v10149_v7  ;;  %v3265_v30 = vadd.f32 %v10178_v0, %v10134_v8  ;;  %v10448_v38 = vadd.f32 %v10173_v41, %v10147_v56 }
 0x917   :  { %v10452_v48 = vadd.f32 %v10173_v41, %v10162_v4  ;;  %vm3324_vm7 = vcmp.ge.f32.partialorder %v3260_v18, 0.0  ;;  %vm3327_vm12 = vcmp.ge.f32.partialorder %v3263_v22, 0.0  ;;  %vm3326_vm5 = vcmp.ge.f32.partialorder %v3262_v3, 0.0 }
 0x918   :  { %vm3328_vm9 = vcmp.ge.f32.partialorder %v3264_v58, 0.0  ;;  %v3388_v10 = vmul.f32 0.2, %v3260_v18  ;;  %v3390_v57 = vmul.f32 0.2, %v3262_v3  ;;  %v3267_v16 = vadd.f32 %v10178_v0, %v10132_v2 }
 0x919   :  { %3587 = vmax.xlane.f32.xlu1 %v3586_v15  ;;  %v10442_v15 = vadd.f32 %v10173_v41, %v10164_v49  ;;  %vm3330_vm0 = vcmp.ge.f32.partialorder %v3266_v55, 0.0  ;;  %v3392_v8 = vmul.f32 0.2, %v3264_v58  ;;  %v3389_v29 = vmul.f32 0.2, %v3261_v44 }
 0x91a   :  { %v3269_v47 = vadd.f32 %v10178_v0, %v10160_v5  ;;  %vm3325_vm8 = vcmp.ge.f32.partialorder %v3261_v44, 0.0  ;;  %v3393_v33 = vmul.f32 0.2, %v3265_v30  ;;  %v3455_v37 = vsel %vm3327_vm12, %v3263_v22, %v3391_v59  ;;  %v13136_v22 = vld [vmem:[#allocation91_spill] sm:$0xff] }
 0x91b   :  { %v3394_v11 = vmul.f32 0.2, %v3266_v55  ;;  %vm3329_vm2 = vcmp.ge.f32.partialorder %v3265_v30, 0.0  ;;  %v3400_v2 = vmul.f32 0.2, %v10428_v39  ;;  %v3454_v50 = vsel %vm3326_vm5, %v3262_v3, %v3390_v57  ;;  %v13138_v3 = vld [vmem:[#allocation12_spill] sm:$0xff] }
 0x91c   :  { %v3452_v21 = vsel %vm3324_vm7, %v3260_v18, %v3388_v10  ;;  %vm3336_vm10 = vcmp.ge.f32.partialorder %v10428_v39, 0.0  ;;  %v3395_v59 = vmul.f32 0.2, %v3267_v16  ;;  %vm13137_vm6 = vcmp.gt.f32.partialorder %v13136_v22, 0.0 }
 0x91d   :  { %v10470_v35 = vsel %vm13137_vm6, %v3455_v37, -1e+30  ;;  %v3453_v63 = vsel %vm3325_vm8, %v3261_v44, %v3389_v29  ;;  %v3273_v46 = vadd.f32 %v10178_v0, %v10143_v42  ;;  %vm3331_vm4 = vcmp.ge.f32.partialorder %v3267_v16, 0.0  ;;  %v13140_v37 = vld [vmem:[#allocation82_spill] sm:$0xff]  ;;  %v13142_v44 = vld [vmem:[#allocation92_spill] sm:$0xff] }
 0x91e   :  { %v3397_v40 = vmul.f32 0.2, %v3269_v47  ;;  %v3457_v57 = vsel %vm3329_vm2, %v3265_v30, %v3393_v33  ;;  %v3402_v18 = vmul.f32 0.2, %v10432_v61  ;;  %vm3333_vm7 = vcmp.ge.f32.partialorder %v3269_v47, 0.0 }
 0x91f   :  { %vm13139_vm12 = vcmp.gt.f32.partialorder %v13138_v3, 0.0  ;;  %v3456_v10 = vsel %vm3328_vm9, %v3264_v58, %v3392_v8  ;;  %vm3338_vm5 = vcmp.ge.f32.partialorder %v10432_v61, 0.0  ;;  %vm13141_vm8 = vcmp.gt.f32.partialorder %v13140_v37, 0.0  ;;  %v13144_v8 = vld [vmem:[#allocation93_spill] sm:$0xff] }
 0x920   :  { %v10486_v42 = vsel %vm13141_vm8, %v3452_v21, -1e+30  ;;  %vm13143_vm2 = vcmp.gt.f32.partialorder %v13142_v44, 0.0  ;;  %v3458_v33 = vsel %vm3330_vm0, %v3266_v55, %v3394_v11  ;;  %vm3340_vm9 = vcmp.ge.f32.partialorder %v10438_v53, 0.0  ;;  %v13146_v44 = vld [vmem:[#allocation83_spill] sm:$0xff] }
 0x921   :  { %v10490_v30 = vsel %vm13143_vm2, %v3453_v63, -1e+30  ;;  %vm13145_vm6 = vcmp.gt.f32.partialorder %v13144_v8, 0.0  ;;  %v3459_v37 = vsel %vm3331_vm4, %v3267_v16, %v3395_v59  ;;  %v3277_v21 = vadd.f32 %v10178_v0, %v10149_v7  ;;  %v13148_v16 = vld [vmem:[#allocation84_spill] sm:$0xff] }
 0x922   :  { %v10498_v22 = vsel %vm13145_vm6, %v3457_v57, -1e+30  ;;  %v3401_v63 = vmul.f32 0.2, %v3273_v46  ;;  %v3461_v11 = vsel %vm3333_vm7, %v3269_v47, %v3397_v40  ;;  %v3404_v55 = vmul.f32 0.2, %v10438_v53 }
 0x923   :  { %vm3337_vm0 = vcmp.ge.f32.partialorder %v3273_v46, 0.0  ;;  %vm13147_vm8 = vcmp.gt.f32.partialorder %v13146_v44, 0.0  ;;  %vm3342_vm4 = vcmp.ge.f32.partialorder %v10442_v15, 0.0  ;;  %vm13149_vm2 = vcmp.gt.f32.partialorder %v13148_v16, 0.0  ;;  %v13150_v47 = vld [vmem:[#allocation95_spill] sm:$0xff]  ;;  %v13152_v44 = vld [vmem:[#allocation96_spill] sm:$0xff] }
 0x924   :  { %v10509_v57 = vsel %vm13147_vm8, %v3456_v10, -1e+30  ;;  %v10516_v59 = vsel %vm13149_vm2, %v3458_v33, -1e+30  ;;  %vm13151_vm7 = vcmp.gt.f32.partialorder %v13150_v47, 0.0  ;;  %v3279_v10 = vadd.f32 %v10178_v0, %v10164_v49 }
 0x925   :  { %v3598_v7 = vmax.f32 %v10509_v57, %v10498_v22  ;;  %v10520_v40 = vsel %vm13151_vm7, %v3459_v37, -1e+30  ;;  %vm13153_vm6 = vcmp.gt.f32.partialorder %v13152_v44, 0.0  ;;  %v3281_v47 = vadd.f32 %v10178_v0, %v10147_v56 }
 0x926   :  { %v10529_v3 = vsel %vm13153_vm6, %v3461_v11, -1e+30  ;;  %v3405_v37 = vmul.f32 0.2, %v3277_v21  ;;  %v3465_v16 = vsel %vm3337_vm0, %v3273_v46, %v3401_v63  ;;  %v3601_v49 = vmax.f32 %v10516_v59, %v10520_v40 }
 0x927   :  { %v3464_v63 = vsel %vm3336_vm10, %v10428_v39, %v3400_v2  ;;  %v3409_v44 = vmul.f32 0.2, %v3281_v47  ;;  %vm3345_vm10 = vcmp.ge.f32.partialorder %v3281_v47, 0.0  ;;  %vm3344_vm0 = vcmp.ge.f32.partialorder %v10448_v38, 0.0 }
 0x92a   :  { %3225 = vperm.xlu1 %7828, %v10116_v13   ;;  %v10420_v13 = vadd.f32 %v10173_v41, %v10160_v5  ;;  %v3271_v5 = vadd.f32 %v10178_v0, %v10145_v14 }
 0x92c   :  { %3221 = vperm.xlu0 %7829, %v10111_v17   ;;  %v10424_v17 = vadd.f32 %v10173_v41, %v10145_v14  ;;  %vm3332_vm3 = vcmp.ge.f32.partialorder %v10420_v13, 0.0  ;;  %v3396_v12 = vmul.f32 0.2, %v10420_v13  ;;  %v10478_v14 = vsel %vm13139_vm12, %v3454_v50, -1e+30 }
 0x92d   :  { %v3595_v29 = vmax.f32 %v10478_v14, %v10470_v35  ;;  %v3275_v50 = vadd.f32 %v10178_v0, %v10141_v36  ;;  %v3399_v58 = vmul.f32 0.2, %v3271_v5  ;;  %vm3335_vm12 = vcmp.ge.f32.partialorder %v3271_v5, 0.0 }
 0x92e   :  { %vm3334_vm1 = vcmp.ge.f32.partialorder %v10424_v17, 0.0  ;;  %v3398_v32 = vmul.f32 0.2, %v10424_v17  ;;  %v3592_v36 = vmax.f32 %v10486_v42, %v10490_v30 }
 0x92f   :  { %v3403_v8 = vmul.f32 0.2, %v3275_v50  ;;  %v3463_v33 = vsel %vm3335_vm12, %v3271_v5, %v3399_v58  ;;  %vm3339_vm8 = vcmp.ge.f32.partialorder %v3275_v50, 0.0  ;;  %v3406_v58 = vmul.f32 0.2, %v10442_v15 }
 0x930   :  { %v3462_v5 = vsel %vm3334_vm1, %v10424_v17, %v3398_v32  ;;  %v10549_v46 = vsel %vm223_vm14, %v3463_v33, -1e+30  ;;  %v10558_v32 = vsel %vm225_vm11, %v3465_v16, -1e+30  ;;  %vm3343_vm1 = vcmp.ge.f32.partialorder %v3279_v10, 0.0  ;;  %v13159_v33 = vld [vmem:[#allocation86_spill] sm:$0xff] }
 0x931   :  { %13158 = vst [vmem:[#allocation64_spill] sm:$0xff] %v10558_v32  ;;  %v3467_v17 = vsel %vm3339_vm8, %v3275_v50, %v3403_v8  ;;  %vm13160_vm12 = vcmp.gt.f32.partialorder %v13159_v33, 0.0  ;;  %v3466_v50 = vsel %vm3338_vm5, %v10432_v61, %v3402_v18  ;;  %v3408_v8 = vmul.f32 0.2, %v10448_v38 }
 0x932   :  { %v10563_v11 = vsel %vm13160_vm12, %v3462_v5, -1e+30  ;;  %v3473_v5 = vsel %vm3345_vm10, %v3281_v47, %v3409_v44  ;;  %vm3346_vm8 = vcmp.ge.f32.partialorder %v10452_v48, 0.0 }
 0x933   :  { %v3472_v47 = vsel %vm3344_vm0, %v10448_v38, %v3408_v8 }
 0x94b   :  { %3596 = vmax.xlane.f32.xlu0 %v3595_v29  ;;  %v3460_v29 = vsel %vm3332_vm3, %v10420_v13, %v3396_v12  ;;  %vm3341_vm3 = vcmp.ge.f32.partialorder %v3277_v21, 0.0  ;;  %v13154_v12 = vld [vmem:[#allocation85_spill] sm:$0xff] }
 0x94c   :  { %vm13155_vm2 = vcmp.gt.f32.partialorder %v13154_v12, 0.0  ;;  %v3469_v39 = vsel %vm3341_vm3, %v3277_v21, %v3405_v37  ;;  %v10580_v21 = vsel %vm227_vm13, %v3467_v17, -1e+30  ;;  %v3468_v37 = vsel %vm3340_vm9, %v10438_v53, %v3404_v55 }
 0x94d   :  { %v10539_v13 = vsel %vm13155_vm2, %v3460_v29, -1e+30  ;;  %13163 = vst [vmem:[#allocation59_spill] sm:$0xff] %v10580_v21  ;;  %v13167_v29 = vld [vmem:[#allocation88_spill] sm:$0xff]  ;;  %v3410_v53 = vmul.f32 0.2, %v10452_v48 }
 0x94e   :  { %3593 = vmax.xlane.f32.xlu1 %v3592_v36  ;;  %v3604_v56 = vmax.f32 %v10539_v13, %v10529_v3  ;;  %v3283_v36 = vadd.f32 %v10178_v0, %v10162_v4  ;;  %v3607_v4 = vmax.f32 %v10563_v11, %v10549_v46  ;;  %vm13168_vm6 = vcmp.gt.f32.partialorder %v13167_v29, 0.0 }
 0x94f   :  { %3599 = vmax.xlane.f32.xlu0 %v3598_v7  ;;  %v3407_v7 = vmul.f32 0.2, %v3279_v10  ;;  %v10593_v17 = vsel %vm13168_vm6, %v3466_v50, -1e+30  ;;  %v13176_v50 = vld [vmem:[#allocation13_spill] sm:$0xff]  ;;  %v3474_v38 = vsel %vm3346_vm8, %v10452_v48, %v3410_v53 }
 0x950   :  { %vm3347_vm5 = vcmp.ge.f32.partialorder %v3283_v36, 0.0  ;;  %13169 = vst [vmem:[#allocation65_spill] sm:$0xff] %v10593_v17  ;;  %v3613_v55 = vmax.f32 %v10593_v17, %v10580_v21  ;;  %vm13177_vm2 = vcmp.gt.f32.partialorder %v13176_v50, 0.0 }
 0x951   :  { %v3471_v18 = vsel %vm3343_vm1, %v3279_v10, %v3407_v7  ;;  %v3470_v10 = vsel %vm3342_vm4, %v10442_v15, %v3406_v58  ;;  %v13179_v15 = vld [vmem:[#allocation89_spill] sm:$0xff] }
 0x952   :  { %3602 = vmax.xlane.f32.xlu1 %v3601_v49  ;;  %v10570_v49 = vsel %vm224_vm15, %v3464_v63, -1e+30  ;;  %v13164_v63 = vld [vmem:[#allocation99_spill] sm:$0xff]  ;;  %vm13180_vm4 = vcmp.gt.f32.partialorder %v13179_v15, 0.0 }
 0x953   :  { %3605 = vmax.xlane.f32.xlu0 %v3604_v56  ;;  %v3610_v16 = vmax.f32 %v10570_v49, %v10558_v32  ;;  %v3411_v56 = vmul.f32 0.2, %v3283_v36  ;;  %vm13165_vm7 = vcmp.gt.f32.partialorder %v13164_v63, 0.0  ;;  %v10622_v58 = vsel %vm13180_vm4, %v3470_v10, -1e+30 }
 0x954   :  { %v10588_v61 = vsel %vm13165_vm7, %v3469_v39, -1e+30  ;;  %v13173_v39 = vld [vmem:[#allocation100_spill] sm:$0xff]  ;;  %13181 = vst [vmem:[#allocation70_spill] sm:$0xff] %v10622_v58 }
 0x955   :  { %13166 = vst [vmem:[#allocation63_spill] sm:$0xff] %v10588_v61  ;;  %vm13174_vm3 = vcmp.gt.f32.partialorder %v13173_v39, 0.0 }
 0x956   :  { %3608 = vmax.xlane.f32.xlu1 %v3607_v4  ;;  %v13170_v4 = vld [vmem:[#allocation20_spill] sm:$0xff]  ;;  %v10611_v44 = vsel %vm13174_vm3, %v3471_v18, -1e+30  ;;  %v13182_v18 = vld [vmem:[#allocation90_spill] sm:$0xff] }
 0x957   :  { %3611 = vmax.xlane.f32.xlu0 %v3610_v16  ;;  %vm13171_vm9 = vcmp.gt.f32.partialorder %v13170_v4, 0.0  ;;  %13175 = vst [vmem:[#allocation68_spill] sm:$0xff] %v10611_v44  ;;  %v10618_v16 = vsel %vm13177_vm2, %v3473_v5, -1e+30  ;;  %v3619_v39 = vmax.f32 %v10622_v58, %v10611_v44  ;;  %vm13183_vm1 = vcmp.gt.f32.partialorder %v13182_v18, 0.0  ;;  %v13185_v5 = vld [vmem:[#allocation101_spill] sm:$0xff] }
 0x958   :  { %v10601_v63 = vsel %vm13171_vm9, %v3468_v37, -1e+30  ;;  %13178 = vst [vmem:[#allocation69_spill] sm:$0xff] %v10618_v16  ;;  %v3475_v37 = vsel %vm3347_vm5, %v3283_v36, %v3411_v56  ;;  %v10628_v4 = vsel %vm13183_vm1, %v3472_v47, -1e+30  ;;  %vm13186_vm12 = vcmp.gt.f32.partialorder %v13185_v5, 0.0 }
 0x959   :  { %13172 = vst [vmem:[#allocation60_spill] sm:$0xff] %v10601_v63  ;;  %v3616_v7 = vmax.f32 %v10601_v63, %v10588_v61  ;;  %13184 = vst [vmem:[#allocation71_spill] sm:$0xff] %v10628_v4  ;;  %v3622_v8 = vmax.f32 %v10628_v4, %v10618_v16  ;;  %v10635_v36 = vsel %vm13186_vm12, %v3475_v37, -1e+30  ;;  %v13188_v56 = vld [vmem:[#allocation94_spill] sm:$0xff]  ;;  %v3284_v37 = vadd.f32 %v10173_v41, %v10156_v19  ;;  %v13194_v58 = vld [vmem:[#allocation45_spill] sm:$0xff] }
 0x95a   :  { %3614 = vmax.xlane.f32.xlu1 %v3613_v55  ;;  %13187 = vst [vmem:[#allocation72_spill] sm:$0xff] %v10635_v36  ;;  %vm13189_vm10 = vcmp.gt.f32.partialorder %v13188_v56, 0.0 }
 0x95b   :  { %3617 = vmax.xlane.f32.xlu0 %v3616_v7  ;;  %v10639_v55 = vsel %vm13189_vm10, %v3474_v38, -1e+30  ;;  %v3287_v38 = vadd.f32 %v10178_v0, %v10168_v20  ;;  %vm3348_vm0 = vcmp.ge.f32.partialorder %v3284_v37, 0.0 }
 0x95c   :  { %13190 = vst [vmem:[#allocation74_spill] sm:$0xff] %v10639_v55  ;;  %v3625_v10 = vmax.f32 %v10639_v55, %v10635_v36  ;;  %v13193_v36 = vld [vmem:[#allocation33_spill] sm:$0xff] }
 0x95d   :  { %vm3351_vm9 = vcmp.ge.f32.partialorder %v3287_v38, 0.0 }
 0x95e   :  { %3620 = vmax.xlane.f32.xlu1 %v3619_v39  ;;  %v3286_v39 = vadd.f32 %v10173_v41, %v10168_v20  ;;  %v3412_v20 = vmul.f32 0.2, %v3284_v37 }
 0x95f   :  { %3623 = vmax.xlane.f32.xlu0 %v3622_v8  ;;  %v10653_v8 = vadd.f32 %v10173_v41, %v10154_v43 }
 0x960   :  { %vm3350_vm7 = vcmp.ge.f32.partialorder %v3286_v39, 0.0 }
 0x961   :  { %vm3352_vm5 = vcmp.ge.f32.partialorder %v10653_v8, 0.0  ;;  %v3416_v5 = vmul.f32 0.2, %v10653_v8 }
 0x962   :  { %3626 = vmax.xlane.f32.xlu1 %v3625_v10 }
 0x988   :  { %v3561_v7 = vpop.xlane.xlu0 %3560 }
 0x989   :  { %v3654_v48 = vsub.f32 %v10184_v9, %v3561_v7  ;;  %v3655_v53 = vsub.f32 %v10188_v27, %v3561_v7  ;;  %v3290_v9 = vadd.f32 %v10173_v41, %v10166_v45  ;;  %v13191_v27 = vld [vmem:[#allocation81_spill] sm:$0xff] }
 0x98a   :  { %v10659_v10 = vadd.f32 %v10173_v41, %v13191_v27 }
 0x98b   :  { %v3720_v47 = vmul.f32 1.442695, %v3654_v48  ;;  %v3722_v50 = vmul.f32 1.442695, %v3655_v53  ;;  %v3414_v48 = vmul.f32 0.2, %v3286_v39 }
 0x98c   :  { %v3415_v53 = vmul.f32 0.2, %v3287_v38  ;;  %vm3354_vm6 = vcmp.ge.f32.partialorder %v3290_v9, 0.0  ;;  %v3418_v56 = vmul.f32 0.2, %v3290_v9 }
 0x98d   :  { %8166 = vpow2.f32 %v3720_v47  ;;  %v10669_v18 = vmul.f32 0.2, %v10659_v10  ;;  %v3478_v16 = vsel %vm3350_vm7, %v3286_v39, %v3414_v48  ;;  %v13195_v39 = vld [vmem:[#allocation17_spill] sm:$0xff] }
 0x98e   :  { %8168 = vpow2.f32 %v3722_v50  ;;  %v13192_v50 = vld [vmem:[#allocation79_spill] sm:$0xff]  ;;  %v3558_v15 = vpop.xlane.xlu1 %3557  ;;  %v3479_v63 = vsel %vm3351_vm9, %v3287_v38, %v3415_v53  ;;  %vm13196_vm3 = vcmp.gt.f32.partialorder %v13195_v39, 0.0  ;;  %v13197_v38 = vld [vmem:[#allocation29_spill] sm:$0xff]  ;;  %vm3356_vm9 = vcmp.ge.f32.partialorder %v10659_v10, 0.0 }
 0x98f   :  { %v10663_v7 = vadd.f32 %v10173_v41, %v13192_v50  ;;  %v3652_v2 = vsub.f32 %v10252_v25, %v3558_v15  ;;  %v3653_v33 = vsub.f32 %v10263_v1, %v3558_v15  ;;  %v3567_v12 = vpop.xlane.xlu0 %3566  ;;  %vm13198_vm2 = vcmp.gt.f32.partialorder %v13197_v38, 0.0 }
 0x990   :  { %v3658_v4 = vsub.f32 %v10269_v34, %v3567_v12  ;;  %v3659_v44 = vsub.f32 %v10273_v6, %v3567_v12  ;;  %v10688_v34 = vsel %vm13196_vm3, %v3478_v16, -1e+30  ;;  %v3285_v16 = vadd.f32 %v10178_v0, %v10156_v19 }
 0x991   :  { %vm3358_vm8 = vcmp.ge.f32.partialorder %v10663_v7, 0.0  ;;  %v3422_v21 = vmul.f32 0.2, %v10663_v7  ;;  %v3716_v25 = vmul.f32 1.442695, %v3652_v2  ;;  %v3289_v19 = vadd.f32 %v10178_v0, %v10154_v43 }
 0x992   :  { %v3718_v17 = vmul.f32 1.442695, %v3653_v33  ;;  %v3728_v1 = vmul.f32 1.442695, %v3658_v4  ;;  %v3730_v15 = vmul.f32 1.442695, %v3659_v44  ;;  %v3476_v44 = vsel %vm3348_vm0, %v3284_v37, %v3412_v20 }
 0x993   :  { %v3564_v32 = vpop.xlane.xlu1 %3563  ;;  %8170 = vpow2.f32 %v3716_v25  ;;  %v10694_v2 = vsel %vm13198_vm2, %v3479_v63, -1e+30  ;;  %v13199_v37 = vld [vmem:[#allocation32_spill] sm:$0xff]  ;;  %vm3349_vm1 = vcmp.ge.f32.partialorder %v3285_v16, 0.0  ;;  %vm3353_vm0 = vcmp.ge.f32.partialorder %v3289_v19, 0.0 }
 0x994   :  { %v3656_v6 = vsub.f32 %v10280_v54, %v3564_v32  ;;  %v3657_v12 = vsub.f32 %v10284_v26, %v3564_v32  ;;  %8172 = vpow2.f32 %v3718_v17  ;;  %v3631_v63 = vmax.f32 %v10688_v34, %v10694_v2 }
 0x995   :  { %8174 = vpow2.f32 %v3728_v1  ;;  %v3482_v17 = vsel %vm3354_vm6, %v3290_v9, %v3418_v56  ;;  %vm13200_vm4 = vcmp.gt.f32.partialorder %v13199_v37, 0.0  ;;  %v3480_v56 = vsel %vm3352_vm5, %v10653_v8, %v3416_v5  ;;  %v13203_v8 = vld [vmem:[#allocation31_spill] sm:$0xff] }
 0x996   :  { %v3724_v54 = vmul.f32 1.442695, %v3656_v6  ;;  %v3726_v48 = vmul.f32 1.442695, %v3657_v12  ;;  %8176 = vpow2.f32 %v3730_v15  ;;  %v10707_v20 = vsel %vm13200_vm4, %v3476_v44, -1e+30 }
 0x997   :  { %v8167_v47 = vpop.eup %8166  ;;  %v3291_v9 = vadd.f32 %v10178_v0, %v10166_v45  ;;  %v3413_v1 = vmul.f32 0.2, %v3285_v16  ;;  %v3486_v15 = vsel %vm3358_vm8, %v10663_v7, %v3422_v21  ;;  %vm13204_vm10 = vcmp.gt.f32.partialorder %v13203_v8, 0.0  ;;  %v13205_v12 = vld [vmem:[#allocation22_spill] sm:$0xff]  ;;  %v13215_v8 = vld [vmem:[#allocation23_spill] sm:$0xff] }
 0x998   :  { %v8169_v29 = vpop.eup %8168  ;;  %v10674_v55 = vmul.f32 %v8167_v47, %v13193_v36  ;;  %8178 = vpow2.f32 %v3724_v54  ;;  %v10734_v21 = vadd.f32 %v10178_v0, %v13191_v27  ;;  %vm13206_vm7 = vcmp.gt.f32.partialorder %v13205_v12, 0.0  ;;  %v13207_v27 = vld [vmem:[#allocation34_spill] sm:$0xff] }
 0x999   :  { %v10680_v61 = vmul.f32 %v8169_v29, %v13194_v58  ;;  %v3573_v29 = vpop.xlane.xlu0 %3572  ;;  %v3570_v32 = vpop.xlane.xlu1 %3569  ;;  %8180 = vpow2.f32 %v3726_v48  ;;  %vm3355_vm5 = vcmp.ge.f32.partialorder %v3291_v9, 0.0  ;;  %v3417_v54 = vmul.f32 0.2, %v3289_v19 }
 0x99a   :  { %v3662_v33 = vsub.f32 %v10301_v62, %v3573_v29  ;;  %v3663_v4 = vsub.f32 %v10291_v52, %v3573_v29  ;;  %v3660_v52 = vsub.f32 %v10325_v28, %v3570_v32  ;;  %v3661_v25 = vsub.f32 %v10311_v24, %v3570_v32 }
 0x99b   :  { %v3911_v47 = vadd.f32 %v10680_v61, %v10674_v55  ;;  %v3295_v28 = vadd.f32 %v10178_v0, %v13192_v50  ;;  %v10730_v50 = vsel %vm13204_vm10, %v3480_v56, -1e+30  ;;  %v10738_v29 = vsel %vm13206_vm7, %v3486_v15, -1e+30 }
 0x99c   :  { %v3736_v26 = vmul.f32 1.442695, %v3662_v33  ;;  %v3738_v62 = vmul.f32 1.442695, %v3663_v4  ;;  %v3732_v5 = vmul.f32 1.442695, %v3660_v52 }
 0x99d   :  { %3912 = vadd.xlane.f32.xlu1 %v3911_v47  ;;  %v3579_v53 = vpop.xlane.xlu0 %3578  ;;  %v3576_v24 = vpop.xlane.xlu1 %3575  ;;  %v13201_v47 = vld [vmem:[#allocation44_spill] sm:$0xff]  ;;  %v3734_v7 = vmul.f32 1.442695, %v3661_v25  ;;  %vm3359_vm6 = vcmp.ge.f32.partialorder %v3295_v28, 0.0  ;;  %v3419_v4 = vmul.f32 0.2, %v3291_v9 }
 0x99e   :  { %8182 = vpow2.f32 %v3736_v26  ;;  %v3666_v43 = vsub.f32 %v10332_v23, %v3579_v53  ;;  %vm13202_vm12 = vcmp.gt.f32.partialorder %v13201_v47, 0.0  ;;  %v3667_v45 = vsub.f32 %v10320_v60, %v3579_v53  ;;  %v8171_v33 = vpop.eup %8170 }
 0x99f   :  { %v10725_v6 = vsel %vm13202_vm12, %v3482_v17, -1e+30  ;;  %8184 = vpow2.f32 %v3738_v62  ;;  %v3477_v60 = vsel %vm3349_vm1, %v3285_v16, %v3413_v1  ;;  %v8173_v44 = vpop.eup %8172  ;;  %v3423_v48 = vmul.f32 0.2, %v3295_v28  ;;  %v13208_v16 = vld [vmem:[#allocation24_spill] sm:$0xff]  ;;  %v13209_v1 = vld [vmem:[#allocation21_spill] sm:$0xff] }
 0x9a0   :  { %v3744_v26 = vmul.f32 1.442695, %v3666_v43  ;;  %v8175_v17 = vpop.eup %8174  ;;  %8186 = vpow2.f32 %v3732_v5  ;;  %v3746_v62 = vmul.f32 1.442695, %v3667_v45  ;;  %v3664_v52 = vsub.f32 %v10355_v31, %v3576_v24  ;;  %v13211_v43 = vld [vmem:[#allocation35_spill] sm:$0xff] }
 0x9a1   :  { %3632 = vmax.xlane.f32.xlu1 %v3631_v63  ;;  %v3585_v23 = vpop.xlane.xlu0 %3584  ;;  %v10744_v63 = vmul.f32 %v8171_v33, %v13207_v27  ;;  %v10748_v53 = vmul.f32 %v8173_v44, %v13085_v51  ;;  %v8177_v25 = vpop.eup %8176  ;;  %8188 = vpow2.f32 %v3734_v7  ;;  %v3665_v56 = vsub.f32 %v13208_v16, %v3576_v24  ;;  %v13212_v31 = vld [vmem:[#allocation15_spill] sm:$0xff] }
 0x9a2   :  { %v10741_v32 = vpop.xlane.xlu1 %3581  ;;  %vm13210_vm8 = vcmp.gt.f32.partialorder %v13209_v1, 0.0  ;;  %v10757_v33 = vmul.f32 %v8175_v17, %v13211_v43  ;;  %v8179_v5 = vpop.eup %8178  ;;  %v3421_v45 = vmul.f32 0.2, %v10734_v21  ;;  %v3670_v27 = vsub.f32 %v13212_v31, %v3585_v23  ;;  %v13214_v31 = vld [vmem:[#allocation18_spill] sm:$0xff]  ;;  %v13224_v1 = vld [vmem:[#allocation27_spill] sm:$0xff] }
 0x9a3   :  { %v10754_v15 = vsel %vm13210_vm8, %v3477_v60, -1e+30  ;;  %v3908_v44 = vadd.f32 %v10748_v53, %v10744_v63  ;;  %v3483_v51 = vsel %vm3355_vm5, %v3291_v9, %v3419_v4  ;;  %v8181_v7 = vpop.eup %8180  ;;  %8190 = vpow2.f32 %v3744_v26  ;;  %v13213_v60 = vld [vmem:[#allocation48_spill] sm:$0xff] }
 0x9a4   :  { %v10767_v58 = vmul.f32 %v8177_v25, %v13213_v60  ;;  %v3481_v17 = vsel %vm3353_vm0, %v3289_v19, %v3417_v54  ;;  %v3487_v43 = vsel %vm3359_vm6, %v3295_v28, %v3423_v48  ;;  %8192 = vpow2.f32 %v3746_v62  ;;  %v13216_v60 = vld [vmem:[#allocation103_spill] sm:$0xff]  ;;  %v13218_v48 = vld [vmem:[#allocation25_spill] sm:$0xff]  ;;  %v13219_v62 = vld [vmem:[#allocation36_spill] sm:$0xff] }
 0x9a5   :  { %v3591_v24 = vpop.xlane.xlu0 %3590  ;;  %v3740_v36 = vmul.f32 1.442695, %v3664_v52  ;;  %v3671_v12 = vsub.f32 %v13214_v31, %v3585_v23  ;;  %3909 = vadd.xlane.f32.xlu0 %v3908_v44  ;;  %v3628_v9 = vmax.f32 %v10707_v20, %v10754_v15  ;;  %v3742_v26 = vmul.f32 1.442695, %v3665_v56  ;;  %v13221_v44 = vld [vmem:[#allocation49_spill] sm:$0xff] }
 0x9a6   :  { %v10764_v16 = vpop.xlane.xlu1 %3587  ;;  %v3668_v47 = vsub.f32 %v13215_v8, %v10741_v32  ;;  %v3917_v25 = vadd.f32 %v10767_v58, %v10757_v33  ;;  %vm13217_vm3 = vcmp.gt.f32.partialorder %v13216_v60, 0.0  ;;  %v3752_v54 = vmul.f32 1.442695, %v3670_v27  ;;  %v13223_v8 = vld [vmem:[#allocation19_spill] sm:$0xff] }
 0x9a7   :  { %v10780_v19 = vsel %vm13217_vm3, %v3483_v51, -1e+30  ;;  %v3674_v23 = vsub.f32 %v13218_v48, %v3591_v24  ;;  %v10784_v52 = vmul.f32 %v8179_v5, %v13219_v62  ;;  %v10787_v31 = vmul.f32 %v8181_v7, %v13221_v44  ;;  %v13226_v51 = vld [vmem:[#allocation104_spill] sm:$0xff] }
 0x9a8   :  { %v8183_v4 = vpop.eup %8182  ;;  %vm3357_vm2 = vcmp.ge.f32.partialorder %v10734_v21, 0.0  ;;  %v3675_v56 = vsub.f32 %v13223_v8, %v3591_v24  ;;  %3918 = vadd.xlane.f32.xlu1 %v3917_v25  ;;  %vm13225_vm4 = vcmp.gt.f32.partialorder %v13224_v1, 0.0  ;;  %vm13227_vm1 = vcmp.gt.f32.partialorder %v13226_v51, 0.0  ;;  %v13228_v5 = vld [vmem:[#allocation16_spill] sm:$0xff]  ;;  %v13229_v25 = vld [vmem:[#allocation37_spill] sm:$0xff]  ;;  %v13234_v51 = vld [vmem:[#allocation51_spill] sm:$0xff] }
 0x9a9   :  { %v8185_v28 = vpop.eup %8184  ;;  %13220 = vst [vmem:[#allocation73_spill] sm:$0xff] %v10784_v52  ;;  %13222 = vst [vmem:[#allocation76_spill] sm:$0xff] %v10787_v31  ;;  %v10793_v60 = vsel %vm13225_vm4, %v3481_v17, -1e+30  ;;  %v10797_v27 = vsel %vm13227_vm1, %v3487_v43, -1e+30  ;;  %8194 = vpow2.f32 %v3740_v36  ;;  %v3669_v62 = vsub.f32 %v13228_v5, %v10741_v32  ;;  %3629 = vmax.xlane.f32.xlu0 %v3628_v9 }
 0x9aa   :  { %v3754_v48 = vmul.f32 1.442695, %v3671_v12  ;;  %v3226_v7 = vpop.permute.xlu1 %3225  ;;  %v3637_v44 = vmax.f32 %v10725_v6, %v10780_v19  ;;  %8196 = vpow2.f32 %v3742_v26  ;;  %v3748_v24 = vmul.f32 1.442695, %v3668_v47  ;;  %v13230_v17 = vld [vmem:[#allocation50_spill] sm:$0xff]  ;;  %v8187_v43 = vpop.eup %8186 }
 0x9ab   :  { %v10804_v8 = vmul.f32 %v8183_v4, %v13229_v25  ;;  %v10807_v1 = vmul.f32 %v8185_v28, %v13230_v17  ;;  %8198 = vpow2.f32 %v3752_v54  ;;  %v3760_v36 = vmul.f32 1.442695, %v3674_v23  ;;  %v8189_v9 = vpop.eup %8188  ;;  %v13231_v47 = vld [vmem:[#allocation58_spill] sm:$0xff] }
 0x9ac   :  { %v3914_v12 = vadd.f32 %v10787_v31, %v10784_v52  ;;  %v3485_v32 = vsel %vm3357_vm2, %v10734_v21, %v3421_v45  ;;  %v3762_v5 = vmul.f32 1.442695, %v3675_v56  ;;  %v3672_v26 = vsub.f32 %v13231_v47, %v10764_v16  ;;  %3638 = vmax.xlane.f32.xlu1 %v3637_v44  ;;  %v13232_v47 = vld [vmem:[#allocation26_spill] sm:$0xff]  ;;  %v3222_v44 = vpop.permute.xlu0 %3221  ;;  %v13235_v31 = vld [vmem:[#allocation105_spill] sm:$0xff] }
 0x9ad   :  { %v3298_v4 = vadd.f32 %v10173_v41, %v3226_v7  ;;  %v3299_v28 = vadd.f32 %v10178_v0, %v3226_v7  ;;  %8200 = vpow2.f32 %v3754_v48  ;;  %v3634_v54 = vmax.f32 %v10730_v50, %v10793_v60  ;;  %v8191_v45 = vpop.eup %8190  ;;  %v13233_v25 = vld [vmem:[#allocation38_spill] sm:$0xff] }
 0x9ae   :  { %3915 = vadd.xlane.f32.xlu0 %v3914_v12  ;;  %v3643_v23 = vmax.f32 %v10738_v29, %v10797_v27  ;;  %v3484_v21 = vsel %vm3356_vm9, %v10659_v10, %v10669_v18  ;;  %8202 = vpow2.f32 %v3748_v24  ;;  %v3750_v56 = vmul.f32 1.442695, %v3669_v62  ;;  %v8193_v12 = vpop.eup %8192 }
 0x9af   :  { %v3673_v7 = vsub.f32 %v13232_v47, %v10764_v16  ;;  %v3923_v48 = vadd.f32 %v10807_v1, %v10804_v8  ;;  %8204 = vpow2.f32 %v3760_v36  ;;  %v10831_v17 = vmul.f32 %v8187_v43, %v13233_v25  ;;  %v13239_v25 = vld [vmem:[#allocation52_spill] sm:$0xff] }
 0x9b0   :  { %v10834_v52 = vmul.f32 %v8189_v9, %v13234_v51  ;;  %vm13236_vm12 = vcmp.gt.f32.partialorder %v13235_v31, 0.0  ;;  %8206 = vpow2.f32 %v3762_v5  ;;  %v3756_v10 = vmul.f32 1.442695, %v3672_v26  ;;  %v13237_v9 = vld [vmem:[#allocation39_spill] sm:$0xff]  ;;  %v13241_v51 = vld [vmem:[#allocation102_spill] sm:$0xff] }
 0x9b1   :  { %v10838_v18 = vsel %vm13236_vm12, %v3485_v32, -1e+30  ;;  %v3426_v62 = vmul.f32 0.2, %v3298_v4  ;;  %v3427_v16 = vmul.f32 0.2, %v3299_v28  ;;  %3924 = vadd.xlane.f32.xlu1 %v3923_v48  ;;  %v3296_v24 = vadd.f32 %v10173_v41, %v3222_v44 }
 0x9b2   :  { %vm3362_vm10 = vcmp.ge.f32.partialorder %v3298_v4, 0.0  ;;  %vm3363_vm0 = vcmp.ge.f32.partialorder %v3299_v28, 0.0  ;;  %v3297_v36 = vadd.f32 %v10178_v0, %v3222_v44  ;;  %3635 = vmax.xlane.f32.xlu0 %v3634_v54  ;;  %8208 = vpow2.f32 %v3750_v56 }
 0x9b3   :  { %v3758_v43 = vmul.f32 1.442695, %v3673_v7  ;;  %v10843_v47 = vmul.f32 %v8191_v45, %v13237_v9  ;;  %v10846_v32 = vmul.f32 %v8193_v12, %v13239_v25  ;;  %v8195_v5 = vpop.eup %8194  ;;  %v3920_v26 = vadd.f32 %v10834_v52, %v10831_v17  ;;  %v13243_v9 = vld [vmem:[#allocation40_spill] sm:$0xff] }
 0x9b4   :  { %v8197_v48 = vpop.eup %8196  ;;  %vm13242_vm7 = vcmp.gt.f32.partialorder %v13241_v51, 0.0  ;;  %v3490_v0 = vsel %vm3362_vm10, %v3298_v4, %v3426_v62  ;;  %v3491_v54 = vsel %vm3363_vm0, %v3299_v28, %v3427_v16  ;;  %8210 = vpow2.f32 %v3756_v10  ;;  %v13244_v4 = vld [vmem:[#allocation53_spill] sm:$0xff]  ;;  %v13245_v10 = vld [vmem:[#allocation62_spill] sm:$0xff]  ;;  %v13247_v16 = vld [vmem:[#allocation67_spill] sm:$0xff] }
 0x9b5   :  { %13238 = vst [vmem:[#allocation77_spill] sm:$0xff] %v10843_v47  ;;  %13240 = vst [vmem:[#allocation78_spill] sm:$0xff] %v10846_v32  ;;  %3644 = vmax.xlane.f32.xlu1 %v3643_v23  ;;  %v10852_v41 = vsel %vm13242_vm7, %v3484_v21, -1e+30  ;;  %v8199_v56 = vpop.eup %8198  ;;  %v3424_v7 = vmul.f32 0.2, %v3296_v24  ;;  %8212 = vpow2.f32 %v3758_v43  ;;  %v3929_v23 = vadd.f32 %v10846_v32, %v10843_v47 }
 0x9b6   :  { %v3425_v45 = vmul.f32 0.2, %v3297_v36  ;;  %3921 = vadd.xlane.f32.xlu0 %v3920_v26  ;;  %v3640_v44 = vmax.f32 %v10852_v41, %v10838_v18  ;;  %vm3360_vm5 = vcmp.ge.f32.partialorder %v3296_v24, 0.0  ;;  %vm3361_vm6 = vcmp.ge.f32.partialorder %v3297_v36, 0.0 }
 0x9b7   :  { %v8201_v12 = vpop.eup %8200  ;;  %v10859_v21 = vmul.f32 %v8195_v5, %v13243_v9  ;;  %v10862_v28 = vmul.f32 %v8197_v48, %v13244_v4  ;;  %vm13246_vm9 = vcmp.gt.f32.partialorder %v13245_v10, 0.0  ;;  %vm13248_vm8 = vcmp.gt.f32.partialorder %v13247_v16, 0.0  ;;  %v13249_v48 = vld [vmem:[#allocation41_spill] sm:$0xff]  ;;  %v13251_v4 = vld [vmem:[#allocation54_spill] sm:$0xff] }
 0x9b8   :  { %v10866_v62 = vsel %vm13246_vm9, %v3490_v0, -1e+30  ;;  %v10870_v26 = vsel %vm13248_vm8, %v3491_v54, -1e+30  ;;  %v8203_v43 = vpop.eup %8202  ;;  %v3488_v31 = vsel %vm3360_vm5, %v3296_v24, %v3424_v7  ;;  %v3489_v47 = vsel %vm3361_vm6, %v3297_v36, %v3425_v45  ;;  %v13252_v10 = vld [vmem:[#allocation61_spill] sm:$0xff]  ;;  %v13254_v24 = vld [vmem:[#allocation66_spill] sm:$0xff] }
 0x9b9   :  { %3930 = vadd.xlane.f32.xlu1 %v3929_v23  ;;  %v8205_v25 = vpop.eup %8204  ;;  %v3649_v5 = vmax.f32 %v10866_v62, %v10870_v26  ;;  %v10875_v9 = vmul.f32 %v8199_v56, %v13249_v48  ;;  %v10878_v0 = vmul.f32 %v8201_v12, %v13251_v4  ;;  %v3926_v54 = vadd.f32 %v10862_v28, %v10859_v21  ;;  %v13256_v7 = vld [vmem:[#allocation43_spill] sm:$0xff]  ;;  %v13259_v4 = vld [vmem:[#allocation42_spill] sm:$0xff] }
 0x9ba   :  { %3641 = vmax.xlane.f32.xlu0 %v3640_v44  ;;  %v8207_v32 = vpop.eup %8206  ;;  %vm13253_vm3 = vcmp.gt.f32.partialorder %v13252_v10, 0.0  ;;  %vm13255_vm2 = vcmp.gt.f32.partialorder %v13254_v24, 0.0  ;;  %v10893_v45 = vmul.f32 %v8205_v25, %v13256_v7  ;;  %v13258_v44 = vld [vmem:[#allocation56_spill] sm:$0xff]  ;;  %v10901_v10 = vmul.f32 %v8203_v43, %v13259_v4 }
 0x9bb   :  { %13250 = vst [vmem:[#allocation75_spill] sm:$0xff] %v10875_v9  ;;  %v10884_v23 = vsel %vm13253_vm3, %v3488_v31, -1e+30  ;;  %v10888_v36 = vsel %vm13255_vm2, %v3489_v47, -1e+30  ;;  %v3935_v56 = vadd.f32 %v10878_v0, %v10875_v9  ;;  %v10896_v12 = vmul.f32 %v8207_v32, %v13258_v44  ;;  %v13260_v47 = vld [vmem:[#allocation55_spill] sm:$0xff] }
 0x9bc   :  { %v8209_v16 = vpop.eup %8208  ;;  %13257 = vst [vmem:[#allocation80_spill] sm:$0xff] %v10893_v45  ;;  %v3646_v31 = vmax.f32 %v10884_v23, %v10888_v36  ;;  %v13263_v44 = vld [vmem:[#allocation57_spill] sm:$0xff] }
 0x9bd   :  { %3650 = vmax.xlane.f32.xlu1 %v3649_v5  ;;  %v10904_v24 = vmul.f32 %v8209_v16, %v13260_v47  ;;  %v3941_v25 = vadd.f32 %v10896_v12, %v10893_v45 }
 0x9be   :  { %3927 = vadd.xlane.f32.xlu0 %v3926_v54  ;;  %v8211_v48 = vpop.eup %8210  ;;  %v13261_v54 = vld [vmem:[#allocation46_spill] sm:$0xff] }
 0x9bf   :  { %v8213_v5 = vpop.eup %8212  ;;  %v3932_v32 = vadd.f32 %v10904_v24, %v10901_v10  ;;  %v10911_v7 = vmul.f32 %v8211_v48, %v13261_v54 }
 0x9c0   :  { %v10914_v9 = vmul.f32 %v8213_v5, %v13263_v44 }
 0x9c1   :  { %3936 = vadd.xlane.f32.xlu1 %v3935_v56  ;;  %13262 = vst [vmem:[#allocation81_spill] sm:$0xff] %v10911_v7 }
 0x9c2   :  { %3647 = vmax.xlane.f32.xlu0 %v3646_v31  ;;  %13264 = vst [vmem:[#allocation79_spill] sm:$0xff] %v10914_v9  ;;  %v3938_v16 = vadd.f32 %v10914_v9, %v10911_v7 }
 0x9c5   :  { %3942 = vadd.xlane.f32.xlu1 %v3941_v25 }
 0x9c6   :  { %3933 = vadd.xlane.f32.xlu0 %v3932_v32 }
 0x9ca   :  { %3939 = vadd.xlane.f32.xlu0 %v3938_v16 }
 0x9d8   :  { %v3597_v43 = vpop.xlane.xlu0 %3596 }
 0x9d9   :  { %v3678_v56 = vsub.f32 %v10478_v14, %v3597_v43  ;;  %v3679_v31 = vsub.f32 %v10470_v35, %v3597_v43 }
 0x9db   :  { %v3768_v4 = vmul.f32 1.442695, %v3678_v56  ;;  %v3770_v47 = vmul.f32 1.442695, %v3679_v31  ;;  %v3594_v45 = vpop.xlane.xlu1 %3593 }
 0x9dc   :  { %v3676_v48 = vsub.f32 %v10486_v42, %v3594_v45  ;;  %v3677_v54 = vsub.f32 %v10490_v30, %v3594_v45  ;;  %v3600_v5 = vpop.xlane.xlu0 %3599 }
 0x9dd   :  { %8214 = vpow2.f32 %v3768_v4  ;;  %v3680_v25 = vsub.f32 %v10509_v57, %v3600_v5  ;;  %v3681_v32 = vsub.f32 %v10498_v22, %v3600_v5 }
 0x9de   :  { %8216 = vpow2.f32 %v3770_v47  ;;  %v3764_v16 = vmul.f32 1.442695, %v3676_v48  ;;  %v3766_v44 = vmul.f32 1.442695, %v3677_v54 }
 0x9df   :  { %v3772_v7 = vmul.f32 1.442695, %v3680_v25  ;;  %v3774_v14 = vmul.f32 1.442695, %v3681_v32  ;;  %v3603_v9 = vpop.xlane.xlu1 %3602 }
 0x9e0   :  { %8218 = vpow2.f32 %v3764_v16  ;;  %v3682_v35 = vsub.f32 %v10516_v59, %v3603_v9  ;;  %v3683_v43 = vsub.f32 %v10520_v40, %v3603_v9  ;;  %v3606_v42 = vpop.xlane.xlu0 %3605  ;;  %v13265_v9 = vld [vmem:[#allocation64_spill] sm:$0xff]  ;;  %v13266_v16 = vld [vmem:[#allocation65_spill] sm:$0xff] }
 0x9e1   :  { %8220 = vpow2.f32 %v3766_v44  ;;  %v3684_v30 = vsub.f32 %v10539_v13, %v3606_v42  ;;  %v3685_v4 = vsub.f32 %v10529_v3, %v3606_v42 }
 0x9e2   :  { %8222 = vpow2.f32 %v3772_v7  ;;  %v3776_v57 = vmul.f32 1.442695, %v3682_v35  ;;  %v3778_v22 = vmul.f32 1.442695, %v3683_v43  ;;  %v13268_v43 = vld [vmem:[#allocation12_spill] sm:$0xff] }
 0x9e3   :  { %8224 = vpow2.f32 %v3774_v14  ;;  %v3780_v45 = vmul.f32 1.442695, %v3684_v30  ;;  %v3782_v47 = vmul.f32 1.442695, %v3685_v4  ;;  %v3609_v54 = vpop.xlane.xlu1 %3608  ;;  %v13267_v14 = vld [vmem:[#allocation59_spill] sm:$0xff] }
 0x9e4   :  { %8226 = vpow2.f32 %v3776_v57  ;;  %v3686_v56 = vsub.f32 %v10563_v11, %v3609_v54  ;;  %v3687_v59 = vsub.f32 %v10549_v46, %v3609_v54  ;;  %v3612_v31 = vpop.xlane.xlu0 %3611  ;;  %v13270_v4 = vld [vmem:[#allocation63_spill] sm:$0xff] }
 0x9e5   :  { %8228 = vpow2.f32 %v3778_v22  ;;  %v3688_v40 = vsub.f32 %v10570_v49, %v3612_v31  ;;  %v3689_v13 = vsub.f32 %v13265_v9, %v3612_v31  ;;  %v13269_v49 = vld [vmem:[#allocation60_spill] sm:$0xff]  ;;  %v13271_v22 = vld [vmem:[#allocation91_spill] sm:$0xff] }
 0x9e6   :  { %8230 = vpow2.f32 %v3780_v45  ;;  %v3784_v3 = vmul.f32 1.442695, %v3686_v56  ;;  %v3786_v7 = vmul.f32 1.442695, %v3687_v59 }
 0x9e7   :  { %v8215_v44 = vpop.eup %8214  ;;  %8232 = vpow2.f32 %v3782_v47  ;;  %v3788_v48 = vmul.f32 1.442695, %v3688_v40  ;;  %v3790_v5 = vmul.f32 1.442695, %v3689_v13  ;;  %v3615_v25 = vpop.xlane.xlu1 %3614 }
 0x9e8   :  { %v8217_v32 = vpop.eup %8216  ;;  %8234 = vpow2.f32 %v3784_v3  ;;  %v3690_v11 = vsub.f32 %v13266_v16, %v3615_v25  ;;  %v3691_v46 = vsub.f32 %v13267_v14, %v3615_v25  ;;  %v3618_v35 = vpop.xlane.xlu0 %3617  ;;  %v10935_v42 = vmul.f32 %v8215_v44, %v13268_v43  ;;  %v13273_v25 = vld [vmem:[#allocation68_spill] sm:$0xff]  ;;  %v13274_v14 = vld [vmem:[#allocation82_spill] sm:$0xff]  ;;  %v13279_v43 = vld [vmem:[#allocation83_spill] sm:$0xff] }
 0x9e9   :  { %8236 = vpow2.f32 %v3786_v7  ;;  %v3692_v30 = vsub.f32 %v13269_v49, %v3618_v35  ;;  %v3693_v57 = vsub.f32 %v13270_v4, %v3618_v35  ;;  %v10940_v45 = vmul.f32 %v8217_v32, %v13271_v22  ;;  %v13272_v7 = vld [vmem:[#allocation70_spill] sm:$0xff] }
 0x9ea   :  { %v8219_v47 = vpop.eup %8218  ;;  %8238 = vpow2.f32 %v3788_v48  ;;  %v3792_v54 = vmul.f32 1.442695, %v3690_v11  ;;  %v3794_v56 = vmul.f32 1.442695, %v3691_v46  ;;  %v13276_v11 = vld [vmem:[#allocation71_spill] sm:$0xff]  ;;  %v13277_v46 = vld [vmem:[#allocation69_spill] sm:$0xff] }
 0x9eb   :  { %v8221_v59 = vpop.eup %8220  ;;  %8240 = vpow2.f32 %v3790_v5  ;;  %v3796_v31 = vmul.f32 1.442695, %v3692_v30  ;;  %v3798_v40 = vmul.f32 1.442695, %v3693_v57  ;;  %v3621_v9 = vpop.xlane.xlu1 %3620  ;;  %v3947_v13 = vadd.f32 %v10940_v45, %v10935_v42  ;;  %v13278_v30 = vld [vmem:[#allocation92_spill] sm:$0xff] }
 0x9ec   :  { %v8223_v3 = vpop.eup %8222  ;;  %8242 = vpow2.f32 %v3792_v54  ;;  %v3694_v44 = vsub.f32 %v13272_v7, %v3621_v9  ;;  %v3695_v16 = vsub.f32 %v13273_v25, %v3621_v9  ;;  %v3624_v32 = vpop.xlane.xlu0 %3623  ;;  %v10947_v35 = vmul.f32 %v8219_v47, %v13274_v14 }
 0x9ed   :  { %v8225_v48 = vpop.eup %8224  ;;  %8244 = vpow2.f32 %v3794_v56  ;;  %v3696_v5 = vsub.f32 %v13276_v11, %v3624_v32  ;;  %v3697_v49 = vsub.f32 %v13277_v46, %v3624_v32  ;;  %3948 = vadd.xlane.f32.xlu1 %v3947_v13  ;;  %v10952_v4 = vmul.f32 %v8221_v59, %v13278_v30  ;;  %v13280_v13 = vld [vmem:[#allocation74_spill] sm:$0xff]  ;;  %v13281_v46 = vld [vmem:[#allocation72_spill] sm:$0xff] }
 0x9ee   :  { %13275 = vst [vmem:[#allocation24_spill] sm:$0xff] %v10947_v35  ;;  %v8227_v57 = vpop.eup %8226  ;;  %8246 = vpow2.f32 %v3796_v31  ;;  %v3800_v54 = vmul.f32 1.442695, %v3694_v44  ;;  %v3802_v7 = vmul.f32 1.442695, %v3695_v16  ;;  %v10955_v9 = vmul.f32 %v8223_v3, %v13279_v43  ;;  %v13282_v31 = vld [vmem:[#allocation93_spill] sm:$0xff] }
 0x9ef   :  { %v8229_v25 = vpop.eup %8228  ;;  %8248 = vpow2.f32 %v3798_v40  ;;  %v3804_v47 = vmul.f32 1.442695, %v3696_v5  ;;  %v3806_v14 = vmul.f32 1.442695, %v3697_v49  ;;  %v3944_v56 = vadd.f32 %v10952_v4, %v10947_v35  ;;  %v3627_v11 = vpop.xlane.xlu1 %3626  ;;  %v13283_v3 = vld [vmem:[#allocation84_spill] sm:$0xff]  ;;  %v13284_v5 = vld [vmem:[#allocation95_spill] sm:$0xff] }
 0x9f0   :  { %v8231_v32 = vpop.eup %8230  ;;  %8250 = vpow2.f32 %v3800_v54  ;;  %v3698_v59 = vsub.f32 %v13280_v13, %v3627_v11  ;;  %v3699_v30 = vsub.f32 %v13281_v46, %v3627_v11  ;;  %v10962_v44 = vmul.f32 %v8225_v48, %v13282_v31  ;;  %v13285_v43 = vld [vmem:[#allocation85_spill] sm:$0xff] }
 0x9f1   :  { %v8233_v16 = vpop.eup %8232  ;;  %8252 = vpow2.f32 %v3802_v7  ;;  %3945 = vadd.xlane.f32.xlu0 %v3944_v56  ;;  %v10965_v40 = vmul.f32 %v8227_v57, %v13283_v3  ;;  %v10968_v49 = vmul.f32 %v8229_v25, %v13284_v5  ;;  %v10971_v22 = vmul.f32 %v8231_v32, %v13285_v43  ;;  %v13287_v57 = vld [vmem:[#allocation96_spill] sm:$0xff]  ;;  %v13288_v25 = vld [vmem:[#allocation86_spill] sm:$0xff]  ;;  %v13290_v43 = vld [vmem:[#allocation97_spill] sm:$0xff] }
 0x9f2   :  { %v8235_v54 = vpop.eup %8234  ;;  %8254 = vpow2.f32 %v3804_v47  ;;  %v3808_v13 = vmul.f32 1.442695, %v3698_v59  ;;  %v3810_v35 = vmul.f32 1.442695, %v3699_v30  ;;  %v3950_v48 = vadd.f32 %v10962_v44, %v10955_v9  ;;  %v13292_v59 = vld [vmem:[#allocation87_spill] sm:$0xff] }
 0x9f3   :  { %13286 = vst [vmem:[#allocation15_spill] sm:$0xff] %v10971_v22  ;;  %v8237_v11 = vpop.eup %8236  ;;  %8256 = vpow2.f32 %v3806_v14  ;;  %v3953_v7 = vadd.f32 %v10968_v49, %v10965_v40  ;;  %v10978_v56 = vmul.f32 %v8233_v16, %v13287_v57  ;;  %v10981_v46 = vmul.f32 %v8235_v54, %v13288_v25  ;;  %v13294_v25 = vld [vmem:[#allocation98_spill] sm:$0xff] }
 0x9f4   :  { %v8239_v32 = vpop.eup %8238  ;;  %8258 = vpow2.f32 %v3808_v13  ;;  %v10984_v47 = vmul.f32 %v8237_v11, %v13290_v43  ;;  %v13295_v11 = vld [vmem:[#allocation88_spill] sm:$0xff] }
 0x9f5   :  { %13289 = vst [vmem:[#allocation18_spill] sm:$0xff] %v10981_v46  ;;  %v8241_v30 = vpop.eup %8240  ;;  %8260 = vpow2.f32 %v3810_v35  ;;  %3951 = vadd.xlane.f32.xlu0 %v3950_v48  ;;  %3954 = vadd.xlane.f32.xlu1 %v3953_v7  ;;  %v3956_v14 = vadd.f32 %v10978_v56, %v10971_v22  ;;  %v10989_v5 = vmul.f32 %v8239_v32, %v13292_v59  ;;  %v13297_v48 = vld [vmem:[#allocation14_spill] sm:$0xff]  ;;  %v13299_v59 = vld [vmem:[#allocation20_spill] sm:$0xff]  ;;  %v13301_v22 = vld [vmem:[#allocation89_spill] sm:$0xff] }
 0x9f6   :  { %13291 = vst [vmem:[#allocation23_spill] sm:$0xff] %v10984_v47  ;;  %v8243_v16 = vpop.eup %8242  ;;  %v3959_v54 = vadd.f32 %v10984_v47, %v10981_v46  ;;  %v10994_v57 = vmul.f32 %v8241_v30, %v13294_v25  ;;  %v13300_v25 = vld [vmem:[#allocation99_spill] sm:$0xff] }
 0x9f7   :  { %13293 = vst [vmem:[#allocation25_spill] sm:$0xff] %v10989_v5  ;;  %v8245_v13 = vpop.eup %8244  ;;  %v10997_v43 = vmul.f32 %v8243_v16, %v13295_v11 }
 0x9f8   :  { %v8247_v35 = vpop.eup %8246  ;;  %v11000_v7 = vmul.f32 %v8245_v13, %v13297_v48  ;;  %v3962_v32 = vadd.f32 %v10994_v57, %v10989_v5 }
 0x9f9   :  { %13296 = vst [vmem:[#allocation19_spill] sm:$0xff] %v10997_v43  ;;  %v8249_v3 = vpop.eup %8248  ;;  %3957 = vadd.xlane.f32.xlu0 %v3956_v14  ;;  %3960 = vadd.xlane.f32.xlu1 %v3959_v54  ;;  %v11005_v31 = vmul.f32 %v8247_v35, %v13299_v59  ;;  %v13303_v14 = vld [vmem:[#allocation100_spill] sm:$0xff]  ;;  %v13304_v59 = vld [vmem:[#allocation90_spill] sm:$0xff] }
 0x9fa   :  { %13298 = vst [vmem:[#allocation16_spill] sm:$0xff] %v11000_v7  ;;  %v8251_v46 = vpop.eup %8250  ;;  %v3965_v30 = vadd.f32 %v11000_v7, %v10997_v43  ;;  %v11010_v16 = vmul.f32 %v8249_v3, %v13300_v25  ;;  %v13306_v25 = vld [vmem:[#allocation13_spill] sm:$0xff]  ;;  %v13307_v7 = vld [vmem:[#allocation94_spill] sm:$0xff] }
 0x9fb   :  { %v8253_v11 = vpop.eup %8252  ;;  %v11013_v13 = vmul.f32 %v8251_v46, %v13301_v22 }
 0x9fc   :  { %v8255_v48 = vpop.eup %8254  ;;  %v11016_v54 = vmul.f32 %v8253_v11, %v13303_v14  ;;  %v3968_v35 = vadd.f32 %v11010_v16, %v11005_v31  ;;  %v13309_v14 = vld [vmem:[#allocation101_spill] sm:$0xff] }
 0x9fd   :  { %13302 = vst [vmem:[#allocation58_spill] sm:$0xff] %v11013_v13  ;;  %v8257_v47 = vpop.eup %8256  ;;  %3963 = vadd.xlane.f32.xlu0 %v3962_v32  ;;  %3966 = vadd.xlane.f32.xlu1 %v3965_v30  ;;  %v11021_v5 = vmul.f32 %v8255_v48, %v13304_v59 }
 0x9fe   :  { %v8259_v43 = vpop.eup %8258  ;;  %v3971_v3 = vadd.f32 %v11016_v54, %v11013_v13  ;;  %v11026_v46 = vmul.f32 %v8257_v47, %v13306_v25 }
 0x9ff   :  { %13305 = vst [vmem:[#allocation26_spill] sm:$0xff] %v11021_v5  ;;  %v8261_v22 = vpop.eup %8260  ;;  %v11029_v11 = vmul.f32 %v8259_v43, %v13307_v7 }
 0xa00   :  { %v11032_v32 = vmul.f32 %v8261_v22, %v13309_v14  ;;  %v3974_v48 = vadd.f32 %v11026_v46, %v11021_v5 }
 0xa01   :  { %13308 = vst [vmem:[#allocation64_spill] sm:$0xff] %v11029_v11  ;;  %3969 = vadd.xlane.f32.xlu0 %v3968_v35  ;;  %3972 = vadd.xlane.f32.xlu1 %v3971_v3 }
 0xa02   :  { %13310 = vst [vmem:[#allocation65_spill] sm:$0xff] %v11032_v32  ;;  %v3977_v30 = vadd.f32 %v11032_v32, %v11029_v11 }
 0xa05   :  { %3975 = vadd.xlane.f32.xlu0 %v3974_v48  ;;  %3978 = vadd.xlane.f32.xlu1 %v3977_v30 }
 0xa2a   :  { %v3913_v59 = vpop.xlane.xlu1 %3912 }
 0xa2b   :  { %v4005_v22 = vmax.f32 %v3913_v59, 1e-20 }
 0xa2e   :  { %v3633_v47 = vpop.xlane.xlu1 %3632 }
 0xa2f   :  { %v3702_v25 = vsub.f32 %v10688_v34, %v3633_v47  ;;  %v3703_v43 = vsub.f32 %v10694_v2, %v3633_v47 }
 0xa31   :  { %v3816_v7 = vmul.f32 1.442695, %v3702_v25  ;;  %v3818_v13 = vmul.f32 1.442695, %v3703_v43 }
 0xa32   :  { %v3910_v35 = vpop.xlane.xlu0 %3909 }
 0xa33   :  { %8262 = vpow2.f32 %v3816_v7  ;;  %v4004_v3 = vmax.f32 %v3910_v35, 1e-20 }
 0xa34   :  { %8264 = vpow2.f32 %v3818_v13 }
 0xa35   :  { %8266 = vrcp.f32 %v4005_v22  ;;  %v3919_v14 = vpop.xlane.xlu1 %3918 }
 0xa36   :  { %8268 = vrcp.f32 %v4004_v3  ;;  %v3630_v11 = vpop.xlane.xlu0 %3629  ;;  %v4007_v48 = vmax.f32 %v3919_v14, 1e-20 }
 0xa37   :  { %v3700_v32 = vsub.f32 %v10707_v20, %v3630_v11  ;;  %v3701_v34 = vsub.f32 %v10754_v15, %v3630_v11 }
 0xa38   :  { %8270 = vrcp.f32 %v4007_v48 }
 0xa39   :  { %v3812_v59 = vmul.f32 1.442695, %v3700_v32  ;;  %v3814_v7 = vmul.f32 1.442695, %v3701_v34  ;;  %v3639_v13 = vpop.xlane.xlu1 %3638 }
 0xa3a   :  { %v3706_v43 = vsub.f32 %v10725_v6, %v3639_v13  ;;  %v3707_v14 = vsub.f32 %v10780_v19, %v3639_v13 }
 0xa3b   :  { %v3916_v47 = vpop.xlane.xlu0 %3915  ;;  %8272 = vpow2.f32 %v3812_v59 }
 0xa3c   :  { %v4006_v15 = vmax.f32 %v3916_v47, 1e-20  ;;  %8274 = vpow2.f32 %v3814_v7  ;;  %v3826_v11 = vmul.f32 1.442695, %v3707_v14 }
 0xa3d   :  { %v8263_v5 = vpop.eup %8262 }
 0xa3e   :  { %v8265_v30 = vpop.eup %8264  ;;  %v11043_v2 = vmul.f32 %v8263_v5, %v13195_v39  ;;  %v3824_v5 = vmul.f32 1.442695, %v3706_v43  ;;  %8276 = vrcp.f32 %v4006_v15  ;;  %v3925_v35 = vpop.xlane.xlu1 %3924  ;;  %v13349_v39 = vld [vmem:[#allocation34_spill] sm:$0xff] }
 0xa3f   :  { %v11046_v25 = vmul.f32 %v8265_v30, %v13197_v38  ;;  %v8267_v22 = vpop.eup %8266  ;;  %v3636_v3 = vpop.xlane.xlu0 %3635  ;;  %v4009_v48 = vmax.f32 %v3925_v35, 1e-20 }
 0xa40   :  { %v4070_v32 = vmul.f32 %v8267_v22, %v10674_v55  ;;  %8278 = vpow2.f32 %v3824_v5  ;;  %v4071_v6 = vmul.f32 %v8267_v22, %v10680_v61  ;;  %v8269_v19 = vpop.eup %8268  ;;  %v3704_v30 = vsub.f32 %v10730_v50, %v3636_v3 }
 0xa41   :  { %v3983_v20 = vadd.f32 %v11046_v25, %v11043_v2  ;;  %v3705_v34 = vsub.f32 %v10793_v60, %v3636_v3  ;;  %8280 = vpow2.f32 %v3826_v11  ;;  %v4068_v59 = vmul.f32 %v8269_v19, %v10744_v63 }
 0xa42   :  { %8282 = vrcp.f32 %v4009_v48  ;;  %v4069_v7 = vmul.f32 %v8269_v19, %v10748_v53  ;;  %v3820_v13 = vmul.f32 1.442695, %v3704_v30  ;;  %v3645_v43 = vpop.xlane.xlu1 %3644  ;;  %v8271_v55 = vpop.eup %8270  ;;  %v13311_v30 = vld [vmem:[#allocation21_spill] sm:$0xff] }
 0xa43   :  { %3984 = vadd.xlane.f32.xlu1 %v3983_v20  ;;  %v3822_v47 = vmul.f32 1.442695, %v3705_v34  ;;  %v3922_v14 = vpop.xlane.xlu0 %3921  ;;  %v4132_v15 = vpack.c.bf16 %v4070_v32, %v4068_v59  ;;  %v3710_v61 = vsub.f32 %v10738_v29, %v3645_v43  ;;  %v3711_v22 = vsub.f32 %v10797_v27, %v3645_v43 }
 0xa44   :  { %v4133_v20 = vpack.c.bf16 %v4071_v6, %v4069_v7  ;;  %8284 = vpow2.f32 %v3820_v13  ;;  %v4008_v50 = vmax.f32 %v3922_v14, 1e-20  ;;  %v4075_v11 = vmul.f32 %v8271_v55, %v10767_v58  ;;  %v13312_v58 = vld [vmem:[#allocation76_spill] sm:$0xff]  ;;  %v13313_v13 = vld [vmem:[#allocation73_spill] sm:$0xff] }
 0xa45   :  { %8286 = vpow2.f32 %v3822_v47  ;;  %v3832_v60 = vmul.f32 1.442695, %v3710_v61  ;;  %v3834_v63 = vmul.f32 1.442695, %v3711_v22  ;;  %v8273_v5 = vpop.eup %8272  ;;  %v4074_v27 = vmul.f32 %v8271_v55, %v10757_v33 }
 0xa46   :  { %4196 = vmatprep.mubr.bf16.mxu0 %v4133_v20  ;;  %8288 = vrcp.f32 %v4008_v50  ;;  %v3931_v53 = vpop.xlane.xlu1 %3930  ;;  %v8275_v35 = vpop.eup %8274  ;;  %v11062_v32 = vmul.f32 %v8273_v5, %v13199_v37 }
 0xa47   :  { %4197 = vmatmul.mubr.bf16.vlgmr.msra.gmra.mrb[80].mxu0 %v4132_v15  ;;  %v3642_v3 = vpop.xlane.xlu0 %3641  ;;  %8290 = vpow2.f32 %v3832_v60  ;;  %v4011_v29 = vmax.f32 %v3931_v53, 1e-20  ;;  %v11068_v34 = vmul.f32 %v8275_v35, %v13311_v30  ;;  %v13315_v53 = vld [vmem:[#allocation103_spill] sm:$0xff] }
 0xa48   :  { %v8277_v48 = vpop.eup %8276  ;;  %v3708_v6 = vsub.f32 %v10852_v41, %v3642_v3  ;;  %v3709_v19 = vsub.f32 %v10838_v18, %v3642_v3  ;;  %8292 = vpow2.f32 %v3834_v63  ;;  %v13314_v41 = vld [vmem:[#allocation44_spill] sm:$0xff] }
 0xa49   :  { %8294 = vrcp.f32 %v4011_v29  ;;  %v4073_v7 = vmul.f32 %v8277_v48, %v13312_v58  ;;  %v4072_v47 = vmul.f32 %v8277_v48, %v13313_v13  ;;  %v3980_v33 = vadd.f32 %v11068_v34, %v11062_v32 }
 0xa4a   :  { %v8279_v59 = vpop.eup %8278  ;;  %v3828_v14 = vmul.f32 1.442695, %v3708_v6  ;;  %v3830_v20 = vmul.f32 1.442695, %v3709_v19  ;;  %v3651_v55 = vpop.xlane.xlu1 %3650  ;;  %v13316_v19 = vld [vmem:[#allocation31_spill] sm:$0xff] }
 0xa4b   :  { %v8281_v43 = vpop.eup %8280  ;;  %v11075_v15 = vmul.f32 %v8279_v59, %v13314_v41  ;;  %v3928_v61 = vpop.xlane.xlu0 %3927  ;;  %v4135_v22 = vpack.c.bf16 %v4075_v11, %v4073_v7  ;;  %v4134_v50 = vpack.c.bf16 %v4074_v27, %v4072_v47  ;;  %v3714_v60 = vsub.f32 %v10866_v62, %v3651_v55  ;;  %3981 = vadd.xlane.f32.xlu0 %v3980_v33 }
 0xa4c   :  { %v8283_v18 = vpop.eup %8282  ;;  %v3715_v63 = vsub.f32 %v10870_v26, %v3651_v55  ;;  %8296 = vpow2.f32 %v3828_v14  ;;  %v4010_v5 = vmax.f32 %v3928_v61, 1e-20  ;;  %v11080_v35 = vmul.f32 %v8281_v43, %v13315_v53  ;;  %v13317_v14 = vld [vmem:[#allocation27_spill] sm:$0xff] }
 0xa4d   :  { %8298 = vpow2.f32 %v3830_v20  ;;  %4204 = vmatprep.mubr.bf16.mxu0 %v4135_v22  ;;  %v3840_v3 = vmul.f32 1.442695, %v3714_v60  ;;  %v4079_v62 = vmul.f32 %v8283_v18, %v10807_v1  ;;  %v4078_v7 = vmul.f32 %v8283_v18, %v10804_v8  ;;  %v13318_v18 = vld [vmem:[#allocation22_spill] sm:$0xff] }
 0xa4e   :  { %v3842_v29 = vmul.f32 1.442695, %v3715_v63  ;;  %v8285_v48 = vpop.eup %8284  ;;  %8300 = vrcp.f32 %v4010_v5  ;;  %v3989_v11 = vadd.f32 %v11080_v35, %v11075_v15  ;;  %v3937_v27 = vpop.xlane.xlu1 %3936 }
 0xa4f   :  { %4205 = vmatmul.mubr.bf16.gmra.mrb[84].mxu0 %v4134_v50  ;;  %v8287_v26 = vpop.eup %8286  ;;  %v3648_v6 = vpop.xlane.xlu0 %3647  ;;  %8302 = vpow2.f32 %v3840_v3  ;;  %v11086_v59 = vmul.f32 %v8285_v48, %v13316_v19  ;;  %v4013_v58 = vmax.f32 %v3937_v27, 1e-20  ;;  %v13319_v48 = vld [vmem:[#allocation104_spill] sm:$0xff] }
 0xa50   :  { %v8289_v13 = vpop.eup %8288  ;;  %v3712_v47 = vsub.f32 %v10884_v23, %v3648_v6  ;;  %v3713_v43 = vsub.f32 %v10888_v36, %v3648_v6  ;;  %8304 = vpow2.f32 %v3842_v29  ;;  %v11092_v20 = vmul.f32 %v8287_v26, %v13317_v14  ;;  %3990 = vadd.xlane.f32.xlu1 %v3989_v11 }
 0xa51   :  { %v8291_v1 = vpop.eup %8290  ;;  %8306 = vrcp.f32 %v4013_v58  ;;  %v4077_v33 = vmul.f32 %v8289_v13, %v10834_v52  ;;  %v4076_v55 = vmul.f32 %v8289_v13, %v10831_v17  ;;  %v13320_v58 = vld [vmem:[#allocation78_spill] sm:$0xff]  ;;  %v13321_v13 = vld [vmem:[#allocation77_spill] sm:$0xff] }
 0xa52   :  { %v8293_v61 = vpop.eup %8292  ;;  %v3836_v22 = vmul.f32 1.442695, %v3712_v47  ;;  %v3838_v50 = vmul.f32 1.442695, %v3713_v43  ;;  %v3986_v8 = vadd.f32 %v11092_v20, %v11086_v59  ;;  %v3943_v23 = vpop.xlane.xlu1 %3942  ;;  %v11099_v36 = vmul.f32 %v8291_v1, %v13318_v18 }
 0xa53   :  { %v8295_v60 = vpop.eup %8294  ;;  %v3934_v63 = vpop.xlane.xlu0 %3933  ;;  %v4137_v5 = vpack.c.bf16 %v4079_v62, %v4077_v33  ;;  %v4136_v3 = vpack.c.bf16 %v4078_v7, %v4076_v55  ;;  %v4015_v29 = vmax.f32 %v3943_v23, 1e-20  ;;  %v11102_v11 = vmul.f32 %v8293_v61, %v13319_v48  ;;  %v13322_v33 = vld [vmem:[#allocation105_spill] sm:$0xff] }
 0xa54   :  { %8308 = vpow2.f32 %v3836_v22  ;;  %v4012_v52 = vmax.f32 %v3934_v63, 1e-20  ;;  %3987 = vadd.xlane.f32.xlu0 %v3986_v8  ;;  %v4083_v7 = vmul.f32 %v8295_v60, %v13320_v58  ;;  %v4082_v47 = vmul.f32 %v8295_v60, %v13321_v13  ;;  %v13323_v63 = vld [vmem:[#allocation62_spill] sm:$0xff]  ;;  %v13326_v13 = vld [vmem:[#allocation75_spill] sm:$0xff] }
 0xa55   :  { %8310 = vpow2.f32 %v3838_v50  ;;  %4212 = vmatprep.mubr.bf16.mxu0 %v4137_v5  ;;  %v3995_v17 = vadd.f32 %v11102_v11, %v11099_v36 }
 0xa56   :  { %v8297_v27 = vpop.eup %8296  ;;  %8312 = vrcp.f32 %v4012_v52  ;;  %v13324_v52 = vld [vmem:[#allocation67_spill] sm:$0xff] }
 0xa57   :  { %4213 = vmatmul.mubr.bf16.gmra.mrb[88].mxu0 %v4136_v3  ;;  %v8299_v26 = vpop.eup %8298  ;;  %v3940_v6 = vpop.xlane.xlu0 %3939  ;;  %8314 = vrcp.f32 %v4015_v29  ;;  %v11107_v62 = vmul.f32 %v8297_v27, %v13241_v51  ;;  %3996 = vadd.xlane.f32.xlu1 %v3995_v17 }
 0xa58   :  { %v8301_v43 = vpop.eup %8300  ;;  %v4014_v1 = vmax.f32 %v3940_v6, 1e-20  ;;  %v11112_v55 = vmul.f32 %v8299_v26, %v13322_v33  ;;  %v13325_v26 = vld [vmem:[#allocation61_spill] sm:$0xff] }
 0xa59   :  { %v8303_v61 = vpop.eup %8302  ;;  %v4081_v22 = vmul.f32 %v8301_v43, %v10862_v28  ;;  %v4080_v50 = vmul.f32 %v8301_v43, %v10859_v21  ;;  %v13327_v43 = vld [vmem:[#allocation66_spill] sm:$0xff] }
 0xa5a   :  { %v8305_v8 = vpop.eup %8304  ;;  %8316 = vrcp.f32 %v4014_v1  ;;  %v3992_v23 = vadd.f32 %v11112_v55, %v11107_v62  ;;  %v11119_v5 = vmul.f32 %v8303_v61, %v13323_v63 }
 0xa5b   :  { %v8307_v3 = vpop.eup %8306  ;;  %v4139_v60 = vpack.c.bf16 %v4083_v7, %v4081_v22  ;;  %v4138_v29 = vpack.c.bf16 %v4082_v47, %v4080_v50  ;;  %v11122_v17 = vmul.f32 %v8305_v8, %v13324_v52 }
 0xa5c   :  { %3993 = vadd.xlane.f32.xlu0 %v3992_v23  ;;  %v4087_v58 = vmul.f32 %v8307_v3, %v10878_v0  ;;  %v4086_v7 = vmul.f32 %v8307_v3, %v13326_v13  ;;  %v13328_v0 = vld [vmem:[#allocation79_spill] sm:$0xff] }
 0xa5d   :  { %4220 = vmatprep.mubr.bf16.mxu0 %v4139_v60  ;;  %v4001_v28 = vadd.f32 %v11122_v17, %v11119_v5 }
 0xa5e   :  { %v8309_v21 = vpop.eup %8308 }
 0xa5f   :  { %4221 = vmatmul.mubr.bf16.gmra.mrb[92].mxu0 %v4138_v29  ;;  %v8311_v27 = vpop.eup %8310  ;;  %v11127_v6 = vmul.f32 %v8309_v21, %v13325_v26  ;;  %4002 = vadd.xlane.f32.xlu1 %v4001_v28 }
 0xa60   :  { %v8313_v47 = vpop.eup %8312  ;;  %v11132_v1 = vmul.f32 %v8311_v27, %v13327_v43  ;;  %v13329_v27 = vld [vmem:[#allocation81_spill] sm:$0xff]  ;;  %v13330_v43 = vld [vmem:[#allocation80_spill] sm:$0xff] }
 0xa61   :  { %v8315_v61 = vpop.eup %8314  ;;  %v4085_v22 = vmul.f32 %v8313_v47, %v10904_v24  ;;  %v4084_v50 = vmul.f32 %v8313_v47, %v10901_v10 }
 0xa62   :  { %v3998_v8 = vadd.f32 %v11132_v1, %v11127_v6  ;;  %v4091_v29 = vmul.f32 %v8315_v61, %v10896_v12  ;;  %v4090_v24 = vmul.f32 %v8315_v61, %v13330_v43 }
 0xa63   :  { %v4141_v23 = vpack.c.bf16 %v4087_v58, %v4085_v22  ;;  %v4140_v60 = vpack.c.bf16 %v4086_v7, %v4084_v50 }
 0xa64   :  { %v8317_v28 = vpop.eup %8316  ;;  %3999 = vadd.xlane.f32.xlu0 %v3998_v8 }
 0xa65   :  { %4228 = vmatprep.mubr.bf16.mxu0 %v4141_v23  ;;  %v4089_v3 = vmul.f32 %v8317_v28, %v13328_v0  ;;  %v4088_v13 = vmul.f32 %v8317_v28, %v13329_v27 }
 0xa67   :  { %4229 = vmatmul.mubr.bf16.gmra.mrb[96].mxu0 %v4140_v60  ;;  %v4143_v21 = vpack.c.bf16 %v4091_v29, %v4089_v3  ;;  %v4142_v10 = vpack.c.bf16 %v4090_v24, %v4088_v13 }
 0xa69   :  { %4236 = vmatprep.mubr.bf16.mxu0 %v4143_v21 }
 0xa6f   :  { %4237 = vmatmul.mubr.bf16.gmra.mrb[100].mxu0 %v4142_v10  ;;  %v13331_v10 = vld [vmem:[#allocation24_spill] sm:$0xff] }
 0xa7a   :  { %v3949_v47 = vpop.xlane.xlu1 %3948 }
 0xa7b   :  { %v4017_v26 = vmax.f32 %v3949_v47, 1e-20 }
 0xa7d   :  { %8318 = vrcp.f32 %v4017_v26 }
 0xa7e   :  { %v3946_v58 = vpop.xlane.xlu0 %3945 }
 0xa7f   :  { %v4016_v7 = vmax.f32 %v3946_v58, 1e-20 }
 0xa81   :  { %8320 = vrcp.f32 %v4016_v7 }
 0xa82   :  { %v3952_v12 = vpop.xlane.xlu0 %3951  ;;  %v3955_v22 = vpop.xlane.xlu1 %3954 }
 0xa83   :  { %v4018_v50 = vmax.f32 %v3952_v12, 1e-20  ;;  %v4019_v8 = vmax.f32 %v3955_v22, 1e-20 }
 0xa85   :  { %8322 = vrcp.f32 %v4018_v50 }
 0xa86   :  { %8324 = vrcp.f32 %v4019_v8  ;;  %v3958_v23 = vpop.xlane.xlu0 %3957  ;;  %v3961_v60 = vpop.xlane.xlu1 %3960 }
 0xa87   :  { %v8319_v29 = vpop.eup %8318  ;;  %v4020_v28 = vmax.f32 %v3958_v23, 1e-20  ;;  %v4021_v43 = vmax.f32 %v3961_v60, 1e-20 }
 0xa88   :  { %v4095_v26 = vmul.f32 %v8319_v29, %v10940_v45  ;;  %v4094_v3 = vmul.f32 %v8319_v29, %v10935_v42 }
 0xa89   :  { %8326 = vrcp.f32 %v4020_v28 }
 0xa8a   :  { %8328 = vrcp.f32 %v4021_v43  ;;  %v3964_v61 = vpop.xlane.xlu0 %3963  ;;  %v3967_v0 = vpop.xlane.xlu1 %3966 }
 0xa8b   :  { %v8321_v21 = vpop.eup %8320  ;;  %v4022_v27 = vmax.f32 %v3964_v61, 1e-20  ;;  %v4023_v13 = vmax.f32 %v3967_v0, 1e-20 }
 0xa8c   :  { %v4093_v24 = vmul.f32 %v8321_v21, %v10952_v4  ;;  %v4092_v47 = vmul.f32 %v8321_v21, %v13331_v10 }
 0xa8d   :  { %8330 = vrcp.f32 %v4022_v27 }
 0xa8e   :  { %v4145_v58 = vpack.c.bf16 %v4095_v26, %v4093_v24  ;;  %v4144_v7 = vpack.c.bf16 %v4094_v3, %v4092_v47  ;;  %8332 = vrcp.f32 %v4023_v13  ;;  %v3970_v22 = vpop.xlane.xlu0 %3969  ;;  %v3973_v8 = vpop.xlane.xlu1 %3972  ;;  %v13332_v26 = vld [vmem:[#allocation23_spill] sm:$0xff] }
 0xa8f   :  { %v8323_v12 = vpop.eup %8322  ;;  %v4024_v23 = vmax.f32 %v3970_v22, 1e-20  ;;  %v4025_v29 = vmax.f32 %v3973_v8, 1e-20  ;;  %v13333_v47 = vld [vmem:[#allocation15_spill] sm:$0xff] }
 0xa90   :  { %v8325_v50 = vpop.eup %8324  ;;  %4244 = vmatprep.mubr.bf16.mxu0 %v4145_v58  ;;  %v4097_v45 = vmul.f32 %v8323_v12, %v10962_v44  ;;  %v4096_v28 = vmul.f32 %v8323_v12, %v10955_v9  ;;  %v13334_v58 = vld [vmem:[#allocation18_spill] sm:$0xff]  ;;  %v13335_v12 = vld [vmem:[#allocation16_spill] sm:$0xff] }
 0xa91   :  { %4245 = vmatmul.mubr.bf16.gmra.mrb[104].mxu0 %v4144_v7  ;;  %v4099_v42 = vmul.f32 %v8325_v50, %v10968_v49  ;;  %v4098_v43 = vmul.f32 %v8325_v50, %v10965_v40  ;;  %8334 = vrcp.f32 %v4024_v23  ;;  %v13336_v23 = vld [vmem:[#allocation25_spill] sm:$0xff] }
 0xa92   :  { %8336 = vrcp.f32 %v4025_v29  ;;  %v3976_v44 = vpop.xlane.xlu0 %3975  ;;  %v3979_v49 = vpop.xlane.xlu1 %3978 }
 0xa93   :  { %v8327_v60 = vpop.eup %8326  ;;  %v4147_v4 = vpack.c.bf16 %v4099_v42, %v4097_v45  ;;  %v4146_v21 = vpack.c.bf16 %v4098_v43, %v4096_v28  ;;  %v4026_v10 = vmax.f32 %v3976_v44, 1e-20  ;;  %v4027_v9 = vmax.f32 %v3979_v49, 1e-20  ;;  %v13338_v44 = vld [vmem:[#allocation58_spill] sm:$0xff] }
 0xa94   :  { %v8329_v61 = vpop.eup %8328  ;;  %v4101_v0 = vmul.f32 %v8327_v60, %v10978_v56  ;;  %v4100_v40 = vmul.f32 %v8327_v60, %v13333_v47 }
 0xa95   :  { %4252 = vmatprep.mubr.bf16.mxu0 %v4147_v4  ;;  %v4103_v3 = vmul.f32 %v8329_v61, %v13332_v26  ;;  %v4102_v7 = vmul.f32 %v8329_v61, %v13334_v58  ;;  %8338 = vrcp.f32 %v4026_v10  ;;  %v13337_v4 = vld [vmem:[#allocation19_spill] sm:$0xff]  ;;  %v7878_v10 = vld [vmem:[#allocation7 + $0x80] sm:$0xff]  }
 0xa96   :  { %8340 = vrcp.f32 %v4027_v9  ;;  %7665 = vmatprep.subr.bf16.mxu1 %v7878_v10 }
 0xa97   :  { %v8331_v27 = vpop.eup %8330  ;;  %v4149_v13 = vpack.c.bf16 %v4103_v3, %v4101_v0  ;;  %v4148_v50 = vpack.c.bf16 %v4102_v7, %v4100_v40  ;;  %7666 = vmatpush3.bf16.msra.mxu1 %v7878_v10  ;;  %v13341_v40 = vld [vmem:[#allocation64_spill] sm:$0xff] }
 0xa98   :  { %v8333_v24 = vpop.eup %8332  ;;  %v4105_v56 = vmul.f32 %v8331_v27, %v10994_v57  ;;  %v4104_v29 = vmul.f32 %v8331_v27, %v13336_v23 }
 0xa99   :  { %4253 = vmatmul.mubr.bf16.gmra.mrb[108].mxu0 %v4146_v21  ;;  %v4107_v22 = vmul.f32 %v8333_v24, %v13335_v12  ;;  %v4106_v28 = vmul.f32 %v8333_v24, %v13337_v4  ;;  %v7883_v12 = vld [vmem:[#allocation7 + $0xa8] sm:$0xff]  }
 0xa9a   :  { %4260 = vmatprep.mubr.bf16.mxu0 %v4149_v13  ;;  %v13339_v13 = vld [vmem:[#allocation65_spill] sm:$0xff] }
 0xa9b   :  { %v8335_v8 = vpop.eup %8334  ;;  %v4151_v45 = vpack.c.bf16 %v4107_v22, %v4105_v56  ;;  %v4150_v61 = vpack.c.bf16 %v4106_v28, %v4104_v29  ;;  %v7882_v56 = vld [vmem:[#allocation7 + $0xa0] sm:$0xff]   ;;  %v7884_v22 = vld [vmem:[#allocation7 + $0xb0] sm:$0xff]  }
 0xa9c   :  { %v8337_v42 = vpop.eup %8336  ;;  %v4109_v60 = vmul.f32 %v8335_v8, %v11010_v16  ;;  %v4108_v3 = vmul.f32 %v8335_v8, %v11005_v31  ;;  %v7879_v16 = vld [vmem:[#allocation7 + $0x88] sm:$0xff]   ;;  %v7880_v31 = vld [vmem:[#allocation7 + $0x90] sm:$0xff]  }
 0xa9d   :  { %v4111_v43 = vmul.f32 %v8337_v42, %v11016_v54  ;;  %v4110_v21 = vmul.f32 %v8337_v42, %v13338_v44  ;;  %7667 = vmatprep.subr.bf16.mxu1 %v7879_v16  ;;  %v13340_v54 = vld [vmem:[#allocation26_spill] sm:$0xff] }
 0xa9e   :  { %7668 = vmatpush3.bf16.msra.mxu1 %v7879_v16 }
 0xa9f   :  { %v8339_v57 = vpop.eup %8338  ;;  %v4153_v0 = vpack.c.bf16 %v4111_v43, %v4109_v60  ;;  %v4152_v24 = vpack.c.bf16 %v4110_v21, %v4108_v3  ;;  %7669 = vmatprep.subr.bf16.mxu1 %v7880_v31 }
 0xaa0   :  { %v8341_v26 = vpop.eup %8340  ;;  %v4113_v49 = vmul.f32 %v8339_v57, %v11026_v46  ;;  %v4112_v47 = vmul.f32 %v8339_v57, %v13340_v54  ;;  %v7881_v46 = vld [vmem:[#allocation7 + $0x98] sm:$0xff]  }
 0xaa1   :  { %4261 = vmatmul.mubr.bf16.gmra.mrb[112].mxu0 %v4148_v50  ;;  %v4115_v27 = vmul.f32 %v8341_v26, %v13339_v13  ;;  %v4114_v58 = vmul.f32 %v8341_v26, %v13341_v40  ;;  %v7885_v50 = vld [vmem:[#allocation7 + $0xb8] sm:$0xff]  }
 0xaa2   :  { %4268 = vmatprep.mubr.bf16.mxu0 %v4151_v45  ;;  %7670 = vmatpush3.bf16.msra.mxu1 %v7880_v31 }
 0xaa3   :  { %v4155_v9 = vpack.c.bf16 %v4115_v27, %v4113_v49  ;;  %v4154_v7 = vpack.c.bf16 %v4114_v58, %v4112_v47  ;;  %7671 = vmatprep.subr.bf16.mxu1 %v7881_v46 }
 0xaa6   :  { %7672 = vmatpush3.bf16.msra.mxu1 %v7881_v46 }
 0xaa7   :  { %7673 = vmatprep.subr.bf16.mxu1 %v7882_v56 }
 0xaa9   :  { %4269 = vmatmul.mubr.bf16.gmra.mrb[116].mxu0 %v4150_v61 }
 0xaaa   :  { %4276 = vmatprep.mubr.bf16.mxu0 %v4153_v0  ;;  %7674 = vmatpush3.bf16.msra.mxu1 %v7882_v56 }
 0xaab   :  { %7675 = vmatprep.subr.bf16.mxu1 %v7883_v12 }
 0xaae   :  { %7676 = vmatpush3.bf16.msra.mxu1 %v7883_v12 }
 0xaaf   :  { %7677 = vmatprep.subr.bf16.mxu1 %v7884_v22 }
 0xab1   :  { %4277 = vmatmul.mubr.bf16.gmra.mrb[120].mxu0 %v4152_v24 }
 0xab2   :  { %4284 = vmatprep.mubr.bf16.mxu0 %v4155_v9  ;;  %7678 = vmatpush3.bf16.msra.mxu1 %v7884_v22 }
 0xab3   :  { %7679 = vmatprep.subr.bf16.mxu1 %v7885_v50 }
 0xab6   :  { %7680 = vmatpush3.bf16.msra.mxu1 %v7885_v50 }
 0xab9   :  { %4285 = vmatmul.mubr.bf16.gmra.mrb[124].mxu0 %v4154_v7 }
 0xad0   :  { %v3985_v8 = vpop.xlane.xlu1 %3984 }
 0xad1   :  { %v4029_v45 = vmax.f32 %v3985_v8, 1e-20 }
 0xad3   :  { %8342 = vrcp.f32 %v4029_v45 }
 0xad8   :  { %v3982_v42 = vpop.xlane.xlu0 %3981 }
 0xad9   :  { %v4028_v23 = vmax.f32 %v3982_v42, 1e-20 }
 0xadb   :  { %8344 = vrcp.f32 %v4028_v23 }
 0xadd   :  { %v3991_v29 = vpop.xlane.xlu1 %3990  ;;  %v8343_v60 = vpop.eup %8342 }
 0xade   :  { %v4031_v4 = vmax.f32 %v3991_v29, 1e-20  ;;  %v4119_v0 = vmul.f32 %v8343_v60, %v11046_v25  ;;  %v4118_v26 = vmul.f32 %v8343_v60, %v11043_v2 }
 0xae0   :  { %8346 = vrcp.f32 %v4031_v4 }
 0xae1   :  { %v3988_v28 = vpop.xlane.xlu0 %3987 }
 0xae2   :  { %v4030_v43 = vmax.f32 %v3988_v28, 1e-20 }
 0xae4   :  { %8348 = vrcp.f32 %v4030_v43  ;;  %v3997_v61 = vpop.xlane.xlu1 %3996 }
 0xae5   :  { %v4033_v57 = vmax.f32 %v3997_v61, 1e-20  ;;  %v8345_v3 = vpop.eup %8344 }
 0xae6   :  { %v4117_v44 = vmul.f32 %v8345_v3, %v11068_v34  ;;  %v4116_v21 = vmul.f32 %v8345_v3, %v11062_v32 }
 0xae7   :  { %8350 = vrcp.f32 %v4033_v57 }
 0xae8   :  { %v4157_v13 = vpack.c.bf16 %v4119_v0, %v4117_v44  ;;  %v4156_v27 = vpack.c.bf16 %v4118_v26, %v4116_v21 }
 0xae9   :  { %v3994_v49 = vpop.xlane.xlu0 %3993 }
 0xaea   :  { %v8347_v10 = vpop.eup %8346  ;;  %v4032_v24 = vmax.f32 %v3994_v49, 1e-20  ;;  %4292 = vmatprep.mubr.bf16.mxu0 %v4157_v13 }
 0xaeb   :  { %4293 = vmatmul.mubr.bf16.gmra.mrb[128].mxu0 %v4156_v27  ;;  %v4123_v25 = vmul.f32 %v8347_v10, %v11080_v35  ;;  %v4122_v2 = vmul.f32 %v8347_v10, %v11075_v15 }
 0xaec   :  { %8352 = vrcp.f32 %v4032_v24  ;;  %v4003_v16 = vpop.xlane.xlu1 %4002 }
 0xaed   :  { %v4035_v9 = vmax.f32 %v4003_v16, 1e-20 }
 0xaee   :  { %v8349_v54 = vpop.eup %8348 }
 0xaef   :  { %v4121_v34 = vmul.f32 %v8349_v54, %v11092_v20  ;;  %v4120_v32 = vmul.f32 %v8349_v54, %v11086_v59  ;;  %8354 = vrcp.f32 %v4035_v9 }
 0xaf1   :  { %v4000_v47 = vpop.xlane.xlu0 %3999  ;;  %v4159_v40 = vpack.c.bf16 %v4123_v25, %v4121_v34  ;;  %v4158_v58 = vpack.c.bf16 %v4122_v2, %v4120_v32  ;;  %v8351_v31 = vpop.eup %8350 }
 0xaf2   :  { %v4034_v7 = vmax.f32 %v4000_v47, 1e-20  ;;  %v4127_v46 = vmul.f32 %v8351_v31, %v11102_v11  ;;  %v4126_v35 = vmul.f32 %v8351_v31, %v11099_v36 }
 0xaf3   :  { %4300 = vmatprep.mubr.bf16.mxu0 %v4159_v40 }
 0xaf4   :  { %8356 = vrcp.f32 %v4034_v7  ;;  %4301 = vmatmul.mubr.bf16.gmra.mrb[132].mxu0 %v4158_v58 }
 0xaf6   :  { %v8353_v56 = vpop.eup %8352 }
 0xaf7   :  { %v4125_v15 = vmul.f32 %v8353_v56, %v11112_v55  ;;  %v4124_v20 = vmul.f32 %v8353_v56, %v11107_v62 }
 0xaf9   :  { %v4161_v12 = vpack.c.bf16 %v4127_v46, %v4125_v15  ;;  %v4160_v59 = vpack.c.bf16 %v4126_v35, %v4124_v20  ;;  %v8355_v22 = vpop.eup %8354 }
 0xafa   :  { %v4131_v50 = vmul.f32 %v8355_v22, %v11122_v17  ;;  %v4130_v8 = vmul.f32 %v8355_v22, %v11119_v5 }
 0xafb   :  { %4308 = vmatprep.mubr.bf16.mxu0 %v4161_v12 }
 0xafc   :  { %4309 = vmatmul.mubr.bf16.gmra.mrb[136].mxu0 %v4160_v59 }
 0xafe   :  { %v8357_v45 = vpop.eup %8356 }
 0xaff   :  { %v4129_v42 = vmul.f32 %v8357_v45, %v11132_v1  ;;  %v4128_v11 = vmul.f32 %v8357_v45, %v11127_v6 }
 0xb01   :  { %v4163_v36 = vpack.c.bf16 %v4131_v50, %v4129_v42  ;;  %v4162_v23 = vpack.c.bf16 %v4130_v8, %v4128_v11 }
 0xb03   :  { %4316 = vmatprep.mubr.bf16.mxu0 %v4163_v36 }
 0xb04   :  { %4317 = vmatmul.mubr.bf16.gmra.mrb[140].mxu0 %v4162_v23 }
 0xb1a   :  { %v7169_v55 = vpop.f32.mrb[80].mxu0 }
 0xb1b   :  { %v7170_v62 = vpop.f32.mrb[81].mxu0 }
 0xb1c   :  { %v7171_v29 = vadd.f32 %v7170_v62, %v7169_v55  ;;  %v7172_v4 = vpop.f32.mrb[82].mxu0 }
 0xb1d   :  { %v7173_v28 = vpop.f32.mrb[83].mxu0 }
 0xb1e   :  { %v4357_v60 = vmin.f32 %v7171_v29, 0.0  ;;  %v7174_v43 = vadd.f32 %v7173_v28, %v7172_v4  ;;  %vm4325_vm4 = vcmp.gt.f32.partialorder %v7171_v29, 0.0 }
 0xb20   :  { %v4389_v61 = vmul.f32 1.442695, %v4357_v60  ;;  %v4358_v17 = vmin.f32 %v7174_v43, 0.0  ;;  %vm4326_vm1 = vcmp.gt.f32.partialorder %v7174_v43, 0.0 }
 0xb22   :  { %8358 = vpow2.f32 %v4389_v61  ;;  %v4391_v5 = vmul.f32 1.442695, %v4358_v17  ;;  %v7175_v57 = vpop.f32.mrb[84].mxu0 }
 0xb23   :  { %v7176_v0 = vpop.f32.mrb[85].mxu0 }
 0xb24   :  { %8360 = vpow2.f32 %v4391_v5  ;;  %v7177_v1 = vadd.f32 %v7176_v0, %v7175_v57  ;;  %v7178_v6 = vpop.f32.mrb[86].mxu0 }
 0xb25   :  { %v7179_v26 = vpop.f32.mrb[87].mxu0 }
 0xb26   :  { %v4359_v3 = vmin.f32 %v7177_v1, 0.0  ;;  %v7180_v44 = vadd.f32 %v7179_v26, %v7178_v6  ;;  %vm4327_vm12 = vcmp.gt.f32.partialorder %v7177_v1, 0.0 }
 0xb28   :  { %v4393_v21 = vmul.f32 1.442695, %v4359_v3  ;;  %v4360_v49 = vmin.f32 %v7180_v44, 0.0  ;;  %vm4328_vm10 = vcmp.gt.f32.partialorder %v7180_v44, 0.0 }
 0xb2a   :  { %8362 = vpow2.f32 %v4393_v21  ;;  %v4395_v13 = vmul.f32 1.442695, %v4360_v49  ;;  %v7181_v27 = vpop.f32.mrb[88].mxu0 }
 0xb2b   :  { %v7182_v10 = vpop.f32.mrb[89].mxu0 }
 0xb2c   :  { %v8359_v24 = vpop.eup %8358  ;;  %8364 = vpow2.f32 %v4395_v13  ;;  %v7183_v16 = vadd.f32 %v7182_v10, %v7181_v27  ;;  %v7184_v9 = vpop.f32.mrb[90].mxu0 }
 0xb2d   :  { %v6871_v25 = vadd.f32 -1.0, %v8359_v24  ;;  %v7185_v2 = vpop.f32.mrb[91].mxu0 }
 0xb2e   :  { %v8361_v54 = vpop.eup %8360  ;;  %v4361_v34 = vmin.f32 %v7183_v16, 0.0  ;;  %v7186_v32 = vadd.f32 %v7185_v2, %v7184_v9  ;;  %vm4329_vm0 = vcmp.gt.f32.partialorder %v7183_v16, 0.0 }
 0xb2f   :  { %v6872_v47 = vadd.f32 -1.0, %v8361_v54  ;;  %v4485_v31 = vsel %vm4325_vm4, %v7171_v29, %v6871_v25 }
 0xb30   :  { %v4397_v40 = vmul.f32 1.442695, %v4361_v34  ;;  %v4362_v58 = vmin.f32 %v7186_v32, 0.0  ;;  %vm4330_vm7 = vcmp.gt.f32.partialorder %v7186_v32, 0.0 }
 0xb31   :  { %v4486_v7 = vsel %vm4326_vm1, %v7174_v43, %v6872_v47 }
 0xb32   :  { %8366 = vpow2.f32 %v4397_v40  ;;  %v4399_v46 = vmul.f32 1.442695, %v4362_v58  ;;  %v7187_v35 = vpop.f32.mrb[92].mxu0  ;;  %v4551_v56 = vpack.c.bf16 %v4486_v7, %v4485_v31 }
 0xb33   :  { %v7188_v15 = vpop.f32.mrb[93].mxu0 }
 0xb34   :  { %v8363_v20 = vpop.eup %8362  ;;  %8368 = vpow2.f32 %v4399_v46  ;;  %v7189_v12 = vadd.f32 %v7188_v15, %v7187_v35  ;;  %v7190_v59 = vpop.f32.mrb[94].mxu0  ;;  %7681 = vmatprep.mubr.bf16.mxu1 %v4551_v56 }
 0xb35   :  { %v6873_v22 = vadd.f32 -1.0, %v8363_v20  ;;  %v7191_v50 = vpop.f32.mrb[95].mxu0 }
 0xb36   :  { %v8365_v8 = vpop.eup %8364  ;;  %v4363_v45 = vmin.f32 %v7189_v12, 0.0  ;;  %v7192_v42 = vadd.f32 %v7191_v50, %v7190_v59  ;;  %vm4331_vm5 = vcmp.gt.f32.partialorder %v7189_v12, 0.0 }
 0xb37   :  { %v6874_v11 = vadd.f32 -1.0, %v8365_v8  ;;  %v4487_v55 = vsel %vm4327_vm12, %v7177_v1, %v6873_v22 }
 0xb38   :  { %v4401_v36 = vmul.f32 1.442695, %v4363_v45  ;;  %v4364_v23 = vmin.f32 %v7192_v42, 0.0  ;;  %vm4332_vm6 = vcmp.gt.f32.partialorder %v7192_v42, 0.0 }
 0xb39   :  { %v4488_v62 = vsel %vm4328_vm10, %v7180_v44, %v6874_v11 }
 0xb3a   :  { %v4552_v29 = vpack.c.bf16 %v4488_v62, %v4487_v55  ;;  %8370 = vpow2.f32 %v4401_v36  ;;  %v4403_v4 = vmul.f32 1.442695, %v4364_v23  ;;  %v7193_v28 = vpop.f32.mrb[96].mxu0 }
 0xb3b   :  { %v7194_v60 = vpop.f32.mrb[97].mxu0 }
 0xb3c   :  { %v8367_v43 = vpop.eup %8366  ;;  %8372 = vpow2.f32 %v4403_v4  ;;  %v7195_v61 = vadd.f32 %v7194_v60, %v7193_v28  ;;  %v7196_v17 = vpop.f32.mrb[98].mxu0  ;;  %7682 = vmatmul.mubr.bf16.vlgmr.msra.gmra.mrb[112].mxu1 %v4552_v29 }
 0xb3d   :  { %v6875_v5 = vadd.f32 -1.0, %v8367_v43  ;;  %v7197_v57 = vpop.f32.mrb[99].mxu0 }
 0xb3e   :  { %v8369_v0 = vpop.eup %8368  ;;  %v4365_v6 = vmin.f32 %v7195_v61, 0.0  ;;  %v7198_v26 = vadd.f32 %v7197_v57, %v7196_v17  ;;  %vm4333_vm9 = vcmp.gt.f32.partialorder %v7195_v61, 0.0 }
 0xb3f   :  { %v6876_v3 = vadd.f32 -1.0, %v8369_v0  ;;  %v4489_v21 = vsel %vm4329_vm0, %v7183_v16, %v6875_v5 }
 0xb40   :  { %v4405_v1 = vmul.f32 1.442695, %v4365_v6  ;;  %v4366_v44 = vmin.f32 %v7198_v26, 0.0  ;;  %vm4334_vm8 = vcmp.gt.f32.partialorder %v7198_v26, 0.0 }
 0xb41   :  { %v4490_v49 = vsel %vm4330_vm7, %v7186_v32, %v6876_v3 }
 0xb42   :  { %8374 = vpow2.f32 %v4405_v1  ;;  %v4407_v13 = vmul.f32 1.442695, %v4366_v44  ;;  %v7199_v27 = vpop.f32.mrb[100].mxu0  ;;  %v4553_v10 = vpack.c.bf16 %v4490_v49, %v4489_v21 }
 0xb43   :  { %v7200_v24 = vpop.f32.mrb[101].mxu0 }
 0xb44   :  { %v8371_v9 = vpop.eup %8370  ;;  %8376 = vpow2.f32 %v4407_v13  ;;  %v7201_v25 = vadd.f32 %v7200_v24, %v7199_v27  ;;  %v7202_v2 = vpop.f32.mrb[102].mxu0  ;;  %7685 = vmatprep.mubr.bf16.mxu1 %v4553_v10  ;;  %v7886_v10 = vld [vmem:[#allocation7 + $0x1c0] sm:$0xff]   ;;  %v7887_v24 = vld [vmem:[#allocation7 + $0x1c8] sm:$0xff]  }
 0xb45   :  { %v6877_v54 = vadd.f32 -1.0, %v8371_v9  ;;  %v7203_v34 = vpop.f32.mrb[103].mxu0  ;;  %7713 = vmatprep.subr.bf16.mxu1 %v7886_v10 }
 0xb46   :  { %v8373_v47 = vpop.eup %8372  ;;  %v4367_v40 = vmin.f32 %v7201_v25, 0.0  ;;  %v7204_v58 = vadd.f32 %v7203_v34, %v7202_v2  ;;  %vm4335_vm3 = vcmp.gt.f32.partialorder %v7201_v25, 0.0  ;;  %7714 = vmatpush3.bf16.msra.mxu1 %v7886_v10 }
 0xb47   :  { %v6878_v31 = vadd.f32 -1.0, %v8373_v47  ;;  %v4491_v7 = vsel %vm4331_vm5, %v7189_v12, %v6877_v54  ;;  %7715 = vmatprep.subr.bf16.mxu1 %v7887_v24 }
 0xb48   :  { %v4409_v16 = vmul.f32 1.442695, %v4367_v40  ;;  %v4368_v32 = vmin.f32 %v7204_v58, 0.0  ;;  %vm4336_vm2 = vcmp.gt.f32.partialorder %v7204_v58, 0.0  ;;  %v7888_v40 = vld [vmem:[#allocation7 + $0x1d0] sm:$0xff]  }
 0xb49   :  { %v4492_v46 = vsel %vm4332_vm6, %v7192_v42, %v6878_v31 }
 0xb4a   :  { %8378 = vpow2.f32 %v4409_v16  ;;  %v4411_v35 = vmul.f32 1.442695, %v4368_v32  ;;  %v4554_v56 = vpack.c.bf16 %v4492_v46, %v4491_v7  ;;  %7716 = vmatpush3.bf16.msra.mxu1 %v7887_v24 }
 0xb4b   :  { %7717 = vmatprep.subr.bf16.mxu1 %v7888_v40 }
 0xb4c   :  { %v8375_v15 = vpop.eup %8374  ;;  %8380 = vpow2.f32 %v4411_v35  ;;  %7686 = vmatmul.mubr.bf16.gmra.mrb[116].mxu1 %v4554_v56 }
 0xb4d   :  { %v6879_v20 = vadd.f32 -1.0, %v8375_v15  ;;  %v7889_v15 = vld [vmem:[#allocation7 + $0x1d8] sm:$0xff]  }
 0xb4e   :  { %v8377_v59 = vpop.eup %8376  ;;  %7718 = vmatpush3.bf16.msra.mxu1 %v7888_v40 }
 0xb4f   :  { %v6880_v22 = vadd.f32 -1.0, %v8377_v59  ;;  %v4493_v50 = vsel %vm4333_vm9, %v7195_v61, %v6879_v20  ;;  %7719 = vmatprep.subr.bf16.mxu1 %v7889_v15 }
 0xb51   :  { %v4494_v8 = vsel %vm4334_vm8, %v7198_v26, %v6880_v22 }
 0xb52   :  { %v4555_v45 = vpack.c.bf16 %v4494_v8, %v4493_v50  ;;  %7720 = vmatpush3.bf16.msra.mxu1 %v7889_v15 }
 0xb54   :  { %v8379_v11 = vpop.eup %8378  ;;  %7689 = vmatprep.mubr.bf16.mxu1 %v4555_v45 }
 0xb55   :  { %v6881_v36 = vadd.f32 -1.0, %v8379_v11 }
 0xb56   :  { %v8381_v23 = vpop.eup %8380 }
 0xb57   :  { %v6882_v12 = vadd.f32 -1.0, %v8381_v23  ;;  %v4495_v42 = vsel %vm4335_vm3, %v7201_v25, %v6881_v36 }
 0xb59   :  { %v4496_v55 = vsel %vm4336_vm2, %v7204_v58, %v6882_v12  ;;  %v7890_v12 = vld [vmem:[#allocation7 + $0x1e0] sm:$0xff]  }
 0xb5a   :  { %v4556_v62 = vpack.c.bf16 %v4496_v55, %v4495_v42  ;;  %7721 = vmatprep.subr.bf16.mxu1 %v7890_v12 }
 0xb5b   :  { %7722 = vmatpush3.bf16.msra.mxu1 %v7890_v12 }
 0xb5c   :  { %7690 = vmatmul.mubr.bf16.gmra.mrb[120].mxu1 %v4556_v62 }
 0xb64   :  { %v7205_v29 = vpop.f32.mrb[104].mxu0 }
 0xb65   :  { %v7206_v4 = vpop.f32.mrb[105].mxu0 }
 0xb66   :  { %v7207_v28 = vadd.f32 %v7206_v4, %v7205_v29  ;;  %v7208_v60 = vpop.f32.mrb[106].mxu0 }
 0xb67   :  { %v7209_v43 = vpop.f32.mrb[107].mxu0 }
 0xb68   :  { %v4369_v17 = vmin.f32 %v7207_v28, 0.0  ;;  %v7210_v61 = vadd.f32 %v7209_v43, %v7208_v60  ;;  %vm4337_vm4 = vcmp.gt.f32.partialorder %v7207_v28, 0.0 }
 0xb6a   :  { %v4413_v5 = vmul.f32 1.442695, %v4369_v17  ;;  %v4370_v57 = vmin.f32 %v7210_v61, 0.0  ;;  %vm4338_vm1 = vcmp.gt.f32.partialorder %v7210_v61, 0.0  ;;  %v7891_v17 = vld [vmem:[#allocation7 + $0x1e8] sm:$0xff]  }
 0xb6b   :  { %7723 = vmatprep.subr.bf16.mxu1 %v7891_v17 }
 0xb6c   :  { %8382 = vpow2.f32 %v4413_v5  ;;  %v4415_v0 = vmul.f32 1.442695, %v4370_v57  ;;  %v7211_v6 = vpop.f32.mrb[108].mxu0  ;;  %7724 = vmatpush3.bf16.msra.mxu1 %v7891_v17 }
 0xb6d   :  { %v7212_v26 = vpop.f32.mrb[109].mxu0 }
 0xb6e   :  { %8384 = vpow2.f32 %v4415_v0  ;;  %v11182_v3 = vadd.f32 %v7212_v26, %v7211_v6  ;;  %v7214_v1 = vpop.f32.mrb[110].mxu0 }
 0xb6f   :  { %v7215_v44 = vpop.f32.mrb[111].mxu0 }
 0xb70   :  { %v4371_v21 = vmin.f32 %v11182_v3, 0.0  ;;  %v7216_v49 = vadd.f32 %v7215_v44, %v7214_v1  ;;  %vm4339_vm12 = vcmp.gt.f32.partialorder %v11182_v3, 0.0 }
 0xb72   :  { %v4417_v13 = vmul.f32 1.442695, %v4371_v21  ;;  %v4372_v27 = vmin.f32 %v7216_v49, 0.0  ;;  %vm4340_vm10 = vcmp.gt.f32.partialorder %v7216_v49, 0.0 }
 0xb74   :  { %8386 = vpow2.f32 %v4417_v13  ;;  %v4419_v9 = vmul.f32 1.442695, %v4372_v27  ;;  %v7217_v25 = vpop.f32.mrb[112].mxu0  ;;  %v7892_v13 = vld [vmem:[#allocation7 + $0x1f0] sm:$0xff]  }
 0xb75   :  { %v7218_v2 = vpop.f32.mrb[113].mxu0  ;;  %7725 = vmatprep.subr.bf16.mxu1 %v7892_v13 }
 0xb76   :  { %v8383_v54 = vpop.eup %8382  ;;  %8388 = vpow2.f32 %v4419_v9  ;;  %v11185_v34 = vadd.f32 %v7218_v2, %v7217_v25  ;;  %v7220_v47 = vpop.f32.mrb[114].mxu0  ;;  %7726 = vmatpush3.bf16.msra.mxu1 %v7892_v13 }
 0xb77   :  { %v6883_v58 = vadd.f32 -1.0, %v8383_v54  ;;  %v7221_v31 = vpop.f32.mrb[115].mxu0 }
 0xb78   :  { %v8385_v16 = vpop.eup %8384  ;;  %v4373_v32 = vmin.f32 %v11185_v34, 0.0  ;;  %v11188_v7 = vadd.f32 %v7221_v31, %v7220_v47  ;;  %vm4341_vm0 = vcmp.gt.f32.partialorder %v11185_v34, 0.0 }
 0xb79   :  { %v6884_v46 = vadd.f32 -1.0, %v8385_v16  ;;  %v4497_v20 = vsel %vm4337_vm4, %v7207_v28, %v6883_v58 }
 0xb7a   :  { %v4421_v35 = vmul.f32 1.442695, %v4373_v32  ;;  %v4374_v56 = vmin.f32 %v11188_v7, 0.0  ;;  %vm4342_vm7 = vcmp.gt.f32.partialorder %v11188_v7, 0.0 }
 0xb7b   :  { %v4498_v59 = vsel %vm4338_vm1, %v7210_v61, %v6884_v46 }
 0xb7c   :  { %8390 = vpow2.f32 %v4421_v35  ;;  %v4423_v22 = vmul.f32 1.442695, %v4374_v56  ;;  %v7223_v50 = vpop.f32.mrb[116].mxu0  ;;  %v4557_v8 = vpack.c.bf16 %v4498_v59, %v4497_v20 }
 0xb7d   :  { %v7224_v45 = vpop.f32.mrb[117].mxu0 }
 0xb7e   :  { %v8387_v11 = vpop.eup %8386  ;;  %8392 = vpow2.f32 %v4423_v22  ;;  %v11191_v36 = vadd.f32 %v7224_v45, %v7223_v50  ;;  %v7226_v23 = vpop.f32.mrb[118].mxu0  ;;  %7693 = vmatprep.mubr.bf16.mxu1 %v4557_v8 }
 0xb7f   :  { %v6885_v42 = vadd.f32 -1.0, %v8387_v11  ;;  %v7227_v55 = vpop.f32.mrb[119].mxu0  ;;  %v7893_v11 = vld [vmem:[#allocation7 + $0x1f8] sm:$0xff]  }
 0xb80   :  { %v8389_v62 = vpop.eup %8388  ;;  %v4375_v29 = vmin.f32 %v11191_v36, 0.0  ;;  %v7228_v4 = vadd.f32 %v7227_v55, %v7226_v23  ;;  %vm4343_vm5 = vcmp.gt.f32.partialorder %v11191_v36, 0.0  ;;  %7727 = vmatprep.subr.bf16.mxu1 %v7893_v11 }
 0xb81   :  { %v6886_v28 = vadd.f32 -1.0, %v8389_v62  ;;  %v4499_v61 = vsel %vm4339_vm12, %v11182_v3, %v6885_v42  ;;  %7728 = vmatpush3.bf16.msra.mxu1 %v7893_v11 }
 0xb82   :  { %v4425_v60 = vmul.f32 1.442695, %v4375_v29  ;;  %v4376_v43 = vmin.f32 %v7228_v4, 0.0  ;;  %vm4344_vm6 = vcmp.gt.f32.partialorder %v7228_v4, 0.0 }
 0xb83   :  { %v4500_v5 = vsel %vm4340_vm10, %v7216_v49, %v6886_v28 }
 0xb84   :  { %8394 = vpow2.f32 %v4425_v60  ;;  %v4427_v57 = vmul.f32 1.442695, %v4376_v43  ;;  %v7229_v0 = vpop.f32.mrb[120].mxu0  ;;  %v4558_v6 = vpack.c.bf16 %v4500_v5, %v4499_v61 }
 0xb85   :  { %v7230_v26 = vpop.f32.mrb[121].mxu0 }
 0xb86   :  { %v8391_v1 = vpop.eup %8390  ;;  %8396 = vpow2.f32 %v4427_v57  ;;  %v7231_v44 = vadd.f32 %v7230_v26, %v7229_v0  ;;  %v7232_v21 = vpop.f32.mrb[122].mxu0  ;;  %7694 = vmatmul.mubr.bf16.gmra.mrb[124].mxu1 %v4558_v6 }
 0xb87   :  { %v6887_v27 = vadd.f32 -1.0, %v8391_v1  ;;  %v7233_v10 = vpop.f32.mrb[123].mxu0 }
 0xb88   :  { %v8393_v24 = vpop.eup %8392  ;;  %v4377_v9 = vmin.f32 %v7231_v44, 0.0  ;;  %v7234_v25 = vadd.f32 %v7233_v10, %v7232_v21  ;;  %vm4345_vm9 = vcmp.gt.f32.partialorder %v7231_v44, 0.0 }
 0xb89   :  { %v6888_v3 = vadd.f32 -1.0, %v8393_v24  ;;  %v4501_v54 = vsel %vm4341_vm0, %v11185_v34, %v6887_v27 }
 0xb8a   :  { %v4429_v49 = vmul.f32 1.442695, %v4377_v9  ;;  %v4378_v2 = vmin.f32 %v7234_v25, 0.0  ;;  %vm4346_vm8 = vcmp.gt.f32.partialorder %v7234_v25, 0.0 }
 0xb8b   :  { %v4502_v47 = vsel %vm4342_vm7, %v11188_v7, %v6888_v3 }
 0xb8c   :  { %8398 = vpow2.f32 %v4429_v49  ;;  %v4431_v40 = vmul.f32 1.442695, %v4378_v2  ;;  %v7235_v58 = vpop.f32.mrb[124].mxu0  ;;  %v4559_v31 = vpack.c.bf16 %v4502_v47, %v4501_v54 }
 0xb8d   :  { %v7236_v16 = vpop.f32.mrb[125].mxu0 }
 0xb8e   :  { %v8395_v32 = vpop.eup %8394  ;;  %8400 = vpow2.f32 %v4431_v40  ;;  %v7237_v46 = vadd.f32 %v7236_v16, %v7235_v58  ;;  %v7238_v35 = vpop.f32.mrb[126].mxu0  ;;  %7697 = vmatprep.mubr.bf16.mxu1 %v4559_v31 }
 0xb8f   :  { %v6889_v56 = vadd.f32 -1.0, %v8395_v32  ;;  %v7239_v15 = vpop.f32.mrb[127].mxu0 }
 0xb90   :  { %v8397_v20 = vpop.eup %8396  ;;  %v4379_v59 = vmin.f32 %v7237_v46, 0.0  ;;  %v7240_v22 = vadd.f32 %v7239_v15, %v7238_v35  ;;  %vm4347_vm3 = vcmp.gt.f32.partialorder %v7237_v46, 0.0 }
 0xb91   :  { %v6890_v50 = vadd.f32 -1.0, %v8397_v20  ;;  %v4503_v8 = vsel %vm4343_vm5, %v11191_v36, %v6889_v56 }
 0xb92   :  { %v4433_v34 = vmul.f32 1.442695, %v4379_v59  ;;  %v4380_v7 = vmin.f32 %v7240_v22, 0.0  ;;  %vm4348_vm2 = vcmp.gt.f32.partialorder %v7240_v22, 0.0 }
 0xb93   :  { %v4504_v45 = vsel %vm4344_vm6, %v7228_v4, %v6890_v50 }
 0xb94   :  { %8402 = vpow2.f32 %v4433_v34  ;;  %v4435_v23 = vmul.f32 1.442695, %v4380_v7  ;;  %v4560_v12 = vpack.c.bf16 %v4504_v45, %v4503_v8 }
 0xb96   :  { %v8399_v42 = vpop.eup %8398  ;;  %8404 = vpow2.f32 %v4435_v23  ;;  %7698 = vmatmul.mubr.bf16.gmra.mrb[128].mxu1 %v4560_v12 }
 0xb97   :  { %v6891_v55 = vadd.f32 -1.0, %v8399_v42 }
 0xb98   :  { %v8401_v62 = vpop.eup %8400 }
 0xb99   :  { %v6892_v29 = vadd.f32 -1.0, %v8401_v62  ;;  %v4505_v28 = vsel %vm4345_vm9, %v7231_v44, %v6891_v55 }
 0xb9b   :  { %v4506_v60 = vsel %vm4346_vm8, %v7234_v25, %v6892_v29 }
 0xb9c   :  { %v4561_v43 = vpack.c.bf16 %v4506_v60, %v4505_v28 }
 0xb9e   :  { %v8403_v17 = vpop.eup %8402  ;;  %7701 = vmatprep.mubr.bf16.mxu1 %v4561_v43 }
 0xb9f   :  { %v6893_v36 = vadd.f32 -1.0, %v8403_v17 }
 0xba0   :  { %v8405_v4 = vpop.eup %8404 }
 0xba1   :  { %v6894_v61 = vadd.f32 -1.0, %v8405_v4  ;;  %v4507_v5 = vsel %vm4347_vm3, %v7237_v46, %v6893_v36 }
 0xba3   :  { %v4508_v57 = vsel %vm4348_vm2, %v7240_v22, %v6894_v61 }
 0xba4   :  { %v4562_v0 = vpack.c.bf16 %v4508_v57, %v4507_v5 }
 0xba6   :  { %7702 = vmatmul.mubr.bf16.gmra.mrb[132].mxu1 %v4562_v0 }
 0xbbe   :  { %v7241_v6 = vpop.f32.mrb[128].mxu0 }
 0xbbf   :  { %v7242_v26 = vpop.f32.mrb[129].mxu0 }
 0xbc0   :  { %v7243_v1 = vadd.f32 %v7242_v26, %v7241_v6  ;;  %v7244_v21 = vpop.f32.mrb[130].mxu0 }
 0xbc1   :  { %v7245_v13 = vpop.f32.mrb[131].mxu0 }
 0xbc2   :  { %v4381_v27 = vmin.f32 %v7243_v1, 0.0  ;;  %v7246_v44 = vadd.f32 %v7245_v13, %v7244_v21  ;;  %vm4349_vm4 = vcmp.gt.f32.partialorder %v7243_v1, 0.0 }
 0xbc4   :  { %v4437_v10 = vmul.f32 1.442695, %v4381_v27  ;;  %v4382_v24 = vmin.f32 %v7246_v44, 0.0  ;;  %vm4350_vm1 = vcmp.gt.f32.partialorder %v7246_v44, 0.0 }
 0xbc6   :  { %8406 = vpow2.f32 %v4437_v10  ;;  %v4439_v9 = vmul.f32 1.442695, %v4382_v24 }
 0xbc7   :  { %v7247_v25 = vpop.f32.mrb[132].mxu0 }
 0xbc8   :  { %v7248_v3 = vpop.f32.mrb[133].mxu0  ;;  %8408 = vpow2.f32 %v4439_v9 }
 0xbc9   :  { %v7249_v49 = vadd.f32 %v7248_v3, %v7247_v25  ;;  %v7250_v2 = vpop.f32.mrb[134].mxu0 }
 0xbca   :  { %v7251_v54 = vpop.f32.mrb[135].mxu0 }
 0xbcb   :  { %v4383_v47 = vmin.f32 %v7249_v49, 0.0  ;;  %v7252_v40 = vadd.f32 %v7251_v54, %v7250_v2  ;;  %vm4351_vm12 = vcmp.gt.f32.partialorder %v7249_v49, 0.0 }
 0xbcd   :  { %v4441_v58 = vmul.f32 1.442695, %v4383_v47  ;;  %v4384_v31 = vmin.f32 %v7252_v40, 0.0  ;;  %vm4352_vm10 = vcmp.gt.f32.partialorder %v7252_v40, 0.0 }
 0xbcf   :  { %8410 = vpow2.f32 %v4441_v58  ;;  %v4443_v16 = vmul.f32 1.442695, %v4384_v31  ;;  %v7253_v32 = vpop.f32.mrb[136].mxu0 }
 0xbd0   :  { %v7254_v46 = vpop.f32.mrb[137].mxu0  ;;  %v8407_v35 = vpop.eup %8406 }
 0xbd1   :  { %8412 = vpow2.f32 %v4443_v16  ;;  %v7255_v56 = vadd.f32 %v7254_v46, %v7253_v32  ;;  %v7256_v15 = vpop.f32.mrb[138].mxu0  ;;  %v6895_v20 = vadd.f32 -1.0, %v8407_v35 }
 0xbd2   :  { %v7257_v59 = vpop.f32.mrb[139].mxu0  ;;  %v8409_v22 = vpop.eup %8408 }
 0xbd3   :  { %v4385_v50 = vmin.f32 %v7255_v56, 0.0  ;;  %v7258_v34 = vadd.f32 %v7257_v59, %v7256_v15  ;;  %v6896_v7 = vadd.f32 -1.0, %v8409_v22  ;;  %v4509_v11 = vsel %vm4349_vm4, %v7243_v1, %v6895_v20 }
 0xbd4   :  { %vm4353_vm0 = vcmp.gt.f32.partialorder %v7255_v56, 0.0 }
 0xbd5   :  { %v4445_v8 = vmul.f32 1.442695, %v4385_v50  ;;  %v4386_v45 = vmin.f32 %v7258_v34, 0.0  ;;  %v4510_v23 = vsel %vm4350_vm1, %v7246_v44, %v6896_v7  ;;  %vm4354_vm7 = vcmp.gt.f32.partialorder %v7258_v34, 0.0 }
 0xbd6   :  { %v4563_v55 = vpack.c.bf16 %v4510_v23, %v4509_v11 }
 0xbd7   :  { %8414 = vpow2.f32 %v4445_v8  ;;  %v4447_v12 = vmul.f32 1.442695, %v4386_v45  ;;  %v7259_v42 = vpop.f32.mrb[140].mxu0 }
 0xbd8   :  { %v7260_v62 = vpop.f32.mrb[141].mxu0  ;;  %7705 = vmatprep.mubr.bf16.mxu1 %v4563_v55 }
 0xbd9   :  { %v8411_v29 = vpop.eup %8410  ;;  %8416 = vpow2.f32 %v4447_v12  ;;  %v7261_v28 = vadd.f32 %v7260_v62, %v7259_v42  ;;  %v7262_v60 = vpop.f32.mrb[142].mxu0 }
 0xbda   :  { %v6897_v43 = vadd.f32 -1.0, %v8411_v29  ;;  %v7263_v17 = vpop.f32.mrb[143].mxu0 }
 0xbdb   :  { %v8413_v36 = vpop.eup %8412  ;;  %v4387_v4 = vmin.f32 %v7261_v28, 0.0  ;;  %v7264_v61 = vadd.f32 %v7263_v17, %v7262_v60  ;;  %vm4355_vm5 = vcmp.gt.f32.partialorder %v7261_v28, 0.0 }
 0xbdc   :  { %v6898_v5 = vadd.f32 -1.0, %v8413_v36  ;;  %v4511_v6 = vsel %vm4351_vm12, %v7249_v49, %v6897_v43 }
 0xbdd   :  { %v4449_v57 = vmul.f32 1.442695, %v4387_v4  ;;  %v4388_v0 = vmin.f32 %v7264_v61, 0.0  ;;  %vm4356_vm6 = vcmp.gt.f32.partialorder %v7264_v61, 0.0 }
 0xbde   :  { %v4512_v26 = vsel %vm4352_vm10, %v7252_v40, %v6898_v5 }
 0xbdf   :  { %8418 = vpow2.f32 %v4449_v57  ;;  %v4451_v1 = vmul.f32 1.442695, %v4388_v0  ;;  %v4564_v21 = vpack.c.bf16 %v4512_v26, %v4511_v6 }
 0xbe1   :  { %v8415_v13 = vpop.eup %8414  ;;  %8420 = vpow2.f32 %v4451_v1  ;;  %7706 = vmatmul.mubr.bf16.gmra.mrb[136].mxu1 %v4564_v21 }
 0xbe2   :  { %v6899_v27 = vadd.f32 -1.0, %v8415_v13 }
 0xbe3   :  { %v8417_v44 = vpop.eup %8416 }
 0xbe4   :  { %v6900_v10 = vadd.f32 -1.0, %v8417_v44  ;;  %v4513_v24 = vsel %vm4353_vm0, %v7255_v56, %v6899_v27 }
 0xbe6   :  { %v4514_v9 = vsel %vm4354_vm7, %v7258_v34, %v6900_v10 }
 0xbe7   :  { %v4565_v25 = vpack.c.bf16 %v4514_v9, %v4513_v24 }
 0xbe9   :  { %v8419_v3 = vpop.eup %8418  ;;  %7709 = vmatprep.mubr.bf16.mxu1 %v4565_v25 }
 0xbea   :  { %v6901_v2 = vadd.f32 -1.0, %v8419_v3 }
 0xbeb   :  { %v8421_v54 = vpop.eup %8420 }
 0xbec   :  { %v6902_v49 = vadd.f32 -1.0, %v8421_v54  ;;  %v4515_v47 = vsel %vm4355_vm5, %v7261_v28, %v6901_v2 }
 0xbee   :  { %v4516_v40 = vsel %vm4356_vm6, %v7264_v61, %v6902_v49 }
 0xbef   :  { %v4566_v58 = vpack.c.bf16 %v4516_v40, %v4515_v47 }
 0xbf1   :  { %7710 = vmatmul.mubr.bf16.gmra.mrb[140].mxu1 %v4566_v58 }
 0xc0f   :  { %v7683_v31 = vpop.f32.mrb[112].mxu1 }
 0xc10   :  { %v4649_v16 = vpop.f32.mrb[113].mxu1 }
 0xc11   :  { %v7684_v32 = vpop.f32.mrb[114].mxu1 }
 0xc12   :  { %v4777_v46 = vpack.c.bf16 %v7684_v32, %v7683_v31  ;;  %v4652_v35 = vpop.f32.mrb[115].mxu1 }
 0xc13   :  { %v4776_v15 = vpack.c.bf16 %v4652_v35, %v4649_v16 }
 0xc15   :  { %7729 = vmatprep.mubr.bf16.mxu1 %v4776_v15 }
 0xc16   :  { %7730 = vmatmul.mubr.bf16.vlgmr.msra.gmra.mrb[144].mxu1 %v4777_v46 }
 0xc1f   :  { %v7687_v56 = vpop.f32.mrb[116].mxu1 }
 0xc20   :  { %v4665_v20 = vpop.f32.mrb[117].mxu1 }
 0xc21   :  { %v7688_v59 = vpop.f32.mrb[118].mxu1 }
 0xc22   :  { %v4779_v22 = vpack.c.bf16 %v7688_v59, %v7687_v56  ;;  %v4668_v50 = vpop.f32.mrb[119].mxu1 }
 0xc23   :  { %v4778_v34 = vpack.c.bf16 %v4668_v50, %v4665_v20 }
 0xc25   :  { %7733 = vmatprep.mubr.bf16.mxu1 %v4778_v34 }
 0xc26   :  { %7734 = vmatmul.mubr.bf16.gmra.mrb[148].mxu1 %v4779_v22 }
 0xc2f   :  { %v7691_v7 = vpop.f32.mrb[120].mxu1 }
 0xc30   :  { %v4681_v8 = vpop.f32.mrb[121].mxu1 }
 0xc31   :  { %v7692_v45 = vpop.f32.mrb[122].mxu1 }
 0xc32   :  { %v4781_v11 = vpack.c.bf16 %v7692_v45, %v7691_v7  ;;  %v4684_v23 = vpop.f32.mrb[123].mxu1 }
 0xc33   :  { %v4780_v12 = vpack.c.bf16 %v4684_v23, %v4681_v8 }
 0xc35   :  { %7737 = vmatprep.mubr.bf16.mxu1 %v4780_v12 }
 0xc36   :  { %7738 = vmatmul.mubr.bf16.gmra.mrb[152].mxu1 %v4781_v11 }
 0xc59   :  { %v7695_v42 = vpop.f32.mrb[124].mxu1 }
 0xc5a   :  { %v4697_v55 = vpop.f32.mrb[125].mxu1 }
 0xc5b   :  { %v7696_v62 = vpop.f32.mrb[126].mxu1 }
 0xc5c   :  { %v4783_v29 = vpack.c.bf16 %v7696_v62, %v7695_v42  ;;  %v4700_v28 = vpop.f32.mrb[127].mxu1 }
 0xc5d   :  { %v4782_v60 = vpack.c.bf16 %v4700_v28, %v4697_v55 }
 0xc5f   :  { %7741 = vmatprep.mubr.bf16.mxu1 %v4782_v60 }
 0xc60   :  { %7742 = vmatmul.mubr.bf16.gmra.mrb[156].mxu1 %v4783_v29 }
 0xc69   :  { %v7699_v43 = vpop.f32.mrb[128].mxu1 }
 0xc6a   :  { %v4713_v17 = vpop.f32.mrb[129].mxu1 }
 0xc6b   :  { %v7700_v36 = vpop.f32.mrb[130].mxu1 }
 0xc6c   :  { %v4785_v4 = vpack.c.bf16 %v7700_v36, %v7699_v43  ;;  %v4716_v61 = vpop.f32.mrb[131].mxu1 }
 0xc6d   :  { %v4784_v5 = vpack.c.bf16 %v4716_v61, %v4713_v17 }
 0xc6f   :  { %7745 = vmatprep.mubr.bf16.mxu1 %v4784_v5  ;;  %7313 = vmatprep.subr.bf16.mxu0 %v4784_v5 }
 0xc70   :  { %7746 = vmatmul.mubr.bf16.gmra.mrb[160].mxu1 %v4785_v4  ;;  %7314 = vmatpush3.bf16.msra.mxu0 %v4776_v15 }
 0xc71   :  { %7315 = vmatprep.subr.bf16.mxu0 %v4785_v4 }
 0xc74   :  { %7316 = vmatpush3.bf16.msra.mxu0 %v4777_v46 }
 0xc79   :  { %v7703_v57 = vpop.f32.mrb[132].mxu1 }
 0xc7a   :  { %v4729_v0 = vpop.f32.mrb[133].mxu1 }
 0xc7b   :  { %v7704_v6 = vpop.f32.mrb[134].mxu1 }
 0xc7c   :  { %v4787_v26 = vpack.c.bf16 %v7704_v6, %v7703_v57  ;;  %v4732_v1 = vpop.f32.mrb[135].mxu1 }
 0xc7d   :  { %v4786_v21 = vpack.c.bf16 %v4732_v1, %v4729_v0 }
 0xc7f   :  { %7749 = vmatprep.mubr.bf16.mxu1 %v4786_v21  ;;  %7317 = vmatprep.subr.bf16.mxu0 %v4786_v21 }
 0xc80   :  { %7750 = vmatmul.mubr.bf16.gmra.mrb[164].mxu1 %v4787_v26  ;;  %7318 = vmatpush3.bf16.msra.mxu0 %v4778_v34 }
 0xc81   :  { %7319 = vmatprep.subr.bf16.mxu0 %v4787_v26 }
 0xc84   :  { %7320 = vmatpush3.bf16.msra.mxu0 %v4779_v22 }
 0xcb4   :  { %v7707_v13 = vpop.f32.mrb[136].mxu1 }
 0xcb5   :  { %v4745_v27 = vpop.f32.mrb[137].mxu1 }
 0xcb6   :  { %v7708_v44 = vpop.f32.mrb[138].mxu1 }
 0xcb7   :  { %v4789_v10 = vpack.c.bf16 %v7708_v44, %v7707_v13  ;;  %v4748_v24 = vpop.f32.mrb[139].mxu1 }
 0xcb8   :  { %v4788_v9 = vpack.c.bf16 %v4748_v24, %v4745_v27 }
 0xcba   :  { %7753 = vmatprep.mubr.bf16.mxu1 %v4788_v9  ;;  %7321 = vmatprep.subr.bf16.mxu0 %v4788_v9 }
 0xcbb   :  { %7754 = vmatmul.mubr.bf16.gmra.mrb[168].mxu1 %v4789_v10  ;;  %7322 = vmatpush3.bf16.msra.mxu0 %v4780_v12 }
 0xcbc   :  { %7323 = vmatprep.subr.bf16.mxu0 %v4789_v10 }
 0xcbf   :  { %7324 = vmatpush3.bf16.msra.mxu0 %v4781_v11 }
 0xcc4   :  { %v7711_v25 = vpop.f32.mrb[140].mxu1 }
 0xcc5   :  { %v4761_v3 = vpop.f32.mrb[141].mxu1 }
 0xcc6   :  { %v7712_v2 = vpop.f32.mrb[142].mxu1 }
 0xcc7   :  { %v4791_v54 = vpack.c.bf16 %v7712_v2, %v7711_v25  ;;  %v4764_v49 = vpop.f32.mrb[143].mxu1 }
 0xcc8   :  { %v4790_v47 = vpack.c.bf16 %v4764_v49, %v4761_v3 }
 0xcca   :  { %7757 = vmatprep.mubr.bf16.mxu1 %v4790_v47  ;;  %7325 = vmatprep.subr.bf16.mxu0 %v4790_v47 }
 0xccb   :  { %7758 = vmatmul.mubr.bf16.gmra.mrb[172].mxu1 %v4791_v54  ;;  %7326 = vmatpush3.bf16.msra.mxu0 %v4782_v60 }
 0xccc   :  { %7327 = vmatprep.subr.bf16.mxu0 %v4791_v54 }
 0xccf   :  { %7328 = vmatpush3.bf16.msra.mxu0 %v4783_v29 }
 0xce9   :  { %v7731_v40 = vpop.f32.mrb[144].mxu1 }
 0xcea   :  { %5037 = vrot.lane.b32.xlu1 %v7731_v40, %s8716_s2  ;;  %v4874_v58 = vpop.f32.mrb[145].mxu1 }
 0xceb   :  { %5033 = vrot.lane.b32.xlu0 %v4874_v58, %s8716_s2  ;;  %v7732_v31 = vpop.f32.mrb[146].mxu1 }
 0xcec   :  { %v4877_v16 = vpop.f32.mrb[147].mxu1 }
 0xcee   :  { %5202 = vperm.xlu1 %7828, %v7731_v40  }
 0xcef   :  { %5206 = vperm.xlu0 %7829, %v7732_v31  }
 0xcf2   :  { %5194 = vperm.xlu1 %7828, %v4874_v58  }
 0xcf3   :  { %5198 = vperm.xlu0 %7829, %v4877_v16  }
 0xcf6   :  { %5039 = vrot.lane.b32.xlu1 %v7732_v31, %s8716_s2 }
 0xcf9   :  { %v7735_v32 = vpop.f32.mrb[148].mxu1 }
 0xcfa   :  { %5035 = vrot.lane.b32.xlu1 %v4877_v16, %s8716_s2  ;;  %v4890_v46 = vpop.f32.mrb[149].mxu1 }
 0xcfb   :  { %v7736_v35 = vpop.f32.mrb[150].mxu1 }
 0xcfc   :  { %5222 = vperm.xlu0 %7829, %v7736_v35   ;;  %v4893_v15 = vpop.f32.mrb[151].mxu1 }
 0xcfe   :  { %5045 = vrot.lane.b32.xlu1 %v7735_v32, %s8716_s2 }
 0xd00   :  { %5214 = vperm.xlu0 %7829, %v4893_v15  }
 0xd02   :  { %5218 = vperm.xlu1 %7828, %v7735_v32  }
 0xd06   :  { %5041 = vrot.lane.b32.xlu1 %v4890_v46, %s8716_s2 }
 0xd09   :  { %v7739_v56 = vpop.f32.mrb[152].mxu1 }
 0xd0a   :  { %5210 = vperm.xlu1 %7828, %v4890_v46   ;;  %v4906_v20 = vpop.f32.mrb[153].mxu1 }
 0xd0b   :  { %5226 = vperm.xlu0 %7829, %v4906_v20   ;;  %v7740_v59 = vpop.f32.mrb[154].mxu1 }
 0xd0c   :  { %v4909_v22 = vpop.f32.mrb[155].mxu1 }
 0xd0e   :  { %5047 = vrot.lane.b32.xlu1 %v7736_v35, %s8716_s2 }
 0xd0f   :  { %5238 = vperm.xlu0 %7829, %v7740_v59  }
 0xd12   :  { %5043 = vrot.lane.b32.xlu1 %v4893_v15, %s8716_s2 }
 0xd16   :  { %5053 = vrot.lane.b32.xlu1 %v7739_v56, %s8716_s2 }
 0xd1a   :  { %5234 = vperm.xlu1 %7828, %v7739_v56  }
 0xd1e   :  { %5049 = vrot.lane.b32.xlu1 %v4906_v20, %s8716_s2 }
 0xd22   :  { %5055 = vrot.lane.b32.xlu1 %v7740_v59, %s8716_s2 }
 0xd26   :  { %5051 = vrot.lane.b32.xlu1 %v4909_v22, %s8716_s2 }
 0xd2a   :  { %5230 = vperm.xlu1 %7828, %v4909_v22  }
 0xd33   :  { %v7743_v50 = vpop.f32.mrb[156].mxu1 }
 0xd34   :  { %5061 = vrot.lane.b32.xlu1 %v7743_v50, %s8716_s2  ;;  %v4922_v34 = vpop.f32.mrb[157].mxu1 }
 0xd35   :  { %v7744_v7 = vpop.f32.mrb[158].mxu1 }
 0xd36   :  { %5254 = vperm.xlu0 %7829, %v7744_v7   ;;  %v4925_v8 = vpop.f32.mrb[159].mxu1 }
 0xd38   :  { %5250 = vperm.xlu1 %7828, %v7743_v50  }
 0xd3a   :  { %5246 = vperm.xlu0 %7829, %v4925_v8  }
 0xd3c   :  { %5057 = vrot.lane.b32.xlu1 %v4922_v34, %s8716_s2 }
 0xd40   :  { %5242 = vperm.xlu1 %7828, %v4922_v34  }
 0xd43   :  { %v7747_v45 = vpop.f32.mrb[160].mxu1 }
 0xd44   :  { %5063 = vrot.lane.b32.xlu1 %v7744_v7, %s8716_s2  ;;  %5069 = vrot.lane.b32.xlu0 %v7747_v45, %s8716_s2  ;;  %v4938_v11 = vpop.f32.mrb[161].mxu1 }
 0xd45   :  { %v7748_v23 = vpop.f32.mrb[162].mxu1 }
 0xd46   :  { %v4941_v12 = vpop.f32.mrb[163].mxu1 }
 0xd48   :  { %5059 = vrot.lane.b32.xlu1 %v4925_v8, %s8716_s2  ;;  %5071 = vrot.lane.b32.xlu0 %v7748_v23, %s8716_s2 }
 0xd4c   :  { %5266 = vperm.xlu1 %7828, %v7747_v45   ;;  %5270 = vperm.xlu0 %7829, %v7748_v23  }
 0xd50   :  { %5065 = vrot.lane.b32.xlu1 %v4938_v11, %s8716_s2  ;;  %5067 = vrot.lane.b32.xlu0 %v4941_v12, %s8716_s2 }
 0xd53   :  { %v7751_v42 = vpop.f32.mrb[164].mxu1 }
 0xd54   :  { %5258 = vperm.xlu1 %7828, %v4938_v11   ;;  %5262 = vperm.xlu0 %7829, %v4941_v12   ;;  %v4954_v55 = vpop.f32.mrb[165].mxu1 }
 0xd55   :  { %v7752_v62 = vpop.f32.mrb[166].mxu1 }
 0xd56   :  { %v4957_v29 = vpop.f32.mrb[167].mxu1 }
 0xd58   :  { %5077 = vrot.lane.b32.xlu0 %v7751_v42, %s8716_s2  ;;  %5286 = vperm.xlu1 %7828, %v7752_v62  }
 0xd5c   :  { %5282 = vperm.xlu0 %7829, %v7751_v42   ;;  %5278 = vperm.xlu1 %7828, %v4957_v29   ;;  %v5038_v28 = vpop.permute.xlu1 %5037 }
 0xd5d   :  { %v5034_v13 = vpop.permute.xlu0 %5033 }
 0xd60   :  { %5073 = vrot.lane.b32.xlu0 %v4954_v55, %s8716_s2 }
 0xd64   :  { %5274 = vperm.xlu0 %7829, %v4954_v55  }
 0xd68   :  { %5079 = vrot.lane.b32.xlu0 %v7752_v62, %s8716_s2 }
 0xd6c   :  { %5075 = vrot.lane.b32.xlu0 %v4957_v29, %s8716_s2 }
 0xd6d   :  { %v11226_v60 = vpop.permute.xlu1 %5202 }
 0xd6e   :  { %v11241_v10 = vpop.permute.xlu0 %5206 }
 0xd71   :  { %v11228_v43 = vpop.permute.xlu1 %5194 }
 0xd72   :  { %v11246_v9 = vpop.permute.xlu0 %5198 }
 0xd75   :  { %v5040_v17 = vpop.permute.xlu1 %5039 }
 0xd79   :  { %v5036_v36 = vpop.permute.xlu1 %5035 }
 0xd7b   :  { %v11250_v2 = vpop.permute.xlu0 %5222 }
 0xd7d   :  { %v11230_v4 = vpop.permute.xlu1 %5045 }
 0xd7f   :  { %v11256_v58 = vpop.permute.xlu0 %5214 }
 0xd81   :  { %v11232_v61 = vpop.permute.xlu1 %5218 }
 0xd85   :  { %v5042_v5 = vpop.permute.xlu1 %5041 }
 0xd89   :  { %v11234_v57 = vpop.permute.xlu1 %5210 }
 0xd8a   :  { %v11260_v16 = vpop.permute.xlu0 %5226 }
 0xd8d   :  { %v11236_v0 = vpop.permute.xlu1 %5047 }
 0xd8e   :  { %v7755_v6 = vpop.f32.mrb[168].mxu1  ;;  %v11265_v46 = vpop.permute.xlu0 %5238 }
 0xd8f   :  { %5085 = vrot.lane.b32.xlu0 %v7755_v6, %s8716_s2  ;;  %v4970_v26 = vpop.f32.mrb[169].mxu1 }
 0xd90   :  { %v7756_v1 = vpop.f32.mrb[170].mxu1 }
 0xd91   :  { %v5044_v21 = vpop.permute.xlu1 %5043  ;;  %5302 = vperm.xlu1 %7828, %v7756_v1   ;;  %v4973_v27 = vpop.f32.mrb[171].mxu1 }
 0xd93   :  { %5298 = vperm.xlu0 %7829, %v7755_v6  }
 0xd95   :  { %v11239_v44 = vpop.permute.xlu1 %5053  ;;  %5294 = vperm.xlu1 %7828, %v4973_v27  }
 0xd97   :  { %5081 = vrot.lane.b32.xlu0 %v4970_v26, %s8716_s2 }
 0xd99   :  { %v11244_v24 = vpop.permute.xlu1 %5234 }
 0xd9b   :  { %5290 = vperm.xlu0 %7829, %v4970_v26  }
 0xd9d   :  { %v5050_v25 = vpop.permute.xlu1 %5049 }
 0xd9e   :  { %v11248_v3 = vpop.f32.mrb[172].mxu1 }
 0xd9f   :  { %5087 = vrot.lane.b32.xlu0 %v7756_v1, %s8716_s2  ;;  %v4986_v54 = vpop.f32.mrb[173].mxu1 }
 0xda0   :  { %v11253_v49 = vpop.f32.mrb[174].mxu1 }
 0xda1   :  { %v5056_v47 = vpop.permute.xlu1 %5055  ;;  %v4989_v40 = vpop.f32.mrb[175].mxu1 }
 0xda2   :  { %5310 = vperm.xlu1 %7828, %v4989_v40  }
 0xda3   :  { %5083 = vrot.lane.b32.xlu0 %v4973_v27, %s8716_s2 }
 0xda5   :  { %v5052_v31 = vpop.permute.xlu1 %5051 }
 0xda7   :  { %5093 = vrot.lane.b32.xlu0 %v11248_v3, %s8716_s2 }
 0xda9   :  { %v11263_v32 = vpop.permute.xlu1 %5230 }
 0xdab   :  { %5089 = vrot.lane.b32.xlu0 %v4986_v54, %s8716_s2 }
 0xdad   :  { %v5062_v35 = vpop.permute.xlu1 %5061 }
 0xdaf   :  { %5306 = vperm.xlu0 %7829, %v4986_v54  }
 0xdb3   :  { %5095 = vrot.lane.b32.xlu0 %v11253_v49, %s8716_s2 }
 0xdb5   :  { %v11269_v15 = vpop.permute.xlu0 %5254 }
 0xdb7   :  { %v11271_v56 = vpop.permute.xlu1 %5250  ;;  %5091 = vrot.lane.b32.xlu0 %v4989_v40, %s8716_s2 }
 0xdb9   :  { %v11274_v20 = vpop.permute.xlu0 %5246 }
 0xdbb   :  { %v5058_v59 = vpop.permute.xlu1 %5057 }
 0xdbd   :  { %v5070_v50 = vpop.permute.xlu0 %5069 }
 0xdbf   :  { %v11276_v22 = vpop.permute.xlu1 %5242 }
 0xdc1   :  { %v5072_v7 = vpop.permute.xlu0 %5071 }
 0xdc3   :  { %v5064_v34 = vpop.permute.xlu1 %5063 }
 0xdc7   :  { %v5060_v8 = vpop.permute.xlu1 %5059 }
 0xdcb   :  { %v11278_v45 = vpop.permute.xlu0 %5270  ;;  %5129 = vxpose.xlu1.b32.start [1/16] (narrow) %v5034_v13, 8  ;;  %v11280_v11 = vpop.permute.xlu1 %5266 }
 0xdcf   :  { %v5068_v23 = vpop.permute.xlu0 %5067  ;;  %5130 = vxpose.xlu1.b32.cont [2/16] (narrow) %v5036_v36, 8  ;;  %v5066_v42 = vpop.permute.xlu1 %5065 }
 0xdd3   :  { %v11282_v12 = vpop.permute.xlu0 %5262  ;;  %5131 = vxpose.xlu1.b32.cont [3/16] (narrow) %v5038_v28, 8  ;;  %v11297_v54 = vpop.permute.xlu1 %5258 }
 0xdd5   :  { %5161 = vxpose.xlu0.b32.start [1/16] (narrow) %v5066_v42, 8 }
 0xdd7   :  { %v5078_v55 = vpop.permute.xlu0 %5077  ;;  %5132 = vxpose.xlu1.b32.cont [4/16] (narrow) %v5040_v17, 8 }
 0xdd9   :  { %5162 = vxpose.xlu0.b32.cont [2/16] (narrow) %v5068_v23, 8 }
 0xddb   :  { %v11284_v62 = vpop.permute.xlu0 %5282  ;;  %5133 = vxpose.xlu1.b32.cont [5/16] (narrow) %v5042_v5, 8 }
 0xddd   :  { %5163 = vxpose.xlu0.b32.cont [3/16] (narrow) %v5070_v50, 8 }
 0xddf   :  { %v5074_v29 = vpop.permute.xlu0 %5073  ;;  %5134 = vxpose.xlu1.b32.cont [6/16] (narrow) %v5044_v21, 8 }
 0xde1   :  { %5164 = vxpose.xlu0.b32.cont [4/16] (narrow) %v5072_v7, 8 }
 0xde3   :  { %v11286_v6 = vpop.permute.xlu0 %5274  ;;  %5135 = vxpose.xlu1.b32.cont [7/16] (narrow) %v11230_v4, 8 }
 0xde5   :  { %5165 = vxpose.xlu0.b32.cont [5/16] (narrow) %v5074_v29, 8 }
 0xde7   :  { %v5080_v36 = vpop.permute.xlu0 %5079  ;;  %5136 = vxpose.xlu1.b32.cont [8/16] (narrow) %v11236_v0, 8 }
 0xdeb   :  { %v5076_v28 = vpop.permute.xlu0 %5075  ;;  %5137 = vxpose.xlu1.b32.cont [9/16] (narrow) %v5050_v25, 8 }
 0xdec   :  { %5166 = vxpose.xlu0.b32.cont [6/16] (narrow) %v5076_v28, 8 }
 0xdef   :  { %5138 = vxpose.xlu1.b32.cont [10/16] (narrow) %v5052_v31, 8 }
 0xdf0   :  { %5167 = vxpose.xlu0.b32.cont [7/16] (narrow) %v5078_v55, 8 }
 0xdf3   :  { %5139 = vxpose.xlu1.b32.cont [11/16] (narrow) %v11239_v44, 8 }
 0xdf4   :  { %5168 = vxpose.xlu0.b32.cont [8/16] (narrow) %v5080_v36, 8 }
 0xdf7   :  { %5140 = vxpose.xlu1.b32.cont [12/16] (narrow) %v5056_v47, 8  ;;  %v11299_v47 = vpop.permute.xlu1 %5286 }
 0xdfb   :  { %5141 = vxpose.xlu1.b32.cont [13/16] (narrow) %v5058_v59, 8  ;;  %v11301_v40 = vpop.permute.xlu1 %5278 }
 0xdff   :  { %5142 = vxpose.xlu1.b32.cont [14/16] (narrow) %v5060_v8, 8 }
 0xe01   :  { %v5086_v17 = vpop.permute.xlu0 %5085 }
 0xe03   :  { %5143 = vxpose.xlu1.b32.cont [15/16] (narrow) %v5062_v35, 8 }
 0xe07   :  { %5144 = vxpose.xlu1.b32.end [16/16] (narrow) %v5064_v34, 8  ;;  %v13344_v34 = vld [vmem:[#allocation30_spill] sm:$0xff] }
 0xe10   :  { %v11303_v31 = vpop.permute.xlu1 %5302 }
 0xe12   :  { %v11291_v5 = vpop.permute.xlu0 %5298 }
 0xe14   :  { %v11305_v35 = vpop.permute.xlu1 %5294 }
 0xe16   :  { %v5082_v4 = vpop.permute.xlu0 %5081 }
 0xe17   :  { %5169 = vxpose.xlu0.b32.cont [9/16] (narrow) %v5082_v4, 8  ;;  %v13345_v4 = vld [vmem:[#allocation33_spill] sm:$0xff] }
 0xe18   :  { %vm13346_vm3 = vcmp.gt.f32.partialorder %v13345_v4, 0.0 }
 0xe1a   :  { %v11293_v26 = vpop.permute.xlu0 %5290 }
 0xe1e   :  { %v5088_v0 = vpop.permute.xlu0 %5087 }
 0xe21   :  { %v11307_v59 = vpop.permute.xlu1 %5310 }
 0xe22   :  { %v5084_v1 = vpop.permute.xlu0 %5083  ;;  %13343 = vst [vmem:[#allocation60_spill] sm:$0xff] %v11307_v59 }
 0xe23   :  { %5170 = vxpose.xlu0.b32.cont [10/16] (narrow) %v5084_v1, 8  ;;  %v13347_v1 = vld [vmem:[#allocation45_spill] sm:$0xff] }
 0xe24   :  { %vm13348_vm2 = vcmp.gt.f32.partialorder %v13347_v1, 0.0 }
 0xe26   :  { %v5094_v21 = vpop.permute.xlu0 %5093 }
 0xe27   :  { %5171 = vxpose.xlu0.b32.cont [11/16] (narrow) %v5086_v17, 8 }
 0xe2a   :  { %v5090_v13 = vpop.permute.xlu0 %5089 }
 0xe2b   :  { %5172 = vxpose.xlu0.b32.cont [12/16] (narrow) %v5088_v0, 8 }
 0xe2e   :  { %v11295_v27 = vpop.permute.xlu0 %5306 }
 0xe2f   :  { %13342 = vst [vmem:[#allocation59_spill] sm:$0xff] %v11295_v27  ;;  %5173 = vxpose.xlu0.b32.cont [13/16] (narrow) %v5090_v13, 8 }
 0xe32   :  { %v5096_v44 = vpop.permute.xlu0 %5095 }
 0xe36   :  { %v5092_v25 = vpop.permute.xlu0 %5091 }
 0xe37   :  { %5174 = vxpose.xlu0.b32.cont [14/16] (narrow) %v5092_v25, 8 }
 0xe3b   :  { %5175 = vxpose.xlu0.b32.cont [15/16] (narrow) %v5094_v21, 8 }
 0xe3f   :  { %5176 = vxpose.xlu0.b32.end [16/16] (narrow) %v5096_v44, 8 }
 0xe4b   :  { %v5145_v50 = vpop.trf.xlu1 }
 0xe4c   :  { %v11310_v7 = vrot.slane %v5145_v50, %v13344_v34 }
 0xe4e   :  { %v5331_v23 = vadd.f32 %v11310_v7, %v11246_v9  ;;  %v5333_v44 = vadd.f32 %v11310_v7, %v11226_v60  ;;  %v5335_v25 = vadd.f32 %v11310_v7, %v11241_v10  ;;  %v11337_v50 = vadd.f32 %v11310_v7, %v11234_v57 }
 0xe4f   :  { %v11371_v51 = vadd.f32 %v11310_v7, %v11265_v46 }
 0xe50   :  { %v5459_v29 = vmul.f32 0.2, %v5331_v23  ;;  %vm5395_vm9 = vcmp.ge.f32.partialorder %v5331_v23, 0.0  ;;  %vm5397_vm1 = vcmp.ge.f32.partialorder %v5333_v44, 0.0  ;;  %vm5399_vm12 = vcmp.ge.f32.partialorder %v5335_v25, 0.0 }
 0xe51   :  { %v5461_v63 = vmul.f32 0.2, %v5333_v44  ;;  %v5465_v33 = vmul.f32 0.2, %v11337_v50  ;;  %vm5401_vm10 = vcmp.ge.f32.partialorder %v11337_v50, 0.0 }
 0xe52   :  { %v5523_v28 = vsel %vm5395_vm9, %v5331_v23, %v5459_v29  ;;  %v11353_v29 = vadd.f32 %v11310_v7, %v11260_v16 }
 0xe53   :  { %v11321_v0 = vsel %vm13346_vm3, %v5523_v28, -1e+30 }
 0xe54   :  { %v11384_v38 = vmul.f32 0.2, %v11353_v29 }
 0xe83   :  { %v5177_v8 = vpop.trf.xlu0 }
 0xe84   :  { %v11315_v42 = vrot.slane %v5177_v8, %v13344_v34  ;;  %v5339_v34 = vadd.f32 %v11310_v7, %v11256_v58  ;;  %v11343_v8 = vadd.f32 %v11310_v7, %v11232_v61 }
 0xe86   :  { %v5332_v55 = vadd.f32 %v11315_v42, %v11246_v9  ;;  %v5329_v9 = vadd.f32 %v11310_v7, %v11228_v43  ;;  %v5330_v23 = vadd.f32 %v11315_v42, %v11228_v43  ;;  %v5336_v28 = vadd.f32 %v11315_v42, %v11241_v10 }
 0xe87   :  { %v5334_v43 = vadd.f32 %v11315_v42, %v11226_v60  ;;  %v5340_v52 = vadd.f32 %v11315_v42, %v11256_v58  ;;  %v5463_v10 = vmul.f32 0.2, %v5335_v25  ;;  %vm5403_vm0 = vcmp.ge.f32.partialorder %v5339_v34, 0.0 }
 0xe88   :  { %vm5396_vm8 = vcmp.ge.f32.partialorder %v5332_v55, 0.0  ;;  %v5460_v36 = vmul.f32 0.2, %v5332_v55  ;;  %vm5393_vm4 = vcmp.ge.f32.partialorder %v5329_v9, 0.0  ;;  %v5458_v48 = vmul.f32 0.2, %v5330_v23 }
 0xe89   :  { %v5467_v60 = vmul.f32 0.2, %v5339_v34  ;;  %vm5394_vm7 = vcmp.ge.f32.partialorder %v5330_v23, 0.0  ;;  %v5464_v14 = vmul.f32 0.2, %v5336_v28  ;;  %v5338_v58 = vadd.f32 %v11315_v42, %v11234_v57 }
 0xe8a   :  { %v5524_v17 = vsel %vm5396_vm8, %v5332_v55, %v5460_v36  ;;  %v11349_v55 = vadd.f32 %v11310_v7, %v11250_v2  ;;  %v11357_v36 = vadd.f32 %v11310_v7, %v11263_v32  ;;  %vm5400_vm6 = vcmp.ge.f32.partialorder %v5336_v28, 0.0 }
 0xe8b   :  { %v11325_v21 = vsel %vm13348_vm2, %v5524_v17, -1e+30  ;;  %v11363_v17 = vadd.f32 %v11310_v7, %v11244_v24  ;;  %v5462_v53 = vmul.f32 0.2, %v5334_v43  ;;  %v5344_v18 = vadd.f32 %v11315_v42, %v11250_v2 }
 0xe8c   :  { %v5652_v13 = vmax.f32 %v11321_v0, %v11325_v21  ;;  %vm5407_vm5 = vcmp.ge.f32.partialorder %v11349_v55, 0.0  ;;  %v5469_v19 = vmul.f32 0.2, %v11343_v8  ;;  %vm5398_vm9 = vcmp.ge.f32.partialorder %v5334_v43, 0.0 }
 0xe8d   :  { %v5468_v41 = vmul.f32 0.2, %v5340_v52  ;;  %v5471_v37 = vmul.f32 0.2, %v11349_v55  ;;  %vm5404_vm8 = vcmp.ge.f32.partialorder %v5340_v52, 0.0  ;;  %v5522_v57 = vsel %vm5394_vm7, %v5330_v23, %v5458_v48 }
 0xe8e   :  { %5653 = vmax.xlane.f32.xlu0 %v5652_v13  ;;  %v5457_v13 = vmul.f32 0.2, %v5329_v9  ;;  %vm5405_vm3 = vcmp.ge.f32.partialorder %v11343_v8, 0.0  ;;  %vm13350_vm2 = vcmp.gt.f32.partialorder %v13349_v39, 0.0  ;;  %v5528_v2 = vsel %vm5400_vm6, %v5336_v28, %v5464_v14  ;;  %v13351_v39 = vld [vmem:[#allocation47_spill] sm:$0xff]  ;;  %v13357_v28 = vld [vmem:[#allocation36_spill] sm:$0xff] }
 0xe8f   :  { %v5342_v4 = vadd.f32 %v11315_v42, %v11232_v61  ;;  %v5348_v59 = vadd.f32 %v11315_v42, %v11263_v32  ;;  %v5466_v48 = vmul.f32 0.2, %v5338_v58  ;;  %v5526_v23 = vsel %vm5398_vm9, %v5334_v43, %v5462_v53  ;;  %v13355_v32 = vld [vmem:[#allocation48_spill] sm:$0xff] }
 0xe90   :  { %v5521_v30 = vsel %vm5393_vm4, %v5329_v9, %v5457_v13  ;;  %v5527_v9 = vsel %vm5399_vm12, %v5335_v25, %v5463_v10  ;;  %v5525_v13 = vsel %vm5397_vm1, %v5333_v44, %v5461_v63  ;;  %vm5411_vm4 = vcmp.ge.f32.partialorder %v11357_v36, 0.0  ;;  %v13353_v63 = vld [vmem:[#allocation35_spill] sm:$0xff] }
 0xe91   :  { %v11389_v1 = vsel %vm13350_vm2, %v5521_v30, -1e+30  ;;  %vm5402_vm7 = vcmp.ge.f32.partialorder %v5338_v58, 0.0  ;;  %v5472_v27 = vmul.f32 0.2, %v5344_v18  ;;  %vm13352_vm2 = vcmp.gt.f32.partialorder %v13351_v39, 0.0 }
 0xe92   :  { %v11400_v30 = vsel %vm13352_vm2, %v5522_v57, -1e+30  ;;  %v5532_v25 = vsel %vm5404_vm8, %v5340_v52, %v5468_v41  ;;  %vm5408_vm12 = vcmp.ge.f32.partialorder %v5344_v18, 0.0  ;;  %vm13354_vm1 = vcmp.gt.f32.partialorder %v13353_v63, 0.0  ;;  %v13359_v52 = vld [vmem:[#allocation49_spill] sm:$0xff] }
 0xe93   :  { %v5649_v14 = vmax.f32 %v11389_v1, %v11400_v30  ;;  %v11406_v61 = vsel %vm13354_vm1, %v5527_v9, -1e+30  ;;  %vm13356_vm6 = vcmp.gt.f32.partialorder %v13355_v32, 0.0  ;;  %vm5409_vm9 = vcmp.ge.f32.partialorder %v11353_v29, 0.0 }
 0xe94   :  { %v11410_v44 = vsel %vm13356_vm6, %v5528_v2, -1e+30  ;;  %vm13358_vm2 = vcmp.gt.f32.partialorder %v13357_v28, 0.0  ;;  %vm13360_vm8 = vcmp.gt.f32.partialorder %v13359_v52, 0.0  ;;  %v5531_v10 = vsel %vm5403_vm0, %v5339_v34, %v5467_v60  ;;  %v13361_v2 = vld [vmem:[#allocation50_spill] sm:$0xff]  ;;  %v13363_v34 = vld [vmem:[#allocation37_spill] sm:$0xff] }
 0xe95   :  { %v5658_v53 = vmax.f32 %v11406_v61, %v11410_v44  ;;  %v11417_v41 = vsel %vm13358_vm2, %v5525_v13, -1e+30  ;;  %v11421_v43 = vsel %vm13360_vm8, %v5526_v23, -1e+30  ;;  %v5346_v57 = vadd.f32 %v11315_v42, %v11260_v16  ;;  %5650 = vmax.xlane.f32.xlu1 %v5649_v14 }
 0xe96   :  { %v5470_v9 = vmul.f32 0.2, %v5342_v4  ;;  %vm13362_vm1 = vcmp.gt.f32.partialorder %v13361_v2, 0.0  ;;  %v5530_v63 = vsel %vm5402_vm7, %v5338_v58, %v5466_v48  ;;  %v5352_v13 = vadd.f32 %v11315_v42, %v11265_v46 }
 0xe97   :  { %v11428_v32 = vsel %vm13362_vm1, %v5532_v25, -1e+30  ;;  %vm5406_vm6 = vcmp.ge.f32.partialorder %v5342_v4, 0.0  ;;  %v5476_v52 = vmul.f32 0.2, %v5348_v59  ;;  %5659 = vmax.xlane.f32.xlu0 %v5658_v53  ;;  %v5536_v23 = vsel %vm5408_vm12, %v5344_v18, %v5472_v27  ;;  %v13365_v25 = vld [vmem:[#allocation51_spill] sm:$0xff] }
 0xe98   :  { %vm5412_vm0 = vcmp.ge.f32.partialorder %v5348_v59, 0.0  ;;  %v5655_v16 = vmax.f32 %v11417_v41, %v11421_v43  ;;  %vm13364_vm2 = vcmp.gt.f32.partialorder %v13363_v34, 0.0  ;;  %v5529_v58 = vsel %vm5401_vm10, %v11337_v50, %v5465_v33 }
 0xe99   :  { %v11438_v60 = vsel %vm13364_vm2, %v5531_v10, -1e+30  ;;  %v5475_v48 = vmul.f32 0.2, %v11357_v36  ;;  %vm13366_vm7 = vcmp.gt.f32.partialorder %v13365_v25, 0.0  ;;  %v5535_v27 = vsel %vm5407_vm5, %v11349_v55, %v5471_v37  ;;  %v13367_v10 = vld [vmem:[#allocation52_spill] sm:$0xff] }
 0xe9a   :  { %v5664_v46 = vmax.f32 %v11438_v60, %v11428_v32  ;;  %v11448_v18 = vsel %vm13366_vm7, %v5530_v63, -1e+30  ;;  %v5350_v14 = vadd.f32 %v11315_v42, %v11244_v24  ;;  %v5474_v53 = vmul.f32 0.2, %v5346_v57  ;;  %5656 = vmax.xlane.f32.xlu1 %v5655_v16  ;;  %v13369_v63 = vld [vmem:[#allocation38_spill] sm:$0xff]  ;;  %v13371_v55 = vld [vmem:[#allocation39_spill] sm:$0xff] }
 0xe9b   :  { %vm13368_vm10 = vcmp.gt.f32.partialorder %v13367_v10, 0.0  ;;  %v5534_v50 = vsel %vm5406_vm6, %v5342_v4, %v5470_v9  ;;  %vm5410_vm12 = vcmp.ge.f32.partialorder %v5346_v57, 0.0  ;;  %v5480_v2 = vmul.f32 0.2, %v5352_v13  ;;  %v13379_v10 = vld [vmem:[#allocation40_spill] sm:$0xff] }
 0xe9c   :  { %v11457_v33 = vsel %vm13368_vm10, %v5536_v23, -1e+30  ;;  %5665 = vmax.xlane.f32.xlu0 %v5664_v46  ;;  %vm13370_vm8 = vcmp.gt.f32.partialorder %v13369_v63, 0.0  ;;  %v5540_v37 = vsel %vm5412_vm0, %v5348_v59, %v5476_v52  ;;  %vm5416_vm5 = vcmp.ge.f32.partialorder %v5352_v13, 0.0 }
 0xe9d   :  { %v11462_v25 = vsel %vm13370_vm8, %v5529_v58, -1e+30  ;;  %vm13372_vm1 = vcmp.gt.f32.partialorder %v13371_v55, 0.0  ;;  %v5533_v4 = vsel %vm5405_vm3, %v11343_v8, %v5469_v19  ;;  %v5479_v9 = vmul.f32 0.2, %v11371_v51  ;;  %v13373_v58 = vld [vmem:[#allocation53_spill] sm:$0xff] }
 0xe9e   :  { %v5661_v24 = vmax.f32 %v11462_v25, %v11448_v18  ;;  %v11469_v16 = vsel %vm13372_vm1, %v5535_v27, -1e+30  ;;  %vm13374_vm6 = vcmp.gt.f32.partialorder %v13373_v58, 0.0  ;;  %v5539_v52 = vsel %vm5411_vm4, %v11357_v36, %v5475_v48  ;;  %v13376_v27 = vld [vmem:[#allocation54_spill] sm:$0xff] }
 0xe9f   :  { %v5670_v23 = vmax.f32 %v11469_v16, %v11457_v33  ;;  %v11479_v59 = vsel %vm13374_vm6, %v5534_v50, -1e+30  ;;  %vm5415_vm0 = vcmp.ge.f32.partialorder %v11371_v51, 0.0  ;;  %v5478_v46 = vmul.f32 0.2, %v5350_v14 }
 0xea0   :  { %13375 = vst [vmem:[#allocation63_spill] sm:$0xff] %v11479_v59  ;;  %5662 = vmax.xlane.f32.xlu1 %v5661_v24  ;;  %vm13377_vm2 = vcmp.gt.f32.partialorder %v13376_v27, 0.0  ;;  %v5538_v8 = vsel %vm5410_vm12, %v5346_v57, %v5474_v53  ;;  %vm5414_vm3 = vcmp.ge.f32.partialorder %v5350_v14, 0.0  ;;  %vm13380_vm7 = vcmp.gt.f32.partialorder %v13379_v10, 0.0  ;;  %v13381_v24 = vld [vmem:[#allocation41_spill] sm:$0xff] }
 0xea1   :  { %v11487_v19 = vsel %vm13377_vm2, %v5540_v37, -1e+30  ;;  %5671 = vmax.xlane.f32.xlu0 %v5670_v23  ;;  %v11492_v50 = vsel %vm13380_vm7, %v5533_v4, -1e+30  ;;  %v5544_v58 = vsel %vm5416_vm5, %v5352_v13, %v5480_v2  ;;  %v5477_v36 = vmul.f32 0.2, %v11363_v17 }
 0xea2   :  { %13378 = vst [vmem:[#allocation70_spill] sm:$0xff] %v11487_v19  ;;  %v5667_v48 = vmax.f32 %v11492_v50, %v11479_v59  ;;  %vm13382_vm4 = vcmp.gt.f32.partialorder %v13381_v24, 0.0  ;;  %v5537_v57 = vsel %vm5409_vm9, %v11353_v29, %v11384_v38  ;;  %vm5413_vm10 = vcmp.ge.f32.partialorder %v11363_v17, 0.0  ;;  %v13384_v2 = vld [vmem:[#allocation55_spill] sm:$0xff]  ;;  %v13387_v4 = vld [vmem:[#allocation56_spill] sm:$0xff]  ;;  %v13390_v38 = vld [vmem:[#allocation42_spill] sm:$0xff] }
 0xea3   :  { %v11500_v27 = vsel %vm13382_vm4, %v5539_v52, -1e+30  ;;  %vm13385_vm12 = vcmp.gt.f32.partialorder %v13384_v2, 0.0  ;;  %v5543_v37 = vsel %vm5415_vm0, %v11371_v51, %v5479_v9  ;;  %vm13388_vm8 = vcmp.gt.f32.partialorder %v13387_v4, 0.0 }
 0xea4   :  { %13383 = vst [vmem:[#allocation68_spill] sm:$0xff] %v11500_v27  ;;  %v5676_v53 = vmax.f32 %v11500_v27, %v11487_v19  ;;  %v11511_v13 = vsel %vm13385_vm12, %v5538_v8, -1e+30  ;;  %5668 = vmax.xlane.f32.xlu1 %v5667_v48  ;;  %v11518_v23 = vsel %vm13388_vm8, %v5544_v58, -1e+30  ;;  %v5542_v52 = vsel %vm5414_vm3, %v5350_v14, %v5478_v46  ;;  %v13393_v8 = vld [vmem:[#allocation43_spill] sm:$0xff] }
 0xea5   :  { %13386 = vst [vmem:[#allocation71_spill] sm:$0xff] %v11511_v13  ;;  %13389 = vst [vmem:[#allocation69_spill] sm:$0xff] %v11518_v23  ;;  %vm13391_vm9 = vcmp.gt.f32.partialorder %v13390_v38, 0.0  ;;  %vm13394_vm5 = vcmp.gt.f32.partialorder %v13393_v8, 0.0  ;;  %v5541_v51 = vsel %vm5413_vm10, %v11363_v17, %v5477_v36  ;;  %v13396_v58 = vld [vmem:[#allocation57_spill] sm:$0xff]  ;;  %v13399_v46 = vld [vmem:[#allocation46_spill] sm:$0xff]  ;;  %v5356_v17 = vadd.f32 %v11315_v42, %v11274_v20 }
 0xea6   :  { %5677 = vmax.xlane.f32.xlu0 %v5676_v53  ;;  %v11522_v29 = vsel %vm13391_vm9, %v5537_v57, -1e+30  ;;  %v11528_v24 = vsel %vm13394_vm5, %v5543_v37, -1e+30  ;;  %vm13397_vm1 = vcmp.gt.f32.partialorder %v13396_v58, 0.0  ;;  %vm13400_vm6 = vcmp.gt.f32.partialorder %v13399_v46, 0.0 }
 0xea7   :  { %13392 = vst [vmem:[#allocation74_spill] sm:$0xff] %v11522_v29  ;;  %v5673_v2 = vmax.f32 %v11522_v29, %v11511_v13  ;;  %13395 = vst [vmem:[#allocation72_spill] sm:$0xff] %v11528_v24  ;;  %v5682_v9 = vmax.f32 %v11528_v24, %v11518_v23  ;;  %v11535_v14 = vsel %vm13397_vm1, %v5542_v52, -1e+30  ;;  %v11539_v48 = vsel %vm13400_vm6, %v5541_v51, -1e+30 }
 0xea8   :  { %13398 = vst [vmem:[#allocation76_spill] sm:$0xff] %v11535_v14  ;;  %13401 = vst [vmem:[#allocation73_spill] sm:$0xff] %v11539_v48  ;;  %v5679_v57 = vmax.f32 %v11539_v48, %v11535_v14  ;;  %v5353_v36 = vadd.f32 %v11310_v7, %v11276_v22  ;;  %v5355_v53 = vadd.f32 %v11310_v7, %v11274_v20  ;;  %v5484_v46 = vmul.f32 0.2, %v5356_v17 }
 0xea9   :  { %5674 = vmax.xlane.f32.xlu1 %v5673_v2  ;;  %v5357_v2 = vadd.f32 %v11310_v7, %v11271_v56  ;;  %v5359_v37 = vadd.f32 %v11310_v7, %v11269_v15  ;;  %v11565_v52 = vadd.f32 %v11310_v7, %v11280_v11  ;;  %v11569_v20 = vadd.f32 %v11310_v7, %v11278_v45 }
 0xeaa   :  { %5683 = vmax.xlane.f32.xlu0 %v5682_v9  ;;  %v5354_v51 = vadd.f32 %v11315_v42, %v11276_v22  ;;  %v11575_v9 = vadd.f32 %v11310_v7, %v11286_v6  ;;  %v5358_v58 = vadd.f32 %v11315_v42, %v11271_v56  ;;  %v11585_v38 = vadd.f32 %v11310_v7, %v11284_v62 }
 0xeab   :  { %v11589_v4 = vadd.f32 %v11310_v7, %v11299_v47  ;;  %vm5417_vm0 = vcmp.ge.f32.partialorder %v5353_v36, 0.0  ;;  %vm5420_vm2 = vcmp.ge.f32.partialorder %v5356_v17, 0.0  ;;  %vm5419_vm3 = vcmp.ge.f32.partialorder %v5355_v53, 0.0 }
 0xeac   :  { %vm5421_vm7 = vcmp.ge.f32.partialorder %v5357_v2, 0.0  ;;  %v5481_v22 = vmul.f32 0.2, %v5353_v36  ;;  %v5483_v8 = vmul.f32 0.2, %v5355_v53  ;;  %v5360_v10 = vadd.f32 %v11315_v42, %v11269_v15 }
 0xead   :  { %5680 = vmax.xlane.f32.xlu1 %v5679_v57  ;;  %v11579_v57 = vadd.f32 %v11310_v7, %v11301_v40  ;;  %vm5423_vm4 = vcmp.ge.f32.partialorder %v5359_v37, 0.0  ;;  %v5485_v56 = vmul.f32 0.2, %v5357_v2  ;;  %v5482_v55 = vmul.f32 0.2, %v5354_v51 }
 0xeae   :  { %v5362_v63 = vadd.f32 %v11315_v42, %v11297_v54  ;;  %vm5418_vm10 = vcmp.ge.f32.partialorder %v5354_v51, 0.0  ;;  %v5486_v14 = vmul.f32 0.2, %v5358_v58  ;;  %v5548_v48 = vsel %vm5420_vm2, %v5356_v17, %v5484_v46  ;;  %v13402_v17 = vld [vmem:[#allocation91_spill] sm:$0xff] }
 0xeaf   :  { %v5487_v34 = vmul.f32 0.2, %v5359_v37  ;;  %vm5422_vm8 = vcmp.ge.f32.partialorder %v5358_v58, 0.0  ;;  %v5493_v15 = vmul.f32 0.2, %v11565_v52  ;;  %v5547_v28 = vsel %vm5419_vm3, %v5355_v53, %v5483_v8  ;;  %v13404_v53 = vld [vmem:[#allocation12_spill] sm:$0xff] }
 0xeb0   :  { %v5545_v24 = vsel %vm5417_vm0, %v5353_v36, %v5481_v22  ;;  %vm5429_vm5 = vcmp.ge.f32.partialorder %v11565_v52, 0.0  ;;  %v5488_v46 = vmul.f32 0.2, %v5360_v10  ;;  %vm13403_vm1 = vcmp.gt.f32.partialorder %v13402_v17, 0.0 }
 0xeb1   :  { %v11607_v29 = vsel %vm13403_vm1, %v5548_v48, -1e+30  ;;  %v5546_v19 = vsel %vm5418_vm10, %v5354_v51, %v5482_v55  ;;  %v5366_v27 = vadd.f32 %v11315_v42, %v11280_v11  ;;  %vm5424_vm6 = vcmp.ge.f32.partialorder %v5360_v10, 0.0  ;;  %v13406_v48 = vld [vmem:[#allocation82_spill] sm:$0xff]  ;;  %v13408_v51 = vld [vmem:[#allocation92_spill] sm:$0xff] }
 0xeb2   :  { %v5490_v59 = vmul.f32 0.2, %v5362_v63  ;;  %v5550_v8 = vsel %vm5422_vm8, %v5358_v58, %v5486_v14  ;;  %v5495_v36 = vmul.f32 0.2, %v11569_v20  ;;  %vm5426_vm0 = vcmp.ge.f32.partialorder %v5362_v63, 0.0 }
 0xeb3   :  { %vm13405_vm2 = vcmp.gt.f32.partialorder %v13404_v53, 0.0  ;;  %v5549_v22 = vsel %vm5421_vm7, %v5357_v2, %v5485_v56  ;;  %vm5431_vm3 = vcmp.ge.f32.partialorder %v11569_v20, 0.0  ;;  %vm13407_vm10 = vcmp.gt.f32.partialorder %v13406_v48, 0.0  ;;  %v13410_v56 = vld [vmem:[#allocation93_spill] sm:$0xff] }
 0xeb4   :  { %v11623_v11 = vsel %vm13407_vm10, %v5545_v24, -1e+30  ;;  %vm13409_vm8 = vcmp.gt.f32.partialorder %v13408_v51, 0.0  ;;  %v5551_v14 = vsel %vm5423_vm4, %v5359_v37, %v5487_v34  ;;  %vm5433_vm7 = vcmp.ge.f32.partialorder %v11575_v9, 0.0  ;;  %v13412_v51 = vld [vmem:[#allocation83_spill] sm:$0xff] }
 0xeb5   :  { %v11627_v58 = vsel %vm13409_vm8, %v5546_v19, -1e+30  ;;  %vm13411_vm1 = vcmp.gt.f32.partialorder %v13410_v56, 0.0  ;;  %v5552_v48 = vsel %vm5424_vm6, %v5360_v10, %v5488_v46  ;;  %v5370_v24 = vadd.f32 %v11315_v42, %v11286_v6  ;;  %v13414_v10 = vld [vmem:[#allocation84_spill] sm:$0xff] }
 0xeb6   :  { %v11635_v17 = vsel %vm13411_vm1, %v5550_v8, -1e+30  ;;  %v5494_v19 = vmul.f32 0.2, %v5366_v27  ;;  %v5554_v34 = vsel %vm5426_vm0, %v5362_v63, %v5490_v59  ;;  %v5497_v37 = vmul.f32 0.2, %v11575_v9 }
 0xeb7   :  { %vm5430_vm4 = vcmp.ge.f32.partialorder %v5366_v27, 0.0  ;;  %vm13413_vm10 = vcmp.gt.f32.partialorder %v13412_v51, 0.0  ;;  %vm5435_vm6 = vcmp.ge.f32.partialorder %v11579_v57, 0.0  ;;  %vm13415_vm8 = vcmp.gt.f32.partialorder %v13414_v10, 0.0  ;;  %v13416_v63 = vld [vmem:[#allocation95_spill] sm:$0xff]  ;;  %v13418_v51 = vld [vmem:[#allocation96_spill] sm:$0xff] }
 0xeb8   :  { %v11646_v8 = vsel %vm13413_vm10, %v5549_v22, -1e+30  ;;  %v11653_v46 = vsel %vm13415_vm8, %v5551_v14, -1e+30  ;;  %vm13417_vm0 = vcmp.gt.f32.partialorder %v13416_v63, 0.0  ;;  %v5372_v22 = vadd.f32 %v11315_v42, %v11301_v40 }
 0xeb9   :  { %v5691_v6 = vmax.f32 %v11646_v8, %v11635_v17  ;;  %v11657_v59 = vsel %vm13417_vm0, %v5552_v48, -1e+30  ;;  %vm13419_vm1 = vcmp.gt.f32.partialorder %v13418_v51, 0.0  ;;  %v5374_v63 = vadd.f32 %v11315_v42, %v11284_v62 }
 0xeba   :  { %v11666_v53 = vsel %vm13419_vm1, %v5554_v34, -1e+30  ;;  %v5498_v48 = vmul.f32 0.2, %v5370_v24  ;;  %v5558_v10 = vsel %vm5430_vm4, %v5366_v27, %v5494_v19  ;;  %v5694_v40 = vmax.f32 %v11653_v46, %v11657_v59 }
 0xebb   :  { %v5557_v19 = vsel %vm5429_vm5, %v11565_v52, %v5493_v15  ;;  %v5502_v51 = vmul.f32 0.2, %v5374_v63  ;;  %vm5438_vm5 = vcmp.ge.f32.partialorder %v5374_v63, 0.0 }
 0xebe   :  { %5318 = vperm.xlu1 %7828, %v11253_v49   ;;  %v11557_v49 = vadd.f32 %v11310_v7, %v11297_v54  ;;  %v5364_v54 = vadd.f32 %v11315_v42, %v11282_v12 }
 0xec0   :  { %5314 = vperm.xlu0 %7829, %v11248_v3   ;;  %v11561_v3 = vadd.f32 %v11310_v7, %v11282_v12  ;;  %vm5425_vm12 = vcmp.ge.f32.partialorder %v11557_v49, 0.0  ;;  %v5489_v13 = vmul.f32 0.2, %v11557_v49  ;;  %v11615_v12 = vsel %vm13405_vm2, %v5547_v28, -1e+30 }
 0xec1   :  { %v5688_v55 = vmax.f32 %v11615_v12, %v11607_v29  ;;  %v5368_v28 = vadd.f32 %v11315_v42, %v11278_v45  ;;  %v5492_v2 = vmul.f32 0.2, %v5364_v54  ;;  %vm5428_vm2 = vcmp.ge.f32.partialorder %v5364_v54, 0.0 }
 0xec2   :  { %vm5427_vm9 = vcmp.ge.f32.partialorder %v11561_v3, 0.0  ;;  %v5491_v23 = vmul.f32 0.2, %v11561_v3  ;;  %v5685_v45 = vmax.f32 %v11623_v11, %v11627_v58 }
 0xec3   :  { %v5496_v56 = vmul.f32 0.2, %v5368_v28  ;;  %v5556_v14 = vsel %vm5428_vm2, %v5364_v54, %v5492_v2  ;;  %vm5432_vm10 = vcmp.ge.f32.partialorder %v5368_v28, 0.0  ;;  %v5499_v2 = vmul.f32 0.2, %v11579_v57 }
 0xec4   :  { %v5555_v54 = vsel %vm5427_vm9, %v11561_v3, %v5491_v23  ;;  %v11686_v27 = vsel %vm223_vm14, %v5556_v14, -1e+30  ;;  %v11695_v23 = vsel %vm225_vm11, %v5558_v10, -1e+30  ;;  %vm5436_vm9 = vcmp.ge.f32.partialorder %v5372_v22, 0.0  ;;  %v13425_v14 = vld [vmem:[#allocation86_spill] sm:$0xff] }
 0xec5   :  { %13424 = vst [vmem:[#allocation78_spill] sm:$0xff] %v11695_v23  ;;  %v5560_v3 = vsel %vm5432_vm10, %v5368_v28, %v5496_v56  ;;  %vm13426_vm14 = vcmp.gt.f32.partialorder %v13425_v14, 0.0  ;;  %v5559_v28 = vsel %vm5431_vm3, %v11569_v20, %v5495_v36  ;;  %v5501_v56 = vmul.f32 0.2, %v11585_v38 }
 0xec6   :  { %v11700_v34 = vsel %vm13426_vm14, %v5555_v54, -1e+30  ;;  %v5566_v54 = vsel %vm5438_vm5, %v5374_v63, %v5502_v51 }
 0xedf   :  { %5689 = vmax.xlane.f32.xlu0 %v5688_v55  ;;  %v5553_v55 = vsel %vm5425_vm12, %v11557_v49, %v5489_v13  ;;  %vm5434_vm12 = vcmp.ge.f32.partialorder %v5370_v24, 0.0  ;;  %v13420_v13 = vld [vmem:[#allocation85_spill] sm:$0xff] }
 0xee0   :  { %vm13421_vm8 = vcmp.gt.f32.partialorder %v13420_v13, 0.0  ;;  %v5562_v52 = vsel %vm5434_vm12, %v5370_v24, %v5498_v48  ;;  %v11717_v24 = vsel %vm227_vm13, %v5560_v3, -1e+30  ;;  %v5561_v48 = vsel %vm5433_vm7, %v11575_v9, %v5497_v37 }
 0xee1   :  { %v11676_v49 = vsel %vm13421_vm8, %v5553_v55, -1e+30  ;;  %13429 = vst [vmem:[#allocation77_spill] sm:$0xff] %v11717_v24  ;;  %v13433_v55 = vld [vmem:[#allocation88_spill] sm:$0xff]  ;;  %v5503_v9 = vmul.f32 0.2, %v11589_v4 }
 0xee2   :  { %5686 = vmax.xlane.f32.xlu1 %v5685_v45  ;;  %v5697_v62 = vmax.f32 %v11676_v49, %v11666_v53  ;;  %v5376_v45 = vadd.f32 %v11315_v42, %v11299_v47  ;;  %v5700_v47 = vmax.f32 %v11700_v34, %v11686_v27  ;;  %vm13434_vm2 = vcmp.gt.f32.partialorder %v13433_v55, 0.0 }
 0xee3   :  { %5692 = vmax.xlane.f32.xlu0 %v5691_v6  ;;  %v5500_v6 = vmul.f32 0.2, %v5372_v22  ;;  %v11730_v3 = vsel %vm13434_vm2, %v5559_v28, -1e+30  ;;  %vm5439_vm7 = vcmp.ge.f32.partialorder %v11589_v4, 0.0  ;;  %v13442_v28 = vld [vmem:[#allocation13_spill] sm:$0xff] }
 0xee4   :  { %vm5440_vm3 = vcmp.ge.f32.partialorder %v5376_v45, 0.0  ;;  %13435 = vst [vmem:[#allocation79_spill] sm:$0xff] %v11730_v3  ;;  %v5706_v37 = vmax.f32 %v11730_v3, %v11717_v24  ;;  %vm13443_vm0 = vcmp.gt.f32.partialorder %v13442_v28, 0.0 }
 0xee5   :  { %v5564_v36 = vsel %vm5436_vm9, %v5372_v22, %v5500_v6  ;;  %v5563_v22 = vsel %vm5435_vm6, %v11579_v57, %v5499_v2  ;;  %v13445_v57 = vld [vmem:[#allocation89_spill] sm:$0xff] }
 0xee6   :  { %5695 = vmax.xlane.f32.xlu1 %v5694_v40  ;;  %v11707_v40 = vsel %vm224_vm15, %v5557_v19, -1e+30  ;;  %vm5437_vm15 = vcmp.ge.f32.partialorder %v11585_v38, 0.0  ;;  %v13430_v19 = vld [vmem:[#allocation99_spill] sm:$0xff]  ;;  %vm13446_vm6 = vcmp.gt.f32.partialorder %v13445_v57, 0.0 }
 0xee7   :  { %5698 = vmax.xlane.f32.xlu0 %v5697_v62  ;;  %v5703_v10 = vmax.f32 %v11707_v40, %v11695_v23  ;;  %v5504_v62 = vmul.f32 0.2, %v5376_v45  ;;  %vm13431_vm11 = vcmp.gt.f32.partialorder %v13430_v19, 0.0  ;;  %v5565_v63 = vsel %vm5437_vm15, %v11585_v38, %v5501_v56 }
 0xee8   :  { %v11725_v20 = vsel %vm13431_vm11, %v5562_v52, -1e+30  ;;  %v13439_v52 = vld [vmem:[#allocation100_spill] sm:$0xff]  ;;  %v11759_v2 = vsel %vm13446_vm6, %v5563_v22, -1e+30  ;;  %v5567_v38 = vsel %vm5439_vm7, %v11589_v4, %v5503_v9 }
 0xee9   :  { %13432 = vst [vmem:[#allocation75_spill] sm:$0xff] %v11725_v20  ;;  %vm13440_vm4 = vcmp.gt.f32.partialorder %v13439_v52, 0.0  ;;  %13447 = vst [vmem:[#allocation23_spill] sm:$0xff] %v11759_v2 }
 0xeea   :  { %5701 = vmax.xlane.f32.xlu1 %v5700_v47  ;;  %v13436_v47 = vld [vmem:[#allocation20_spill] sm:$0xff]  ;;  %v11748_v51 = vsel %vm13440_vm4, %v5564_v36, -1e+30  ;;  %v13448_v36 = vld [vmem:[#allocation90_spill] sm:$0xff] }
 0xeeb   :  { %5704 = vmax.xlane.f32.xlu0 %v5703_v10  ;;  %vm13437_vm13 = vcmp.gt.f32.partialorder %v13436_v47, 0.0  ;;  %13441 = vst [vmem:[#allocation80_spill] sm:$0xff] %v11748_v51  ;;  %v11755_v10 = vsel %vm13443_vm0, %v5566_v54, -1e+30  ;;  %v5712_v52 = vmax.f32 %v11759_v2, %v11748_v51  ;;  %vm13449_vm1 = vcmp.gt.f32.partialorder %v13448_v36, 0.0  ;;  %v13451_v54 = vld [vmem:[#allocation101_spill] sm:$0xff] }
 0xeec   :  { %v11738_v19 = vsel %vm13437_vm13, %v5561_v48, -1e+30  ;;  %13444 = vst [vmem:[#allocation24_spill] sm:$0xff] %v11755_v10  ;;  %v5568_v48 = vsel %vm5440_vm3, %v5376_v45, %v5504_v62  ;;  %v11765_v47 = vsel %vm13449_vm1, %v5565_v63, -1e+30  ;;  %vm13452_vm10 = vcmp.gt.f32.partialorder %v13451_v54, 0.0 }
 0xeed   :  { %13438 = vst [vmem:[#allocation81_spill] sm:$0xff] %v11738_v19  ;;  %v5709_v6 = vmax.f32 %v11738_v19, %v11725_v20  ;;  %13450 = vst [vmem:[#allocation15_spill] sm:$0xff] %v11765_v47  ;;  %v5715_v56 = vmax.f32 %v11765_v47, %v11755_v10  ;;  %v11772_v45 = vsel %vm13452_vm10, %v5568_v48, -1e+30  ;;  %v13454_v62 = vld [vmem:[#allocation94_spill] sm:$0xff]  ;;  %v5377_v48 = vadd.f32 %v11310_v7, %v11293_v26  ;;  %v13460_v2 = vld [vmem:[#allocation45_spill] sm:$0xff] }
 0xeee   :  { %5707 = vmax.xlane.f32.xlu1 %v5706_v37  ;;  %13453 = vst [vmem:[#allocation18_spill] sm:$0xff] %v11772_v45  ;;  %vm13455_vm12 = vcmp.gt.f32.partialorder %v13454_v62, 0.0 }
 0xeef   :  { %5710 = vmax.xlane.f32.xlu0 %v5709_v6  ;;  %v11776_v37 = vsel %vm13455_vm12, %v5567_v38, -1e+30  ;;  %v5380_v38 = vadd.f32 %v11315_v42, %v11305_v35  ;;  %vm5441_vm8 = vcmp.ge.f32.partialorder %v5377_v48, 0.0 }
 0xef0   :  { %13456 = vst [vmem:[#allocation16_spill] sm:$0xff] %v11776_v37  ;;  %v5718_v22 = vmax.f32 %v11776_v37, %v11772_v45  ;;  %v13459_v45 = vld [vmem:[#allocation33_spill] sm:$0xff] }
 0xef1   :  { %vm5444_vm15 = vcmp.ge.f32.partialorder %v5380_v38, 0.0 }
 0xef2   :  { %5713 = vmax.xlane.f32.xlu1 %v5712_v52  ;;  %v5379_v52 = vadd.f32 %v11310_v7, %v11305_v35  ;;  %v5505_v35 = vmul.f32 0.2, %v5377_v48 }
 0xef3   :  { %5716 = vmax.xlane.f32.xlu0 %v5715_v56  ;;  %v11790_v56 = vadd.f32 %v11310_v7, %v11291_v5 }
 0xef4   :  { %vm5443_vm9 = vcmp.ge.f32.partialorder %v5379_v52, 0.0 }
 0xef5   :  { %vm5445_vm14 = vcmp.ge.f32.partialorder %v11790_v56, 0.0  ;;  %v5509_v54 = vmul.f32 0.2, %v11790_v56 }
 0xef6   :  { %5719 = vmax.xlane.f32.xlu1 %v5718_v22 }
 0xf1b   :  { %v5654_v6 = vpop.xlane.xlu0 %5653 }
 0xf1c   :  { %v5747_v4 = vsub.f32 %v11321_v0, %v5654_v6  ;;  %v5748_v9 = vsub.f32 %v11325_v21, %v5654_v6  ;;  %v5383_v0 = vadd.f32 %v11310_v7, %v11303_v31  ;;  %v13457_v21 = vld [vmem:[#allocation59_spill] sm:$0xff] }
 0xf1d   :  { %v11796_v22 = vadd.f32 %v11310_v7, %v13457_v21 }
 0xf1e   :  { %v5813_v63 = vmul.f32 1.442695, %v5747_v4  ;;  %v5815_v28 = vmul.f32 1.442695, %v5748_v9  ;;  %v5507_v4 = vmul.f32 0.2, %v5379_v52 }
 0xf1f   :  { %v5508_v9 = vmul.f32 0.2, %v5380_v38  ;;  %vm5447_vm5 = vcmp.ge.f32.partialorder %v5383_v0, 0.0  ;;  %v5511_v62 = vmul.f32 0.2, %v5383_v0 }
 0xf20   :  { %8422 = vpow2.f32 %v5813_v63  ;;  %v11806_v36 = vmul.f32 0.2, %v11796_v22  ;;  %v5571_v10 = vsel %vm5443_vm9, %v5379_v52, %v5507_v4  ;;  %v13461_v52 = vld [vmem:[#allocation17_spill] sm:$0xff] }
 0xf21   :  { %8424 = vpow2.f32 %v5815_v28  ;;  %v13458_v28 = vld [vmem:[#allocation60_spill] sm:$0xff]  ;;  %v5572_v19 = vsel %vm5444_vm15, %v5380_v38, %v5508_v9  ;;  %vm13462_vm3 = vcmp.gt.f32.partialorder %v13461_v52, 0.0 }
 0xf22   :  { %v11800_v6 = vadd.f32 %v11310_v7, %v13458_v28  ;;  %v5651_v57 = vpop.xlane.xlu1 %5650 }
 0xf23   :  { %v5745_v15 = vsub.f32 %v11389_v1, %v5651_v57  ;;  %v5746_v14 = vsub.f32 %v11400_v30, %v5651_v57 }
 0xf24   :  { %vm5451_vm11 = vcmp.ge.f32.partialorder %v11800_v6, 0.0  ;;  %v5660_v13 = vpop.xlane.xlu0 %5659  ;;  %v5515_v24 = vmul.f32 0.2, %v11800_v6 }
 0xf25   :  { %v5751_v47 = vsub.f32 %v11406_v61, %v5660_v13  ;;  %v5752_v51 = vsub.f32 %v11410_v44, %v5660_v13  ;;  %v5809_v1 = vmul.f32 1.442695, %v5745_v15  ;;  %v5811_v3 = vmul.f32 1.442695, %v5746_v14 }
 0xf26   :  { %v11825_v61 = vsel %vm13462_vm3, %v5571_v10, -1e+30  ;;  %v5378_v10 = vadd.f32 %v11315_v42, %v11293_v26  ;;  %v5382_v26 = vadd.f32 %v11315_v42, %v11291_v5 }
 0xf27   :  { %v5821_v30 = vmul.f32 1.442695, %v5751_v47  ;;  %v5823_v57 = vmul.f32 1.442695, %v5752_v51  ;;  %v5657_v23 = vpop.xlane.xlu1 %5656  ;;  %8426 = vpow2.f32 %v5809_v1  ;;  %v5569_v51 = vsel %vm5441_vm8, %v5377_v48, %v5505_v35  ;;  %v13465_v48 = vld [vmem:[#allocation32_spill] sm:$0xff] }
 0xf28   :  { %v5749_v44 = vsub.f32 %v11417_v41, %v5657_v23  ;;  %v5750_v13 = vsub.f32 %v11421_v43, %v5657_v23  ;;  %8428 = vpow2.f32 %v5811_v3  ;;  %v5575_v3 = vsel %vm5447_vm5, %v5383_v0, %v5511_v62 }
 0xf29   :  { %8430 = vpow2.f32 %v5821_v30  ;;  %vm13466_vm13 = vcmp.gt.f32.partialorder %v13465_v48, 0.0  ;;  %v5573_v62 = vsel %vm5445_vm14, %v11790_v56, %v5509_v54  ;;  %v5384_v0 = vadd.f32 %v11315_v42, %v11303_v31  ;;  %v13467_v30 = vld [vmem:[#allocation44_spill] sm:$0xff]  ;;  %v13469_v56 = vld [vmem:[#allocation31_spill] sm:$0xff] }
 0xf2a   :  { %v8423_v63 = vpop.eup %8422  ;;  %v5817_v41 = vmul.f32 1.442695, %v5749_v44  ;;  %v5819_v38 = vmul.f32 1.442695, %v5750_v13  ;;  %8432 = vpow2.f32 %v5823_v57  ;;  %v11844_v9 = vsel %vm13466_vm13, %v5569_v51, -1e+30 }
 0xf2b   :  { %v8425_v55 = vpop.eup %8424  ;;  %v11811_v37 = vmul.f32 %v8423_v63, %v13459_v45  ;;  %v5506_v63 = vmul.f32 0.2, %v5378_v10  ;;  %v5579_v1 = vsel %vm5451_vm11, %v11800_v6, %v5515_v24  ;;  %vm5442_vm7 = vcmp.ge.f32.partialorder %v5378_v10, 0.0 }
 0xf2c   :  { %v11817_v20 = vmul.f32 %v8425_v55, %v13460_v2  ;;  %v5666_v55 = vpop.xlane.xlu0 %5665  ;;  %v13463_v2 = vld [vmem:[#allocation29_spill] sm:$0xff]  ;;  %8434 = vpow2.f32 %v5817_v41  ;;  %vm13468_vm4 = vcmp.gt.f32.partialorder %v13467_v30, 0.0  ;;  %vm13470_vm0 = vcmp.gt.f32.partialorder %v13469_v56, 0.0  ;;  %v13481_v56 = vld [vmem:[#allocation74_spill] sm:$0xff] }
 0xf2d   :  { %vm13464_vm2 = vcmp.gt.f32.partialorder %v13463_v2, 0.0  ;;  %v5755_v14 = vsub.f32 %v11438_v60, %v5666_v55  ;;  %v5756_v47 = vsub.f32 %v11428_v32, %v5666_v55  ;;  %v5663_v23 = vpop.xlane.xlu1 %5662  ;;  %8436 = vpow2.f32 %v5819_v38 }
 0xf2e   :  { %v6004_v45 = vadd.f32 %v11817_v20, %v11811_v37  ;;  %v11831_v15 = vsel %vm13464_vm2, %v5572_v19, -1e+30  ;;  %v5753_v32 = vsub.f32 %v11462_v25, %v5663_v23  ;;  %v5754_v35 = vsub.f32 %v11448_v18, %v5663_v23 }
 0xf2f   :  { %v5829_v43 = vmul.f32 1.442695, %v5755_v14  ;;  %v5724_v19 = vmax.f32 %v11825_v61, %v11831_v15  ;;  %v5831_v60 = vmul.f32 1.442695, %v5756_v47  ;;  %v5388_v25 = vadd.f32 %v11315_v42, %v13458_v28 }
 0xf30   :  { %6005 = vadd.xlane.f32.xlu1 %v6004_v45  ;;  %v5672_v4 = vpop.xlane.xlu0 %5671  ;;  %v11862_v57 = vsel %vm13468_vm4, %v5575_v3, -1e+30  ;;  %v5825_v54 = vmul.f32 1.442695, %v5753_v32  ;;  %v11867_v28 = vsel %vm13470_vm0, %v5573_v62, -1e+30  ;;  %v11871_v24 = vadd.f32 %v11315_v42, %v13457_v21 }
 0xf31   :  { %8438 = vpow2.f32 %v5829_v43  ;;  %v5759_v5 = vsub.f32 %v11469_v16, %v5672_v4  ;;  %v5669_v18 = vpop.xlane.xlu1 %5668  ;;  %v5760_v31 = vsub.f32 %v11457_v33, %v5672_v4  ;;  %vm5446_vm6 = vcmp.ge.f32.partialorder %v5382_v26, 0.0  ;;  %v13471_v45 = vld [vmem:[#allocation22_spill] sm:$0xff]  ;;  %v8427_v13 = vpop.eup %8426 }
 0xf32   :  { %8440 = vpow2.f32 %v5831_v60  ;;  %v5827_v6 = vmul.f32 1.442695, %v5754_v35  ;;  %vm13472_vm1 = vcmp.gt.f32.partialorder %v13471_v45, 0.0  ;;  %vm5448_vm10 = vcmp.ge.f32.partialorder %v5384_v0, 0.0  ;;  %v8429_v14 = vpop.eup %8428  ;;  %v13473_v21 = vld [vmem:[#allocation34_spill] sm:$0xff]  ;;  %v13475_v35 = vld [vmem:[#allocation21_spill] sm:$0xff] }
 0xf33   :  { %v11875_v44 = vsel %vm13472_vm1, %v5579_v1, -1e+30  ;;  %vm5452_vm12 = vcmp.ge.f32.partialorder %v5388_v25, 0.0  ;;  %v5512_v55 = vmul.f32 0.2, %v5384_v0  ;;  %v5570_v33 = vsel %vm5442_vm7, %v5378_v10, %v5506_v63  ;;  %v8431_v23 = vpop.eup %8430  ;;  %v13474_v10 = vld [vmem:[#allocation63_spill] sm:$0xff] }
 0xf34   :  { %5725 = vmax.xlane.f32.xlu1 %v5724_v19  ;;  %v5678_v16 = vpop.xlane.xlu0 %5677  ;;  %v5510_v47 = vmul.f32 0.2, %v5382_v26  ;;  %v5516_v51 = vmul.f32 0.2, %v5388_v25  ;;  %v5837_v41 = vmul.f32 1.442695, %v5759_v5  ;;  %v11881_v43 = vmul.f32 %v8427_v13, %v13473_v21  ;;  %v8433_v32 = vpop.eup %8432 }
 0xf35   :  { %8442 = vpow2.f32 %v5825_v54  ;;  %v5839_v19 = vmul.f32 1.442695, %v5760_v31  ;;  %v5757_v3 = vsub.f32 %v11492_v50, %v5669_v18  ;;  %v11885_v60 = vmul.f32 %v8429_v14, %v13351_v39  ;;  %v13477_v63 = vld [vmem:[#allocation35_spill] sm:$0xff]  ;;  %v13478_v50 = vld [vmem:[#allocation68_spill] sm:$0xff] }
 0xf36   :  { %v11878_v38 = vpop.xlane.xlu1 %5674  ;;  %vm5449_vm8 = vcmp.ge.f32.partialorder %v11796_v22, 0.0  ;;  %8444 = vpow2.f32 %v5827_v6  ;;  %v5758_v4 = vsub.f32 %v13474_v10, %v5669_v18  ;;  %vm13476_vm9 = vcmp.gt.f32.partialorder %v13475_v35, 0.0  ;;  %v8435_v5 = vpop.eup %8434  ;;  %v13490_v35 = vld [vmem:[#allocation27_spill] sm:$0xff] }
 0xf37   :  { %v11891_v62 = vsel %vm13476_vm9, %v5570_v33, -1e+30  ;;  %v11894_v1 = vmul.f32 %v8431_v23, %v13477_v63  ;;  %v5514_v54 = vmul.f32 0.2, %v11871_v24  ;;  %v5763_v31 = vsub.f32 %v13478_v50, %v5678_v16  ;;  %v8437_v6 = vpop.eup %8436  ;;  %v13479_v33 = vld [vmem:[#allocation48_spill] sm:$0xff]  ;;  %v13480_v50 = vld [vmem:[#allocation70_spill] sm:$0xff] }
 0xf38   :  { %v6001_v39 = vadd.f32 %v11885_v60, %v11881_v43  ;;  %v5576_v13 = vsel %vm5448_vm10, %v5384_v0, %v5512_v55  ;;  %8446 = vpow2.f32 %v5837_v41  ;;  %v5684_v18 = vpop.xlane.xlu0 %5683  ;;  %v11904_v21 = vmul.f32 %v8433_v32, %v13479_v33  ;;  %v13482_v33 = vld [vmem:[#allocation103_spill] sm:$0xff] }
 0xf39   :  { %v5574_v23 = vsel %vm5446_vm6, %v5382_v26, %v5510_v47  ;;  %v5580_v10 = vsel %vm5452_vm12, %v5388_v25, %v5516_v51  ;;  %8448 = vpow2.f32 %v5839_v19  ;;  %v5833_v63 = vmul.f32 1.442695, %v5757_v3  ;;  %v13484_v51 = vld [vmem:[#allocation72_spill] sm:$0xff] }
 0xf3a   :  { %v11901_v14 = vpop.xlane.xlu1 %5680  ;;  %v5764_v45 = vsub.f32 %v13480_v50, %v5678_v16  ;;  %6002 = vadd.xlane.f32.xlu0 %v6001_v39  ;;  %v5721_v0 = vmax.f32 %v11844_v9, %v11891_v62  ;;  %v5835_v41 = vmul.f32 1.442695, %v5758_v4  ;;  %v5761_v30 = vsub.f32 %v13481_v56, %v11878_v38  ;;  %v13485_v19 = vld [vmem:[#allocation36_spill] sm:$0xff]  ;;  %v13487_v39 = vld [vmem:[#allocation49_spill] sm:$0xff] }
 0xf3b   :  { %v8439_v55 = vpop.eup %8438  ;;  %v6010_v32 = vadd.f32 %v11904_v21, %v11894_v1  ;;  %vm13483_vm14 = vcmp.gt.f32.partialorder %v13482_v33, 0.0  ;;  %v5845_v47 = vmul.f32 1.442695, %v5763_v31  ;;  %v5767_v16 = vsub.f32 %v13484_v51, %v5684_v18  ;;  %v13489_v56 = vld [vmem:[#allocation69_spill] sm:$0xff] }
 0xf3c   :  { %v11917_v26 = vsel %vm13483_vm14, %v5576_v13, -1e+30  ;;  %v8441_v25 = vpop.eup %8440  ;;  %v11921_v3 = vmul.f32 %v8435_v5, %v13485_v19  ;;  %v11924_v50 = vmul.f32 %v8437_v6, %v13487_v39  ;;  %vm5450_vm5 = vcmp.ge.f32.partialorder %v11871_v24, 0.0  ;;  %v13492_v13 = vld [vmem:[#allocation104_spill] sm:$0xff]  ;;  %v13494_v5 = vld [vmem:[#allocation71_spill] sm:$0xff] }
 0xf3d   :  { %v5768_v4 = vsub.f32 %v13489_v56, %v5684_v18  ;;  %6011 = vadd.xlane.f32.xlu1 %v6010_v32  ;;  %vm13491_vm15 = vcmp.gt.f32.partialorder %v13490_v35, 0.0  ;;  %vm13493_vm11 = vcmp.gt.f32.partialorder %v13492_v13, 0.0  ;;  %8450 = vpow2.f32 %v5833_v63  ;;  %v13495_v32 = vld [vmem:[#allocation37_spill] sm:$0xff]  ;;  %v13500_v13 = vld [vmem:[#allocation51_spill] sm:$0xff] }
 0xf3e   :  { %13486 = vst [vmem:[#allocation25_spill] sm:$0xff] %v11921_v3  ;;  %13488 = vst [vmem:[#allocation19_spill] sm:$0xff] %v11924_v50  ;;  %v11930_v33 = vsel %vm13491_vm15, %v5574_v23, -1e+30  ;;  %v11934_v31 = vsel %vm13493_vm11, %v5580_v10, -1e+30  ;;  %v5762_v19 = vsub.f32 %v13494_v5, %v11878_v38  ;;  %5722 = vmax.xlane.f32.xlu0 %v5721_v0  ;;  %v5319_v6 = vpop.permute.xlu1 %5318  ;;  %v5730_v39 = vmax.f32 %v11862_v57, %v11917_v26 }
 0xf3f   :  { %v5847_v51 = vmul.f32 1.442695, %v5764_v45  ;;  %8452 = vpow2.f32 %v5835_v41  ;;  %v5841_v18 = vmul.f32 1.442695, %v5761_v30  ;;  %v11941_v56 = vmul.f32 %v8439_v55, %v13495_v32  ;;  %v13496_v23 = vld [vmem:[#allocation50_spill] sm:$0xff]  ;;  %v8443_v10 = vpop.eup %8442  ;;  %v13497_v30 = vld [vmem:[#allocation73_spill] sm:$0xff] }
 0xf40   :  { %v11944_v35 = vmul.f32 %v8441_v25, %v13496_v23  ;;  %8454 = vpow2.f32 %v5845_v47  ;;  %v5853_v63 = vmul.f32 1.442695, %v5767_v16  ;;  %v6007_v45 = vadd.f32 %v11924_v50, %v11921_v3  ;;  %v8445_v0 = vpop.eup %8444  ;;  %v13498_v32 = vld [vmem:[#allocation76_spill] sm:$0xff]  ;;  %v13501_v50 = vld [vmem:[#allocation105_spill] sm:$0xff] }
 0xf41   :  { %v5578_v38 = vsel %vm5450_vm5, %v11871_v24, %v5514_v54  ;;  %v5855_v5 = vmul.f32 1.442695, %v5768_v4  ;;  %v5765_v41 = vsub.f32 %v13497_v30, %v11901_v14  ;;  %v5391_v55 = vadd.f32 %v11310_v7, %v5319_v6  ;;  %5731 = vmax.xlane.f32.xlu1 %v5730_v39  ;;  %v5315_v39 = vpop.permute.xlu0 %5314 }
 0xf42   :  { %v5392_v25 = vadd.f32 %v11315_v42, %v5319_v6  ;;  %8456 = vpow2.f32 %v5847_v51  ;;  %6008 = vadd.xlane.f32.xlu0 %v6007_v45  ;;  %v5727_v47 = vmax.f32 %v11867_v28, %v11930_v33  ;;  %v5736_v16 = vmax.f32 %v11875_v44, %v11934_v31  ;;  %v8447_v54 = vpop.eup %8446  ;;  %v13499_v45 = vld [vmem:[#allocation38_spill] sm:$0xff] }
 0xf43   :  { %v5577_v24 = vsel %vm5449_vm8, %v11796_v22, %v11806_v36  ;;  %8458 = vpow2.f32 %v5841_v18  ;;  %v5843_v4 = vmul.f32 1.442695, %v5762_v19  ;;  %v5766_v6 = vsub.f32 %v13498_v32, %v11901_v14  ;;  %v8449_v23 = vpop.eup %8448  ;;  %v13505_v32 = vld [vmem:[#allocation52_spill] sm:$0xff] }
 0xf44   :  { %v6016_v51 = vadd.f32 %v11944_v35, %v11941_v56  ;;  %8460 = vpow2.f32 %v5853_v63  ;;  %v11968_v30 = vmul.f32 %v8443_v10, %v13499_v45  ;;  %v11971_v3 = vmul.f32 %v8445_v0, %v13500_v13  ;;  %v13503_v13 = vld [vmem:[#allocation39_spill] sm:$0xff]  ;;  %v13507_v45 = vld [vmem:[#allocation102_spill] sm:$0xff] }
 0xf45   :  { %vm13502_vm3 = vcmp.gt.f32.partialorder %v13501_v50, 0.0  ;;  %8462 = vpow2.f32 %v5855_v5  ;;  %v5849_v22 = vmul.f32 1.442695, %v5765_v41  ;;  %v5519_v19 = vmul.f32 0.2, %v5391_v55 }
 0xf46   :  { %v11975_v36 = vsel %vm13502_vm3, %v5578_v38, -1e+30  ;;  %v5520_v14 = vmul.f32 0.2, %v5392_v25  ;;  %6017 = vadd.xlane.f32.xlu1 %v6016_v51  ;;  %vm5455_vm2 = vcmp.ge.f32.partialorder %v5391_v55, 0.0  ;;  %vm5456_vm13 = vcmp.ge.f32.partialorder %v5392_v25, 0.0  ;;  %5728 = vmax.xlane.f32.xlu0 %v5727_v47 }
 0xf47   :  { %v5389_v18 = vadd.f32 %v11310_v7, %v5315_v39  ;;  %v5390_v63 = vadd.f32 %v11315_v42, %v5315_v39  ;;  %8464 = vpow2.f32 %v5843_v4  ;;  %v5851_v10 = vmul.f32 1.442695, %v5766_v6  ;;  %v8451_v5 = vpop.eup %8450 }
 0xf48   :  { %v11980_v0 = vmul.f32 %v8447_v54, %v13503_v13  ;;  %v11983_v38 = vmul.f32 %v8449_v23, %v13505_v32  ;;  %v6013_v41 = vadd.f32 %v11971_v3, %v11968_v30  ;;  %vm13508_vm7 = vcmp.gt.f32.partialorder %v13507_v45, 0.0  ;;  %v13509_v13 = vld [vmem:[#allocation40_spill] sm:$0xff] }
 0xf49   :  { %v8453_v51 = vpop.eup %8452  ;;  %v11989_v7 = vsel %vm13508_vm7, %v5577_v24, -1e+30  ;;  %v5583_v42 = vsel %vm5455_vm2, %v5391_v55, %v5519_v19  ;;  %v5584_v47 = vsel %vm5456_vm13, %v5392_v25, %v5520_v14  ;;  %8466 = vpow2.f32 %v5849_v22  ;;  %v13510_v55 = vld [vmem:[#allocation53_spill] sm:$0xff]  ;;  %v13511_v22 = vld [vmem:[#allocation62_spill] sm:$0xff]  ;;  %v13513_v14 = vld [vmem:[#allocation67_spill] sm:$0xff] }
 0xf4a   :  { %13504 = vst [vmem:[#allocation58_spill] sm:$0xff] %v11980_v0  ;;  %13506 = vst [vmem:[#allocation65_spill] sm:$0xff] %v11983_v38  ;;  %5737 = vmax.xlane.f32.xlu1 %v5736_v16  ;;  %v8455_v4 = vpop.eup %8454  ;;  %v5517_v6 = vmul.f32 0.2, %v5389_v18  ;;  %v5518_v54 = vmul.f32 0.2, %v5390_v63  ;;  %6014 = vadd.xlane.f32.xlu0 %v6013_v41  ;;  %v5733_v39 = vmax.f32 %v11989_v7, %v11975_v36  ;;  %8468 = vpow2.f32 %v5851_v10 }
 0xf4b   :  { %vm5453_vm4 = vcmp.ge.f32.partialorder %v5389_v18, 0.0  ;;  %vm5454_vm0 = vcmp.ge.f32.partialorder %v5390_v63, 0.0  ;;  %v6022_v16 = vadd.f32 %v11983_v38, %v11980_v0  ;;  %v11996_v24 = vmul.f32 %v8451_v5, %v13509_v13 }
 0xf4c   :  { %v8457_v23 = vpop.eup %8456  ;;  %v11999_v25 = vmul.f32 %v8453_v51, %v13510_v55  ;;  %vm13512_vm6 = vcmp.gt.f32.partialorder %v13511_v22, 0.0  ;;  %vm13514_vm1 = vcmp.gt.f32.partialorder %v13513_v14, 0.0  ;;  %v5581_v50 = vsel %vm5453_vm4, %v5389_v18, %v5517_v6  ;;  %v13515_v51 = vld [vmem:[#allocation41_spill] sm:$0xff]  ;;  %v13517_v55 = vld [vmem:[#allocation54_spill] sm:$0xff]  ;;  %v13522_v6 = vld [vmem:[#allocation43_spill] sm:$0xff] }
 0xf4d   :  { %v12003_v19 = vsel %vm13512_vm6, %v5583_v42, -1e+30  ;;  %v12007_v32 = vsel %vm13514_vm1, %v5584_v47, -1e+30  ;;  %v8459_v10 = vpop.eup %8458  ;;  %v5582_v0 = vsel %vm5454_vm0, %v5390_v63, %v5518_v54  ;;  %v12012_v13 = vmul.f32 %v8455_v4, %v13515_v51  ;;  %v13518_v22 = vld [vmem:[#allocation61_spill] sm:$0xff]  ;;  %v13520_v18 = vld [vmem:[#allocation66_spill] sm:$0xff] }
 0xf4e   :  { %6023 = vadd.xlane.f32.xlu1 %v6022_v16  ;;  %v8461_v41 = vpop.eup %8460  ;;  %5734 = vmax.xlane.f32.xlu0 %v5733_v39  ;;  %v5742_v5 = vmax.f32 %v12003_v19, %v12007_v32  ;;  %v12015_v42 = vmul.f32 %v8457_v23, %v13517_v55  ;;  %v6019_v47 = vadd.f32 %v11999_v25, %v11996_v24  ;;  %vm13519_vm10 = vcmp.gt.f32.partialorder %v13518_v22, 0.0  ;;  %v13524_v39 = vld [vmem:[#allocation56_spill] sm:$0xff]  ;;  %v13525_v55 = vld [vmem:[#allocation42_spill] sm:$0xff] }
 0xf4f   :  { %v8463_v38 = vpop.eup %8462  ;;  %13516 = vst [vmem:[#allocation26_spill] sm:$0xff] %v12012_v13  ;;  %v12021_v16 = vsel %vm13519_vm10, %v5581_v50, -1e+30  ;;  %vm13521_vm12 = vcmp.gt.f32.partialorder %v13520_v18, 0.0  ;;  %v12030_v54 = vmul.f32 %v8461_v41, %v13522_v6  ;;  %v12038_v22 = vmul.f32 %v8459_v10, %v13525_v55 }
 0xf50   :  { %v12025_v63 = vsel %vm13521_vm12, %v5582_v0, -1e+30  ;;  %v6028_v4 = vadd.f32 %v12015_v42, %v12012_v13  ;;  %v12033_v23 = vmul.f32 %v8463_v38, %v13524_v39  ;;  %v13526_v0 = vld [vmem:[#allocation55_spill] sm:$0xff]  ;;  %v13529_v39 = vld [vmem:[#allocation57_spill] sm:$0xff] }
 0xf51   :  { %v8465_v14 = vpop.eup %8464  ;;  %13523 = vst [vmem:[#allocation64_spill] sm:$0xff] %v12030_v54  ;;  %v5739_v50 = vmax.f32 %v12021_v16, %v12025_v63 }
 0xf52   :  { %5743 = vmax.xlane.f32.xlu1 %v5742_v5  ;;  %6020 = vadd.xlane.f32.xlu0 %v6019_v47  ;;  %v12041_v18 = vmul.f32 %v8465_v14, %v13526_v0  ;;  %v6034_v41 = vadd.f32 %v12033_v23, %v12030_v54  ;;  %v13527_v47 = vld [vmem:[#allocation46_spill] sm:$0xff] }
 0xf53   :  { %v8467_v51 = vpop.eup %8466 }
 0xf54   :  { %v8469_v5 = vpop.eup %8468  ;;  %v6025_v38 = vadd.f32 %v12041_v18, %v12038_v22  ;;  %v12048_v6 = vmul.f32 %v8467_v51, %v13527_v47 }
 0xf55   :  { %v12051_v13 = vmul.f32 %v8469_v5, %v13529_v39 }
 0xf56   :  { %6029 = vadd.xlane.f32.xlu1 %v6028_v4  ;;  %5740 = vmax.xlane.f32.xlu0 %v5739_v50  ;;  %13528 = vst [vmem:[#allocation30_spill] sm:$0xff] %v12048_v6 }
 0xf57   :  { %13530 = vst [vmem:[#allocation47_spill] sm:$0xff] %v12051_v13  ;;  %v6031_v14 = vadd.f32 %v12051_v13, %v12048_v6 }
 0xf5a   :  { %6035 = vadd.xlane.f32.xlu1 %v6034_v41  ;;  %6026 = vadd.xlane.f32.xlu0 %v6025_v38 }
 0xf5e   :  { %6032 = vadd.xlane.f32.xlu0 %v6031_v14 }
 0xf6c   :  { %v5690_v10 = vpop.xlane.xlu0 %5689 }
 0xf6d   :  { %v5771_v4 = vsub.f32 %v11615_v12, %v5690_v10  ;;  %v5772_v50 = vsub.f32 %v11607_v29, %v5690_v10 }
 0xf6f   :  { %v5861_v55 = vmul.f32 1.442695, %v5771_v4  ;;  %v5863_v0 = vmul.f32 1.442695, %v5772_v50  ;;  %v5687_v54 = vpop.xlane.xlu1 %5686 }
 0xf70   :  { %v5769_v51 = vsub.f32 %v11623_v11, %v5687_v54  ;;  %v5770_v47 = vsub.f32 %v11627_v58, %v5687_v54  ;;  %v5693_v5 = vpop.xlane.xlu0 %5692 }
 0xf71   :  { %8470 = vpow2.f32 %v5861_v55  ;;  %v5773_v41 = vsub.f32 %v11646_v8, %v5693_v5  ;;  %v5774_v38 = vsub.f32 %v11635_v17, %v5693_v5 }
 0xf72   :  { %8472 = vpow2.f32 %v5863_v0  ;;  %v5857_v39 = vmul.f32 1.442695, %v5769_v51  ;;  %v5859_v14 = vmul.f32 1.442695, %v5770_v47 }
 0xf73   :  { %v5865_v6 = vmul.f32 1.442695, %v5773_v41  ;;  %v5867_v12 = vmul.f32 1.442695, %v5774_v38  ;;  %v5696_v13 = vpop.xlane.xlu1 %5695 }
 0xf74   :  { %8474 = vpow2.f32 %v5857_v39  ;;  %v5775_v29 = vsub.f32 %v11653_v46, %v5696_v13  ;;  %v5776_v10 = vsub.f32 %v11657_v59, %v5696_v13  ;;  %v5699_v11 = vpop.xlane.xlu0 %5698  ;;  %v13531_v13 = vld [vmem:[#allocation78_spill] sm:$0xff] }
 0xf75   :  { %8476 = vpow2.f32 %v5859_v14  ;;  %v5777_v58 = vsub.f32 %v11676_v49, %v5699_v11  ;;  %v5778_v54 = vsub.f32 %v11666_v53, %v5699_v11  ;;  %v13532_v14 = vld [vmem:[#allocation79_spill] sm:$0xff] }
 0xf76   :  { %8478 = vpow2.f32 %v5865_v6  ;;  %v5869_v8 = vmul.f32 1.442695, %v5775_v29  ;;  %v5871_v17 = vmul.f32 1.442695, %v5776_v10  ;;  %v13534_v10 = vld [vmem:[#allocation12_spill] sm:$0xff] }
 0xf77   :  { %8480 = vpow2.f32 %v5867_v12  ;;  %v5873_v4 = vmul.f32 1.442695, %v5777_v58  ;;  %v5875_v50 = vmul.f32 1.442695, %v5778_v54  ;;  %v5702_v55 = vpop.xlane.xlu1 %5701  ;;  %v13533_v12 = vld [vmem:[#allocation77_spill] sm:$0xff]  ;;  %v13536_v54 = vld [vmem:[#allocation75_spill] sm:$0xff] }
 0xf78   :  { %8482 = vpow2.f32 %v5869_v8  ;;  %v5779_v0 = vsub.f32 %v11700_v34, %v5702_v55  ;;  %v5780_v46 = vsub.f32 %v11686_v27, %v5702_v55  ;;  %v5705_v51 = vpop.xlane.xlu0 %5704 }
 0xf79   :  { %8484 = vpow2.f32 %v5871_v17  ;;  %v5781_v59 = vsub.f32 %v11707_v40, %v5705_v51  ;;  %v5782_v49 = vsub.f32 %v13531_v13, %v5705_v51  ;;  %v13535_v40 = vld [vmem:[#allocation81_spill] sm:$0xff]  ;;  %v13537_v17 = vld [vmem:[#allocation91_spill] sm:$0xff] }
 0xf7a   :  { %8486 = vpow2.f32 %v5873_v4  ;;  %v5877_v53 = vmul.f32 1.442695, %v5779_v0  ;;  %v5879_v6 = vmul.f32 1.442695, %v5780_v46 }
 0xf7b   :  { %v8471_v47 = vpop.eup %8470  ;;  %8488 = vpow2.f32 %v5875_v50  ;;  %v5881_v5 = vmul.f32 1.442695, %v5781_v59  ;;  %v5883_v41 = vmul.f32 1.442695, %v5782_v49  ;;  %v5708_v38 = vpop.xlane.xlu1 %5707 }
 0xf7c   :  { %v8473_v39 = vpop.eup %8472  ;;  %8490 = vpow2.f32 %v5877_v53  ;;  %v5783_v34 = vsub.f32 %v13532_v14, %v5708_v38  ;;  %v5784_v27 = vsub.f32 %v13533_v12, %v5708_v38  ;;  %v5711_v29 = vpop.xlane.xlu0 %5710  ;;  %v12072_v11 = vmul.f32 %v8471_v47, %v13534_v10  ;;  %v13539_v38 = vld [vmem:[#allocation80_spill] sm:$0xff]  ;;  %v13540_v12 = vld [vmem:[#allocation82_spill] sm:$0xff] }
 0xf7d   :  { %8492 = vpow2.f32 %v5879_v6  ;;  %v5785_v58 = vsub.f32 %v13535_v40, %v5711_v29  ;;  %v5786_v8 = vsub.f32 %v13536_v54, %v5711_v29  ;;  %v12077_v4 = vmul.f32 %v8473_v39, %v13537_v17  ;;  %v13538_v6 = vld [vmem:[#allocation23_spill] sm:$0xff]  ;;  %v13544_v40 = vld [vmem:[#allocation92_spill] sm:$0xff] }
 0xf7e   :  { %v8475_v50 = vpop.eup %8474  ;;  %8494 = vpow2.f32 %v5881_v5  ;;  %v5885_v55 = vmul.f32 1.442695, %v5783_v34  ;;  %v5887_v0 = vmul.f32 1.442695, %v5784_v27  ;;  %v13542_v34 = vld [vmem:[#allocation15_spill] sm:$0xff]  ;;  %v13543_v27 = vld [vmem:[#allocation24_spill] sm:$0xff] }
 0xf7f   :  { %v8477_v46 = vpop.eup %8476  ;;  %8496 = vpow2.f32 %v5883_v41  ;;  %v5889_v51 = vmul.f32 1.442695, %v5785_v58  ;;  %v5891_v59 = vmul.f32 1.442695, %v5786_v8  ;;  %v5714_v13 = vpop.xlane.xlu1 %5713  ;;  %v6040_v49 = vadd.f32 %v12077_v4, %v12072_v11 }
 0xf80   :  { %v8479_v53 = vpop.eup %8478  ;;  %8498 = vpow2.f32 %v5885_v55  ;;  %v5787_v47 = vsub.f32 %v13538_v6, %v5714_v13  ;;  %v5788_v14 = vsub.f32 %v13539_v38, %v5714_v13  ;;  %v5717_v39 = vpop.xlane.xlu0 %5716  ;;  %v12084_v29 = vmul.f32 %v8475_v50, %v13540_v12  ;;  %v13545_v55 = vld [vmem:[#allocation83_spill] sm:$0xff] }
 0xf81   :  { %v8481_v5 = vpop.eup %8480  ;;  %8500 = vpow2.f32 %v5887_v0  ;;  %v5789_v41 = vsub.f32 %v13542_v34, %v5717_v39  ;;  %v5790_v10 = vsub.f32 %v13543_v27, %v5717_v39  ;;  %6041 = vadd.xlane.f32.xlu1 %v6040_v49  ;;  %v12089_v58 = vmul.f32 %v8477_v46, %v13544_v40  ;;  %v13546_v49 = vld [vmem:[#allocation16_spill] sm:$0xff]  ;;  %v13547_v34 = vld [vmem:[#allocation18_spill] sm:$0xff]  ;;  %v13551_v40 = vld [vmem:[#allocation85_spill] sm:$0xff] }
 0xf82   :  { %13541 = vst [vmem:[#allocation59_spill] sm:$0xff] %v12084_v29  ;;  %v8483_v54 = vpop.eup %8482  ;;  %8502 = vpow2.f32 %v5889_v51  ;;  %v5893_v8 = vmul.f32 1.442695, %v5787_v47  ;;  %v5895_v17 = vmul.f32 1.442695, %v5788_v14  ;;  %v12092_v13 = vmul.f32 %v8479_v53, %v13545_v55  ;;  %v13548_v51 = vld [vmem:[#allocation93_spill] sm:$0xff] }
 0xf83   :  { %v8485_v6 = vpop.eup %8484  ;;  %8504 = vpow2.f32 %v5891_v59  ;;  %v5897_v50 = vmul.f32 1.442695, %v5789_v41  ;;  %v5899_v38 = vmul.f32 1.442695, %v5790_v10  ;;  %v6037_v0 = vadd.f32 %v12089_v58, %v12084_v29  ;;  %v5720_v12 = vpop.xlane.xlu1 %5719  ;;  %v13549_v53 = vld [vmem:[#allocation84_spill] sm:$0xff]  ;;  %v13550_v41 = vld [vmem:[#allocation95_spill] sm:$0xff] }
 0xf84   :  { %v8487_v39 = vpop.eup %8486  ;;  %8506 = vpow2.f32 %v5893_v8  ;;  %v5791_v46 = vsub.f32 %v13546_v49, %v5720_v12  ;;  %v5792_v27 = vsub.f32 %v13547_v34, %v5720_v12  ;;  %v12099_v47 = vmul.f32 %v8481_v5, %v13548_v51  ;;  %v13556_v51 = vld [vmem:[#allocation97_spill] sm:$0xff] }
 0xf85   :  { %v8489_v14 = vpop.eup %8488  ;;  %8508 = vpow2.f32 %v5895_v17  ;;  %6038 = vadd.xlane.f32.xlu0 %v6037_v0  ;;  %v12102_v59 = vmul.f32 %v8483_v54, %v13549_v53  ;;  %v12105_v10 = vmul.f32 %v8485_v6, %v13550_v41  ;;  %v12108_v55 = vmul.f32 %v8487_v39, %v13551_v40  ;;  %v13553_v54 = vld [vmem:[#allocation96_spill] sm:$0xff]  ;;  %v13554_v6 = vld [vmem:[#allocation86_spill] sm:$0xff] }
 0xf86   :  { %v8491_v8 = vpop.eup %8490  ;;  %8510 = vpow2.f32 %v5897_v50  ;;  %v5901_v49 = vmul.f32 1.442695, %v5791_v46  ;;  %v5903_v29 = vmul.f32 1.442695, %v5792_v27  ;;  %v6043_v5 = vadd.f32 %v12099_v47, %v12092_v13  ;;  %v13558_v27 = vld [vmem:[#allocation87_spill] sm:$0xff]  ;;  %v13560_v40 = vld [vmem:[#allocation98_spill] sm:$0xff] }
 0xf87   :  { %13552 = vst [vmem:[#allocation60_spill] sm:$0xff] %v12108_v55  ;;  %v8493_v12 = vpop.eup %8492  ;;  %8512 = vpow2.f32 %v5899_v38  ;;  %v6046_v17 = vadd.f32 %v12105_v10, %v12102_v59  ;;  %v12115_v0 = vmul.f32 %v8489_v14, %v13553_v54  ;;  %v12118_v34 = vmul.f32 %v8491_v8, %v13554_v6 }
 0xf88   :  { %v8495_v39 = vpop.eup %8494  ;;  %8514 = vpow2.f32 %v5901_v49  ;;  %v12121_v50 = vmul.f32 %v8493_v12, %v13556_v51  ;;  %v13561_v12 = vld [vmem:[#allocation88_spill] sm:$0xff] }
 0xf89   :  { %13555 = vst [vmem:[#allocation33_spill] sm:$0xff] %v12118_v34  ;;  %v8497_v46 = vpop.eup %8496  ;;  %8516 = vpow2.f32 %v5903_v29  ;;  %6044 = vadd.xlane.f32.xlu0 %v6043_v5  ;;  %6047 = vadd.xlane.f32.xlu1 %v6046_v17  ;;  %v6049_v38 = vadd.f32 %v12115_v0, %v12108_v55  ;;  %v12126_v53 = vmul.f32 %v8495_v39, %v13558_v27  ;;  %v13563_v5 = vld [vmem:[#allocation14_spill] sm:$0xff]  ;;  %v13565_v51 = vld [vmem:[#allocation20_spill] sm:$0xff]  ;;  %v13567_v55 = vld [vmem:[#allocation89_spill] sm:$0xff] }
 0xf8a   :  { %13557 = vst [vmem:[#allocation45_spill] sm:$0xff] %v12121_v50  ;;  %v8499_v14 = vpop.eup %8498  ;;  %v6052_v41 = vadd.f32 %v12121_v50, %v12118_v34  ;;  %v12131_v8 = vmul.f32 %v8497_v46, %v13560_v40  ;;  %v13566_v40 = vld [vmem:[#allocation99_spill] sm:$0xff] }
 0xf8b   :  { %13559 = vst [vmem:[#allocation17_spill] sm:$0xff] %v12126_v53  ;;  %v8501_v49 = vpop.eup %8500  ;;  %v12134_v54 = vmul.f32 %v8499_v14, %v13561_v12 }
 0xf8c   :  { %v8503_v29 = vpop.eup %8502  ;;  %v12137_v17 = vmul.f32 %v8501_v49, %v13563_v5  ;;  %v6055_v39 = vadd.f32 %v12131_v8, %v12126_v53 }
 0xf8d   :  { %13562 = vst [vmem:[#allocation29_spill] sm:$0xff] %v12134_v54  ;;  %v8505_v6 = vpop.eup %8504  ;;  %6050 = vadd.xlane.f32.xlu0 %v6049_v38  ;;  %6053 = vadd.xlane.f32.xlu1 %v6052_v41  ;;  %v12142_v27 = vmul.f32 %v8503_v29, %v13565_v51  ;;  %v13569_v38 = vld [vmem:[#allocation100_spill] sm:$0xff]  ;;  %v13570_v51 = vld [vmem:[#allocation90_spill] sm:$0xff] }
 0xf8e   :  { %13564 = vst [vmem:[#allocation32_spill] sm:$0xff] %v12137_v17  ;;  %v8507_v34 = vpop.eup %8506  ;;  %v6058_v46 = vadd.f32 %v12137_v17, %v12134_v54  ;;  %v12147_v14 = vmul.f32 %v8505_v6, %v13566_v40  ;;  %v13572_v40 = vld [vmem:[#allocation13_spill] sm:$0xff]  ;;  %v13573_v17 = vld [vmem:[#allocation94_spill] sm:$0xff] }
 0xf8f   :  { %v8509_v12 = vpop.eup %8508  ;;  %v12150_v49 = vmul.f32 %v8507_v34, %v13567_v55 }
 0xf90   :  { %v8511_v5 = vpop.eup %8510  ;;  %v12153_v41 = vmul.f32 %v8509_v12, %v13569_v38  ;;  %v6061_v29 = vadd.f32 %v12147_v14, %v12142_v27  ;;  %v13575_v38 = vld [vmem:[#allocation101_spill] sm:$0xff] }
 0xf91   :  { %13568 = vst [vmem:[#allocation34_spill] sm:$0xff] %v12150_v49  ;;  %v8513_v50 = vpop.eup %8512  ;;  %6056 = vadd.xlane.f32.xlu0 %v6055_v39  ;;  %6059 = vadd.xlane.f32.xlu1 %v6058_v46  ;;  %v12158_v53 = vmul.f32 %v8511_v5, %v13570_v51 }
 0xf92   :  { %v8515_v54 = vpop.eup %8514  ;;  %v6064_v6 = vadd.f32 %v12153_v41, %v12150_v49  ;;  %v12163_v55 = vmul.f32 %v8513_v50, %v13572_v40 }
 0xf93   :  { %13571 = vst [vmem:[#allocation63_spill] sm:$0xff] %v12158_v53  ;;  %v8517_v34 = vpop.eup %8516  ;;  %v12166_v12 = vmul.f32 %v8515_v54, %v13573_v17 }
 0xf94   :  { %v12169_v39 = vmul.f32 %v8517_v34, %v13575_v38  ;;  %v6067_v46 = vadd.f32 %v12163_v55, %v12158_v53 }
 0xf95   :  { %13574 = vst [vmem:[#allocation35_spill] sm:$0xff] %v12166_v12  ;;  %6062 = vadd.xlane.f32.xlu0 %v6061_v29  ;;  %6065 = vadd.xlane.f32.xlu1 %v6064_v6 }
 0xf96   :  { %13576 = vst [vmem:[#allocation68_spill] sm:$0xff] %v12169_v39  ;;  %v6070_v5 = vadd.f32 %v12169_v39, %v12166_v12 }
 0xf99   :  { %6068 = vadd.xlane.f32.xlu0 %v6067_v46  ;;  %6071 = vadd.xlane.f32.xlu1 %v6070_v5 }
 0xfbd   :  { %v6006_v51 = vpop.xlane.xlu1 %6005 }
 0xfbe   :  { %v6098_v34 = vmax.f32 %v6006_v51, 1e-20 }
 0xfc1   :  { %v5726_v50 = vpop.xlane.xlu1 %5725 }
 0xfc2   :  { %v5795_v40 = vsub.f32 %v11825_v61, %v5726_v50  ;;  %v5796_v54 = vsub.f32 %v11831_v15, %v5726_v50 }
 0xfc4   :  { %v5909_v17 = vmul.f32 1.442695, %v5795_v40  ;;  %v5911_v49 = vmul.f32 1.442695, %v5796_v54 }
 0xfc6   :  { %8518 = vpow2.f32 %v5909_v17 }
 0xfc7   :  { %8520 = vpow2.f32 %v5911_v49  ;;  %v6003_v29 = vpop.xlane.xlu0 %6002 }
 0xfc8   :  { %8522 = vrcp.f32 %v6098_v34  ;;  %v6097_v6 = vmax.f32 %v6003_v29, 1e-20 }
 0xfca   :  { %8524 = vrcp.f32 %v6097_v6  ;;  %v6012_v38 = vpop.xlane.xlu1 %6011 }
 0xfcb   :  { %v5723_v12 = vpop.xlane.xlu0 %5722  ;;  %v6100_v46 = vmax.f32 %v6012_v38, 1e-20 }
 0xfcc   :  { %v5793_v39 = vsub.f32 %v11844_v9, %v5723_v12  ;;  %v5794_v61 = vsub.f32 %v11891_v62, %v5723_v12 }
 0xfcd   :  { %8526 = vrcp.f32 %v6100_v46 }
 0xfce   :  { %v5905_v49 = vmul.f32 1.442695, %v5793_v39  ;;  %v5907_v50 = vmul.f32 1.442695, %v5794_v61  ;;  %v5732_v40 = vpop.xlane.xlu1 %5731 }
 0xfcf   :  { %v6009_v54 = vpop.xlane.xlu0 %6008  ;;  %v5799_v17 = vsub.f32 %v11862_v57, %v5732_v40  ;;  %v5800_v34 = vsub.f32 %v11917_v26, %v5732_v40 }
 0xfd0   :  { %v8519_v53 = vpop.eup %8518  ;;  %8528 = vpow2.f32 %v5905_v49  ;;  %v6099_v62 = vmax.f32 %v6009_v54, 1e-20 }
 0xfd1   :  { %v8521_v5 = vpop.eup %8520  ;;  %v12180_v15 = vmul.f32 %v8519_v53, %v13461_v52  ;;  %8530 = vpow2.f32 %v5907_v50  ;;  %v5917_v52 = vmul.f32 1.442695, %v5799_v17  ;;  %v5919_v53 = vmul.f32 1.442695, %v5800_v34 }
 0xfd2   :  { %v12183_v51 = vmul.f32 %v8521_v5, %v13463_v2  ;;  %v8523_v29 = vpop.eup %8522  ;;  %8532 = vrcp.f32 %v6099_v62 }
 0xfd3   :  { %v6018_v2 = vpop.xlane.xlu1 %6017  ;;  %v6163_v12 = vmul.f32 %v8523_v29, %v11811_v37  ;;  %v5729_v39 = vpop.xlane.xlu0 %5728  ;;  %8534 = vpow2.f32 %v5917_v52  ;;  %v6164_v57 = vmul.f32 %v8523_v29, %v11817_v20 }
 0xfd4   :  { %v6076_v9 = vadd.f32 %v12183_v51, %v12180_v15  ;;  %v6102_v6 = vmax.f32 %v6018_v2, 1e-20  ;;  %v8525_v26 = vpop.eup %8524  ;;  %v5797_v38 = vsub.f32 %v11867_v28, %v5729_v39  ;;  %v5798_v46 = vsub.f32 %v11930_v33, %v5729_v39 }
 0xfd5   :  { %8536 = vpow2.f32 %v5919_v53  ;;  %v6161_v5 = vmul.f32 %v8525_v26, %v11881_v43  ;;  %v6162_v61 = vmul.f32 %v8525_v26, %v11885_v60 }
 0xfd6   :  { %6077 = vadd.xlane.f32.xlu1 %v6076_v9  ;;  %8538 = vrcp.f32 %v6102_v6  ;;  %v5913_v49 = vmul.f32 1.442695, %v5797_v38  ;;  %v5915_v50 = vmul.f32 1.442695, %v5798_v46 }
 0xfd7   :  { %v5738_v40 = vpop.xlane.xlu1 %5737  ;;  %v8527_v37 = vpop.eup %8526  ;;  %v6226_v17 = vpack.c.bf16 %v6164_v57, %v6162_v61  ;;  %v6225_v34 = vpack.c.bf16 %v6163_v12, %v6161_v5  ;;  %v13577_v57 = vld [vmem:[#allocation21_spill] sm:$0xff] }
 0xfd8   :  { %v6015_v54 = vpop.xlane.xlu0 %6014  ;;  %v5803_v20 = vsub.f32 %v11875_v44, %v5738_v40  ;;  %v5804_v9 = vsub.f32 %v11934_v31, %v5738_v40  ;;  %8540 = vpow2.f32 %v5913_v49  ;;  %v6168_v62 = vmul.f32 %v8527_v37, %v11904_v21  ;;  %v13578_v21 = vld [vmem:[#allocation19_spill] sm:$0xff]  ;;  %v13579_v5 = vld [vmem:[#allocation25_spill] sm:$0xff] }
 0xfd9   :  { %v6101_v28 = vmax.f32 %v6015_v54, 1e-20  ;;  %8542 = vpow2.f32 %v5915_v50  ;;  %6289 = vmatprep.mubr.bf16.mxu0 %v6226_v17  ;;  %v6167_v31 = vmul.f32 %v8527_v37, %v11894_v1 }
 0xfda   :  { %v5925_v33 = vmul.f32 1.442695, %v5803_v20  ;;  %v5927_v43 = vmul.f32 1.442695, %v5804_v9  ;;  %v8529_v29 = vpop.eup %8528  ;;  %6290 = vmatmul.mubr.bf16.vlgmr.msra.gmra.mrb[144].mxu0 %v6225_v34 }
 0xfdb   :  { %8544 = vrcp.f32 %v6101_v28  ;;  %v6024_v60 = vpop.xlane.xlu1 %6023  ;;  %v8531_v52 = vpop.eup %8530  ;;  %v12199_v2 = vmul.f32 %v8529_v29, %v13465_v48 }
 0xfdc   :  { %v5735_v53 = vpop.xlane.xlu0 %5734  ;;  %8546 = vpow2.f32 %v5925_v33  ;;  %v6104_v44 = vmax.f32 %v6024_v60, 1e-20  ;;  %v8533_v12 = vpop.eup %8532  ;;  %v12205_v26 = vmul.f32 %v8531_v52, %v13577_v57  ;;  %v13581_v33 = vld [vmem:[#allocation103_spill] sm:$0xff] }
 0xfdd   :  { %v5801_v39 = vsub.f32 %v11989_v7, %v5735_v53  ;;  %v5802_v6 = vsub.f32 %v11975_v36, %v5735_v53  ;;  %8548 = vpow2.f32 %v5927_v43  ;;  %v8535_v38 = vpop.eup %8534  ;;  %v6166_v46 = vmul.f32 %v8533_v12, %v13578_v21  ;;  %v13580_v7 = vld [vmem:[#allocation44_spill] sm:$0xff] }
 0xfde   :  { %8550 = vrcp.f32 %v6104_v44  ;;  %v6165_v61 = vmul.f32 %v8533_v12, %v13579_v5  ;;  %v6073_v1 = vadd.f32 %v12205_v26, %v12199_v2  ;;  %v12212_v37 = vmul.f32 %v8535_v38, %v13580_v7 }
 0xfdf   :  { %v8537_v48 = vpop.eup %8536  ;;  %v5921_v49 = vmul.f32 1.442695, %v5801_v39  ;;  %v5923_v50 = vmul.f32 1.442695, %v5802_v6  ;;  %v5744_v40 = vpop.xlane.xlu1 %5743  ;;  %v6228_v17 = vpack.c.bf16 %v6168_v62, %v6166_v46  ;;  %v13583_v46 = vld [vmem:[#allocation27_spill] sm:$0xff] }
 0xfe0   :  { %v8539_v36 = vpop.eup %8538  ;;  %v6021_v54 = vpop.xlane.xlu0 %6020  ;;  %v6227_v34 = vpack.c.bf16 %v6167_v31, %v6165_v61  ;;  %v5807_v20 = vsub.f32 %v12003_v19, %v5744_v40  ;;  %v5808_v9 = vsub.f32 %v12007_v32, %v5744_v40  ;;  %6074 = vadd.xlane.f32.xlu0 %v6073_v1  ;;  %v12217_v43 = vmul.f32 %v8537_v48, %v13581_v33  ;;  %v13582_v31 = vld [vmem:[#allocation31_spill] sm:$0xff]  ;;  %v13584_v40 = vld [vmem:[#allocation22_spill] sm:$0xff] }
 0xfe1   :  { %8552 = vpow2.f32 %v5921_v49  ;;  %v6103_v28 = vmax.f32 %v6021_v54, 1e-20  ;;  %6297 = vmatprep.mubr.bf16.mxu0 %v6228_v17  ;;  %v6172_v19 = vmul.f32 %v8539_v36, %v11944_v35  ;;  %v6171_v6 = vmul.f32 %v8539_v36, %v11941_v56 }
 0xfe2   :  { %8554 = vpow2.f32 %v5923_v50  ;;  %v5933_v29 = vmul.f32 1.442695, %v5807_v20  ;;  %v5935_v60 = vmul.f32 1.442695, %v5808_v9  ;;  %v8541_v52 = vpop.eup %8540  ;;  %6298 = vmatmul.mubr.bf16.gmra.mrb[148].mxu0 %v6227_v34  ;;  %v6082_v62 = vadd.f32 %v12217_v43, %v12212_v37  ;;  %v13585_v20 = vld [vmem:[#allocation104_spill] sm:$0xff] }
 0xfe3   :  { %8556 = vrcp.f32 %v6103_v28  ;;  %v6030_v53 = vpop.xlane.xlu1 %6029  ;;  %v8543_v32 = vpop.eup %8542  ;;  %v12223_v12 = vmul.f32 %v8541_v52, %v13582_v31  ;;  %v13586_v52 = vld [vmem:[#allocation65_spill] sm:$0xff] }
 0xfe4   :  { %v5741_v44 = vpop.xlane.xlu0 %5740  ;;  %8558 = vpow2.f32 %v5933_v29  ;;  %v6106_v39 = vmax.f32 %v6030_v53, 1e-20  ;;  %v12229_v5 = vmul.f32 %v8543_v32, %v13583_v46  ;;  %6083 = vadd.xlane.f32.xlu1 %v6082_v62  ;;  %v13587_v53 = vld [vmem:[#allocation58_spill] sm:$0xff]  ;;  %v13588_v31 = vld [vmem:[#allocation105_spill] sm:$0xff] }
 0xfe5   :  { %v8545_v57 = vpop.eup %8544  ;;  %v5805_v38 = vsub.f32 %v12021_v16, %v5741_v44  ;;  %v5806_v21 = vsub.f32 %v12025_v63, %v5741_v44  ;;  %8560 = vpow2.f32 %v5935_v60  ;;  %v13589_v46 = vld [vmem:[#allocation62_spill] sm:$0xff] }
 0xfe6   :  { %v8547_v35 = vpop.eup %8546  ;;  %8562 = vrcp.f32 %v6106_v39  ;;  %v6170_v61 = vmul.f32 %v8545_v57, %v11971_v3  ;;  %v6169_v48 = vmul.f32 %v8545_v57, %v11968_v30  ;;  %v6079_v56 = vadd.f32 %v12229_v5, %v12223_v12 }
 0xfe7   :  { %v8549_v49 = vpop.eup %8548  ;;  %v5929_v50 = vmul.f32 1.442695, %v5805_v38  ;;  %v5931_v1 = vmul.f32 1.442695, %v5806_v21  ;;  %v6036_v16 = vpop.xlane.xlu1 %6035  ;;  %v12236_v63 = vmul.f32 %v8547_v35, %v13584_v40 }
 0xfe8   :  { %v8551_v7 = vpop.eup %8550  ;;  %v6027_v36 = vpop.xlane.xlu0 %6026  ;;  %v6230_v54 = vpack.c.bf16 %v6172_v19, %v6170_v61  ;;  %v6229_v17 = vpack.c.bf16 %v6171_v6, %v6169_v48  ;;  %v6108_v34 = vmax.f32 %v6036_v16, 1e-20  ;;  %v12239_v9 = vmul.f32 %v8549_v49, %v13585_v20  ;;  %6080 = vadd.xlane.f32.xlu0 %v6079_v56  ;;  %v13591_v16 = vld [vmem:[#allocation61_spill] sm:$0xff] }
 0xfe9   :  { %8564 = vpow2.f32 %v5929_v50  ;;  %v6105_v3 = vmax.f32 %v6027_v36, 1e-20  ;;  %v6176_v62 = vmul.f32 %v8551_v7, %v13586_v52  ;;  %v6175_v19 = vmul.f32 %v8551_v7, %v13587_v53  ;;  %v13590_v50 = vld [vmem:[#allocation67_spill] sm:$0xff]  ;;  %v13592_v36 = vld [vmem:[#allocation26_spill] sm:$0xff] }
 0xfea   :  { %8566 = vpow2.f32 %v5931_v1  ;;  %6305 = vmatprep.mubr.bf16.mxu0 %v6230_v54  ;;  %v6088_v30 = vadd.f32 %v12239_v9, %v12236_v63 }
 0xfeb   :  { %v8553_v28 = vpop.eup %8552  ;;  %8568 = vrcp.f32 %v6105_v3  ;;  %6306 = vmatmul.mubr.bf16.gmra.mrb[152].mxu0 %v6229_v17 }
 0xfec   :  { %v8555_v33 = vpop.eup %8554  ;;  %v6033_v29 = vpop.xlane.xlu0 %6032  ;;  %8570 = vrcp.f32 %v6108_v34  ;;  %v12244_v60 = vmul.f32 %v8553_v28, %v13507_v45  ;;  %6089 = vadd.xlane.f32.xlu1 %v6088_v30  ;;  %v13593_v34 = vld [vmem:[#allocation66_spill] sm:$0xff] }
 0xfed   :  { %v8557_v32 = vpop.eup %8556  ;;  %v6107_v44 = vmax.f32 %v6033_v29, 1e-20  ;;  %v12249_v39 = vmul.f32 %v8555_v33, %v13588_v31 }
 0xfee   :  { %v8559_v6 = vpop.eup %8558  ;;  %v6174_v57 = vmul.f32 %v8557_v32, %v11999_v25  ;;  %v6173_v38 = vmul.f32 %v8557_v32, %v11996_v24 }
 0xfef   :  { %v8561_v21 = vpop.eup %8560  ;;  %8572 = vrcp.f32 %v6107_v44  ;;  %v6085_v45 = vadd.f32 %v12249_v39, %v12244_v60  ;;  %v12256_v35 = vmul.f32 %v8559_v6, %v13589_v46  ;;  %v13595_v44 = vld [vmem:[#allocation30_spill] sm:$0xff]  ;;  %v13596_v6 = vld [vmem:[#allocation64_spill] sm:$0xff] }
 0xff0   :  { %v8563_v61 = vpop.eup %8562  ;;  %v6232_v48 = vpack.c.bf16 %v6176_v62, %v6174_v57  ;;  %v6231_v49 = vpack.c.bf16 %v6175_v19, %v6173_v38  ;;  %v12259_v1 = vmul.f32 %v8561_v21, %v13590_v50 }
 0xff1   :  { %6086 = vadd.xlane.f32.xlu0 %v6085_v45  ;;  %v6180_v7 = vmul.f32 %v8563_v61, %v12015_v42  ;;  %v6179_v54 = vmul.f32 %v8563_v61, %v13592_v36  ;;  %v13594_v42 = vld [vmem:[#allocation47_spill] sm:$0xff] }
 0xff2   :  { %6313 = vmatprep.mubr.bf16.mxu0 %v6232_v48  ;;  %v6094_v25 = vadd.f32 %v12259_v1, %v12256_v35 }
 0xff3   :  { %v8565_v24 = vpop.eup %8564  ;;  %6314 = vmatmul.mubr.bf16.gmra.mrb[156].mxu0 %v6231_v49 }
 0xff4   :  { %v8567_v56 = vpop.eup %8566  ;;  %v12264_v40 = vmul.f32 %v8565_v24, %v13591_v16  ;;  %6095 = vadd.xlane.f32.xlu1 %v6094_v25 }
 0xff5   :  { %v8569_v17 = vpop.eup %8568  ;;  %v12269_v20 = vmul.f32 %v8567_v56, %v13593_v34 }
 0xff6   :  { %v8571_v3 = vpop.eup %8570  ;;  %v6178_v30 = vmul.f32 %v8569_v17, %v12041_v18  ;;  %v6177_v28 = vmul.f32 %v8569_v17, %v12038_v22 }
 0xff7   :  { %v6091_v33 = vadd.f32 %v12269_v20, %v12264_v40  ;;  %v6184_v62 = vmul.f32 %v8571_v3, %v12033_v23  ;;  %v6183_v18 = vmul.f32 %v8571_v3, %v13596_v6 }
 0xff8   :  { %v6234_v29 = vpack.c.bf16 %v6180_v7, %v6178_v30  ;;  %v6233_v52 = vpack.c.bf16 %v6179_v54, %v6177_v28  ;;  %v13597_v28 = vld [vmem:[#allocation59_spill] sm:$0xff] }
 0xff9   :  { %v8573_v53 = vpop.eup %8572  ;;  %6092 = vadd.xlane.f32.xlu0 %v6091_v33 }
 0xffa   :  { %6321 = vmatprep.mubr.bf16.mxu0 %v6234_v29  ;;  %v6182_v19 = vmul.f32 %v8573_v53, %v13594_v42  ;;  %v6181_v31 = vmul.f32 %v8573_v53, %v13595_v44 }
 0xffb   :  { %6322 = vmatmul.mubr.bf16.gmra.mrb[160].mxu0 %v6233_v52 }
 0xffc   :  { %v6236_v32 = vpack.c.bf16 %v6184_v62, %v6182_v19  ;;  %v6235_v22 = vpack.c.bf16 %v6183_v18, %v6181_v31 }
 0xffe   :  { %6329 = vmatprep.mubr.bf16.mxu0 %v6236_v32 }
0x1003   :  { %6330 = vmatmul.mubr.bf16.gmra.mrb[164].mxu0 %v6235_v22 }
0x100e   :  { %v6042_v57 = vpop.xlane.xlu1 %6041 }
0x100f   :  { %v6110_v38 = vmax.f32 %v6042_v57, 1e-20 }
0x1011   :  { %8574 = vrcp.f32 %v6110_v38  ;;  %v13598_v38 = vld [vmem:[#allocation45_spill] sm:$0xff] }
0x1012   :  { %v6039_v21 = vpop.xlane.xlu0 %6038 }
0x1013   :  { %v6109_v45 = vmax.f32 %v6039_v21, 1e-20 }
0x1015   :  { %8576 = vrcp.f32 %v6109_v45 }
0x1016   :  { %v6045_v23 = vpop.xlane.xlu0 %6044  ;;  %v6048_v46 = vpop.xlane.xlu1 %6047 }
0x1017   :  { %v6111_v61 = vmax.f32 %v6045_v23, 1e-20  ;;  %v6112_v48 = vmax.f32 %v6048_v46, 1e-20 }
0x1019   :  { %8578 = vrcp.f32 %v6111_v61 }
0x101a   :  { %8580 = vrcp.f32 %v6112_v48  ;;  %v6051_v49 = vpop.xlane.xlu0 %6050  ;;  %v6054_v50 = vpop.xlane.xlu1 %6053 }
0x101b   :  { %v8575_v25 = vpop.eup %8574  ;;  %v6113_v24 = vmax.f32 %v6051_v49, 1e-20  ;;  %v6114_v56 = vmax.f32 %v6054_v50, 1e-20  ;;  %v13599_v49 = vld [vmem:[#allocation60_spill] sm:$0xff]  ;;  %v13600_v50 = vld [vmem:[#allocation33_spill] sm:$0xff] }
0x101c   :  { %v6188_v36 = vmul.f32 %v8575_v25, %v12077_v4  ;;  %v6187_v54 = vmul.f32 %v8575_v25, %v12072_v11 }
0x101d   :  { %8582 = vrcp.f32 %v6113_v24  ;;  %v13601_v24 = vld [vmem:[#allocation32_spill] sm:$0xff] }
0x101e   :  { %8584 = vrcp.f32 %v6114_v56  ;;  %v6057_v16 = vpop.xlane.xlu0 %6056  ;;  %v6060_v7 = vpop.xlane.xlu1 %6059 }
0x101f   :  { %v8577_v17 = vpop.eup %8576  ;;  %v6115_v34 = vmax.f32 %v6057_v16, 1e-20  ;;  %v6116_v3 = vmax.f32 %v6060_v7, 1e-20 }
0x1020   :  { %v6186_v30 = vmul.f32 %v8577_v17, %v12089_v58  ;;  %v6185_v33 = vmul.f32 %v8577_v17, %v13597_v28  ;;  %v13602_v17 = vld [vmem:[#allocation17_spill] sm:$0xff] }
0x1021   :  { %8586 = vrcp.f32 %v6115_v34 }
0x1022   :  { %v6238_v29 = vpack.c.bf16 %v6188_v36, %v6186_v30  ;;  %v6237_v52 = vpack.c.bf16 %v6187_v54, %v6185_v33  ;;  %8588 = vrcp.f32 %v6116_v3  ;;  %v6063_v53 = vpop.xlane.xlu0 %6062  ;;  %v6066_v19 = vpop.xlane.xlu1 %6065  ;;  %v13603_v3 = vld [vmem:[#allocation29_spill] sm:$0xff] }
0x1023   :  { %v8579_v62 = vpop.eup %8578  ;;  %v6117_v32 = vmax.f32 %v6063_v53, 1e-20  ;;  %v6118_v31 = vmax.f32 %v6066_v19, 1e-20 }
0x1024   :  { %v8581_v42 = vpop.eup %8580  ;;  %6337 = vmatprep.mubr.bf16.mxu0 %v6238_v29  ;;  %v6190_v4 = vmul.f32 %v8579_v62, %v12099_v47  ;;  %v6189_v6 = vmul.f32 %v8579_v62, %v12092_v13 }
0x1025   :  { %6338 = vmatmul.mubr.bf16.gmra.mrb[168].mxu0 %v6237_v52  ;;  %v6192_v11 = vmul.f32 %v8581_v42, %v12105_v10  ;;  %v6191_v18 = vmul.f32 %v8581_v42, %v12102_v59  ;;  %8590 = vrcp.f32 %v6117_v32  ;;  %v13604_v42 = vld [vmem:[#allocation34_spill] sm:$0xff] }
0x1026   :  { %8592 = vrcp.f32 %v6118_v31  ;;  %v6069_v47 = vpop.xlane.xlu0 %6068  ;;  %v6072_v10 = vpop.xlane.xlu1 %6071 }
0x1027   :  { %v8583_v44 = vpop.eup %8582  ;;  %v6240_v58 = vpack.c.bf16 %v6192_v11, %v6190_v4  ;;  %v6239_v45 = vpack.c.bf16 %v6191_v18, %v6189_v6  ;;  %v6119_v48 = vmax.f32 %v6069_v47, 1e-20  ;;  %v6120_v13 = vmax.f32 %v6072_v10, 1e-20  ;;  %v13605_v11 = vld [vmem:[#allocation68_spill] sm:$0xff] }
0x1028   :  { %v8585_v22 = vpop.eup %8584  ;;  %v6194_v57 = vmul.f32 %v8583_v44, %v12115_v0  ;;  %v6193_v59 = vmul.f32 %v8583_v44, %v13599_v49 }
0x1029   :  { %6345 = vmatprep.mubr.bf16.mxu0 %v6240_v58  ;;  %v6196_v21 = vmul.f32 %v8585_v22, %v13598_v38  ;;  %v6195_v25 = vmul.f32 %v8585_v22, %v13600_v50  ;;  %8594 = vrcp.f32 %v6119_v48  ;;  %v13607_v58 = vld [vmem:[#allocation35_spill] sm:$0xff] }
0x102a   :  { %8596 = vrcp.f32 %v6120_v13 }
0x102b   :  { %v8587_v23 = vpop.eup %8586  ;;  %v6242_v46 = vpack.c.bf16 %v6196_v21, %v6194_v57  ;;  %v6241_v16 = vpack.c.bf16 %v6195_v25, %v6193_v59 }
0x102c   :  { %v8589_v61 = vpop.eup %8588  ;;  %v6198_v0 = vmul.f32 %v8587_v23, %v12131_v8  ;;  %v6197_v34 = vmul.f32 %v8587_v23, %v13602_v17 }
0x102d   :  { %6346 = vmatmul.mubr.bf16.gmra.mrb[172].mxu0 %v6239_v45  ;;  %v6200_v56 = vmul.f32 %v8589_v61, %v13601_v24  ;;  %v6199_v30 = vmul.f32 %v8589_v61, %v13603_v3 }
0x102e   :  { %6353 = vmatprep.mubr.bf16.mxu0 %v6242_v46 }
0x102f   :  { %v8591_v7 = vpop.eup %8590  ;;  %v6244_v36 = vpack.c.bf16 %v6200_v56, %v6198_v0  ;;  %v6243_v29 = vpack.c.bf16 %v6199_v30, %v6197_v34 }
0x1030   :  { %v8593_v54 = vpop.eup %8592  ;;  %v6202_v28 = vmul.f32 %v8591_v7, %v12147_v14  ;;  %v6201_v53 = vmul.f32 %v8591_v7, %v12142_v27  ;;  %v13606_v14 = vld [vmem:[#allocation63_spill] sm:$0xff] }
0x1031   :  { %v6204_v33 = vmul.f32 %v8593_v54, %v12153_v41  ;;  %v6203_v19 = vmul.f32 %v8593_v54, %v13604_v42 }
0x1033   :  { %v8595_v8 = vpop.eup %8594  ;;  %v6246_v52 = vpack.c.bf16 %v6204_v33, %v6202_v28  ;;  %v6245_v44 = vpack.c.bf16 %v6203_v19, %v6201_v53 }
0x1034   :  { %v8597_v62 = vpop.eup %8596  ;;  %v6206_v4 = vmul.f32 %v8595_v8, %v12163_v55  ;;  %v6205_v41 = vmul.f32 %v8595_v8, %v13606_v14 }
0x1035   :  { %6354 = vmatmul.mubr.bf16.gmra.mrb[176].mxu0 %v6241_v16  ;;  %v6208_v32 = vmul.f32 %v8597_v62, %v13605_v11  ;;  %v6207_v6 = vmul.f32 %v8597_v62, %v13607_v58 }
0x1036   :  { %6361 = vmatprep.mubr.bf16.mxu0 %v6244_v36 }
0x1037   :  { %v6248_v31 = vpack.c.bf16 %v6208_v32, %v6206_v4  ;;  %v6247_v18 = vpack.c.bf16 %v6207_v6, %v6205_v41 }
0x103d   :  { %6362 = vmatmul.mubr.bf16.gmra.mrb[180].mxu0 %v6243_v29 }
0x103e   :  { %6369 = vmatprep.mubr.bf16.mxu0 %v6246_v52 }
0x1045   :  { %6370 = vmatmul.mubr.bf16.gmra.mrb[184].mxu0 %v6245_v44 }
0x1046   :  { %6377 = vmatprep.mubr.bf16.mxu0 %v6248_v31 }
0x104d   :  { %6378 = vmatmul.mubr.bf16.gmra.mrb[188].mxu0 %v6247_v18 }
0x1063   :  { %v6078_v22 = vpop.xlane.xlu1 %6077 }
0x1064   :  { %v6122_v57 = vmax.f32 %v6078_v22, 1e-20 }
0x1066   :  { %8598 = vrcp.f32 %v6122_v57 }
0x106d   :  { %v6075_v27 = vpop.xlane.xlu0 %6074 }
0x106e   :  { %v6121_v38 = vmax.f32 %v6075_v27, 1e-20 }
0x1070   :  { %8600 = vrcp.f32 %v6121_v38  ;;  %v8599_v45 = vpop.eup %8598 }
0x1071   :  { %v6084_v21 = vpop.xlane.xlu1 %6083  ;;  %v6212_v61 = vmul.f32 %v8599_v45, %v12183_v51  ;;  %v6211_v48 = vmul.f32 %v8599_v45, %v12180_v15 }
0x1072   :  { %v6124_v55 = vmax.f32 %v6084_v21, 1e-20 }
0x1074   :  { %8602 = vrcp.f32 %v6124_v55 }
0x1075   :  { %v6081_v47 = vpop.xlane.xlu0 %6080 }
0x1076   :  { %v6123_v23 = vmax.f32 %v6081_v47, 1e-20 }
0x1078   :  { %8604 = vrcp.f32 %v6123_v23 }
0x1079   :  { %v6090_v10 = vpop.xlane.xlu1 %6089 }
0x107a   :  { %v6126_v46 = vmax.f32 %v6090_v10, 1e-20  ;;  %v8601_v13 = vpop.eup %8600 }
0x107b   :  { %v6210_v49 = vmul.f32 %v8601_v13, %v12205_v26  ;;  %v6209_v59 = vmul.f32 %v8601_v13, %v12199_v2 }
0x107c   :  { %8606 = vrcp.f32 %v6126_v46 }
0x107d   :  { %v6250_v25 = vpack.c.bf16 %v6212_v61, %v6210_v49  ;;  %v6249_v0 = vpack.c.bf16 %v6211_v48, %v6209_v59 }
0x107e   :  { %v6087_v50 = vpop.xlane.xlu0 %6086  ;;  %v8603_v24 = vpop.eup %8602 }
0x107f   :  { %v6125_v56 = vmax.f32 %v6087_v50, 1e-20  ;;  %6385 = vmatprep.mubr.bf16.mxu0 %v6250_v25  ;;  %v6216_v51 = vmul.f32 %v8603_v24, %v12217_v43  ;;  %v6215_v15 = vmul.f32 %v8603_v24, %v12212_v37 }
0x1080   :  { %6386 = vmatmul.mubr.bf16.gmra.mrb[192].mxu0 %v6249_v0 }
0x1081   :  { %8608 = vrcp.f32 %v6125_v56  ;;  %v6096_v16 = vpop.xlane.xlu1 %6095 }
0x1082   :  { %v6128_v7 = vmax.f32 %v6096_v16, 1e-20  ;;  %v8605_v36 = vpop.eup %8604 }
0x1083   :  { %v6214_v26 = vmul.f32 %v8605_v36, %v12229_v5  ;;  %v6213_v2 = vmul.f32 %v8605_v36, %v12223_v12 }
0x1084   :  { %8610 = vrcp.f32 %v6128_v7 }
0x1085   :  { %v6252_v17 = vpack.c.bf16 %v6216_v51, %v6214_v26  ;;  %v6251_v34 = vpack.c.bf16 %v6215_v15, %v6213_v2  ;;  %v13608_v26 = vld [vmem:[#allocation28_spill] sm:$0xff] }
0x1086   :  { %v6093_v54 = vpop.xlane.xlu0 %6092  ;;  %v8607_v3 = vpop.eup %8606  ;;  %v6420_v2 = vadd.s32 8, %v13608_v26 }
0x1087   :  { %v6127_v30 = vmax.f32 %v6093_v54, 1e-20  ;;  %6393 = vmatprep.mubr.bf16.mxu0 %v6252_v17  ;;  %v6220_v28 = vmul.f32 %v8607_v3, %v12239_v9  ;;  %v6219_v43 = vmul.f32 %v8607_v3, %v12236_v63  ;;  %v13609_v54 = vlaneseq }
0x1088   :  { %6394 = vmatmul.mubr.bf16.gmra.mrb[196].mxu0 %v6251_v34  ;;  %v6426_v34 = vmul.u32 8, %v13608_v26 }
0x1089   :  { %8612 = vrcp.f32 %v6127_v30  ;;  %v12357_v17 = vand.u32 127, %v13609_v54  ;;  %v6427_v30 = vmul.u32 8, %v6420_v2 }
0x108b   :  { %v8609_v33 = vpop.eup %8608  ;;  %v12361_v3 = vadd.s32 128, %v12357_v17  ;;  %vm12364_vm8 = vcmp.eq.s32.totalorder %v12357_v17, %v6426_v34  ;;  %vm12370_vm14 = vcmp.eq.s32.totalorder %v12357_v17, %v6427_v30 }
0x108c   :  { %v6218_v37 = vmul.f32 %v8609_v33, %v12249_v39  ;;  %v6217_v5 = vmul.f32 %v8609_v33, %v12244_v60  ;;  %vm6921_vm11 = vmpackc.low %vm12370_vm14, %vm12364_vm8 }
0x108d   :  { %vm6431_vm9 = vcmp.eq.s32.totalorder %v12361_v3, %v6426_v34  ;;  %vm6433_vm5 = vcmp.eq.s32.totalorder %v12361_v3, %v6427_v30 }
0x108e   :  { %v6254_v29 = vpack.c.bf16 %v6220_v28, %v6218_v37  ;;  %v6253_v12 = vpack.c.bf16 %v6219_v43, %v6217_v5  ;;  %v8611_v8 = vpop.eup %8610  ;;  %vm6919_vm15 = vmpackc.low %vm6433_vm5, %vm6431_vm9  ;;  %v7898_v28 = vld [vmem:[#allocation7 + $0xe0] sm:$0xff]   ;;  %v7899_v37 = vld [vmem:[#allocation7 + $0xe8] sm:$0xff]  }
0x108f   :  { %v6224_v52 = vmul.f32 %v8611_v8, %v12259_v1  ;;  %v6223_v62 = vmul.f32 %v8611_v8, %v12256_v35  ;;  %v8717_v8 = vmov 1.0|1.0  }
0x1090   :  { %6401 = vmatprep.mubr.bf16.mxu0 %v6254_v29  ;;  %6920 = vmatprep.mubr.msk.bf16.mxu1 %vm6919_vm15, %v8717_v8 }
0x1091   :  { %6402 = vmatmul.mubr.bf16.gmra.mrb[200].mxu0 %v6253_v12 }
0x1093   :  { %v8613_v53 = vpop.eup %8612 }
0x1094   :  { %v6222_v42 = vmul.f32 %v8613_v53, %v12269_v20  ;;  %v6221_v9 = vmul.f32 %v8613_v53, %v12264_v40 }
0x1096   :  { %v6256_v63 = vpack.c.bf16 %v6224_v52, %v6222_v42  ;;  %v6255_v19 = vpack.c.bf16 %v6223_v62, %v6221_v9 }
0x1098   :  { %6409 = vmatprep.mubr.bf16.mxu0 %v6256_v63 }
0x1099   :  { %6410 = vmatmul.mubr.bf16.gmra.mrb[204].mxu0 %v6255_v19 }
0x10ad   :  { %v7329_v39 = vpop.f32.mrb[144].mxu0 }
0x10ae   :  { %v7330_v60 = vpop.f32.mrb[145].mxu0 }
0x10af   :  { %v12319_v4 = vadd.f32 %v7330_v60, %v7329_v39  ;;  %v7332_v11 = vpop.f32.mrb[146].mxu0 }
0x10b0   :  { %v7333_v32 = vpop.f32.mrb[147].mxu0 }
0x10b1   :  { %v12321_v44 = vadd.f32 %v7333_v32, %v7332_v11 }
0x10b3   :  { %v6450_v35 = vpack.c.bf16 %v12321_v44, %v12319_v4 }
0x10b5   :  { %v7335_v1 = vpop.f32.mrb[148].mxu0 }
0x10b6   :  { %v7336_v31 = vpop.f32.mrb[149].mxu0 }
0x10b7   :  { %v12325_v20 = vadd.f32 %v7336_v31, %v7335_v1  ;;  %v7338_v40 = vpop.f32.mrb[150].mxu0 }
0x10b8   :  { %v7339_v14 = vpop.f32.mrb[151].mxu0 }
0x10b9   :  { %v12327_v41 = vadd.f32 %v7339_v14, %v7338_v40 }
0x10bb   :  { %v6451_v58 = vpack.c.bf16 %v12327_v41, %v12325_v20 }
0x10be   :  { %v7341_v6 = vpop.f32.mrb[152].mxu0 }
0x10bf   :  { %v7342_v18 = vpop.f32.mrb[153].mxu0 }
0x10c0   :  { %v12331_v22 = vadd.f32 %v7342_v18, %v7341_v6  ;;  %v7344_v57 = vpop.f32.mrb[154].mxu0 }
0x10c1   :  { %v7345_v27 = vpop.f32.mrb[155].mxu0 }
0x10c2   :  { %v12333_v38 = vadd.f32 %v7345_v27, %v7344_v57 }
0x10c4   :  { %v6452_v21 = vpack.c.bf16 %v12333_v38, %v12331_v22 }
0x10c6   :  { %v7347_v55 = vpop.f32.mrb[156].mxu0 }
0x10c7   :  { %v7348_v47 = vpop.f32.mrb[157].mxu0 }
0x10c8   :  { %v12337_v45 = vadd.f32 %v7348_v47, %v7347_v55  ;;  %v7350_v23 = vpop.f32.mrb[158].mxu0 }
0x10c9   :  { %v7351_v10 = vpop.f32.mrb[159].mxu0 }
0x10ca   :  { %v12339_v46 = vadd.f32 %v7351_v10, %v7350_v23 }
0x10cc   :  { %v6453_v61 = vpack.c.bf16 %v12339_v46, %v12337_v45 }
0x10ce   :  { %v7353_v48 = vpop.f32.mrb[160].mxu0 }
0x10cf   :  { %v7354_v13 = vpop.f32.mrb[161].mxu0 }
0x10d0   :  { %v12343_v49 = vadd.f32 %v7354_v13, %v7353_v48  ;;  %v7356_v59 = vpop.f32.mrb[162].mxu0 }
0x10d1   :  { %v7357_v50 = vpop.f32.mrb[163].mxu0 }
0x10d2   :  { %v12345_v25 = vadd.f32 %v7357_v50, %v7356_v59 }
0x10d4   :  { %v6454_v0 = vpack.c.bf16 %v12345_v25, %v12343_v49  ;;  %v6421_v49 = vadd.s32 16, %v13608_v26  ;;  %v6422_v25 = vadd.s32 24, %v13608_v26  ;;  %v7895_v26 = vld [vmem:[#allocation7 + $0xc8] sm:$0xff]  }
0x10d6   :  { %v7359_v24 = vpop.f32.mrb[164].mxu0 }
0x10d7   :  { %v7360_v56 = vpop.f32.mrb[165].mxu0 }
0x10d8   :  { %v12349_v16 = vadd.f32 %v7360_v56, %v7359_v24  ;;  %v7362_v7 = vpop.f32.mrb[166].mxu0 }
0x10d9   :  { %v7363_v51 = vpop.f32.mrb[167].mxu0 }
0x10da   :  { %v12351_v15 = vadd.f32 %v7363_v51, %v7362_v7 }
0x10dc   :  { %v6455_v36 = vpack.c.bf16 %v12351_v15, %v12349_v16  ;;  %v6428_v15 = vmul.u32 8, %v6421_v49 }
0x10de   :  { %vm6435_vm3 = vcmp.eq.s32.totalorder %v12361_v3, %v6428_v15  ;;  %vm6434_vm7 = vcmp.eq.s32.totalorder %v12357_v17, %v6428_v15 }
0x10f8   :  { %v7365_v43 = vpop.f32.mrb[168].mxu0 }
0x10f9   :  { %v7366_v33 = vpop.f32.mrb[169].mxu0 }
0x10fa   :  { %v12375_v5 = vadd.f32 %v7366_v33, %v7365_v43  ;;  %v7368_v29 = vpop.f32.mrb[170].mxu0 }
0x10fb   :  { %v7369_v12 = vpop.f32.mrb[171].mxu0 }
0x10fc   :  { %v12382_v52 = vadd.f32 %v7369_v12, %v7368_v29 }
0x10fe   :  { %v6456_v62 = vpack.c.bf16 %v12382_v52, %v12375_v5  ;;  %v7897_v5 = vld [vmem:[#allocation7 + $0xd8] sm:$0xff]   ;;  %v7900_v52 = vld [vmem:[#allocation7 + $0xf0] sm:$0xff]  }
0x1100   :  { %v7371_v53 = vpop.f32.mrb[172].mxu0 }
0x1101   :  { %v7372_v42 = vpop.f32.mrb[173].mxu0 }
0x1102   :  { %v12386_v9 = vadd.f32 %v7372_v42, %v7371_v53  ;;  %v7374_v63 = vpop.f32.mrb[174].mxu0 }
0x1103   :  { %v7375_v19 = vpop.f32.mrb[175].mxu0 }
0x1104   :  { %v12388_v39 = vadd.f32 %v7375_v19, %v7374_v63 }
0x1106   :  { %v6457_v60 = vpack.c.bf16 %v12388_v39, %v12386_v9 }
0x1108   :  { %v7377_v11 = vpop.f32.mrb[176].mxu0 }
0x1109   :  { %v7378_v32 = vpop.f32.mrb[177].mxu0 }
0x110a   :  { %v7379_v1 = vadd.f32 %v7378_v32, %v7377_v11  ;;  %v7380_v31 = vpop.f32.mrb[178].mxu0 }
0x110b   :  { %v7381_v40 = vpop.f32.mrb[179].mxu0 }
0x110c   :  { %v7382_v14 = vadd.f32 %v7381_v40, %v7380_v31 }
0x110e   :  { %v6458_v6 = vpack.c.bf16 %v7382_v14, %v7379_v1 }
0x1110   :  { %v7383_v18 = vpop.f32.mrb[180].mxu0  ;;  %7425 = vmatprep.subr.bf16.mxu1 %v6458_v6 }
0x1111   :  { %v7384_v57 = vpop.f32.mrb[181].mxu0  ;;  %7426 = vmatpush3.bf16.msra.mxu1 %v6450_v35 }
0x1112   :  { %v7385_v27 = vadd.f32 %v7384_v57, %v7383_v18  ;;  %v7386_v55 = vpop.f32.mrb[182].mxu0  ;;  %v7894_v57 = vld [vmem:[#allocation7 + $0xc0] sm:$0xff]  }
0x1113   :  { %v7387_v47 = vpop.f32.mrb[183].mxu0 }
0x1114   :  { %v7388_v23 = vadd.f32 %v7387_v47, %v7386_v55 }
0x1116   :  { %v6459_v10 = vpack.c.bf16 %v7388_v23, %v7385_v27 }
0x1118   :  { %v7389_v48 = vpop.f32.mrb[184].mxu0  ;;  %7427 = vmatprep.subr.bf16.mxu1 %v6459_v10 }
0x1119   :  { %v7390_v13 = vpop.f32.mrb[185].mxu0  ;;  %7428 = vmatpush3.bf16.msra.mxu1 %v6451_v58 }
0x111a   :  { %v7391_v59 = vadd.f32 %v7390_v13, %v7389_v48  ;;  %v7392_v50 = vpop.f32.mrb[186].mxu0 }
0x111b   :  { %v7393_v24 = vpop.f32.mrb[187].mxu0 }
0x111c   :  { %v7394_v56 = vadd.f32 %v7393_v24, %v7392_v50 }
0x111e   :  { %v6460_v7 = vpack.c.bf16 %v7394_v56, %v7391_v59  ;;  %v7903_v56 = vld [vmem:[#allocation7 + $0x108] sm:$0xff]  }
0x1120   :  { %v7395_v51 = vpop.f32.mrb[188].mxu0  ;;  %7429 = vmatprep.subr.bf16.mxu1 %v6460_v7  ;;  %v7904_v7 = vld [vmem:[#allocation7 + $0x110] sm:$0xff]  }
0x1121   :  { %v7396_v4 = vpop.f32.mrb[189].mxu0  ;;  %7430 = vmatpush3.bf16.msra.mxu1 %v6452_v21 }
0x1122   :  { %v7397_v44 = vadd.f32 %v7396_v4, %v7395_v51  ;;  %v7398_v35 = vpop.f32.mrb[190].mxu0  ;;  %v7905_v51 = vld [vmem:[#allocation7 + $0x118] sm:$0xff]   ;;  %v7906_v4 = vld [vmem:[#allocation7 + $0x120] sm:$0xff]  }
0x1123   :  { %v7399_v2 = vpop.f32.mrb[191].mxu0 }
0x1124   :  { %v7400_v54 = vadd.f32 %v7399_v2, %v7398_v35  ;;  %v7908_v35 = vld [vmem:[#allocation7 + $0x130] sm:$0xff]   ;;  %v7909_v2 = vld [vmem:[#allocation7 + $0x138] sm:$0xff]  }
0x1126   :  { %v6461_v34 = vpack.c.bf16 %v7400_v54, %v7397_v44  ;;  %v7907_v44 = vld [vmem:[#allocation7 + $0x128] sm:$0xff]   ;;  %v6927_v54 = vld [vmem:[%s12454_s3] ss:$0 sm:$0xff] }
0x1128   :  { %7431 = vmatprep.subr.bf16.mxu1 %v6461_v34 }
0x1129   :  { %7432 = vmatpush3.bf16.msra.mxu1 %v6453_v61 }
0x1153   :  { %v7401_v20 = vpop.f32.mrb[192].mxu0 }
0x1154   :  { %v7402_v41 = vpop.f32.mrb[193].mxu0 }
0x1155   :  { %v7403_v58 = vadd.f32 %v7402_v41, %v7401_v20  ;;  %v7404_v30 = vpop.f32.mrb[194].mxu0 }
0x1156   :  { %v7405_v43 = vpop.f32.mrb[195].mxu0 }
0x1157   :  { %v7406_v33 = vadd.f32 %v7405_v43, %v7404_v30 }
0x1159   :  { %v6462_v29 = vpack.c.bf16 %v7406_v33, %v7403_v58 }
0x115b   :  { %v7407_v12 = vpop.f32.mrb[196].mxu0  ;;  %7433 = vmatprep.subr.bf16.mxu1 %v6462_v29 }
0x115c   :  { %v7408_v22 = vpop.f32.mrb[197].mxu0  ;;  %7434 = vmatpush3.bf16.msra.mxu1 %v6454_v0 }
0x115d   :  { %v7409_v38 = vadd.f32 %v7408_v22, %v7407_v12  ;;  %v7410_v21 = vpop.f32.mrb[198].mxu0 }
0x115e   :  { %v7411_v53 = vpop.f32.mrb[199].mxu0 }
0x115f   :  { %v7412_v42 = vadd.f32 %v7411_v53, %v7410_v21 }
0x1161   :  { %v6463_v45 = vpack.c.bf16 %v7412_v42, %v7409_v38 }
0x1163   :  { %7435 = vmatprep.subr.bf16.mxu1 %v6463_v45 }
0x1164   :  { %v7413_v46 = vpop.f32.mrb[200].mxu0  ;;  %7436 = vmatpush3.bf16.msra.mxu1 %v6455_v36  ;;  %v6429_v36 = vmul.u32 8, %v6422_v25 }
0x1165   :  { %v7414_v61 = vpop.f32.mrb[201].mxu0 }
0x1166   :  { %v7415_v63 = vadd.f32 %v7414_v61, %v7413_v46  ;;  %v7416_v19 = vpop.f32.mrb[202].mxu0  ;;  %vm6437_vm2 = vcmp.eq.s32.totalorder %v12361_v3, %v6429_v36  ;;  %vm6436_vm4 = vcmp.eq.s32.totalorder %v12357_v17, %v6429_v36  ;;  %v7896_v3 = vld [vmem:[#allocation7 + $0xd0] sm:$0xff]   ;;  %v7901_v17 = vld [vmem:[#allocation7 + $0xf8] sm:$0xff]  }
0x1167   :  { %v7417_v11 = vpop.f32.mrb[203].mxu0  ;;  %vm6923_vm13 = vmpackc.low %vm6437_vm2, %vm6435_vm3 }
0x1168   :  { %v7418_v32 = vadd.f32 %v7417_v11, %v7416_v19  ;;  %vm6925_vm0 = vmpackc.low %vm6436_vm4, %vm6434_vm7  ;;  %v6936_v19 = vld [vmem:[%s12454_s3 + $0x1] ss:$0 sm:$0xff] }
0x116a   :  { %v6464_v1 = vpack.c.bf16 %v7418_v32, %v7415_v63 }
0x116c   :  { %v7419_v0 = vpop.f32.mrb[204].mxu0  ;;  %7437 = vmatprep.subr.bf16.mxu1 %v6464_v1 }
0x116d   :  { %v7420_v31 = vpop.f32.mrb[205].mxu0  ;;  %7438 = vmatpush3.bf16.msra.mxu1 %v6456_v62  ;;  %v7902_v62 = vld [vmem:[#allocation7 + $0x100] sm:$0xff]  }
0x116e   :  { %v7421_v40 = vadd.f32 %v7420_v31, %v7419_v0  ;;  %v7422_v14 = vpop.f32.mrb[206].mxu0 }
0x116f   :  { %v7423_v16 = vpop.f32.mrb[207].mxu0 }
0x1170   :  { %v7424_v6 = vadd.f32 %v7423_v16, %v7422_v14 }
0x1172   :  { %v6465_v18 = vpack.c.bf16 %v7424_v6, %v7421_v40 }
0x1174   :  { %7439 = vmatprep.subr.bf16.mxu1 %v6465_v18 }
0x1175   :  { %7440 = vmatpush3.bf16.msra.mxu1 %v6457_v60 }
0x1176   :  { %7761 = vmatprep.subr.bf16.mxu1 %v7894_v57 }
0x1178   :  { %6922 = vmatmul.mubr.msk.bf16.vlgmr.msra.gmra.mrb[176].mxu1 %vm6921_vm11, %v8717_v8 }
0x1179   :  { %6924 = vmatprep.mubr.msk.bf16.mxu1 %vm6923_vm13, %v8717_v8  ;;  %7762 = vmatpush3.bf16.msra.mxu1 %v7894_v57 }
0x117a   :  { %7763 = vmatprep.subr.bf16.mxu1 %v7895_v26 }
0x117d   :  { %7764 = vmatpush3.bf16.msra.mxu1 %v7895_v26 }
0x117e   :  { %7765 = vmatprep.subr.bf16.mxu1 %v7896_v3 }
0x1180   :  { %6926 = vmatmul.mubr.msk.bf16.gmra.mrb[180].mxu1 %vm6925_vm0, %v8717_v8 }
0x1181   :  { %7766 = vmatpush3.bf16.msra.mxu1 %v7896_v3 }
0x1182   :  { %7767 = vmatprep.subr.bf16.mxu1 %v7897_v5 }
0x1185   :  { %7768 = vmatpush3.bf16.msra.mxu1 %v7897_v5 }
0x1186   :  { %7769 = vmatprep.subr.bf16.mxu1 %v7898_v28 }
0x1189   :  { %7770 = vmatpush3.bf16.msra.mxu1 %v7898_v28 }
0x118a   :  { %7771 = vmatprep.subr.bf16.mxu1 %v7899_v37 }
0x118d   :  { %7772 = vmatpush3.bf16.msra.mxu1 %v7899_v37 }
0x118e   :  { %7773 = vmatprep.subr.bf16.mxu1 %v7900_v52 }
0x1191   :  { %7774 = vmatpush3.bf16.msra.mxu1 %v7900_v52 }
0x1192   :  { %7775 = vmatprep.subr.bf16.mxu1 %v7901_v17 }
0x1195   :  { %7776 = vmatpush3.bf16.msra.mxu1 %v7901_v17 }
0x1196   :  { %7781 = vmatprep.subr.bf16.mxu1 %v7902_v62 }
0x124b   :  { %v7441_v9 = vpop.f32.mrb[176].mxu1 }
0x124c   :  { %v7442_v39 = vpop.f32.mrb[177].mxu1 }
0x124d   :  { %v7443_v8 = vadd.f32 %v7442_v39, %v7441_v9  ;;  %v7444_v60 = vpop.f32.mrb[178].mxu1 }
0x124e   :  { %v7445_v27 = vpop.f32.mrb[179].mxu1 }
0x124f   :  { %v7446_v55 = vadd.f32 %v7445_v27, %v7444_v60 }
0x1251   :  { %v6515_v47 = vpack.c.bf16 %v7446_v55, %v7443_v8 }
0x1253   :  { %v7447_v23 = vpop.f32.mrb[180].mxu1  ;;  %7777 = vmatprep.mubr.bf16.mxu1 %v6515_v47 }
0x1254   :  { %v7448_v10 = vpop.f32.mrb[181].mxu1 }
0x1255   :  { %v7449_v48 = vadd.f32 %v7448_v10, %v7447_v23  ;;  %v7450_v13 = vpop.f32.mrb[182].mxu1 }
0x1256   :  { %v7451_v59 = vpop.f32.mrb[183].mxu1 }
0x1257   :  { %v7452_v50 = vadd.f32 %v7451_v59, %v7450_v13 }
0x1259   :  { %v6516_v24 = vpack.c.bf16 %v7452_v50, %v7449_v48 }
0x125b   :  { %7778 = vmatmul.mubr.bf16.vlgmr.msra.gmra.mrb[184].mxu1 %v6516_v24 }
0x125c   :  { %7782 = vmatpush3.bf16.msra.mxu1 %v7902_v62 }
0x125d   :  { %7783 = vmatprep.subr.bf16.mxu1 %v7903_v56 }
0x1260   :  { %7784 = vmatpush3.bf16.msra.mxu1 %v7903_v56 }
0x1261   :  { %7785 = vmatprep.subr.bf16.mxu1 %v7904_v7 }
0x1264   :  { %7786 = vmatpush3.bf16.msra.mxu1 %v7904_v7 }
0x1265   :  { %7787 = vmatprep.subr.bf16.mxu1 %v7905_v51 }
0x1268   :  { %7788 = vmatpush3.bf16.msra.mxu1 %v7905_v51 }
0x1269   :  { %7789 = vmatprep.subr.bf16.mxu1 %v7906_v4 }
0x126c   :  { %7790 = vmatpush3.bf16.msra.mxu1 %v7906_v4 }
0x126d   :  { %7791 = vmatprep.subr.bf16.mxu1 %v7907_v44 }
0x1270   :  { %7792 = vmatpush3.bf16.msra.mxu1 %v7907_v44 }
0x1271   :  { %7793 = vmatprep.subr.bf16.mxu1 %v7908_v35 }
0x1274   :  { %7794 = vmatpush3.bf16.msra.mxu1 %v7908_v35 }
0x1275   :  { %7795 = vmatprep.subr.bf16.mxu1 %v7909_v2 }
0x1278   :  { %7796 = vmatpush3.bf16.msra.mxu1 %v7909_v2 }
0x132e   :  { %v7779_v34 = vpop.f32.mrb[184].mxu1 }
0x132f   :  { %v6630_v20 = vadd.f32 %v7779_v34, %v6927_v54  ;;  %v6621_v41 = vpop.f32.mrb[185].mxu1 }
0x1330   :  { %v6622_v58 = vadd.f32 %v6927_v54, %v6621_v41  ;;  %v7780_v30 = vpop.f32.mrb[186].mxu1 }
0x1331   :  { %v6642_v43 = vmul.f32 0.01, %v6630_v20  ;;  %v6633_v33 = vadd.f32 %v7780_v30, %v6927_v54  ;;  %v6624_v29 = vpop.f32.mrb[187].mxu1  ;;  %vm6638_vm6 = vcmp.ge.f32.partialorder %v6630_v20, 0.0 }
0x1332   :  { %v6640_v12 = vmul.f32 0.01, %v6622_v58  ;;  %v6625_v22 = vadd.f32 %v6927_v54, %v6624_v29  ;;  %vm6636_vm1 = vcmp.ge.f32.partialorder %v6622_v58, 0.0 }
0x1333   :  { %vm6639_vm10 = vcmp.ge.f32.partialorder %v6633_v33, 0.0  ;;  %v6643_v38 = vmul.f32 0.01, %v6633_v33  ;;  %v6646_v53 = vsel %vm6638_vm6, %v6630_v20, %v6642_v43 }
0x1334   :  { %vm6637_vm12 = vcmp.ge.f32.partialorder %v6625_v22, 0.0  ;;  %v6641_v21 = vmul.f32 0.01, %v6625_v22  ;;  %v6644_v46 = vsel %vm6636_vm1, %v6622_v58, %v6640_v12 }
0x1335   :  { %v6647_v42 = vsel %vm6639_vm10, %v6633_v33, %v6643_v38 }
0x1336   :  { %v6649_v45 = vpack.c.bf16 %v6647_v42, %v6646_v53  ;;  %v6645_v61 = vsel %vm6637_vm12, %v6625_v22, %v6641_v21 }
0x1337   :  { %v6648_v63 = vpack.c.bf16 %v6645_v61, %v6644_v46 }
0x1339   :  { %7797 = vmatprep.mubr.bf16.mxu1 %v6648_v63 }
0x133a   :  { %7798 = vmatmul.mubr.bf16.vlgmr.msra.gmra.mrb[188].mxu1 %v6649_v45 }
0x140d   :  { %v7799_v11 = vpop.f32.mrb[188].mxu1 }
0x140e   :  { %v6763_v32 = vadd.f32 %v7799_v11, %v6936_v19  ;;  %v6754_v1 = vpop.f32.mrb[189].mxu1 }
0x140f   :  { %v6755_v49 = vadd.f32 %v6936_v19, %v6754_v1  ;;  %v7800_v25 = vpop.f32.mrb[190].mxu1 }
0x1410   :  { %6771 = vst [vmem:[#allocation8 + $0x10] sm:$0xff] %v6763_v32  ;;  %v6766_v0 = vadd.f32 %v7800_v25, %v6936_v19  ;;  %v6757_v31 = vpop.f32.mrb[191].mxu1 }
0x1411   :  { %6769 = vst [vmem:[#allocation8] sm:$0xff] %v6755_v49  ;;  %v6758_v40 = vadd.f32 %v6936_v19, %v6757_v31 }
0x1412   :  { %6772 = vst [vmem:[#allocation8 + $0x18] sm:$0xff] %v6766_v0 }
0x1413   :  { %6770 = vst [vmem:[#allocation8 + $0x8] sm:$0xff] %v6758_v40 }
0x1414   :  { %8691 = shalt.err (!%p8688_p0)
}
0x1415   :  { %s8692_s11 = scalar_lea.hbm %s12455_s4, 512 }
0x1416   :  { %p8693_p1 = scmp.ne.s32.totalorder %s12455_s4, %s8692_s11  ;;  %p8696_p2 = scmp.lt.u32.totalorder %s8692_s11, %s12455_s4 }
0x1418   :  { %p8698_p3 = pnand %p8696_p2, %p8693_p1 }
0x141a   :  { %8701 = shalt.err (!%p8698_p3)
}
0x141b   :  { %6784 = dma.vmem_to_hbm [thread:$0]  %s6779_s8, 512, %s12455_s4, [#allocation4], %s8709_s25, %s8709_s25, %s8710_s26  }
0x141c   :  { %8706 = dma.done.wait [#allocation4], 512  }
0x141d   :  { %8707 = vsyncadd [#allocation4], 4294966784 }
0x141e   :  { %6788 = vsyncpa [#allocation3], 1 }
0x141f   :  { %6789 = vsyncpa [#allocation6], 1 }
0x1420   :  { %6790 = vsyncpa [#allocation4], 1 }

</bundles_post_ra>
